<compile_context>
chip_gen: v7x
topology: tpu7x:2x2x1
jax: 0.10.0
libtpu: 0.0.40
codegen_flags: <defaults>
</compile_context>

<pallas_src>
import functools

import jax
import jax.numpy as jnp
from jax.experimental import pallas as pl
from jax.experimental.pallas import tpu as pltpu


C_PAD = 8                      # image channels (3) padded to 8 MXU-friendly rows
CMID = 16                      # hidden channels of every stand-in conv stack
VMEM_LIMIT = 32 * 1024 * 1024  # explicit scoped-VMEM limit (review: v5e default 16 MiB)


# --------------------------- in-kernel helpers -----------------------------

def _guard_extend(x, G):
    """Append G zero guard lanes on both sides of the flattened spatial axis."""
    z = jnp.zeros((x.shape[0], G), x.dtype)
    return jnp.concatenate([z, x, z], axis=1)


def _conv3x3_taps(x_ext, w_all, b, relu, G, NS, wpad):
    """3x3 'same' conv as 9 tap matmuls on the channel-major flattened layout.

    x_ext: [cin, 2G+NS] bf16 value (zero borders inside each image, zero guards)
    w_all: [9, cout, cin] bf16, b: [cout, 1] f32.
    Returns [cout, NS] f32 (border positions are garbage; caller masks them).
    """
    cout = w_all.shape[1]
    acc = jnp.zeros((cout, NS), jnp.float32)
    t = 0
    for dh in (-1, 0, 1):
        for dw in (-1, 0, 1):
            off = G + dh * wpad + dw          # static lane offset, in [0, 2G]
            xt = x_ext[:, off:off + NS]       # natural-layout shifted view
            acc = acc + jnp.dot(w_all[t], xt, preferred_element_type=jnp.float32)
            t += 1
    acc = acc + b
    if relu:
        acc = jnp.maximum(acc, 0.0)
    return acc


def _two_conv_cm(x_ext, w1_ref, b1_ref, w2_ref, b2_ref, mask, relu1, relu2,
                 G, NS, wpad):
    """conv -> (relu) -> conv -> (relu); intermediate is a pure value."""
    y1 = _conv3x3_taps(x_ext, w1_ref[...], b1_ref[...], relu1, G, NS, wpad) * mask
    y1e = _guard_extend(y1.astype(jnp.bfloat16), G)
    y2 = _conv3x3_taps(y1e, w2_ref[...], b2_ref[...], relu2, G, NS, wpad) * mask
    return y2  # [cout, NS] f32, zero borders


# ------------------------------ Pallas kernels ------------------------------

def _generator_kernel(x_ref, w1_ref, b1_ref, w2_ref, b2_ref, mask_ref, out_ref,
                      *, G, NS, wpad):
    mask = mask_ref[...]
    y = _two_conv_cm(x_ref[...], w1_ref, b1_ref, w2_ref, b2_ref, mask,
                     relu1=True, relu2=False, G=G, NS=NS, wpad=wpad)
    # Lane-dense [C_PAD, 2G+NS] store; zero-bordered + guard-extended so the
    # discriminator / VGG kernels consume it directly (no re-pad in XLA).
    out_ref[...] = _guard_extend(y.astype(out_ref.dtype), G)


def _disc_bce_kernel(x_ref, w1_ref, b1_ref, w2_ref, b2_ref, mask_ref, loss_ref,
                     *, G, NS, wpad, target, inv_count):
    """Stand-in PatchGAN discriminator fused with BCE-with-logits mean."""
    mask = mask_ref[...]
    y = _two_conv_cm(x_ref[...], w1_ref, b1_ref, w2_ref, b2_ref, mask,
                     relu1=True, relu2=False, G=G, NS=NS, wpad=wpad)  # [8, NS]
    logits = y[0:1, :]          # real 1-channel head; rows 1..7 are zero padding
    # numerically stable BCE with logits against the constant (baked-in) target
    bce = (jnp.maximum(logits, 0.0) - logits * target
           + jnp.log1p(jnp.exp(-jnp.abs(logits))))
    loss_ref[0, 0] = jnp.sum(bce * mask) * inv_count


def _vgg_img_mse_kernel(xr_ref, xf_ref, w1_ref, b1_ref, w2_ref, b2_ref, mask_ref,
                        vgg_ref, img_ref, *, G, NS, wpad, inv_vgg, inv_img):
    """VGG-proxy features of real & fake + both MSE reductions, fused."""
    mask = mask_ref[...]
    xr = xr_ref[...]
    xf = xf_ref[...]
    fr = _two_conv_cm(xr, w1_ref, b1_ref, w2_ref, b2_ref, mask,
                      relu1=True, relu2=True, G=G, NS=NS, wpad=wpad)
    ff = _two_conv_cm(xf, w1_ref, b1_ref, w2_ref, b2_ref, mask,
                      relu1=True, relu2=True, G=G, NS=NS, wpad=wpad)
    dv = fr - ff                                     # borders already zero
    vgg_ref[0, 0] = jnp.sum(dv * dv) * inv_vgg
    # Full-tile pixel MSE: zero borders, guards and padded channel rows cancel.
    di = xr.astype(jnp.float32) - xf.astype(jnp.float32)
    img_ref[0, 0] = jnp.sum(di * di) * inv_img


# -------------------------- layout helpers (XLA) ----------------------------

def _to_cm_ext(x_nhwc, G, c_pad=C_PAD):
    """NHWC f32 -> channel-major flattened padded bf16 [c_pad, 2G + n*Sp]."""
    n, h, w, c = x_nhwc.shape
    xp = jnp.pad(x_nhwc, ((0, 0), (1, 1), (1, 1), (0, 0)))
    cm = jnp.transpose(xp, (3, 0, 1, 2)).reshape(c, n * (h + 2) * (w + 2))
    cm = jnp.pad(cm, ((0, c_pad - c), (G, G)))
    return cm.astype(jnp.bfloat16)


def _cm_ext_to_nhwc(x_cm, n, h, w, G, c=3):
    NS = n * (h + 2) * (w + 2)
    core = x_cm[:c, G:G + NS].reshape(c, n, h + 2, w + 2)[:, :, 1:h + 1, 1:w + 1]
    return jnp.transpose(core, (1, 2, 3, 0)).astype(jnp.float32)


def _interior_mask_ns(n, h, w):
    """[1, n*(h+2)*(w+2)] f32 mask: 1 at valid pixels, 0 at the padded border."""
    rows = (jnp.arange(h + 2) >= 1) & (jnp.arange(h + 2) <= h)
    cols = (jnp.arange(w + 2) >= 1) & (jnp.arange(w + 2) <= w)
    m = (rows[:, None] & cols[None, :]).astype(jnp.float32).reshape(-1)
    return jnp.tile(m, (n,)).reshape(1, -1)


def _pad_conv(w, b, cout_p, cin_p):
    """Zero-pad tiny conv channel dims to MXU-friendly sizes."""
    w = jnp.pad(w, ((0, 0), (0, cout_p - w.shape[1]), (0, cin_p - w.shape[2])))
    b = jnp.pad(b, ((0, cout_p - b.shape[0]), (0, 0)))
    return w, b


def _compiler_params():
    return pltpu.CompilerParams(dimension_semantics=("arbitrary",),
                                vmem_limit_bytes=VMEM_LIMIT)


# ------------------------------ JAX wrappers --------------------------------

def generator_forward(params, lr_nhwc, mask_ns):
    # TODO(synk): the real generator is an external module passed to
    # Loss.forward; a 2x nearest-upsample + conv-relu-conv stand-in is used.
    x = jnp.repeat(jnp.repeat(lr_nhwc, 2, axis=1), 2, axis=2)
    n, h, w, _ = x.shape
    G = w + 3
    NS = n * (h + 2) * (w + 2)
    EXT = NS + 2 * G
    x_cm = _to_cm_ext(x, G)
    w1, b1 = _pad_conv(*params["gen1"], CMID, C_PAD)
    w2, b2 = _pad_conv(*params["gen2"], C_PAD, CMID)
    kernel = functools.partial(_generator_kernel, G=G, NS=NS, wpad=w + 2)
    return pl.pallas_call(
        kernel,
        out_shape=jax.ShapeDtypeStruct((C_PAD, EXT), jnp.bfloat16),
        grid=(1,),
        in_specs=[
            pl.BlockSpec((C_PAD, EXT), lambda i: (0, 0)),
            pl.BlockSpec((9, CMID, C_PAD), lambda i: (0, 0, 0)),
            pl.BlockSpec((CMID, 1), lambda i: (0, 0)),
            pl.BlockSpec((9, C_PAD, CMID), lambda i: (0, 0, 0)),
            pl.BlockSpec((C_PAD, 1), lambda i: (0, 0)),
            pl.BlockSpec((1, NS), lambda i: (0, 0)),
        ],
        out_specs=pl.BlockSpec((C_PAD, EXT), lambda i: (0, 0)),
        compiler_params=_compiler_params(),
    )(x_cm, w1, b1, w2, b2, mask_ns)


def disc_bce_mean(params, x_cm, mask_ns, *, target, n, h, w):
    """mean(BCE_with_logits(D(x), constant target)) in one fused call."""
    G = w + 3
    NS = mask_ns.shape[1]
    EXT = x_cm.shape[1]
    w1, b1 = _pad_conv(*params["disc1"], CMID, C_PAD)
    w2, b2 = _pad_conv(*params["disc2"], C_PAD, CMID)   # 1-ch head -> 8 zero rows
    inv_count = 1.0 / float(n * h * w)                  # logits head has 1 channel
    kernel = functools.partial(_disc_bce_kernel, G=G, NS=NS, wpad=w + 2,
                               target=float(target), inv_count=inv_count)
    out = pl.pallas_call(
        kernel,
        out_shape=jax.ShapeDtypeStruct((1, 1), jnp.float32),
        grid=(1,),
        in_specs=[
            pl.BlockSpec((C_PAD, EXT), lambda i: (0, 0)),
            pl.BlockSpec((9, CMID, C_PAD), lambda i: (0, 0, 0)),
            pl.BlockSpec((CMID, 1), lambda i: (0, 0)),
            pl.BlockSpec((9, C_PAD, CMID), lambda i: (0, 0, 0)),
            pl.BlockSpec((C_PAD, 1), lambda i: (0, 0)),
            pl.BlockSpec((1, NS), lambda i: (0, 0)),
        ],
        out_specs=pl.BlockSpec((1, 1), lambda i: (0, 0),
                               memory_space=pltpu.MemorySpace.SMEM),
        compiler_params=_compiler_params(),
    )(x_cm, w1, b1, w2, b2, mask_ns)
    return out[0, 0]


def vgg_and_img_mse(params, xr_cm, xf_cm, mask_ns, *, n, h, w):
    # TODO(synk): pretrained VGG19 features cannot be loaded here; a frozen
    # deterministic conv-relu-conv-relu stack stands in as the perceptual net.
    G = w + 3
    NS = mask_ns.shape[1]
    EXT = xr_cm.shape[1]
    w1, b1 = _pad_conv(*params["vgg1"], CMID, C_PAD)
    w2, b2 = _pad_conv(*params["vgg2"], CMID, CMID)
    cfeat = params["vgg2"][0].shape[1]
    inv_vgg = 1.0 / float(n * h * w * cfeat)
    inv_img = 1.0 / float(n * h * w * 3)
    kernel = functools.partial(_vgg_img_mse_kernel, G=G, NS=NS, wpad=w + 2,
                               inv_vgg=inv_vgg, inv_img=inv_img)
    vgg_mse, img_mse = pl.pallas_call(
        kernel,
        out_shape=(jax.ShapeDtypeStruct((1, 1), jnp.float32),
                   jax.ShapeDtypeStruct((1, 1), jnp.float32)),
        grid=(1,),
        in_specs=[
            pl.BlockSpec((C_PAD, EXT), lambda i: (0, 0)),
            pl.BlockSpec((C_PAD, EXT), lambda i: (0, 0)),
            pl.BlockSpec((9, CMID, C_PAD), lambda i: (0, 0, 0)),
            pl.BlockSpec((CMID, 1), lambda i: (0, 0)),
            pl.BlockSpec((9, CMID, CMID), lambda i: (0, 0, 0)),
            pl.BlockSpec((CMID, 1), lambda i: (0, 0)),
            pl.BlockSpec((1, NS), lambda i: (0, 0)),
        ],
        out_specs=(
            pl.BlockSpec((1, 1), lambda i: (0, 0),
                         memory_space=pltpu.MemorySpace.SMEM),
            pl.BlockSpec((1, 1), lambda i: (0, 0),
                         memory_space=pltpu.MemorySpace.SMEM),
        ),
        compiler_params=_compiler_params(),
    )(xr_cm, xf_cm, w1, b1, w2, b2, mask_ns)
    return vgg_mse[0, 0], img_mse[0, 0]


# ------------------------- deterministic parameters -------------------------

def _conv_params(key, cin, cout, scale=0.1):
    kw, kb = jax.random.split(key)
    w = (jax.random.normal(kw, (9, cout, cin), jnp.float32) * scale).astype(jnp.bfloat16)
    b = jax.random.normal(kb, (cout, 1), jnp.float32) * scale
    return w, b


def make_params(key):
    ks = jax.random.split(key, 6)
    return {
        "gen1": _conv_params(ks[0], 3, 16),
        "gen2": _conv_params(ks[1], 16, 3),
        "disc1": _conv_params(ks[2], 3, 16),
        "disc2": _conv_params(ks[3], 16, 1),
        "vgg1": _conv_params(ks[4], 3, 16),
        "vgg2": _conv_params(ks[5], 16, 16),
    }


# ------------------------------ Loss.forward --------------------------------

def loss_forward(params, hr_real_nhwc, lr_real_nhwc):
    n, h, w, _ = hr_real_nhwc.shape
    G = w + 3
    mask_ns = _interior_mask_ns(n, h, w)
    hr_real_cm = _to_cm_ext(hr_real_nhwc, G)                      # one-time pad
    hr_fake_cm = generator_forward(params, lr_real_nhwc, mask_ns)  # padded by kernel
    hr_fake = _cm_ext_to_nhwc(hr_fake_cm, n, h, w, G)             # NHWC return value

    # adv_loss(x, is_real): target = 0 if is_real else 1 (matches the module).
    adv_fake = disc_bce_mean(params, hr_fake_cm, mask_ns, target=1.0, n=n, h=h, w=w)
    adv_real = disc_bce_mean(params, hr_real_cm, mask_ns, target=0.0, n=n, h=h, w=w)
    # Forward values of D(hr_fake) and D(hr_fake.detach()) are identical, so a
    # single discriminator pass serves both the generator adversarial term and
    # the fake half of d_loss (separate passes only matter for autodiff, which
    # these forward-only kernels do not implement — no custom_vjp defined).
    g_adv = adv_fake
    d_loss = 0.5 * (adv_real + adv_fake)

    vgg_mse, img_mse = vgg_and_img_mse(params, hr_real_cm, hr_fake_cm, mask_ns,
                                       n=n, h=h, w=w)
    g_loss = 0.001 * g_adv + 0.006 * vgg_mse + img_mse
    return g_loss, d_loss, hr_fake


if __name__ == "__main__":
    key = jax.random.PRNGKey(0)
    k_p, k_hr, k_lr = jax.random.split(key, 3)

    params = make_params(k_p)

    # PyTorch-style NCHW inputs: hr 16x16, lr 8x8 (2x SR), batch 2, 3 channels.
    hr_real_nchw = jax.random.normal(k_hr, (2, 3, 16, 16), jnp.float32)
    lr_real_nchw = jax.random.normal(k_lr, (2, 3, 8, 8), jnp.float32)

    hr_real = jnp.transpose(hr_real_nchw, (0, 2, 3, 1))  # -> NHWC
    lr_real = jnp.transpose(lr_real_nchw, (0, 2, 3, 1))  # -> NHWC

    g_loss, d_loss, hr_fake_nhwc = jax.jit(loss_forward)(params, hr_real, lr_real)
    hr_fake_nchw = jnp.transpose(hr_fake_nhwc, (0, 3, 1, 2))  # back to NCHW

    jax.block_until_ready((g_loss, d_loss, hr_fake_nchw))
    assert hr_fake_nchw.shape == hr_real_nchw.shape
    assert bool(jnp.isfinite(g_loss)) and bool(jnp.isfinite(d_loss))
    print("KERNEL_OK")
</pallas_src>

<mosaic_0001>
module attributes {stable_mosaic.version = 11 : i64} {
  func.func @_generator_kernel(%arg0: i32, %arg1: memref<8x686xbf16, #tpu.memory_space<vmem>>, %arg2: memref<9x16x8xbf16, #tpu.memory_space<vmem>>, %arg3: memref<16x1xf32, #tpu.memory_space<vmem>>, %arg4: memref<9x8x16xbf16, #tpu.memory_space<vmem>>, %arg5: memref<8x1xf32, #tpu.memory_space<vmem>>, %arg6: memref<1x648xf32, #tpu.memory_space<vmem>>, %arg7: memref<8x686xbf16, #tpu.memory_space<vmem>>) attributes {dimension_semantics = [#tpu.dimension_semantics<arbitrary>], iteration_bounds = array<i64: 1>, scalar_prefetch = 0 : i64, scratch_operands = 0 : i64, tpu.core_type = #tpu.core_type<tc>, window_params = [{pipeline_mode = #tpu.pipeline_mode<synchronous>, transform_indices = @transform_0, window_bounds = array<i64: 8, 686>}, {pipeline_mode = #tpu.pipeline_mode<synchronous>, transform_indices = @transform_1, window_bounds = array<i64: 9, 16, 8>}, {pipeline_mode = #tpu.pipeline_mode<synchronous>, transform_indices = @transform_2, window_bounds = array<i64: 16, 1>}, {pipeline_mode = #tpu.pipeline_mode<synchronous>, transform_indices = @transform_3, window_bounds = array<i64: 9, 8, 16>}, {pipeline_mode = #tpu.pipeline_mode<synchronous>, transform_indices = @transform_4, window_bounds = array<i64: 8, 1>}, {pipeline_mode = #tpu.pipeline_mode<synchronous>, transform_indices = @transform_5, window_bounds = array<i64: 1, 648>}, {pipeline_mode = #tpu.pipeline_mode<synchronous>, transform_indices = @transform_6, window_bounds = array<i64: 8, 686>}]} {
    %c0 = arith.constant 0 : index
    %c0_0 = arith.constant 0 : index
    %0 = vector.load %arg6[%c0, %c0_0] : memref<1x648xf32, #tpu.memory_space<vmem>>, vector<1x648xf32>
    %c0_1 = arith.constant 0 : index
    %c0_2 = arith.constant 0 : index
    %1 = vector.load %arg1[%c0_1, %c0_2] : memref<8x686xbf16, #tpu.memory_space<vmem>>, vector<8x686xbf16>
    %c0_3 = arith.constant 0 : index
    %c0_4 = arith.constant 0 : index
    %c0_5 = arith.constant 0 : index
    %2 = vector.load %arg2[%c0_3, %c0_4, %c0_5] : memref<9x16x8xbf16, #tpu.memory_space<vmem>>, vector<9x16x8xbf16>
    %c0_6 = arith.constant 0 : index
    %c0_7 = arith.constant 0 : index
    %3 = vector.load %arg3[%c0_6, %c0_7] : memref<16x1xf32, #tpu.memory_space<vmem>>, vector<16x1xf32>
    %cst = arith.constant 0.000000e+00 : f32
    %4 = vector.broadcast %cst : f32 to vector<16x648xf32>
    %5 = vector.extract_strided_slice %1 {offsets = [0, 0], sizes = [8, 648], strides = [1, 1]} : vector<8x686xbf16> to vector<8x648xbf16>
    %6 = vector.extract_strided_slice %2 {offsets = [0, 0, 0], sizes = [1, 16, 8], strides = [1, 1, 1]} : vector<9x16x8xbf16> to vector<1x16x8xbf16>
    %7 = vector.shape_cast %6 : vector<1x16x8xbf16> to vector<16x8xbf16>
    %cst_8 = arith.constant dense<0.000000e+00> : vector<16x648xf32>
    %8 = tpu.matmul %7, %5, %cst_8 {dimension_numbers = #tpu.dot_dimension_numbers<[1], [0], [0], [1], [0, 0, 1, 1], [], []>} : vector<16x8xbf16>, vector<8x648xbf16>, vector<16x648xf32> -> vector<16x648xf32>
    %9 = arith.addf %4, %8 : vector<16x648xf32>
    %10 = vector.extract_strided_slice %1 {offsets = [0, 1], sizes = [8, 648], strides = [1, 1]} : vector<8x686xbf16> to vector<8x648xbf16>
    %11 = vector.extract_strided_slice %2 {offsets = [1, 0, 0], sizes = [1, 16, 8], strides = [1, 1, 1]} : vector<9x16x8xbf16> to vector<1x16x8xbf16>
    %12 = vector.shape_cast %11 : vector<1x16x8xbf16> to vector<16x8xbf16>
    %cst_9 = arith.constant dense<0.000000e+00> : vector<16x648xf32>
    %13 = tpu.matmul %12, %10, %cst_9 {dimension_numbers = #tpu.dot_dimension_numbers<[1], [0], [0], [1], [0, 0, 1, 1], [], []>} : vector<16x8xbf16>, vector<8x648xbf16>, vector<16x648xf32> -> vector<16x648xf32>
    %14 = arith.addf %9, %13 : vector<16x648xf32>
    %15 = vector.extract_strided_slice %1 {offsets = [0, 2], sizes = [8, 648], strides = [1, 1]} : vector<8x686xbf16> to vector<8x648xbf16>
    %16 = vector.extract_strided_slice %2 {offsets = [2, 0, 0], sizes = [1, 16, 8], strides = [1, 1, 1]} : vector<9x16x8xbf16> to vector<1x16x8xbf16>
    %17 = vector.shape_cast %16 : vector<1x16x8xbf16> to vector<16x8xbf16>
    %cst_10 = arith.constant dense<0.000000e+00> : vector<16x648xf32>
    %18 = tpu.matmul %17, %15, %cst_10 {dimension_numbers = #tpu.dot_dimension_numbers<[1], [0], [0], [1], [0, 0, 1, 1], [], []>} : vector<16x8xbf16>, vector<8x648xbf16>, vector<16x648xf32> -> vector<16x648xf32>
    %19 = arith.addf %14, %18 : vector<16x648xf32>
    %20 = vector.extract_strided_slice %1 {offsets = [0, 18], sizes = [8, 648], strides = [1, 1]} : vector<8x686xbf16> to vector<8x648xbf16>
    %21 = vector.extract_strided_slice %2 {offsets = [3, 0, 0], sizes = [1, 16, 8], strides = [1, 1, 1]} : vector<9x16x8xbf16> to vector<1x16x8xbf16>
    %22 = vector.shape_cast %21 : vector<1x16x8xbf16> to vector<16x8xbf16>
    %cst_11 = arith.constant dense<0.000000e+00> : vector<16x648xf32>
    %23 = tpu.matmul %22, %20, %cst_11 {dimension_numbers = #tpu.dot_dimension_numbers<[1], [0], [0], [1], [0, 0, 1, 1], [], []>} : vector<16x8xbf16>, vector<8x648xbf16>, vector<16x648xf32> -> vector<16x648xf32>
    %24 = arith.addf %19, %23 : vector<16x648xf32>
    %25 = vector.extract_strided_slice %1 {offsets = [0, 19], sizes = [8, 648], strides = [1, 1]} : vector<8x686xbf16> to vector<8x648xbf16>
    %26 = vector.extract_strided_slice %2 {offsets = [4, 0, 0], sizes = [1, 16, 8], strides = [1, 1, 1]} : vector<9x16x8xbf16> to vector<1x16x8xbf16>
    %27 = vector.shape_cast %26 : vector<1x16x8xbf16> to vector<16x8xbf16>
    %cst_12 = arith.constant dense<0.000000e+00> : vector<16x648xf32>
    %28 = tpu.matmul %27, %25, %cst_12 {dimension_numbers = #tpu.dot_dimension_numbers<[1], [0], [0], [1], [0, 0, 1, 1], [], []>} : vector<16x8xbf16>, vector<8x648xbf16>, vector<16x648xf32> -> vector<16x648xf32>
    %29 = arith.addf %24, %28 : vector<16x648xf32>
    %30 = vector.extract_strided_slice %1 {offsets = [0, 20], sizes = [8, 648], strides = [1, 1]} : vector<8x686xbf16> to vector<8x648xbf16>
    %31 = vector.extract_strided_slice %2 {offsets = [5, 0, 0], sizes = [1, 16, 8], strides = [1, 1, 1]} : vector<9x16x8xbf16> to vector<1x16x8xbf16>
    %32 = vector.shape_cast %31 : vector<1x16x8xbf16> to vector<16x8xbf16>
    %cst_13 = arith.constant dense<0.000000e+00> : vector<16x648xf32>
    %33 = tpu.matmul %32, %30, %cst_13 {dimension_numbers = #tpu.dot_dimension_numbers<[1], [0], [0], [1], [0, 0, 1, 1], [], []>} : vector<16x8xbf16>, vector<8x648xbf16>, vector<16x648xf32> -> vector<16x648xf32>
    %34 = arith.addf %29, %33 : vector<16x648xf32>
    %35 = vector.extract_strided_slice %1 {offsets = [0, 36], sizes = [8, 648], strides = [1, 1]} : vector<8x686xbf16> to vector<8x648xbf16>
    %36 = vector.extract_strided_slice %2 {offsets = [6, 0, 0], sizes = [1, 16, 8], strides = [1, 1, 1]} : vector<9x16x8xbf16> to vector<1x16x8xbf16>
    %37 = vector.shape_cast %36 : vector<1x16x8xbf16> to vector<16x8xbf16>
    %cst_14 = arith.constant dense<0.000000e+00> : vector<16x648xf32>
    %38 = tpu.matmul %37, %35, %cst_14 {dimension_numbers = #tpu.dot_dimension_numbers<[1], [0], [0], [1], [0, 0, 1, 1], [], []>} : vector<16x8xbf16>, vector<8x648xbf16>, vector<16x648xf32> -> vector<16x648xf32>
    %39 = arith.addf %34, %38 : vector<16x648xf32>
    %40 = vector.extract_strided_slice %1 {offsets = [0, 37], sizes = [8, 648], strides = [1, 1]} : vector<8x686xbf16> to vector<8x648xbf16>
    %41 = vector.extract_strided_slice %2 {offsets = [7, 0, 0], sizes = [1, 16, 8], strides = [1, 1, 1]} : vector<9x16x8xbf16> to vector<1x16x8xbf16>
    %42 = vector.shape_cast %41 : vector<1x16x8xbf16> to vector<16x8xbf16>
    %cst_15 = arith.constant dense<0.000000e+00> : vector<16x648xf32>
    %43 = tpu.matmul %42, %40, %cst_15 {dimension_numbers = #tpu.dot_dimension_numbers<[1], [0], [0], [1], [0, 0, 1, 1], [], []>} : vector<16x8xbf16>, vector<8x648xbf16>, vector<16x648xf32> -> vector<16x648xf32>
    %44 = arith.addf %39, %43 : vector<16x648xf32>
    %45 = vector.extract_strided_slice %1 {offsets = [0, 38], sizes = [8, 648], strides = [1, 1]} : vector<8x686xbf16> to vector<8x648xbf16>
    %46 = vector.extract_strided_slice %2 {offsets = [8, 0, 0], sizes = [1, 16, 8], strides = [1, 1, 1]} : vector<9x16x8xbf16> to vector<1x16x8xbf16>
    %47 = vector.shape_cast %46 : vector<1x16x8xbf16> to vector<16x8xbf16>
    %cst_16 = arith.constant dense<0.000000e+00> : vector<16x648xf32>
    %48 = tpu.matmul %47, %45, %cst_16 {dimension_numbers = #tpu.dot_dimension_numbers<[1], [0], [0], [1], [0, 0, 1, 1], [], []>} : vector<16x8xbf16>, vector<8x648xbf16>, vector<16x648xf32> -> vector<16x648xf32>
    %49 = arith.addf %44, %48 : vector<16x648xf32>
    %50 = vector.broadcast %3 : vector<16x1xf32> to vector<16x648xf32>
    %51 = arith.addf %49, %50 : vector<16x648xf32>
    %cst_17 = arith.constant 0.000000e+00 : f32
    %52 = vector.broadcast %cst_17 : f32 to vector<16x648xf32>
    %53 = arith.maximumf %51, %52 : vector<16x648xf32>
    %54 = vector.broadcast %0 : vector<1x648xf32> to vector<16x648xf32>
    %55 = arith.mulf %53, %54 : vector<16x648xf32>
    %56 = arith.truncf %55 : vector<16x648xf32> to vector<16x648xbf16>
    %cst_18 = arith.constant 0.000000e+00 : bf16
    %57 = vector.broadcast %cst_18 : bf16 to vector<16x19xbf16>
    %58 = tpu.concatenate %57, %56, %57 in 1 : vector<16x19xbf16>, vector<16x648xbf16>, vector<16x19xbf16> -> vector<16x686xbf16>
    %c0_19 = arith.constant 0 : index
    %c0_20 = arith.constant 0 : index
    %c0_21 = arith.constant 0 : index
    %59 = vector.load %arg4[%c0_19, %c0_20, %c0_21] : memref<9x8x16xbf16, #tpu.memory_space<vmem>>, vector<9x8x16xbf16>
    %c0_22 = arith.constant 0 : index
    %c0_23 = arith.constant 0 : index
    %60 = vector.load %arg5[%c0_22, %c0_23] : memref<8x1xf32, #tpu.memory_space<vmem>>, vector<8x1xf32>
    %cst_24 = arith.constant 0.000000e+00 : f32
    %61 = vector.broadcast %cst_24 : f32 to vector<8x648xf32>
    %62 = vector.extract_strided_slice %58 {offsets = [0, 0], sizes = [16, 648], strides = [1, 1]} : vector<16x686xbf16> to vector<16x648xbf16>
    %63 = vector.extract_strided_slice %59 {offsets = [0, 0, 0], sizes = [1, 8, 16], strides = [1, 1, 1]} : vector<9x8x16xbf16> to vector<1x8x16xbf16>
    %64 = vector.shape_cast %63 : vector<1x8x16xbf16> to vector<8x16xbf16>
    %cst_25 = arith.constant dense<0.000000e+00> : vector<8x648xf32>
    %65 = tpu.matmul %64, %62, %cst_25 {dimension_numbers = #tpu.dot_dimension_numbers<[1], [0], [0], [1], [0, 0, 1, 1], [], []>} : vector<8x16xbf16>, vector<16x648xbf16>, vector<8x648xf32> -> vector<8x648xf32>
    %66 = arith.addf %61, %65 : vector<8x648xf32>
    %67 = vector.extract_strided_slice %58 {offsets = [0, 1], sizes = [16, 648], strides = [1, 1]} : vector<16x686xbf16> to vector<16x648xbf16>
    %68 = vector.extract_strided_slice %59 {offsets = [1, 0, 0], sizes = [1, 8, 16], strides = [1, 1, 1]} : vector<9x8x16xbf16> to vector<1x8x16xbf16>
    %69 = vector.shape_cast %68 : vector<1x8x16xbf16> to vector<8x16xbf16>
    %cst_26 = arith.constant dense<0.000000e+00> : vector<8x648xf32>
    %70 = tpu.matmul %69, %67, %cst_26 {dimension_numbers = #tpu.dot_dimension_numbers<[1], [0], [0], [1], [0, 0, 1, 1], [], []>} : vector<8x16xbf16>, vector<16x648xbf16>, vector<8x648xf32> -> vector<8x648xf32>
    %71 = arith.addf %66, %70 : vector<8x648xf32>
    %72 = vector.extract_strided_slice %58 {offsets = [0, 2], sizes = [16, 648], strides = [1, 1]} : vector<16x686xbf16> to vector<16x648xbf16>
    %73 = vector.extract_strided_slice %59 {offsets = [2, 0, 0], sizes = [1, 8, 16], strides = [1, 1, 1]} : vector<9x8x16xbf16> to vector<1x8x16xbf16>
    %74 = vector.shape_cast %73 : vector<1x8x16xbf16> to vector<8x16xbf16>
    %cst_27 = arith.constant dense<0.000000e+00> : vector<8x648xf32>
    %75 = tpu.matmul %74, %72, %cst_27 {dimension_numbers = #tpu.dot_dimension_numbers<[1], [0], [0], [1], [0, 0, 1, 1], [], []>} : vector<8x16xbf16>, vector<16x648xbf16>, vector<8x648xf32> -> vector<8x648xf32>
    %76 = arith.addf %71, %75 : vector<8x648xf32>
    %77 = vector.extract_strided_slice %58 {offsets = [0, 18], sizes = [16, 648], strides = [1, 1]} : vector<16x686xbf16> to vector<16x648xbf16>
    %78 = vector.extract_strided_slice %59 {offsets = [3, 0, 0], sizes = [1, 8, 16], strides = [1, 1, 1]} : vector<9x8x16xbf16> to vector<1x8x16xbf16>
    %79 = vector.shape_cast %78 : vector<1x8x16xbf16> to vector<8x16xbf16>
    %cst_28 = arith.constant dense<0.000000e+00> : vector<8x648xf32>
    %80 = tpu.matmul %79, %77, %cst_28 {dimension_numbers = #tpu.dot_dimension_numbers<[1], [0], [0], [1], [0, 0, 1, 1], [], []>} : vector<8x16xbf16>, vector<16x648xbf16>, vector<8x648xf32> -> vector<8x648xf32>
    %81 = arith.addf %76, %80 : vector<8x648xf32>
    %82 = vector.extract_strided_slice %58 {offsets = [0, 19], sizes = [16, 648], strides = [1, 1]} : vector<16x686xbf16> to vector<16x648xbf16>
    %83 = vector.extract_strided_slice %59 {offsets = [4, 0, 0], sizes = [1, 8, 16], strides = [1, 1, 1]} : vector<9x8x16xbf16> to vector<1x8x16xbf16>
    %84 = vector.shape_cast %83 : vector<1x8x16xbf16> to vector<8x16xbf16>
    %cst_29 = arith.constant dense<0.000000e+00> : vector<8x648xf32>
    %85 = tpu.matmul %84, %82, %cst_29 {dimension_numbers = #tpu.dot_dimension_numbers<[1], [0], [0], [1], [0, 0, 1, 1], [], []>} : vector<8x16xbf16>, vector<16x648xbf16>, vector<8x648xf32> -> vector<8x648xf32>
    %86 = arith.addf %81, %85 : vector<8x648xf32>
    %87 = vector.extract_strided_slice %58 {offsets = [0, 20], sizes = [16, 648], strides = [1, 1]} : vector<16x686xbf16> to vector<16x648xbf16>
    %88 = vector.extract_strided_slice %59 {offsets = [5, 0, 0], sizes = [1, 8, 16], strides = [1, 1, 1]} : vector<9x8x16xbf16> to vector<1x8x16xbf16>
    %89 = vector.shape_cast %88 : vector<1x8x16xbf16> to vector<8x16xbf16>
    %cst_30 = arith.constant dense<0.000000e+00> : vector<8x648xf32>
    %90 = tpu.matmul %89, %87, %cst_30 {dimension_numbers = #tpu.dot_dimension_numbers<[1], [0], [0], [1], [0, 0, 1, 1], [], []>} : vector<8x16xbf16>, vector<16x648xbf16>, vector<8x648xf32> -> vector<8x648xf32>
    %91 = arith.addf %86, %90 : vector<8x648xf32>
    %92 = vector.extract_strided_slice %58 {offsets = [0, 36], sizes = [16, 648], strides = [1, 1]} : vector<16x686xbf16> to vector<16x648xbf16>
    %93 = vector.extract_strided_slice %59 {offsets = [6, 0, 0], sizes = [1, 8, 16], strides = [1, 1, 1]} : vector<9x8x16xbf16> to vector<1x8x16xbf16>
    %94 = vector.shape_cast %93 : vector<1x8x16xbf16> to vector<8x16xbf16>
    %cst_31 = arith.constant dense<0.000000e+00> : vector<8x648xf32>
    %95 = tpu.matmul %94, %92, %cst_31 {dimension_numbers = #tpu.dot_dimension_numbers<[1], [0], [0], [1], [0, 0, 1, 1], [], []>} : vector<8x16xbf16>, vector<16x648xbf16>, vector<8x648xf32> -> vector<8x648xf32>
    %96 = arith.addf %91, %95 : vector<8x648xf32>
    %97 = vector.extract_strided_slice %58 {offsets = [0, 37], sizes = [16, 648], strides = [1, 1]} : vector<16x686xbf16> to vector<16x648xbf16>
    %98 = vector.extract_strided_slice %59 {offsets = [7, 0, 0], sizes = [1, 8, 16], strides = [1, 1, 1]} : vector<9x8x16xbf16> to vector<1x8x16xbf16>
    %99 = vector.shape_cast %98 : vector<1x8x16xbf16> to vector<8x16xbf16>
    %cst_32 = arith.constant dense<0.000000e+00> : vector<8x648xf32>
    %100 = tpu.matmul %99, %97, %cst_32 {dimension_numbers = #tpu.dot_dimension_numbers<[1], [0], [0], [1], [0, 0, 1, 1], [], []>} : vector<8x16xbf16>, vector<16x648xbf16>, vector<8x648xf32> -> vector<8x648xf32>
    %101 = arith.addf %96, %100 : vector<8x648xf32>
    %102 = vector.extract_strided_slice %58 {offsets = [0, 38], sizes = [16, 648], strides = [1, 1]} : vector<16x686xbf16> to vector<16x648xbf16>
    %103 = vector.extract_strided_slice %59 {offsets = [8, 0, 0], sizes = [1, 8, 16], strides = [1, 1, 1]} : vector<9x8x16xbf16> to vector<1x8x16xbf16>
    %104 = vector.shape_cast %103 : vector<1x8x16xbf16> to vector<8x16xbf16>
    %cst_33 = arith.constant dense<0.000000e+00> : vector<8x648xf32>
    %105 = tpu.matmul %104, %102, %cst_33 {dimension_numbers = #tpu.dot_dimension_numbers<[1], [0], [0], [1], [0, 0, 1, 1], [], []>} : vector<8x16xbf16>, vector<16x648xbf16>, vector<8x648xf32> -> vector<8x648xf32>
    %106 = arith.addf %101, %105 : vector<8x648xf32>
    %107 = vector.broadcast %60 : vector<8x1xf32> to vector<8x648xf32>
    %108 = arith.addf %106, %107 : vector<8x648xf32>
    %109 = vector.broadcast %0 : vector<1x648xf32> to vector<8x648xf32>
    %110 = arith.mulf %108, %109 : vector<8x648xf32>
    %111 = arith.truncf %110 : vector<8x648xf32> to vector<8x648xbf16>
    %cst_34 = arith.constant 0.000000e+00 : bf16
    %112 = vector.broadcast %cst_34 : bf16 to vector<8x19xbf16>
    %113 = tpu.concatenate %112, %111, %112 in 1 : vector<8x19xbf16>, vector<8x648xbf16>, vector<8x19xbf16> -> vector<8x686xbf16>
    %c0_35 = arith.constant 0 : index
    %c0_36 = arith.constant 0 : index
    %114 = vector.load %arg7[%c0_35, %c0_36] : memref<8x686xbf16, #tpu.memory_space<vmem>>, vector<8x686xbf16>
    tpu.vector_store %arg7[%c0_35, %c0_36], %113 {strides = array<i32>} : memref<8x686xbf16, #tpu.memory_space<vmem>>, vector<8x686xbf16>,
    return
  }
  func.func @transform_0(%arg0: i32) -> (i32, i32) {
    %c0_i32 = arith.constant 0 : i32
    %c0_i32_0 = arith.constant 0 : i32
    %c0_i32_1 = arith.constant 0 : i32
    return %c0_i32, %c0_i32_0 : i32, i32
  }
  func.func @transform_1(%arg0: i32) -> (i32, i32, i32) {
    %c0_i32 = arith.constant 0 : i32
    %c0_i32_0 = arith.constant 0 : i32
    %c0_i32_1 = arith.constant 0 : i32
    %c0_i32_2 = arith.constant 0 : i32
    return %c0_i32, %c0_i32_0, %c0_i32_1 : i32, i32, i32
  }
  func.func @transform_2(%arg0: i32) -> (i32, i32) {
    %c0_i32 = arith.constant 0 : i32
    %c0_i32_0 = arith.constant 0 : i32
    %c0_i32_1 = arith.constant 0 : i32
    return %c0_i32, %c0_i32_0 : i32, i32
  }
  func.func @transform_3(%arg0: i32) -> (i32, i32, i32) {
    %c0_i32 = arith.constant 0 : i32
    %c0_i32_0 = arith.constant 0 : i32
    %c0_i32_1 = arith.constant 0 : i32
    %c0_i32_2 = arith.constant 0 : i32
    return %c0_i32, %c0_i32_0, %c0_i32_1 : i32, i32, i32
  }
  func.func @transform_4(%arg0: i32) -> (i32, i32) {
    %c0_i32 = arith.constant 0 : i32
    %c0_i32_0 = arith.constant 0 : i32
    %c0_i32_1 = arith.constant 0 : i32
    return %c0_i32, %c0_i32_0 : i32, i32
  }
  func.func @transform_5(%arg0: i32) -> (i32, i32) {
    %c0_i32 = arith.constant 0 : i32
    %c0_i32_0 = arith.constant 0 : i32
    %c0_i32_1 = arith.constant 0 : i32
    return %c0_i32, %c0_i32_0 : i32, i32
  }
  func.func @transform_6(%arg0: i32) -> (i32, i32) {
    %c0_i32 = arith.constant 0 : i32
    %c0_i32_0 = arith.constant 0 : i32
    %c0_i32_1 = arith.constant 0 : i32
    return %c0_i32, %c0_i32_0 : i32, i32
  }
}

module attributes {stable_mosaic.version = 11 : i64} {
  func.func @_disc_bce_kernel(%arg0: i32, %arg1: memref<8x686xbf16, #tpu.memory_space<vmem>>, %arg2: memref<9x16x8xbf16, #tpu.memory_space<vmem>>, %arg3: memref<16x1xf32, #tpu.memory_space<vmem>>, %arg4: memref<9x8x16xbf16, #tpu.memory_space<vmem>>, %arg5: memref<8x1xf32, #tpu.memory_space<vmem>>, %arg6: memref<1x648xf32, #tpu.memory_space<vmem>>, %arg7: memref<1x1xf32, #tpu.memory_space<smem>>) attributes {dimension_semantics = [#tpu.dimension_semantics<arbitrary>], iteration_bounds = array<i64: 1>, scalar_prefetch = 0 : i64, scratch_operands = 0 : i64, tpu.core_type = #tpu.core_type<tc>, window_params = [{pipeline_mode = #tpu.pipeline_mode<synchronous>, transform_indices = @transform_0, window_bounds = array<i64: 8, 686>}, {pipeline_mode = #tpu.pipeline_mode<synchronous>, transform_indices = @transform_1, window_bounds = array<i64: 9, 16, 8>}, {pipeline_mode = #tpu.pipeline_mode<synchronous>, transform_indices = @transform_2, window_bounds = array<i64: 16, 1>}, {pipeline_mode = #tpu.pipeline_mode<synchronous>, transform_indices = @transform_3, window_bounds = array<i64: 9, 8, 16>}, {pipeline_mode = #tpu.pipeline_mode<synchronous>, transform_indices = @transform_4, window_bounds = array<i64: 8, 1>}, {pipeline_mode = #tpu.pipeline_mode<synchronous>, transform_indices = @transform_5, window_bounds = array<i64: 1, 648>}, {transform_indices = @transform_6, window_bounds = array<i64: 1, 1>}]} {
    %c0 = arith.constant 0 : index
    %c0_0 = arith.constant 0 : index
    %0 = vector.load %arg6[%c0, %c0_0] : memref<1x648xf32, #tpu.memory_space<vmem>>, vector<1x648xf32>
    %c0_1 = arith.constant 0 : index
    %c0_2 = arith.constant 0 : index
    %1 = vector.load %arg1[%c0_1, %c0_2] : memref<8x686xbf16, #tpu.memory_space<vmem>>, vector<8x686xbf16>
    %c0_3 = arith.constant 0 : index
    %c0_4 = arith.constant 0 : index
    %c0_5 = arith.constant 0 : index
    %2 = vector.load %arg2[%c0_3, %c0_4, %c0_5] : memref<9x16x8xbf16, #tpu.memory_space<vmem>>, vector<9x16x8xbf16>
    %c0_6 = arith.constant 0 : index
    %c0_7 = arith.constant 0 : index
    %3 = vector.load %arg3[%c0_6, %c0_7] : memref<16x1xf32, #tpu.memory_space<vmem>>, vector<16x1xf32>
    %cst = arith.constant 0.000000e+00 : f32
    %4 = vector.broadcast %cst : f32 to vector<16x648xf32>
    %5 = vector.extract_strided_slice %1 {offsets = [0, 0], sizes = [8, 648], strides = [1, 1]} : vector<8x686xbf16> to vector<8x648xbf16>
    %6 = vector.extract_strided_slice %2 {offsets = [0, 0, 0], sizes = [1, 16, 8], strides = [1, 1, 1]} : vector<9x16x8xbf16> to vector<1x16x8xbf16>
    %7 = vector.shape_cast %6 : vector<1x16x8xbf16> to vector<16x8xbf16>
    %cst_8 = arith.constant dense<0.000000e+00> : vector<16x648xf32>
    %8 = tpu.matmul %7, %5, %cst_8 {dimension_numbers = #tpu.dot_dimension_numbers<[1], [0], [0], [1], [0, 0, 1, 1], [], []>} : vector<16x8xbf16>, vector<8x648xbf16>, vector<16x648xf32> -> vector<16x648xf32>
    %9 = arith.addf %4, %8 : vector<16x648xf32>
    %10 = vector.extract_strided_slice %1 {offsets = [0, 1], sizes = [8, 648], strides = [1, 1]} : vector<8x686xbf16> to vector<8x648xbf16>
    %11 = vector.extract_strided_slice %2 {offsets = [1, 0, 0], sizes = [1, 16, 8], strides = [1, 1, 1]} : vector<9x16x8xbf16> to vector<1x16x8xbf16>
    %12 = vector.shape_cast %11 : vector<1x16x8xbf16> to vector<16x8xbf16>
    %cst_9 = arith.constant dense<0.000000e+00> : vector<16x648xf32>
    %13 = tpu.matmul %12, %10, %cst_9 {dimension_numbers = #tpu.dot_dimension_numbers<[1], [0], [0], [1], [0, 0, 1, 1], [], []>} : vector<16x8xbf16>, vector<8x648xbf16>, vector<16x648xf32> -> vector<16x648xf32>
    %14 = arith.addf %9, %13 : vector<16x648xf32>
    %15 = vector.extract_strided_slice %1 {offsets = [0, 2], sizes = [8, 648], strides = [1, 1]} : vector<8x686xbf16> to vector<8x648xbf16>
    %16 = vector.extract_strided_slice %2 {offsets = [2, 0, 0], sizes = [1, 16, 8], strides = [1, 1, 1]} : vector<9x16x8xbf16> to vector<1x16x8xbf16>
    %17 = vector.shape_cast %16 : vector<1x16x8xbf16> to vector<16x8xbf16>
    %cst_10 = arith.constant dense<0.000000e+00> : vector<16x648xf32>
    %18 = tpu.matmul %17, %15, %cst_10 {dimension_numbers = #tpu.dot_dimension_numbers<[1], [0], [0], [1], [0, 0, 1, 1], [], []>} : vector<16x8xbf16>, vector<8x648xbf16>, vector<16x648xf32> -> vector<16x648xf32>
    %19 = arith.addf %14, %18 : vector<16x648xf32>
    %20 = vector.extract_strided_slice %1 {offsets = [0, 18], sizes = [8, 648], strides = [1, 1]} : vector<8x686xbf16> to vector<8x648xbf16>
    %21 = vector.extract_strided_slice %2 {offsets = [3, 0, 0], sizes = [1, 16, 8], strides = [1, 1, 1]} : vector<9x16x8xbf16> to vector<1x16x8xbf16>
    %22 = vector.shape_cast %21 : vector<1x16x8xbf16> to vector<16x8xbf16>
    %cst_11 = arith.constant dense<0.000000e+00> : vector<16x648xf32>
    %23 = tpu.matmul %22, %20, %cst_11 {dimension_numbers = #tpu.dot_dimension_numbers<[1], [0], [0], [1], [0, 0, 1, 1], [], []>} : vector<16x8xbf16>, vector<8x648xbf16>, vector<16x648xf32> -> vector<16x648xf32>
    %24 = arith.addf %19, %23 : vector<16x648xf32>
    %25 = vector.extract_strided_slice %1 {offsets = [0, 19], sizes = [8, 648], strides = [1, 1]} : vector<8x686xbf16> to vector<8x648xbf16>
    %26 = vector.extract_strided_slice %2 {offsets = [4, 0, 0], sizes = [1, 16, 8], strides = [1, 1, 1]} : vector<9x16x8xbf16> to vector<1x16x8xbf16>
    %27 = vector.shape_cast %26 : vector<1x16x8xbf16> to vector<16x8xbf16>
    %cst_12 = arith.constant dense<0.000000e+00> : vector<16x648xf32>
    %28 = tpu.matmul %27, %25, %cst_12 {dimension_numbers = #tpu.dot_dimension_numbers<[1], [0], [0], [1], [0, 0, 1, 1], [], []>} : vector<16x8xbf16>, vector<8x648xbf16>, vector<16x648xf32> -> vector<16x648xf32>
    %29 = arith.addf %24, %28 : vector<16x648xf32>
    %30 = vector.extract_strided_slice %1 {offsets = [0, 20], sizes = [8, 648], strides = [1, 1]} : vector<8x686xbf16> to vector<8x648xbf16>
    %31 = vector.extract_strided_slice %2 {offsets = [5, 0, 0], sizes = [1, 16, 8], strides = [1, 1, 1]} : vector<9x16x8xbf16> to vector<1x16x8xbf16>
    %32 = vector.shape_cast %31 : vector<1x16x8xbf16> to vector<16x8xbf16>
    %cst_13 = arith.constant dense<0.000000e+00> : vector<16x648xf32>
    %33 = tpu.matmul %32, %30, %cst_13 {dimension_numbers = #tpu.dot_dimension_numbers<[1], [0], [0], [1], [0, 0, 1, 1], [], []>} : vector<16x8xbf16>, vector<8x648xbf16>, vector<16x648xf32> -> vector<16x648xf32>
    %34 = arith.addf %29, %33 : vector<16x648xf32>
    %35 = vector.extract_strided_slice %1 {offsets = [0, 36], sizes = [8, 648], strides = [1, 1]} : vector<8x686xbf16> to vector<8x648xbf16>
    %36 = vector.extract_strided_slice %2 {offsets = [6, 0, 0], sizes = [1, 16, 8], strides = [1, 1, 1]} : vector<9x16x8xbf16> to vector<1x16x8xbf16>
    %37 = vector.shape_cast %36 : vector<1x16x8xbf16> to vector<16x8xbf16>
    %cst_14 = arith.constant dense<0.000000e+00> : vector<16x648xf32>
    %38 = tpu.matmul %37, %35, %cst_14 {dimension_numbers = #tpu.dot_dimension_numbers<[1], [0], [0], [1], [0, 0, 1, 1], [], []>} : vector<16x8xbf16>, vector<8x648xbf16>, vector<16x648xf32> -> vector<16x648xf32>
    %39 = arith.addf %34, %38 : vector<16x648xf32>
    %40 = vector.extract_strided_slice %1 {offsets = [0, 37], sizes = [8, 648], strides = [1, 1]} : vector<8x686xbf16> to vector<8x648xbf16>
    %41 = vector.extract_strided_slice %2 {offsets = [7, 0, 0], sizes = [1, 16, 8], strides = [1, 1, 1]} : vector<9x16x8xbf16> to vector<1x16x8xbf16>
    %42 = vector.shape_cast %41 : vector<1x16x8xbf16> to vector<16x8xbf16>
    %cst_15 = arith.constant dense<0.000000e+00> : vector<16x648xf32>
    %43 = tpu.matmul %42, %40, %cst_15 {dimension_numbers = #tpu.dot_dimension_numbers<[1], [0], [0], [1], [0, 0, 1, 1], [], []>} : vector<16x8xbf16>, vector<8x648xbf16>, vector<16x648xf32> -> vector<16x648xf32>
    %44 = arith.addf %39, %43 : vector<16x648xf32>
    %45 = vector.extract_strided_slice %1 {offsets = [0, 38], sizes = [8, 648], strides = [1, 1]} : vector<8x686xbf16> to vector<8x648xbf16>
    %46 = vector.extract_strided_slice %2 {offsets = [8, 0, 0], sizes = [1, 16, 8], strides = [1, 1, 1]} : vector<9x16x8xbf16> to vector<1x16x8xbf16>
    %47 = vector.shape_cast %46 : vector<1x16x8xbf16> to vector<16x8xbf16>
    %cst_16 = arith.constant dense<0.000000e+00> : vector<16x648xf32>
    %48 = tpu.matmul %47, %45, %cst_16 {dimension_numbers = #tpu.dot_dimension_numbers<[1], [0], [0], [1], [0, 0, 1, 1], [], []>} : vector<16x8xbf16>, vector<8x648xbf16>, vector<16x648xf32> -> vector<16x648xf32>
    %49 = arith.addf %44, %48 : vector<16x648xf32>
    %50 = vector.broadcast %3 : vector<16x1xf32> to vector<16x648xf32>
    %51 = arith.addf %49, %50 : vector<16x648xf32>
    %cst_17 = arith.constant 0.000000e+00 : f32
    %52 = vector.broadcast %cst_17 : f32 to vector<16x648xf32>
    %53 = arith.maximumf %51, %52 : vector<16x648xf32>
    %54 = vector.broadcast %0 : vector<1x648xf32> to vector<16x648xf32>
    %55 = arith.mulf %53, %54 : vector<16x648xf32>
    %56 = arith.truncf %55 : vector<16x648xf32> to vector<16x648xbf16>
    %cst_18 = arith.constant 0.000000e+00 : bf16
    %57 = vector.broadcast %cst_18 : bf16 to vector<16x19xbf16>
    %58 = tpu.concatenate %57, %56, %57 in 1 : vector<16x19xbf16>, vector<16x648xbf16>, vector<16x19xbf16> -> vector<16x686xbf16>
    %c0_19 = arith.constant 0 : index
    %c0_20 = arith.constant 0 : index
    %c0_21 = arith.constant 0 : index
    %59 = vector.load %arg4[%c0_19, %c0_20, %c0_21] : memref<9x8x16xbf16, #tpu.memory_space<vmem>>, vector<9x8x16xbf16>
    %c0_22 = arith.constant 0 : index
    %c0_23 = arith.constant 0 : index
    %60 = vector.load %arg5[%c0_22, %c0_23] : memref<8x1xf32, #tpu.memory_space<vmem>>, vector<8x1xf32>
    %cst_24 = arith.constant 0.000000e+00 : f32
    %61 = vector.broadcast %cst_24 : f32 to vector<8x648xf32>
    %62 = vector.extract_strided_slice %58 {offsets = [0, 0], sizes = [16, 648], strides = [1, 1]} : vector<16x686xbf16> to vector<16x648xbf16>
    %63 = vector.extract_strided_slice %59 {offsets = [0, 0, 0], sizes = [1, 8, 16], strides = [1, 1, 1]} : vector<9x8x16xbf16> to vector<1x8x16xbf16>
    %64 = vector.shape_cast %63 : vector<1x8x16xbf16> to vector<8x16xbf16>
    %cst_25 = arith.constant dense<0.000000e+00> : vector<8x648xf32>
    %65 = tpu.matmul %64, %62, %cst_25 {dimension_numbers = #tpu.dot_dimension_numbers<[1], [0], [0], [1], [0, 0, 1, 1], [], []>} : vector<8x16xbf16>, vector<16x648xbf16>, vector<8x648xf32> -> vector<8x648xf32>
    %66 = arith.addf %61, %65 : vector<8x648xf32>
    %67 = vector.extract_strided_slice %58 {offsets = [0, 1], sizes = [16, 648], strides = [1, 1]} : vector<16x686xbf16> to vector<16x648xbf16>
    %68 = vector.extract_strided_slice %59 {offsets = [1, 0, 0], sizes = [1, 8, 16], strides = [1, 1, 1]} : vector<9x8x16xbf16> to vector<1x8x16xbf16>
    %69 = vector.shape_cast %68 : vector<1x8x16xbf16> to vector<8x16xbf16>
    %cst_26 = arith.constant dense<0.000000e+00> : vector<8x648xf32>
    %70 = tpu.matmul %69, %67, %cst_26 {dimension_numbers = #tpu.dot_dimension_numbers<[1], [0], [0], [1], [0, 0, 1, 1], [], []>} : vector<8x16xbf16>, vector<16x648xbf16>, vector<8x648xf32> -> vector<8x648xf32>
    %71 = arith.addf %66, %70 : vector<8x648xf32>
    %72 = vector.extract_strided_slice %58 {offsets = [0, 2], sizes = [16, 648], strides = [1, 1]} : vector<16x686xbf16> to vector<16x648xbf16>
    %73 = vector.extract_strided_slice %59 {offsets = [2, 0, 0], sizes = [1, 8, 16], strides = [1, 1, 1]} : vector<9x8x16xbf16> to vector<1x8x16xbf16>
    %74 = vector.shape_cast %73 : vector<1x8x16xbf16> to vector<8x16xbf16>
    %cst_27 = arith.constant dense<0.000000e+00> : vector<8x648xf32>
    %75 = tpu.matmul %74, %72, %cst_27 {dimension_numbers = #tpu.dot_dimension_numbers<[1], [0], [0], [1], [0, 0, 1, 1], [], []>} : vector<8x16xbf16>, vector<16x648xbf16>, vector<8x648xf32> -> vector<8x648xf32>
    %76 = arith.addf %71, %75 : vector<8x648xf32>
    %77 = vector.extract_strided_slice %58 {offsets = [0, 18], sizes = [16, 648], strides = [1, 1]} : vector<16x686xbf16> to vector<16x648xbf16>
    %78 = vector.extract_strided_slice %59 {offsets = [3, 0, 0], sizes = [1, 8, 16], strides = [1, 1, 1]} : vector<9x8x16xbf16> to vector<1x8x16xbf16>
    %79 = vector.shape_cast %78 : vector<1x8x16xbf16> to vector<8x16xbf16>
    %cst_28 = arith.constant dense<0.000000e+00> : vector<8x648xf32>
    %80 = tpu.matmul %79, %77, %cst_28 {dimension_numbers = #tpu.dot_dimension_numbers<[1], [0], [0], [1], [0, 0, 1, 1], [], []>} : vector<8x16xbf16>, vector<16x648xbf16>, vector<8x648xf32> -> vector<8x648xf32>
    %81 = arith.addf %76, %80 : vector<8x648xf32>
    %82 = vector.extract_strided_slice %58 {offsets = [0, 19], sizes = [16, 648], strides = [1, 1]} : vector<16x686xbf16> to vector<16x648xbf16>
    %83 = vector.extract_strided_slice %59 {offsets = [4, 0, 0], sizes = [1, 8, 16], strides = [1, 1, 1]} : vector<9x8x16xbf16> to vector<1x8x16xbf16>
    %84 = vector.shape_cast %83 : vector<1x8x16xbf16> to vector<8x16xbf16>
    %cst_29 = arith.constant dense<0.000000e+00> : vector<8x648xf32>
    %85 = tpu.matmul %84, %82, %cst_29 {dimension_numbers = #tpu.dot_dimension_numbers<[1], [0], [0], [1], [0, 0, 1, 1], [], []>} : vector<8x16xbf16>, vector<16x648xbf16>, vector<8x648xf32> -> vector<8x648xf32>
    %86 = arith.addf %81, %85 : vector<8x648xf32>
    %87 = vector.extract_strided_slice %58 {offsets = [0, 20], sizes = [16, 648], strides = [1, 1]} : vector<16x686xbf16> to vector<16x648xbf16>
    %88 = vector.extract_strided_slice %59 {offsets = [5, 0, 0], sizes = [1, 8, 16], strides = [1, 1, 1]} : vector<9x8x16xbf16> to vector<1x8x16xbf16>
    %89 = vector.shape_cast %88 : vector<1x8x16xbf16> to vector<8x16xbf16>
    %cst_30 = arith.constant dense<0.000000e+00> : vector<8x648xf32>
    %90 = tpu.matmul %89, %87, %cst_30 {dimension_numbers = #tpu.dot_dimension_numbers<[1], [0], [0], [1], [0, 0, 1, 1], [], []>} : vector<8x16xbf16>, vector<16x648xbf16>, vector<8x648xf32> -> vector<8x648xf32>
    %91 = arith.addf %86, %90 : vector<8x648xf32>
    %92 = vector.extract_strided_slice %58 {offsets = [0, 36], sizes = [16, 648], strides = [1, 1]} : vector<16x686xbf16> to vector<16x648xbf16>
    %93 = vector.extract_strided_slice %59 {offsets = [6, 0, 0], sizes = [1, 8, 16], strides = [1, 1, 1]} : vector<9x8x16xbf16> to vector<1x8x16xbf16>
    %94 = vector.shape_cast %93 : vector<1x8x16xbf16> to vector<8x16xbf16>
    %cst_31 = arith.constant dense<0.000000e+00> : vector<8x648xf32>
    %95 = tpu.matmul %94, %92, %cst_31 {dimension_numbers = #tpu.dot_dimension_numbers<[1], [0], [0], [1], [0, 0, 1, 1], [], []>} : vector<8x16xbf16>, vector<16x648xbf16>, vector<8x648xf32> -> vector<8x648xf32>
    %96 = arith.addf %91, %95 : vector<8x648xf32>
    %97 = vector.extract_strided_slice %58 {offsets = [0, 37], sizes = [16, 648], strides = [1, 1]} : vector<16x686xbf16> to vector<16x648xbf16>
    %98 = vector.extract_strided_slice %59 {offsets = [7, 0, 0], sizes = [1, 8, 16], strides = [1, 1, 1]} : vector<9x8x16xbf16> to vector<1x8x16xbf16>
    %99 = vector.shape_cast %98 : vector<1x8x16xbf16> to vector<8x16xbf16>
    %cst_32 = arith.constant dense<0.000000e+00> : vector<8x648xf32>
    %100 = tpu.matmul %99, %97, %cst_32 {dimension_numbers = #tpu.dot_dimension_numbers<[1], [0], [0], [1], [0, 0, 1, 1], [], []>} : vector<8x16xbf16>, vector<16x648xbf16>, vector<8x648xf32> -> vector<8x648xf32>
    %101 = arith.addf %96, %100 : vector<8x648xf32>
    %102 = vector.extract_strided_slice %58 {offsets = [0, 38], sizes = [16, 648], strides = [1, 1]} : vector<16x686xbf16> to vector<16x648xbf16>
    %103 = vector.extract_strided_slice %59 {offsets = [8, 0, 0], sizes = [1, 8, 16], strides = [1, 1, 1]} : vector<9x8x16xbf16> to vector<1x8x16xbf16>
    %104 = vector.shape_cast %103 : vector<1x8x16xbf16> to vector<8x16xbf16>
    %cst_33 = arith.constant dense<0.000000e+00> : vector<8x648xf32>
    %105 = tpu.matmul %104, %102, %cst_33 {dimension_numbers = #tpu.dot_dimension_numbers<[1], [0], [0], [1], [0, 0, 1, 1], [], []>} : vector<8x16xbf16>, vector<16x648xbf16>, vector<8x648xf32> -> vector<8x648xf32>
    %106 = arith.addf %101, %105 : vector<8x648xf32>
    %107 = vector.broadcast %60 : vector<8x1xf32> to vector<8x648xf32>
    %108 = arith.addf %106, %107 : vector<8x648xf32>
    %109 = vector.broadcast %0 : vector<1x648xf32> to vector<8x648xf32>
    %110 = arith.mulf %108, %109 : vector<8x648xf32>
    %111 = vector.extract_strided_slice %110 {offsets = [0, 0], sizes = [1, 648], strides = [1, 1]} : vector<8x648xf32> to vector<1x648xf32>
    %cst_34 = arith.constant 0.000000e+00 : f32
    %112 = vector.broadcast %cst_34 : f32 to vector<1x648xf32>
    %113 = arith.maximumf %111, %112 : vector<1x648xf32>
    %cst_35 = arith.constant 1.000000e+00 : f32
    %114 = vector.broadcast %cst_35 : f32 to vector<1x648xf32>
    %115 = arith.mulf %111, %114 : vector<1x648xf32>
    %116 = arith.subf %113, %115 : vector<1x648xf32>
    %117 = math.absf %111 : vector<1x648xf32>
    %cst_36 = arith.constant 0.000000e+00 : f32
    %118 = vector.broadcast %cst_36 : f32 to vector<1x648xf32>
    %119 = arith.subf %118, %117 : vector<1x648xf32>
    %120 = math.exp %119 : vector<1x648xf32>
    %121 = math.log1p %120 : vector<1x648xf32>
    %122 = arith.addf %116, %121 : vector<1x648xf32>
    %123 = arith.mulf %122, %0 : vector<1x648xf32>
    %124 = vector.shape_cast %123 : vector<1x648xf32> to vector<1x1x648xf32>
    %cst_37 = arith.constant dense<0.000000e+00> : vector<1xf32>
    %125 = vector.multi_reduction <add>, %124, %cst_37 [1, 2] : vector<1x1x648xf32> to vector<1xf32>
    %126 = vector.shape_cast %125 : vector<1xf32> to vector<1x1x1xf32>
    %127 = vector.extract %126[0, 0, 0] : f32 from vector<1x1x1xf32>
    %cst_38 = arith.constant 0.001953125 : f32
    %128 = arith.mulf %127, %cst_38 : f32
    %c0_39 = arith.constant 0 : index
    %c0_40 = arith.constant 0 : index
    %129 = memref.load %arg7[%c0_39, %c0_40] : memref<1x1xf32, #tpu.memory_space<smem>>
    memref.store %128, %arg7[%c0_39, %c0_40] : memref<1x1xf32, #tpu.memory_space<smem>>
    return
  }
  func.func @transform_0(%arg0: i32) -> (i32, i32) {
    %c0_i32 = arith.constant 0 : i32
    %c0_i32_0 = arith.constant 0 : i32
    %c0_i32_1 = arith.constant 0 : i32
    return %c0_i32, %c0_i32_0 : i32, i32
  }
  func.func @transform_1(%arg0: i32) -> (i32, i32, i32) {
    %c0_i32 = arith.constant 0 : i32
    %c0_i32_0 = arith.constant 0 : i32
    %c0_i32_1 = arith.constant 0 : i32
    %c0_i32_2 = arith.constant 0 : i32
    return %c0_i32, %c0_i32_0, %c0_i32_1 : i32, i32, i32
  }
  func.func @transform_2(%arg0: i32) -> (i32, i32) {
    %c0_i32 = arith.constant 0 : i32
    %c0_i32_0 = arith.constant 0 : i32
    %c0_i32_1 = arith.constant 0 : i32
    return %c0_i32, %c0_i32_0 : i32, i32
  }
  func.func @transform_3(%arg0: i32) -> (i32, i32, i32) {
    %c0_i32 = arith.constant 0 : i32
    %c0_i32_0 = arith.constant 0 : i32
    %c0_i32_1 = arith.constant 0 : i32
    %c0_i32_2 = arith.constant 0 : i32
    return %c0_i32, %c0_i32_0, %c0_i32_1 : i32, i32, i32
  }
  func.func @transform_4(%arg0: i32) -> (i32, i32) {
    %c0_i32 = arith.constant 0 : i32
    %c0_i32_0 = arith.constant 0 : i32
    %c0_i32_1 = arith.constant 0 : i32
    return %c0_i32, %c0_i32_0 : i32, i32
  }
  func.func @transform_5(%arg0: i32) -> (i32, i32) {
    %c0_i32 = arith.constant 0 : i32
    %c0_i32_0 = arith.constant 0 : i32
    %c0_i32_1 = arith.constant 0 : i32
    return %c0_i32, %c0_i32_0 : i32, i32
  }
  func.func @transform_6(%arg0: i32) -> (i32, i32) {
    %c0_i32 = arith.constant 0 : i32
    %c0_i32_0 = arith.constant 0 : i32
    %c0_i32_1 = arith.constant 0 : i32
    return %c0_i32, %c0_i32_0 : i32, i32
  }
}

module attributes {stable_mosaic.version = 11 : i64} {
  func.func @_vgg_img_mse_kernel(%arg0: i32, %arg1: memref<8x686xbf16, #tpu.memory_space<vmem>>, %arg2: memref<8x686xbf16, #tpu.memory_space<vmem>>, %arg3: memref<9x16x8xbf16, #tpu.memory_space<vmem>>, %arg4: memref<16x1xf32, #tpu.memory_space<vmem>>, %arg5: memref<9x16x16xbf16, #tpu.memory_space<vmem>>, %arg6: memref<16x1xf32, #tpu.memory_space<vmem>>, %arg7: memref<1x648xf32, #tpu.memory_space<vmem>>, %arg8: memref<1x1xf32, #tpu.memory_space<smem>>, %arg9: memref<1x1xf32, #tpu.memory_space<smem>>) attributes {dimension_semantics = [#tpu.dimension_semantics<arbitrary>], iteration_bounds = array<i64: 1>, scalar_prefetch = 0 : i64, scratch_operands = 0 : i64, tpu.core_type = #tpu.core_type<tc>, window_params = [{pipeline_mode = #tpu.pipeline_mode<synchronous>, transform_indices = @transform_0, window_bounds = array<i64: 8, 686>}, {pipeline_mode = #tpu.pipeline_mode<synchronous>, transform_indices = @transform_1, window_bounds = array<i64: 8, 686>}, {pipeline_mode = #tpu.pipeline_mode<synchronous>, transform_indices = @transform_2, window_bounds = array<i64: 9, 16, 8>}, {pipeline_mode = #tpu.pipeline_mode<synchronous>, transform_indices = @transform_3, window_bounds = array<i64: 16, 1>}, {pipeline_mode = #tpu.pipeline_mode<synchronous>, transform_indices = @transform_4, window_bounds = array<i64: 9, 16, 16>}, {pipeline_mode = #tpu.pipeline_mode<synchronous>, transform_indices = @transform_5, window_bounds = array<i64: 16, 1>}, {pipeline_mode = #tpu.pipeline_mode<synchronous>, transform_indices = @transform_6, window_bounds = array<i64: 1, 648>}, {transform_indices = @transform_7, window_bounds = array<i64: 1, 1>}, {transform_indices = @transform_8, window_bounds = array<i64: 1, 1>}]} {
    %c0 = arith.constant 0 : index
    %c0_0 = arith.constant 0 : index
    %0 = vector.load %arg7[%c0, %c0_0] : memref<1x648xf32, #tpu.memory_space<vmem>>, vector<1x648xf32>
    %c0_1 = arith.constant 0 : index
    %c0_2 = arith.constant 0 : index
    %1 = vector.load %arg1[%c0_1, %c0_2] : memref<8x686xbf16, #tpu.memory_space<vmem>>, vector<8x686xbf16>
    %c0_3 = arith.constant 0 : index
    %c0_4 = arith.constant 0 : index
    %2 = vector.load %arg2[%c0_3, %c0_4] : memref<8x686xbf16, #tpu.memory_space<vmem>>, vector<8x686xbf16>
    %c0_5 = arith.constant 0 : index
    %c0_6 = arith.constant 0 : index
    %c0_7 = arith.constant 0 : index
    %3 = vector.load %arg3[%c0_5, %c0_6, %c0_7] : memref<9x16x8xbf16, #tpu.memory_space<vmem>>, vector<9x16x8xbf16>
    %c0_8 = arith.constant 0 : index
    %c0_9 = arith.constant 0 : index
    %4 = vector.load %arg4[%c0_8, %c0_9] : memref<16x1xf32, #tpu.memory_space<vmem>>, vector<16x1xf32>
    %cst = arith.constant 0.000000e+00 : f32
    %5 = vector.broadcast %cst : f32 to vector<16x648xf32>
    %6 = vector.extract_strided_slice %1 {offsets = [0, 0], sizes = [8, 648], strides = [1, 1]} : vector<8x686xbf16> to vector<8x648xbf16>
    %7 = vector.extract_strided_slice %3 {offsets = [0, 0, 0], sizes = [1, 16, 8], strides = [1, 1, 1]} : vector<9x16x8xbf16> to vector<1x16x8xbf16>
    %8 = vector.shape_cast %7 : vector<1x16x8xbf16> to vector<16x8xbf16>
    %cst_10 = arith.constant dense<0.000000e+00> : vector<16x648xf32>
    %9 = tpu.matmul %8, %6, %cst_10 {dimension_numbers = #tpu.dot_dimension_numbers<[1], [0], [0], [1], [0, 0, 1, 1], [], []>} : vector<16x8xbf16>, vector<8x648xbf16>, vector<16x648xf32> -> vector<16x648xf32>
    %10 = arith.addf %5, %9 : vector<16x648xf32>
    %11 = vector.extract_strided_slice %1 {offsets = [0, 1], sizes = [8, 648], strides = [1, 1]} : vector<8x686xbf16> to vector<8x648xbf16>
    %12 = vector.extract_strided_slice %3 {offsets = [1, 0, 0], sizes = [1, 16, 8], strides = [1, 1, 1]} : vector<9x16x8xbf16> to vector<1x16x8xbf16>
    %13 = vector.shape_cast %12 : vector<1x16x8xbf16> to vector<16x8xbf16>
    %cst_11 = arith.constant dense<0.000000e+00> : vector<16x648xf32>
    %14 = tpu.matmul %13, %11, %cst_11 {dimension_numbers = #tpu.dot_dimension_numbers<[1], [0], [0], [1], [0, 0, 1, 1], [], []>} : vector<16x8xbf16>, vector<8x648xbf16>, vector<16x648xf32> -> vector<16x648xf32>
    %15 = arith.addf %10, %14 : vector<16x648xf32>
    %16 = vector.extract_strided_slice %1 {offsets = [0, 2], sizes = [8, 648], strides = [1, 1]} : vector<8x686xbf16> to vector<8x648xbf16>
    %17 = vector.extract_strided_slice %3 {offsets = [2, 0, 0], sizes = [1, 16, 8], strides = [1, 1, 1]} : vector<9x16x8xbf16> to vector<1x16x8xbf16>
    %18 = vector.shape_cast %17 : vector<1x16x8xbf16> to vector<16x8xbf16>
    %cst_12 = arith.constant dense<0.000000e+00> : vector<16x648xf32>
    %19 = tpu.matmul %18, %16, %cst_12 {dimension_numbers = #tpu.dot_dimension_numbers<[1], [0], [0], [1], [0, 0, 1, 1], [], []>} : vector<16x8xbf16>, vector<8x648xbf16>, vector<16x648xf32> -> vector<16x648xf32>
    %20 = arith.addf %15, %19 : vector<16x648xf32>
    %21 = vector.extract_strided_slice %1 {offsets = [0, 18], sizes = [8, 648], strides = [1, 1]} : vector<8x686xbf16> to vector<8x648xbf16>
    %22 = vector.extract_strided_slice %3 {offsets = [3, 0, 0], sizes = [1, 16, 8], strides = [1, 1, 1]} : vector<9x16x8xbf16> to vector<1x16x8xbf16>
    %23 = vector.shape_cast %22 : vector<1x16x8xbf16> to vector<16x8xbf16>
    %cst_13 = arith.constant dense<0.000000e+00> : vector<16x648xf32>
    %24 = tpu.matmul %23, %21, %cst_13 {dimension_numbers = #tpu.dot_dimension_numbers<[1], [0], [0], [1], [0, 0, 1, 1], [], []>} : vector<16x8xbf16>, vector<8x648xbf16>, vector<16x648xf32> -> vector<16x648xf32>
    %25 = arith.addf %20, %24 : vector<16x648xf32>
    %26 = vector.extract_strided_slice %1 {offsets = [0, 19], sizes = [8, 648], strides = [1, 1]} : vector<8x686xbf16> to vector<8x648xbf16>
    %27 = vector.extract_strided_slice %3 {offsets = [4, 0, 0], sizes = [1, 16, 8], strides = [1, 1, 1]} : vector<9x16x8xbf16> to vector<1x16x8xbf16>
    %28 = vector.shape_cast %27 : vector<1x16x8xbf16> to vector<16x8xbf16>
    %cst_14 = arith.constant dense<0.000000e+00> : vector<16x648xf32>
    %29 = tpu.matmul %28, %26, %cst_14 {dimension_numbers = #tpu.dot_dimension_numbers<[1], [0], [0], [1], [0, 0, 1, 1], [], []>} : vector<16x8xbf16>, vector<8x648xbf16>, vector<16x648xf32> -> vector<16x648xf32>
    %30 = arith.addf %25, %29 : vector<16x648xf32>
    %31 = vector.extract_strided_slice %1 {offsets = [0, 20], sizes = [8, 648], strides = [1, 1]} : vector<8x686xbf16> to vector<8x648xbf16>
    %32 = vector.extract_strided_slice %3 {offsets = [5, 0, 0], sizes = [1, 16, 8], strides = [1, 1, 1]} : vector<9x16x8xbf16> to vector<1x16x8xbf16>
    %33 = vector.shape_cast %32 : vector<1x16x8xbf16> to vector<16x8xbf16>
    %cst_15 = arith.constant dense<0.000000e+00> : vector<16x648xf32>
    %34 = tpu.matmul %33, %31, %cst_15 {dimension_numbers = #tpu.dot_dimension_numbers<[1], [0], [0], [1], [0, 0, 1, 1], [], []>} : vector<16x8xbf16>, vector<8x648xbf16>, vector<16x648xf32> -> vector<16x648xf32>
    %35 = arith.addf %30, %34 : vector<16x648xf32>
    %36 = vector.extract_strided_slice %1 {offsets = [0, 36], sizes = [8, 648], strides = [1, 1]} : vector<8x686xbf16> to vector<8x648xbf16>
    %37 = vector.extract_strided_slice %3 {offsets = [6, 0, 0], sizes = [1, 16, 8], strides = [1, 1, 1]} : vector<9x16x8xbf16> to vector<1x16x8xbf16>
    %38 = vector.shape_cast %37 : vector<1x16x8xbf16> to vector<16x8xbf16>
    %cst_16 = arith.constant dense<0.000000e+00> : vector<16x648xf32>
    %39 = tpu.matmul %38, %36, %cst_16 {dimension_numbers = #tpu.dot_dimension_numbers<[1], [0], [0], [1], [0, 0, 1, 1], [], []>} : vector<16x8xbf16>, vector<8x648xbf16>, vector<16x648xf32> -> vector<16x648xf32>
    %40 = arith.addf %35, %39 : vector<16x648xf32>
    %41 = vector.extract_strided_slice %1 {offsets = [0, 37], sizes = [8, 648], strides = [1, 1]} : vector<8x686xbf16> to vector<8x648xbf16>
    %42 = vector.extract_strided_slice %3 {offsets = [7, 0, 0], sizes = [1, 16, 8], strides = [1, 1, 1]} : vector<9x16x8xbf16> to vector<1x16x8xbf16>
    %43 = vector.shape_cast %42 : vector<1x16x8xbf16> to vector<16x8xbf16>
    %cst_17 = arith.constant dense<0.000000e+00> : vector<16x648xf32>
    %44 = tpu.matmul %43, %41, %cst_17 {dimension_numbers = #tpu.dot_dimension_numbers<[1], [0], [0], [1], [0, 0, 1, 1], [], []>} : vector<16x8xbf16>, vector<8x648xbf16>, vector<16x648xf32> -> vector<16x648xf32>
    %45 = arith.addf %40, %44 : vector<16x648xf32>
    %46 = vector.extract_strided_slice %1 {offsets = [0, 38], sizes = [8, 648], strides = [1, 1]} : vector<8x686xbf16> to vector<8x648xbf16>
    %47 = vector.extract_strided_slice %3 {offsets = [8, 0, 0], sizes = [1, 16, 8], strides = [1, 1, 1]} : vector<9x16x8xbf16> to vector<1x16x8xbf16>
    %48 = vector.shape_cast %47 : vector<1x16x8xbf16> to vector<16x8xbf16>
    %cst_18 = arith.constant dense<0.000000e+00> : vector<16x648xf32>
    %49 = tpu.matmul %48, %46, %cst_18 {dimension_numbers = #tpu.dot_dimension_numbers<[1], [0], [0], [1], [0, 0, 1, 1], [], []>} : vector<16x8xbf16>, vector<8x648xbf16>, vector<16x648xf32> -> vector<16x648xf32>
    %50 = arith.addf %45, %49 : vector<16x648xf32>
    %51 = vector.broadcast %4 : vector<16x1xf32> to vector<16x648xf32>
    %52 = arith.addf %50, %51 : vector<16x648xf32>
    %cst_19 = arith.constant 0.000000e+00 : f32
    %53 = vector.broadcast %cst_19 : f32 to vector<16x648xf32>
    %54 = arith.maximumf %52, %53 : vector<16x648xf32>
    %55 = vector.broadcast %0 : vector<1x648xf32> to vector<16x648xf32>
    %56 = arith.mulf %54, %55 : vector<16x648xf32>
    %57 = arith.truncf %56 : vector<16x648xf32> to vector<16x648xbf16>
    %cst_20 = arith.constant 0.000000e+00 : bf16
    %58 = vector.broadcast %cst_20 : bf16 to vector<16x19xbf16>
    %59 = tpu.concatenate %58, %57, %58 in 1 : vector<16x19xbf16>, vector<16x648xbf16>, vector<16x19xbf16> -> vector<16x686xbf16>
    %c0_21 = arith.constant 0 : index
    %c0_22 = arith.constant 0 : index
    %c0_23 = arith.constant 0 : index
    %60 = vector.load %arg5[%c0_21, %c0_22, %c0_23] : memref<9x16x16xbf16, #tpu.memory_space<vmem>>, vector<9x16x16xbf16>
    %c0_24 = arith.constant 0 : index
    %c0_25 = arith.constant 0 : index
    %61 = vector.load %arg6[%c0_24, %c0_25] : memref<16x1xf32, #tpu.memory_space<vmem>>, vector<16x1xf32>
    %cst_26 = arith.constant 0.000000e+00 : f32
    %62 = vector.broadcast %cst_26 : f32 to vector<16x648xf32>
    %63 = vector.extract_strided_slice %59 {offsets = [0, 0], sizes = [16, 648], strides = [1, 1]} : vector<16x686xbf16> to vector<16x648xbf16>
    %64 = vector.extract_strided_slice %60 {offsets = [0, 0, 0], sizes = [1, 16, 16], strides = [1, 1, 1]} : vector<9x16x16xbf16> to vector<1x16x16xbf16>
    %65 = vector.shape_cast %64 : vector<1x16x16xbf16> to vector<16x16xbf16>
    %cst_27 = arith.constant dense<0.000000e+00> : vector<16x648xf32>
    %66 = tpu.matmul %65, %63, %cst_27 {dimension_numbers = #tpu.dot_dimension_numbers<[1], [0], [0], [1], [0, 0, 1, 1], [], []>} : vector<16x16xbf16>, vector<16x648xbf16>, vector<16x648xf32> -> vector<16x648xf32>
    %67 = arith.addf %62, %66 : vector<16x648xf32>
    %68 = vector.extract_strided_slice %59 {offsets = [0, 1], sizes = [16, 648], strides = [1, 1]} : vector<16x686xbf16> to vector<16x648xbf16>
    %69 = vector.extract_strided_slice %60 {offsets = [1, 0, 0], sizes = [1, 16, 16], strides = [1, 1, 1]} : vector<9x16x16xbf16> to vector<1x16x16xbf16>
    %70 = vector.shape_cast %69 : vector<1x16x16xbf16> to vector<16x16xbf16>
    %cst_28 = arith.constant dense<0.000000e+00> : vector<16x648xf32>
    %71 = tpu.matmul %70, %68, %cst_28 {dimension_numbers = #tpu.dot_dimension_numbers<[1], [0], [0], [1], [0, 0, 1, 1], [], []>} : vector<16x16xbf16>, vector<16x648xbf16>, vector<16x648xf32> -> vector<16x648xf32>
    %72 = arith.addf %67, %71 : vector<16x648xf32>
    %73 = vector.extract_strided_slice %59 {offsets = [0, 2], sizes = [16, 648], strides = [1, 1]} : vector<16x686xbf16> to vector<16x648xbf16>
    %74 = vector.extract_strided_slice %60 {offsets = [2, 0, 0], sizes = [1, 16, 16], strides = [1, 1, 1]} : vector<9x16x16xbf16> to vector<1x16x16xbf16>
    %75 = vector.shape_cast %74 : vector<1x16x16xbf16> to vector<16x16xbf16>
    %cst_29 = arith.constant dense<0.000000e+00> : vector<16x648xf32>
    %76 = tpu.matmul %75, %73, %cst_29 {dimension_numbers = #tpu.dot_dimension_numbers<[1], [0], [0], [1], [0, 0, 1, 1], [], []>} : vector<16x16xbf16>, vector<16x648xbf16>, vector<16x648xf32> -> vector<16x648xf32>
    %77 = arith.addf %72, %76 : vector<16x648xf32>
    %78 = vector.extract_strided_slice %59 {offsets = [0, 18], sizes = [16, 648], strides = [1, 1]} : vector<16x686xbf16> to vector<16x648xbf16>
    %79 = vector.extract_strided_slice %60 {offsets = [3, 0, 0], sizes = [1, 16, 16], strides = [1, 1, 1]} : vector<9x16x16xbf16> to vector<1x16x16xbf16>
    %80 = vector.shape_cast %79 : vector<1x16x16xbf16> to vector<16x16xbf16>
    %cst_30 = arith.constant dense<0.000000e+00> : vector<16x648xf32>
    %81 = tpu.matmul %80, %78, %cst_30 {dimension_numbers = #tpu.dot_dimension_numbers<[1], [0], [0], [1], [0, 0, 1, 1], [], []>} : vector<16x16xbf16>, vector<16x648xbf16>, vector<16x648xf32> -> vector<16x648xf32>
    %82 = arith.addf %77, %81 : vector<16x648xf32>
    %83 = vector.extract_strided_slice %59 {offsets = [0, 19], sizes = [16, 648], strides = [1, 1]} : vector<16x686xbf16> to vector<16x648xbf16>
    %84 = vector.extract_strided_slice %60 {offsets = [4, 0, 0], sizes = [1, 16, 16], strides = [1, 1, 1]} : vector<9x16x16xbf16> to vector<1x16x16xbf16>
    %85 = vector.shape_cast %84 : vector<1x16x16xbf16> to vector<16x16xbf16>
    %cst_31 = arith.constant dense<0.000000e+00> : vector<16x648xf32>
    %86 = tpu.matmul %85, %83, %cst_31 {dimension_numbers = #tpu.dot_dimension_numbers<[1], [0], [0], [1], [0, 0, 1, 1], [], []>} : vector<16x16xbf16>, vector<16x648xbf16>, vector<16x648xf32> -> vector<16x648xf32>
    %87 = arith.addf %82, %86 : vector<16x648xf32>
    %88 = vector.extract_strided_slice %59 {offsets = [0, 20], sizes = [16, 648], strides = [1, 1]} : vector<16x686xbf16> to vector<16x648xbf16>
    %89 = vector.extract_strided_slice %60 {offsets = [5, 0, 0], sizes = [1, 16, 16], strides = [1, 1, 1]} : vector<9x16x16xbf16> to vector<1x16x16xbf16>
    %90 = vector.shape_cast %89 : vector<1x16x16xbf16> to vector<16x16xbf16>
    %cst_32 = arith.constant dense<0.000000e+00> : vector<16x648xf32>
    %91 = tpu.matmul %90, %88, %cst_32 {dimension_numbers = #tpu.dot_dimension_numbers<[1], [0], [0], [1], [0, 0, 1, 1], [], []>} : vector<16x16xbf16>, vector<16x648xbf16>, vector<16x648xf32> -> vector<16x648xf32>
    %92 = arith.addf %87, %91 : vector<16x648xf32>
    %93 = vector.extract_strided_slice %59 {offsets = [0, 36], sizes = [16, 648], strides = [1, 1]} : vector<16x686xbf16> to vector<16x648xbf16>
    %94 = vector.extract_strided_slice %60 {offsets = [6, 0, 0], sizes = [1, 16, 16], strides = [1, 1, 1]} : vector<9x16x16xbf16> to vector<1x16x16xbf16>
    %95 = vector.shape_cast %94 : vector<1x16x16xbf16> to vector<16x16xbf16>
    %cst_33 = arith.constant dense<0.000000e+00> : vector<16x648xf32>
    %96 = tpu.matmul %95, %93, %cst_33 {dimension_numbers = #tpu.dot_dimension_numbers<[1], [0], [0], [1], [0, 0, 1, 1], [], []>} : vector<16x16xbf16>, vector<16x648xbf16>, vector<16x648xf32> -> vector<16x648xf32>
    %97 = arith.addf %92, %96 : vector<16x648xf32>
    %98 = vector.extract_strided_slice %59 {offsets = [0, 37], sizes = [16, 648], strides = [1, 1]} : vector<16x686xbf16> to vector<16x648xbf16>
    %99 = vector.extract_strided_slice %60 {offsets = [7, 0, 0], sizes = [1, 16, 16], strides = [1, 1, 1]} : vector<9x16x16xbf16> to vector<1x16x16xbf16>
    %100 = vector.shape_cast %99 : vector<1x16x16xbf16> to vector<16x16xbf16>
    %cst_34 = arith.constant dense<0.000000e+00> : vector<16x648xf32>
    %101 = tpu.matmul %100, %98, %cst_34 {dimension_numbers = #tpu.dot_dimension_numbers<[1], [0], [0], [1], [0, 0, 1, 1], [], []>} : vector<16x16xbf16>, vector<16x648xbf16>, vector<16x648xf32> -> vector<16x648xf32>
    %102 = arith.addf %97, %101 : vector<16x648xf32>
    %103 = vector.extract_strided_slice %59 {offsets = [0, 38], sizes = [16, 648], strides = [1, 1]} : vector<16x686xbf16> to vector<16x648xbf16>
    %104 = vector.extract_strided_slice %60 {offsets = [8, 0, 0], sizes = [1, 16, 16], strides = [1, 1, 1]} : vector<9x16x16xbf16> to vector<1x16x16xbf16>
    %105 = vector.shape_cast %104 : vector<1x16x16xbf16> to vector<16x16xbf16>
    %cst_35 = arith.constant dense<0.000000e+00> : vector<16x648xf32>
    %106 = tpu.matmul %105, %103, %cst_35 {dimension_numbers = #tpu.dot_dimension_numbers<[1], [0], [0], [1], [0, 0, 1, 1], [], []>} : vector<16x16xbf16>, vector<16x648xbf16>, vector<16x648xf32> -> vector<16x648xf32>
    %107 = arith.addf %102, %106 : vector<16x648xf32>
    %108 = vector.broadcast %61 : vector<16x1xf32> to vector<16x648xf32>
    %109 = arith.addf %107, %108 : vector<16x648xf32>
    %cst_36 = arith.constant 0.000000e+00 : f32
    %110 = vector.broadcast %cst_36 : f32 to vector<16x648xf32>
    %111 = arith.maximumf %109, %110 : vector<16x648xf32>
    %112 = vector.broadcast %0 : vector<1x648xf32> to vector<16x648xf32>
    %113 = arith.mulf %111, %112 : vector<16x648xf32>
    %c0_37 = arith.constant 0 : index
    %c0_38 = arith.constant 0 : index
    %c0_39 = arith.constant 0 : index
    %114 = vector.load %arg3[%c0_37, %c0_38, %c0_39] : memref<9x16x8xbf16, #tpu.memory_space<vmem>>, vector<9x16x8xbf16>
    %c0_40 = arith.constant 0 : index
    %c0_41 = arith.constant 0 : index
    %115 = vector.load %arg4[%c0_40, %c0_41] : memref<16x1xf32, #tpu.memory_space<vmem>>, vector<16x1xf32>
    %cst_42 = arith.constant 0.000000e+00 : f32
    %116 = vector.broadcast %cst_42 : f32 to vector<16x648xf32>
    %117 = vector.extract_strided_slice %2 {offsets = [0, 0], sizes = [8, 648], strides = [1, 1]} : vector<8x686xbf16> to vector<8x648xbf16>
    %118 = vector.extract_strided_slice %114 {offsets = [0, 0, 0], sizes = [1, 16, 8], strides = [1, 1, 1]} : vector<9x16x8xbf16> to vector<1x16x8xbf16>
    %119 = vector.shape_cast %118 : vector<1x16x8xbf16> to vector<16x8xbf16>
    %cst_43 = arith.constant dense<0.000000e+00> : vector<16x648xf32>
    %120 = tpu.matmul %119, %117, %cst_43 {dimension_numbers = #tpu.dot_dimension_numbers<[1], [0], [0], [1], [0, 0, 1, 1], [], []>} : vector<16x8xbf16>, vector<8x648xbf16>, vector<16x648xf32> -> vector<16x648xf32>
    %121 = arith.addf %116, %120 : vector<16x648xf32>
    %122 = vector.extract_strided_slice %2 {offsets = [0, 1], sizes = [8, 648], strides = [1, 1]} : vector<8x686xbf16> to vector<8x648xbf16>
    %123 = vector.extract_strided_slice %114 {offsets = [1, 0, 0], sizes = [1, 16, 8], strides = [1, 1, 1]} : vector<9x16x8xbf16> to vector<1x16x8xbf16>
    %124 = vector.shape_cast %123 : vector<1x16x8xbf16> to vector<16x8xbf16>
    %cst_44 = arith.constant dense<0.000000e+00> : vector<16x648xf32>
    %125 = tpu.matmul %124, %122, %cst_44 {dimension_numbers = #tpu.dot_dimension_numbers<[1], [0], [0], [1], [0, 0, 1, 1], [], []>} : vector<16x8xbf16>, vector<8x648xbf16>, vector<16x648xf32> -> vector<16x648xf32>
    %126 = arith.addf %121, %125 : vector<16x648xf32>
    %127 = vector.extract_strided_slice %2 {offsets = [0, 2], sizes = [8, 648], strides = [1, 1]} : vector<8x686xbf16> to vector<8x648xbf16>
    %128 = vector.extract_strided_slice %114 {offsets = [2, 0, 0], sizes = [1, 16, 8], strides = [1, 1, 1]} : vector<9x16x8xbf16> to vector<1x16x8xbf16>
    %129 = vector.shape_cast %128 : vector<1x16x8xbf16> to vector<16x8xbf16>
    %cst_45 = arith.constant dense<0.000000e+00> : vector<16x648xf32>
    %130 = tpu.matmul %129, %127, %cst_45 {dimension_numbers = #tpu.dot_dimension_numbers<[1], [0], [0], [1], [0, 0, 1, 1], [], []>} : vector<16x8xbf16>, vector<8x648xbf16>, vector<16x648xf32> -> vector<16x648xf32>
    %131 = arith.addf %126, %130 : vector<16x648xf32>
    %132 = vector.extract_strided_slice %2 {offsets = [0, 18], sizes = [8, 648], strides = [1, 1]} : vector<8x686xbf16> to vector<8x648xbf16>
    %133 = vector.extract_strided_slice %114 {offsets = [3, 0, 0], sizes = [1, 16, 8], strides = [1, 1, 1]} : vector<9x16x8xbf16> to vector<1x16x8xbf16>
    %134 = vector.shape_cast %133 : vector<1x16x8xbf16> to vector<16x8xbf16>
    %cst_46 = arith.constant dense<0.000000e+00> : vector<16x648xf32>
    %135 = tpu.matmul %134, %132, %cst_46 {dimension_numbers = #tpu.dot_dimension_numbers<[1], [0], [0], [1], [0, 0, 1, 1], [], []>} : vector<16x8xbf16>, vector<8x648xbf16>, vector<16x648xf32> -> vector<16x648xf32>
    %136 = arith.addf %131, %135 : vector<16x648xf32>
    %137 = vector.extract_strided_slice %2 {offsets = [0, 19], sizes = [8, 648], strides = [1, 1]} : vector<8x686xbf16> to vector<8x648xbf16>
    %138 = vector.extract_strided_slice %114 {offsets = [4, 0, 0], sizes = [1, 16, 8], strides = [1, 1, 1]} : vector<9x16x8xbf16> to vector<1x16x8xbf16>
    %139 = vector.shape_cast %138 : vector<1x16x8xbf16> to vector<16x8xbf16>
    %cst_47 = arith.constant dense<0.000000e+00> : vector<16x648xf32>
    %140 = tpu.matmul %139, %137, %cst_47 {dimension_numbers = #tpu.dot_dimension_numbers<[1], [0], [0], [1], [0, 0, 1, 1], [], []>} : vector<16x8xbf16>, vector<8x648xbf16>, vector<16x648xf32> -> vector<16x648xf32>
    %141 = arith.addf %136, %140 : vector<16x648xf32>
    %142 = vector.extract_strided_slice %2 {offsets = [0, 20], sizes = [8, 648], strides = [1, 1]} : vector<8x686xbf16> to vector<8x648xbf16>
    %143 = vector.extract_strided_slice %114 {offsets = [5, 0, 0], sizes = [1, 16, 8], strides = [1, 1, 1]} : vector<9x16x8xbf16> to vector<1x16x8xbf16>
    %144 = vector.shape_cast %143 : vector<1x16x8xbf16> to vector<16x8xbf16>
    %cst_48 = arith.constant dense<0.000000e+00> : vector<16x648xf32>
    %145 = tpu.matmul %144, %142, %cst_48 {dimension_numbers = #tpu.dot_dimension_numbers<[1], [0], [0], [1], [0, 0, 1, 1], [], []>} : vector<16x8xbf16>, vector<8x648xbf16>, vector<16x648xf32> -> vector<16x648xf32>
    %146 = arith.addf %141, %145 : vector<16x648xf32>
    %147 = vector.extract_strided_slice %2 {offsets = [0, 36], sizes = [8, 648], strides = [1, 1]} : vector<8x686xbf16> to vector<8x648xbf16>
    %148 = vector.extract_strided_slice %114 {offsets = [6, 0, 0], sizes = [1, 16, 8], strides = [1, 1, 1]} : vector<9x16x8xbf16> to vector<1x16x8xbf16>
    %149 = vector.shape_cast %148 : vector<1x16x8xbf16> to vector<16x8xbf16>
    %cst_49 = arith.constant dense<0.000000e+00> : vector<16x648xf32>
    %150 = tpu.matmul %149, %147, %cst_49 {dimension_numbers = #tpu.dot_dimension_numbers<[1], [0], [0], [1], [0, 0, 1, 1], [], []>} : vector<16x8xbf16>, vector<8x648xbf16>, vector<16x648xf32> -> vector<16x648xf32>
    %151 = arith.addf %146, %150 : vector<16x648xf32>
    %152 = vector.extract_strided_slice %2 {offsets = [0, 37], sizes = [8, 648], strides = [1, 1]} : vector<8x686xbf16> to vector<8x648xbf16>
    %153 = vector.extract_strided_slice %114 {offsets = [7, 0, 0], sizes = [1, 16, 8], strides = [1, 1, 1]} : vector<9x16x8xbf16> to vector<1x16x8xbf16>
    %154 = vector.shape_cast %153 : vector<1x16x8xbf16> to vector<16x8xbf16>
    %cst_50 = arith.constant dense<0.000000e+00> : vector<16x648xf32>
    %155 = tpu.matmul %154, %152, %cst_50 {dimension_numbers = #tpu.dot_dimension_numbers<[1], [0], [0], [1], [0, 0, 1, 1], [], []>} : vector<16x8xbf16>, vector<8x648xbf16>, vector<16x648xf32> -> vector<16x648xf32>
    %156 = arith.addf %151, %155 : vector<16x648xf32>
    %157 = vector.extract_strided_slice %2 {offsets = [0, 38], sizes = [8, 648], strides = [1, 1]} : vector<8x686xbf16> to vector<8x648xbf16>
    %158 = vector.extract_strided_slice %114 {offsets = [8, 0, 0], sizes = [1, 16, 8], strides = [1, 1, 1]} : vector<9x16x8xbf16> to vector<1x16x8xbf16>
    %159 = vector.shape_cast %158 : vector<1x16x8xbf16> to vector<16x8xbf16>
    %cst_51 = arith.constant dense<0.000000e+00> : vector<16x648xf32>
    %160 = tpu.matmul %159, %157, %cst_51 {dimension_numbers = #tpu.dot_dimension_numbers<[1], [0], [0], [1], [0, 0, 1, 1], [], []>} : vector<16x8xbf16>, vector<8x648xbf16>, vector<16x648xf32> -> vector<16x648xf32>
    %161 = arith.addf %156, %160 : vector<16x648xf32>
    %162 = vector.broadcast %115 : vector<16x1xf32> to vector<16x648xf32>
    %163 = arith.addf %161, %162 : vector<16x648xf32>
    %cst_52 = arith.constant 0.000000e+00 : f32
    %164 = vector.broadcast %cst_52 : f32 to vector<16x648xf32>
    %165 = arith.maximumf %163, %164 : vector<16x648xf32>
    %166 = vector.broadcast %0 : vector<1x648xf32> to vector<16x648xf32>
    %167 = arith.mulf %165, %166 : vector<16x648xf32>
    %168 = arith.truncf %167 : vector<16x648xf32> to vector<16x648xbf16>
    %cst_53 = arith.constant 0.000000e+00 : bf16
    %169 = vector.broadcast %cst_53 : bf16 to vector<16x19xbf16>
    %170 = tpu.concatenate %169, %168, %169 in 1 : vector<16x19xbf16>, vector<16x648xbf16>, vector<16x19xbf16> -> vector<16x686xbf16>
    %c0_54 = arith.constant 0 : index
    %c0_55 = arith.constant 0 : index
    %c0_56 = arith.constant 0 : index
    %171 = vector.load %arg5[%c0_54, %c0_55, %c0_56] : memref<9x16x16xbf16, #tpu.memory_space<vmem>>, vector<9x16x16xbf16>
    %c0_57 = arith.constant 0 : index
    %c0_58 = arith.constant 0 : index
    %172 = vector.load %arg6[%c0_57, %c0_58] : memref<16x1xf32, #tpu.memory_space<vmem>>, vector<16x1xf32>
    %cst_59 = arith.constant 0.000000e+00 : f32
    %173 = vector.broadcast %cst_59 : f32 to vector<16x648xf32>
    %174 = vector.extract_strided_slice %170 {offsets = [0, 0], sizes = [16, 648], strides = [1, 1]} : vector<16x686xbf16> to vector<16x648xbf16>
    %175 = vector.extract_strided_slice %171 {offsets = [0, 0, 0], sizes = [1, 16, 16], strides = [1, 1, 1]} : vector<9x16x16xbf16> to vector<1x16x16xbf16>
    %176 = vector.shape_cast %175 : vector<1x16x16xbf16> to vector<16x16xbf16>
    %cst_60 = arith.constant dense<0.000000e+00> : vector<16x648xf32>
    %177 = tpu.matmul %176, %174, %cst_60 {dimension_numbers = #tpu.dot_dimension_numbers<[1], [0], [0], [1], [0, 0, 1, 1], [], []>} : vector<16x16xbf16>, vector<16x648xbf16>, vector<16x648xf32> -> vector<16x648xf32>
    %178 = arith.addf %173, %177 : vector<16x648xf32>
    %179 = vector.extract_strided_slice %170 {offsets = [0, 1], sizes = [16, 648], strides = [1, 1]} : vector<16x686xbf16> to vector<16x648xbf16>
    %180 = vector.extract_strided_slice %171 {offsets = [1, 0, 0], sizes = [1, 16, 16], strides = [1, 1, 1]} : vector<9x16x16xbf16> to vector<1x16x16xbf16>
    %181 = vector.shape_cast %180 : vector<1x16x16xbf16> to vector<16x16xbf16>
    %cst_61 = arith.constant dense<0.000000e+00> : vector<16x648xf32>
    %182 = tpu.matmul %181, %179, %cst_61 {dimension_numbers = #tpu.dot_dimension_numbers<[1], [0], [0], [1], [0, 0, 1, 1], [], []>} : vector<16x16xbf16>, vector<16x648xbf16>, vector<16x648xf32> -> vector<16x648xf32>
    %183 = arith.addf %178, %182 : vector<16x648xf32>
    %184 = vector.extract_strided_slice %170 {offsets = [0, 2], sizes = [16, 648], strides = [1, 1]} : vector<16x686xbf16> to vector<16x648xbf16>
    %185 = vector.extract_strided_slice %171 {offsets = [2, 0, 0], sizes = [1, 16, 16], strides = [1, 1, 1]} : vector<9x16x16xbf16> to vector<1x16x16xbf16>
    %186 = vector.shape_cast %185 : vector<1x16x16xbf16> to vector<16x16xbf16>
    %cst_62 = arith.constant dense<0.000000e+00> : vector<16x648xf32>
    %187 = tpu.matmul %186, %184, %cst_62 {dimension_numbers = #tpu.dot_dimension_numbers<[1], [0], [0], [1], [0, 0, 1, 1], [], []>} : vector<16x16xbf16>, vector<16x648xbf16>, vector<16x648xf32> -> vector<16x648xf32>
    %188 = arith.addf %183, %187 : vector<16x648xf32>
    %189 = vector.extract_strided_slice %170 {offsets = [0, 18], sizes = [16, 648], strides = [1, 1]} : vector<16x686xbf16> to vector<16x648xbf16>
    %190 = vector.extract_strided_slice %171 {offsets = [3, 0, 0], sizes = [1, 16, 16], strides = [1, 1, 1]} : vector<9x16x16xbf16> to vector<1x16x16xbf16>
    %191 = vector.shape_cast %190 : vector<1x16x16xbf16> to vector<16x16xbf16>
    %cst_63 = arith.constant dense<0.000000e+00> : vector<16x648xf32>
    %192 = tpu.matmul %191, %189, %cst_63 {dimension_numbers = #tpu.dot_dimension_numbers<[1], [0], [0], [1], [0, 0, 1, 1], [], []>} : vector<16x16xbf16>, vector<16x648xbf16>, vector<16x648xf32> -> vector<16x648xf32>
    %193 = arith.addf %188, %192 : vector<16x648xf32>
    %194 = vector.extract_strided_slice %170 {offsets = [0, 19], sizes = [16, 648], strides = [1, 1]} : vector<16x686xbf16> to vector<16x648xbf16>
    %195 = vector.extract_strided_slice %171 {offsets = [4, 0, 0], sizes = [1, 16, 16], strides = [1, 1, 1]} : vector<9x16x16xbf16> to vector<1x16x16xbf16>
    %196 = vector.shape_cast %195 : vector<1x16x16xbf16> to vector<16x16xbf16>
    %cst_64 = arith.constant dense<0.000000e+00> : vector<16x648xf32>
    %197 = tpu.matmul %196, %194, %cst_64 {dimension_numbers = #tpu.dot_dimension_numbers<[1], [0], [0], [1], [0, 0, 1, 1], [], []>} : vector<16x16xbf16>, vector<16x648xbf16>, vector<16x648xf32> -> vector<16x648xf32>
    %198 = arith.addf %193, %197 : vector<16x648xf32>
    %199 = vector.extract_strided_slice %170 {offsets = [0, 20], sizes = [16, 648], strides = [1, 1]} : vector<16x686xbf16> to vector<16x648xbf16>
    %200 = vector.extract_strided_slice %171 {offsets = [5, 0, 0], sizes = [1, 16, 16], strides = [1, 1, 1]} : vector<9x16x16xbf16> to vector<1x16x16xbf16>
    %201 = vector.shape_cast %200 : vector<1x16x16xbf16> to vector<16x16xbf16>
    %cst_65 = arith.constant dense<0.000000e+00> : vector<16x648xf32>
    %202 = tpu.matmul %201, %199, %cst_65 {dimension_numbers = #tpu.dot_dimension_numbers<[1], [0], [0], [1], [0, 0, 1, 1], [], []>} : vector<16x16xbf16>, vector<16x648xbf16>, vector<16x648xf32> -> vector<16x648xf32>
    %203 = arith.addf %198, %202 : vector<16x648xf32>
    %204 = vector.extract_strided_slice %170 {offsets = [0, 36], sizes = [16, 648], strides = [1, 1]} : vector<16x686xbf16> to vector<16x648xbf16>
    %205 = vector.extract_strided_slice %171 {offsets = [6, 0, 0], sizes = [1, 16, 16], strides = [1, 1, 1]} : vector<9x16x16xbf16> to vector<1x16x16xbf16>
    %206 = vector.shape_cast %205 : vector<1x16x16xbf16> to vector<16x16xbf16>
    %cst_66 = arith.constant dense<0.000000e+00> : vector<16x648xf32>
    %207 = tpu.matmul %206, %204, %cst_66 {dimension_numbers = #tpu.dot_dimension_numbers<[1], [0], [0], [1], [0, 0, 1, 1], [], []>} : vector<16x16xbf16>, vector<16x648xbf16>, vector<16x648xf32> -> vector<16x648xf32>
    %208 = arith.addf %203, %207 : vector<16x648xf32>
    %209 = vector.extract_strided_slice %170 {offsets = [0, 37], sizes = [16, 648], strides = [1, 1]} : vector<16x686xbf16> to vector<16x648xbf16>
    %210 = vector.extract_strided_slice %171 {offsets = [7, 0, 0], sizes = [1, 16, 16], strides = [1, 1, 1]} : vector<9x16x16xbf16> to vector<1x16x16xbf16>
    %211 = vector.shape_cast %210 : vector<1x16x16xbf16> to vector<16x16xbf16>
    %cst_67 = arith.constant dense<0.000000e+00> : vector<16x648xf32>
    %212 = tpu.matmul %211, %209, %cst_67 {dimension_numbers = #tpu.dot_dimension_numbers<[1], [0], [0], [1], [0, 0, 1, 1], [], []>} : vector<16x16xbf16>, vector<16x648xbf16>, vector<16x648xf32> -> vector<16x648xf32>
    %213 = arith.addf %208, %212 : vector<16x648xf32>
    %214 = vector.extract_strided_slice %170 {offsets = [0, 38], sizes = [16, 648], strides = [1, 1]} : vector<16x686xbf16> to vector<16x648xbf16>
    %215 = vector.extract_strided_slice %171 {offsets = [8, 0, 0], sizes = [1, 16, 16], strides = [1, 1, 1]} : vector<9x16x16xbf16> to vector<1x16x16xbf16>
    %216 = vector.shape_cast %215 : vector<1x16x16xbf16> to vector<16x16xbf16>
    %cst_68 = arith.constant dense<0.000000e+00> : vector<16x648xf32>
    %217 = tpu.matmul %216, %214, %cst_68 {dimension_numbers = #tpu.dot_dimension_numbers<[1], [0], [0], [1], [0, 0, 1, 1], [], []>} : vector<16x16xbf16>, vector<16x648xbf16>, vector<16x648xf32> -> vector<16x648xf32>
    %218 = arith.addf %213, %217 : vector<16x648xf32>
    %219 = vector.broadcast %172 : vector<16x1xf32> to vector<16x648xf32>
    %220 = arith.addf %218, %219 : vector<16x648xf32>
    %cst_69 = arith.constant 0.000000e+00 : f32
    %221 = vector.broadcast %cst_69 : f32 to vector<16x648xf32>
    %222 = arith.maximumf %220, %221 : vector<16x648xf32>
    %223 = vector.broadcast %0 : vector<1x648xf32> to vector<16x648xf32>
    %224 = arith.mulf %222, %223 : vector<16x648xf32>
    %225 = arith.subf %113, %224 : vector<16x648xf32>
    %226 = arith.mulf %225, %225 : vector<16x648xf32>
    %227 = vector.shape_cast %226 : vector<16x648xf32> to vector<1x16x648xf32>
    %cst_70 = arith.constant dense<0.000000e+00> : vector<1xf32>
    %228 = vector.multi_reduction <add>, %227, %cst_70 [1, 2] : vector<1x16x648xf32> to vector<1xf32>
    %229 = vector.shape_cast %228 : vector<1xf32> to vector<1x1x1xf32>
    %230 = vector.extract %229[0, 0, 0] : f32 from vector<1x1x1xf32>
    %cst_71 = arith.constant 1.22070313E-4 : f32
    %231 = arith.mulf %230, %cst_71 : f32
    %c0_72 = arith.constant 0 : index
    %c0_73 = arith.constant 0 : index
    %232 = memref.load %arg8[%c0_72, %c0_73] : memref<1x1xf32, #tpu.memory_space<smem>>
    memref.store %231, %arg8[%c0_72, %c0_73] : memref<1x1xf32, #tpu.memory_space<smem>>
    %233 = arith.extf %1 : vector<8x686xbf16> to vector<8x686xf32>
    %234 = arith.extf %2 : vector<8x686xbf16> to vector<8x686xf32>
    %235 = arith.subf %233, %234 : vector<8x686xf32>
    %236 = arith.mulf %235, %235 : vector<8x686xf32>
    %237 = vector.shape_cast %236 : vector<8x686xf32> to vector<1x8x686xf32>
    %cst_74 = arith.constant dense<0.000000e+00> : vector<1xf32>
    %238 = vector.multi_reduction <add>, %237, %cst_74 [1, 2] : vector<1x8x686xf32> to vector<1xf32>
    %239 = vector.shape_cast %238 : vector<1xf32> to vector<1x1x1xf32>
    %240 = vector.extract %239[0, 0, 0] : f32 from vector<1x1x1xf32>
    %cst_75 = arith.constant 6.51041686E-4 : f32
    %241 = arith.mulf %240, %cst_75 : f32
    %c0_76 = arith.constant 0 : index
    %c0_77 = arith.constant 0 : index
    %242 = memref.load %arg9[%c0_76, %c0_77] : memref<1x1xf32, #tpu.memory_space<smem>>
    memref.store %241, %arg9[%c0_76, %c0_77] : memref<1x1xf32, #tpu.memory_space<smem>>
    return
  }
  func.func @transform_0(%arg0: i32) -> (i32, i32) {
    %c0_i32 = arith.constant 0 : i32
    %c0_i32_0 = arith.constant 0 : i32
    %c0_i32_1 = arith.constant 0 : i32
    return %c0_i32, %c0_i32_0 : i32, i32
  }
  func.func @transform_1(%arg0: i32) -> (i32, i32) {
    %c0_i32 = arith.constant 0 : i32
    %c0_i32_0 = arith.constant 0 : i32
    %c0_i32_1 = arith.constant 0 : i32
    return %c0_i32, %c0_i32_0 : i32, i32
  }
  func.func @transform_2(%arg0: i32) -> (i32, i32, i32) {
    %c0_i32 = arith.constant 0 : i32
    %c0_i32_0 = arith.constant 0 : i32
    %c0_i32_1 = arith.constant 0 : i32
    %c0_i32_2 = arith.constant 0 : i32
    return %c0_i32, %c0_i32_0, %c0_i32_1 : i32, i32, i32
  }
  func.func @transform_3(%arg0: i32) -> (i32, i32) {
    %c0_i32 = arith.constant 0 : i32
    %c0_i32_0 = arith.constant 0 : i32
    %c0_i32_1 = arith.constant 0 : i32
    return %c0_i32, %c0_i32_0 : i32, i32
  }
  func.func @transform_4(%arg0: i32) -> (i32, i32, i32) {
    %c0_i32 = arith.constant 0 : i32
    %c0_i32_0 = arith.constant 0 : i32
    %c0_i32_1 = arith.constant 0 : i32
    %c0_i32_2 = arith.constant 0 : i32
    return %c0_i32, %c0_i32_0, %c0_i32_1 : i32, i32, i32
  }
  func.func @transform_5(%arg0: i32) -> (i32, i32) {
    %c0_i32 = arith.constant 0 : i32
    %c0_i32_0 = arith.constant 0 : i32
    %c0_i32_1 = arith.constant 0 : i32
    return %c0_i32, %c0_i32_0 : i32, i32
  }
  func.func @transform_6(%arg0: i32) -> (i32, i32) {
    %c0_i32 = arith.constant 0 : i32
    %c0_i32_0 = arith.constant 0 : i32
    %c0_i32_1 = arith.constant 0 : i32
    return %c0_i32, %c0_i32_0 : i32, i32
  }
  func.func @transform_7(%arg0: i32) -> (i32, i32) {
    %c0_i32 = arith.constant 0 : i32
    %c0_i32_0 = arith.constant 0 : i32
    %c0_i32_1 = arith.constant 0 : i32
    return %c0_i32, %c0_i32_0 : i32, i32
  }
  func.func @transform_8(%arg0: i32) -> (i32, i32) {
    %c0_i32 = arith.constant 0 : i32
    %c0_i32_0 = arith.constant 0 : i32
    %c0_i32_1 = arith.constant 0 : i32
    return %c0_i32, %c0_i32_0 : i32, i32
  }
}

module attributes {stable_mosaic.version = 11 : i64} {
  func.func @_disc_bce_kernel(%arg0: i32, %arg1: memref<8x686xbf16, #tpu.memory_space<vmem>>, %arg2: memref<9x16x8xbf16, #tpu.memory_space<vmem>>, %arg3: memref<16x1xf32, #tpu.memory_space<vmem>>, %arg4: memref<9x8x16xbf16, #tpu.memory_space<vmem>>, %arg5: memref<8x1xf32, #tpu.memory_space<vmem>>, %arg6: memref<1x648xf32, #tpu.memory_space<vmem>>, %arg7: memref<1x1xf32, #tpu.memory_space<smem>>) attributes {dimension_semantics = [#tpu.dimension_semantics<arbitrary>], iteration_bounds = array<i64: 1>, scalar_prefetch = 0 : i64, scratch_operands = 0 : i64, tpu.core_type = #tpu.core_type<tc>, window_params = [{pipeline_mode = #tpu.pipeline_mode<synchronous>, transform_indices = @transform_0, window_bounds = array<i64: 8, 686>}, {pipeline_mode = #tpu.pipeline_mode<synchronous>, transform_indices = @transform_1, window_bounds = array<i64: 9, 16, 8>}, {pipeline_mode = #tpu.pipeline_mode<synchronous>, transform_indices = @transform_2, window_bounds = array<i64: 16, 1>}, {pipeline_mode = #tpu.pipeline_mode<synchronous>, transform_indices = @transform_3, window_bounds = array<i64: 9, 8, 16>}, {pipeline_mode = #tpu.pipeline_mode<synchronous>, transform_indices = @transform_4, window_bounds = array<i64: 8, 1>}, {pipeline_mode = #tpu.pipeline_mode<synchronous>, transform_indices = @transform_5, window_bounds = array<i64: 1, 648>}, {transform_indices = @transform_6, window_bounds = array<i64: 1, 1>}]} {
    %c0 = arith.constant 0 : index
    %c0_0 = arith.constant 0 : index
    %0 = vector.load %arg6[%c0, %c0_0] : memref<1x648xf32, #tpu.memory_space<vmem>>, vector<1x648xf32>
    %c0_1 = arith.constant 0 : index
    %c0_2 = arith.constant 0 : index
    %1 = vector.load %arg1[%c0_1, %c0_2] : memref<8x686xbf16, #tpu.memory_space<vmem>>, vector<8x686xbf16>
    %c0_3 = arith.constant 0 : index
    %c0_4 = arith.constant 0 : index
    %c0_5 = arith.constant 0 : index
    %2 = vector.load %arg2[%c0_3, %c0_4, %c0_5] : memref<9x16x8xbf16, #tpu.memory_space<vmem>>, vector<9x16x8xbf16>
    %c0_6 = arith.constant 0 : index
    %c0_7 = arith.constant 0 : index
    %3 = vector.load %arg3[%c0_6, %c0_7] : memref<16x1xf32, #tpu.memory_space<vmem>>, vector<16x1xf32>
    %cst = arith.constant 0.000000e+00 : f32
    %4 = vector.broadcast %cst : f32 to vector<16x648xf32>
    %5 = vector.extract_strided_slice %1 {offsets = [0, 0], sizes = [8, 648], strides = [1, 1]} : vector<8x686xbf16> to vector<8x648xbf16>
    %6 = vector.extract_strided_slice %2 {offsets = [0, 0, 0], sizes = [1, 16, 8], strides = [1, 1, 1]} : vector<9x16x8xbf16> to vector<1x16x8xbf16>
    %7 = vector.shape_cast %6 : vector<1x16x8xbf16> to vector<16x8xbf16>
    %cst_8 = arith.constant dense<0.000000e+00> : vector<16x648xf32>
    %8 = tpu.matmul %7, %5, %cst_8 {dimension_numbers = #tpu.dot_dimension_numbers<[1], [0], [0], [1], [0, 0, 1, 1], [], []>} : vector<16x8xbf16>, vector<8x648xbf16>, vector<16x648xf32> -> vector<16x648xf32>
    %9 = arith.addf %4, %8 : vector<16x648xf32>
    %10 = vector.extract_strided_slice %1 {offsets = [0, 1], sizes = [8, 648], strides = [1, 1]} : vector<8x686xbf16> to vector<8x648xbf16>
    %11 = vector.extract_strided_slice %2 {offsets = [1, 0, 0], sizes = [1, 16, 8], strides = [1, 1, 1]} : vector<9x16x8xbf16> to vector<1x16x8xbf16>
    %12 = vector.shape_cast %11 : vector<1x16x8xbf16> to vector<16x8xbf16>
    %cst_9 = arith.constant dense<0.000000e+00> : vector<16x648xf32>
    %13 = tpu.matmul %12, %10, %cst_9 {dimension_numbers = #tpu.dot_dimension_numbers<[1], [0], [0], [1], [0, 0, 1, 1], [], []>} : vector<16x8xbf16>, vector<8x648xbf16>, vector<16x648xf32> -> vector<16x648xf32>
    %14 = arith.addf %9, %13 : vector<16x648xf32>
    %15 = vector.extract_strided_slice %1 {offsets = [0, 2], sizes = [8, 648], strides = [1, 1]} : vector<8x686xbf16> to vector<8x648xbf16>
    %16 = vector.extract_strided_slice %2 {offsets = [2, 0, 0], sizes = [1, 16, 8], strides = [1, 1, 1]} : vector<9x16x8xbf16> to vector<1x16x8xbf16>
    %17 = vector.shape_cast %16 : vector<1x16x8xbf16> to vector<16x8xbf16>
    %cst_10 = arith.constant dense<0.000000e+00> : vector<16x648xf32>
    %18 = tpu.matmul %17, %15, %cst_10 {dimension_numbers = #tpu.dot_dimension_numbers<[1], [0], [0], [1], [0, 0, 1, 1], [], []>} : vector<16x8xbf16>, vector<8x648xbf16>, vector<16x648xf32> -> vector<16x648xf32>
    %19 = arith.addf %14, %18 : vector<16x648xf32>
    %20 = vector.extract_strided_slice %1 {offsets = [0, 18], sizes = [8, 648], strides = [1, 1]} : vector<8x686xbf16> to vector<8x648xbf16>
    %21 = vector.extract_strided_slice %2 {offsets = [3, 0, 0], sizes = [1, 16, 8], strides = [1, 1, 1]} : vector<9x16x8xbf16> to vector<1x16x8xbf16>
    %22 = vector.shape_cast %21 : vector<1x16x8xbf16> to vector<16x8xbf16>
    %cst_11 = arith.constant dense<0.000000e+00> : vector<16x648xf32>
    %23 = tpu.matmul %22, %20, %cst_11 {dimension_numbers = #tpu.dot_dimension_numbers<[1], [0], [0], [1], [0, 0, 1, 1], [], []>} : vector<16x8xbf16>, vector<8x648xbf16>, vector<16x648xf32> -> vector<16x648xf32>
    %24 = arith.addf %19, %23 : vector<16x648xf32>
    %25 = vector.extract_strided_slice %1 {offsets = [0, 19], sizes = [8, 648], strides = [1, 1]} : vector<8x686xbf16> to vector<8x648xbf16>
    %26 = vector.extract_strided_slice %2 {offsets = [4, 0, 0], sizes = [1, 16, 8], strides = [1, 1, 1]} : vector<9x16x8xbf16> to vector<1x16x8xbf16>
    %27 = vector.shape_cast %26 : vector<1x16x8xbf16> to vector<16x8xbf16>
    %cst_12 = arith.constant dense<0.000000e+00> : vector<16x648xf32>
    %28 = tpu.matmul %27, %25, %cst_12 {dimension_numbers = #tpu.dot_dimension_numbers<[1], [0], [0], [1], [0, 0, 1, 1], [], []>} : vector<16x8xbf16>, vector<8x648xbf16>, vector<16x648xf32> -> vector<16x648xf32>
    %29 = arith.addf %24, %28 : vector<16x648xf32>
    %30 = vector.extract_strided_slice %1 {offsets = [0, 20], sizes = [8, 648], strides = [1, 1]} : vector<8x686xbf16> to vector<8x648xbf16>
    %31 = vector.extract_strided_slice %2 {offsets = [5, 0, 0], sizes = [1, 16, 8], strides = [1, 1, 1]} : vector<9x16x8xbf16> to vector<1x16x8xbf16>
    %32 = vector.shape_cast %31 : vector<1x16x8xbf16> to vector<16x8xbf16>
    %cst_13 = arith.constant dense<0.000000e+00> : vector<16x648xf32>
    %33 = tpu.matmul %32, %30, %cst_13 {dimension_numbers = #tpu.dot_dimension_numbers<[1], [0], [0], [1], [0, 0, 1, 1], [], []>} : vector<16x8xbf16>, vector<8x648xbf16>, vector<16x648xf32> -> vector<16x648xf32>
    %34 = arith.addf %29, %33 : vector<16x648xf32>
    %35 = vector.extract_strided_slice %1 {offsets = [0, 36], sizes = [8, 648], strides = [1, 1]} : vector<8x686xbf16> to vector<8x648xbf16>
    %36 = vector.extract_strided_slice %2 {offsets = [6, 0, 0], sizes = [1, 16, 8], strides = [1, 1, 1]} : vector<9x16x8xbf16> to vector<1x16x8xbf16>
    %37 = vector.shape_cast %36 : vector<1x16x8xbf16> to vector<16x8xbf16>
    %cst_14 = arith.constant dense<0.000000e+00> : vector<16x648xf32>
    %38 = tpu.matmul %37, %35, %cst_14 {dimension_numbers = #tpu.dot_dimension_numbers<[1], [0], [0], [1], [0, 0, 1, 1], [], []>} : vector<16x8xbf16>, vector<8x648xbf16>, vector<16x648xf32> -> vector<16x648xf32>
    %39 = arith.addf %34, %38 : vector<16x648xf32>
    %40 = vector.extract_strided_slice %1 {offsets = [0, 37], sizes = [8, 648], strides = [1, 1]} : vector<8x686xbf16> to vector<8x648xbf16>
    %41 = vector.extract_strided_slice %2 {offsets = [7, 0, 0], sizes = [1, 16, 8], strides = [1, 1, 1]} : vector<9x16x8xbf16> to vector<1x16x8xbf16>
    %42 = vector.shape_cast %41 : vector<1x16x8xbf16> to vector<16x8xbf16>
    %cst_15 = arith.constant dense<0.000000e+00> : vector<16x648xf32>
    %43 = tpu.matmul %42, %40, %cst_15 {dimension_numbers = #tpu.dot_dimension_numbers<[1], [0], [0], [1], [0, 0, 1, 1], [], []>} : vector<16x8xbf16>, vector<8x648xbf16>, vector<16x648xf32> -> vector<16x648xf32>
    %44 = arith.addf %39, %43 : vector<16x648xf32>
    %45 = vector.extract_strided_slice %1 {offsets = [0, 38], sizes = [8, 648], strides = [1, 1]} : vector<8x686xbf16> to vector<8x648xbf16>
    %46 = vector.extract_strided_slice %2 {offsets = [8, 0, 0], sizes = [1, 16, 8], strides = [1, 1, 1]} : vector<9x16x8xbf16> to vector<1x16x8xbf16>
    %47 = vector.shape_cast %46 : vector<1x16x8xbf16> to vector<16x8xbf16>
    %cst_16 = arith.constant dense<0.000000e+00> : vector<16x648xf32>
    %48 = tpu.matmul %47, %45, %cst_16 {dimension_numbers = #tpu.dot_dimension_numbers<[1], [0], [0], [1], [0, 0, 1, 1], [], []>} : vector<16x8xbf16>, vector<8x648xbf16>, vector<16x648xf32> -> vector<16x648xf32>
    %49 = arith.addf %44, %48 : vector<16x648xf32>
    %50 = vector.broadcast %3 : vector<16x1xf32> to vector<16x648xf32>
    %51 = arith.addf %49, %50 : vector<16x648xf32>
    %cst_17 = arith.constant 0.000000e+00 : f32
    %52 = vector.broadcast %cst_17 : f32 to vector<16x648xf32>
    %53 = arith.maximumf %51, %52 : vector<16x648xf32>
    %54 = vector.broadcast %0 : vector<1x648xf32> to vector<16x648xf32>
    %55 = arith.mulf %53, %54 : vector<16x648xf32>
    %56 = arith.truncf %55 : vector<16x648xf32> to vector<16x648xbf16>
    %cst_18 = arith.constant 0.000000e+00 : bf16
    %57 = vector.broadcast %cst_18 : bf16 to vector<16x19xbf16>
    %58 = tpu.concatenate %57, %56, %57 in 1 : vector<16x19xbf16>, vector<16x648xbf16>, vector<16x19xbf16> -> vector<16x686xbf16>
    %c0_19 = arith.constant 0 : index
    %c0_20 = arith.constant 0 : index
    %c0_21 = arith.constant 0 : index
    %59 = vector.load %arg4[%c0_19, %c0_20, %c0_21] : memref<9x8x16xbf16, #tpu.memory_space<vmem>>, vector<9x8x16xbf16>
    %c0_22 = arith.constant 0 : index
    %c0_23 = arith.constant 0 : index
    %60 = vector.load %arg5[%c0_22, %c0_23] : memref<8x1xf32, #tpu.memory_space<vmem>>, vector<8x1xf32>
    %cst_24 = arith.constant 0.000000e+00 : f32
    %61 = vector.broadcast %cst_24 : f32 to vector<8x648xf32>
    %62 = vector.extract_strided_slice %58 {offsets = [0, 0], sizes = [16, 648], strides = [1, 1]} : vector<16x686xbf16> to vector<16x648xbf16>
    %63 = vector.extract_strided_slice %59 {offsets = [0, 0, 0], sizes = [1, 8, 16], strides = [1, 1, 1]} : vector<9x8x16xbf16> to vector<1x8x16xbf16>
    %64 = vector.shape_cast %63 : vector<1x8x16xbf16> to vector<8x16xbf16>
    %cst_25 = arith.constant dense<0.000000e+00> : vector<8x648xf32>
    %65 = tpu.matmul %64, %62, %cst_25 {dimension_numbers = #tpu.dot_dimension_numbers<[1], [0], [0], [1], [0, 0, 1, 1], [], []>} : vector<8x16xbf16>, vector<16x648xbf16>, vector<8x648xf32> -> vector<8x648xf32>
    %66 = arith.addf %61, %65 : vector<8x648xf32>
    %67 = vector.extract_strided_slice %58 {offsets = [0, 1], sizes = [16, 648], strides = [1, 1]} : vector<16x686xbf16> to vector<16x648xbf16>
    %68 = vector.extract_strided_slice %59 {offsets = [1, 0, 0], sizes = [1, 8, 16], strides = [1, 1, 1]} : vector<9x8x16xbf16> to vector<1x8x16xbf16>
    %69 = vector.shape_cast %68 : vector<1x8x16xbf16> to vector<8x16xbf16>
    %cst_26 = arith.constant dense<0.000000e+00> : vector<8x648xf32>
    %70 = tpu.matmul %69, %67, %cst_26 {dimension_numbers = #tpu.dot_dimension_numbers<[1], [0], [0], [1], [0, 0, 1, 1], [], []>} : vector<8x16xbf16>, vector<16x648xbf16>, vector<8x648xf32> -> vector<8x648xf32>
    %71 = arith.addf %66, %70 : vector<8x648xf32>
    %72 = vector.extract_strided_slice %58 {offsets = [0, 2], sizes = [16, 648], strides = [1, 1]} : vector<16x686xbf16> to vector<16x648xbf16>
    %73 = vector.extract_strided_slice %59 {offsets = [2, 0, 0], sizes = [1, 8, 16], strides = [1, 1, 1]} : vector<9x8x16xbf16> to vector<1x8x16xbf16>
    %74 = vector.shape_cast %73 : vector<1x8x16xbf16> to vector<8x16xbf16>
    %cst_27 = arith.constant dense<0.000000e+00> : vector<8x648xf32>
    %75 = tpu.matmul %74, %72, %cst_27 {dimension_numbers = #tpu.dot_dimension_numbers<[1], [0], [0], [1], [0, 0, 1, 1], [], []>} : vector<8x16xbf16>, vector<16x648xbf16>, vector<8x648xf32> -> vector<8x648xf32>
    %76 = arith.addf %71, %75 : vector<8x648xf32>
    %77 = vector.extract_strided_slice %58 {offsets = [0, 18], sizes = [16, 648], strides = [1, 1]} : vector<16x686xbf16> to vector<16x648xbf16>
    %78 = vector.extract_strided_slice %59 {offsets = [3, 0, 0], sizes = [1, 8, 16], strides = [1, 1, 1]} : vector<9x8x16xbf16> to vector<1x8x16xbf16>
    %79 = vector.shape_cast %78 : vector<1x8x16xbf16> to vector<8x16xbf16>
    %cst_28 = arith.constant dense<0.000000e+00> : vector<8x648xf32>
    %80 = tpu.matmul %79, %77, %cst_28 {dimension_numbers = #tpu.dot_dimension_numbers<[1], [0], [0], [1], [0, 0, 1, 1], [], []>} : vector<8x16xbf16>, vector<16x648xbf16>, vector<8x648xf32> -> vector<8x648xf32>
    %81 = arith.addf %76, %80 : vector<8x648xf32>
    %82 = vector.extract_strided_slice %58 {offsets = [0, 19], sizes = [16, 648], strides = [1, 1]} : vector<16x686xbf16> to vector<16x648xbf16>
    %83 = vector.extract_strided_slice %59 {offsets = [4, 0, 0], sizes = [1, 8, 16], strides = [1, 1, 1]} : vector<9x8x16xbf16> to vector<1x8x16xbf16>
    %84 = vector.shape_cast %83 : vector<1x8x16xbf16> to vector<8x16xbf16>
    %cst_29 = arith.constant dense<0.000000e+00> : vector<8x648xf32>
    %85 = tpu.matmul %84, %82, %cst_29 {dimension_numbers = #tpu.dot_dimension_numbers<[1], [0], [0], [1], [0, 0, 1, 1], [], []>} : vector<8x16xbf16>, vector<16x648xbf16>, vector<8x648xf32> -> vector<8x648xf32>
    %86 = arith.addf %81, %85 : vector<8x648xf32>
    %87 = vector.extract_strided_slice %58 {offsets = [0, 20], sizes = [16, 648], strides = [1, 1]} : vector<16x686xbf16> to vector<16x648xbf16>
    %88 = vector.extract_strided_slice %59 {offsets = [5, 0, 0], sizes = [1, 8, 16], strides = [1, 1, 1]} : vector<9x8x16xbf16> to vector<1x8x16xbf16>
    %89 = vector.shape_cast %88 : vector<1x8x16xbf16> to vector<8x16xbf16>
    %cst_30 = arith.constant dense<0.000000e+00> : vector<8x648xf32>
    %90 = tpu.matmul %89, %87, %cst_30 {dimension_numbers = #tpu.dot_dimension_numbers<[1], [0], [0], [1], [0, 0, 1, 1], [], []>} : vector<8x16xbf16>, vector<16x648xbf16>, vector<8x648xf32> -> vector<8x648xf32>
    %91 = arith.addf %86, %90 : vector<8x648xf32>
    %92 = vector.extract_strided_slice %58 {offsets = [0, 36], sizes = [16, 648], strides = [1, 1]} : vector<16x686xbf16> to vector<16x648xbf16>
    %93 = vector.extract_strided_slice %59 {offsets = [6, 0, 0], sizes = [1, 8, 16], strides = [1, 1, 1]} : vector<9x8x16xbf16> to vector<1x8x16xbf16>
    %94 = vector.shape_cast %93 : vector<1x8x16xbf16> to vector<8x16xbf16>
    %cst_31 = arith.constant dense<0.000000e+00> : vector<8x648xf32>
    %95 = tpu.matmul %94, %92, %cst_31 {dimension_numbers = #tpu.dot_dimension_numbers<[1], [0], [0], [1], [0, 0, 1, 1], [], []>} : vector<8x16xbf16>, vector<16x648xbf16>, vector<8x648xf32> -> vector<8x648xf32>
    %96 = arith.addf %91, %95 : vector<8x648xf32>
    %97 = vector.extract_strided_slice %58 {offsets = [0, 37], sizes = [16, 648], strides = [1, 1]} : vector<16x686xbf16> to vector<16x648xbf16>
    %98 = vector.extract_strided_slice %59 {offsets = [7, 0, 0], sizes = [1, 8, 16], strides = [1, 1, 1]} : vector<9x8x16xbf16> to vector<1x8x16xbf16>
    %99 = vector.shape_cast %98 : vector<1x8x16xbf16> to vector<8x16xbf16>
    %cst_32 = arith.constant dense<0.000000e+00> : vector<8x648xf32>
    %100 = tpu.matmul %99, %97, %cst_32 {dimension_numbers = #tpu.dot_dimension_numbers<[1], [0], [0], [1], [0, 0, 1, 1], [], []>} : vector<8x16xbf16>, vector<16x648xbf16>, vector<8x648xf32> -> vector<8x648xf32>
    %101 = arith.addf %96, %100 : vector<8x648xf32>
    %102 = vector.extract_strided_slice %58 {offsets = [0, 38], sizes = [16, 648], strides = [1, 1]} : vector<16x686xbf16> to vector<16x648xbf16>
    %103 = vector.extract_strided_slice %59 {offsets = [8, 0, 0], sizes = [1, 8, 16], strides = [1, 1, 1]} : vector<9x8x16xbf16> to vector<1x8x16xbf16>
    %104 = vector.shape_cast %103 : vector<1x8x16xbf16> to vector<8x16xbf16>
    %cst_33 = arith.constant dense<0.000000e+00> : vector<8x648xf32>
    %105 = tpu.matmul %104, %102, %cst_33 {dimension_numbers = #tpu.dot_dimension_numbers<[1], [0], [0], [1], [0, 0, 1, 1], [], []>} : vector<8x16xbf16>, vector<16x648xbf16>, vector<8x648xf32> -> vector<8x648xf32>
    %106 = arith.addf %101, %105 : vector<8x648xf32>
    %107 = vector.broadcast %60 : vector<8x1xf32> to vector<8x648xf32>
    %108 = arith.addf %106, %107 : vector<8x648xf32>
    %109 = vector.broadcast %0 : vector<1x648xf32> to vector<8x648xf32>
    %110 = arith.mulf %108, %109 : vector<8x648xf32>
    %111 = vector.extract_strided_slice %110 {offsets = [0, 0], sizes = [1, 648], strides = [1, 1]} : vector<8x648xf32> to vector<1x648xf32>
    %cst_34 = arith.constant 0.000000e+00 : f32
    %112 = vector.broadcast %cst_34 : f32 to vector<1x648xf32>
    %113 = arith.maximumf %111, %112 : vector<1x648xf32>
    %cst_35 = arith.constant 0.000000e+00 : f32
    %114 = vector.broadcast %cst_35 : f32 to vector<1x648xf32>
    %115 = arith.mulf %111, %114 : vector<1x648xf32>
    %116 = arith.subf %113, %115 : vector<1x648xf32>
    %117 = math.absf %111 : vector<1x648xf32>
    %cst_36 = arith.constant 0.000000e+00 : f32
    %118 = vector.broadcast %cst_36 : f32 to vector<1x648xf32>
    %119 = arith.subf %118, %117 : vector<1x648xf32>
    %120 = math.exp %119 : vector<1x648xf32>
    %121 = math.log1p %120 : vector<1x648xf32>
    %122 = arith.addf %116, %121 : vector<1x648xf32>
    %123 = arith.mulf %122, %0 : vector<1x648xf32>
    %124 = vector.shape_cast %123 : vector<1x648xf32> to vector<1x1x648xf32>
    %cst_37 = arith.constant dense<0.000000e+00> : vector<1xf32>
    %125 = vector.multi_reduction <add>, %124, %cst_37 [1, 2] : vector<1x1x648xf32> to vector<1xf32>
    %126 = vector.shape_cast %125 : vector<1xf32> to vector<1x1x1xf32>
    %127 = vector.extract %126[0, 0, 0] : f32 from vector<1x1x1xf32>
    %cst_38 = arith.constant 0.001953125 : f32
    %128 = arith.mulf %127, %cst_38 : f32
    %c0_39 = arith.constant 0 : index
    %c0_40 = arith.constant 0 : index
    %129 = memref.load %arg7[%c0_39, %c0_40] : memref<1x1xf32, #tpu.memory_space<smem>>
    memref.store %128, %arg7[%c0_39, %c0_40] : memref<1x1xf32, #tpu.memory_space<smem>>
    return
  }
  func.func @transform_0(%arg0: i32) -> (i32, i32) {
    %c0_i32 = arith.constant 0 : i32
    %c0_i32_0 = arith.constant 0 : i32
    %c0_i32_1 = arith.constant 0 : i32
    return %c0_i32, %c0_i32_0 : i32, i32
  }
  func.func @transform_1(%arg0: i32) -> (i32, i32, i32) {
    %c0_i32 = arith.constant 0 : i32
    %c0_i32_0 = arith.constant 0 : i32
    %c0_i32_1 = arith.constant 0 : i32
    %c0_i32_2 = arith.constant 0 : i32
    return %c0_i32, %c0_i32_0, %c0_i32_1 : i32, i32, i32
  }
  func.func @transform_2(%arg0: i32) -> (i32, i32) {
    %c0_i32 = arith.constant 0 : i32
    %c0_i32_0 = arith.constant 0 : i32
    %c0_i32_1 = arith.constant 0 : i32
    return %c0_i32, %c0_i32_0 : i32, i32
  }
  func.func @transform_3(%arg0: i32) -> (i32, i32, i32) {
    %c0_i32 = arith.constant 0 : i32
    %c0_i32_0 = arith.constant 0 : i32
    %c0_i32_1 = arith.constant 0 : i32
    %c0_i32_2 = arith.constant 0 : i32
    return %c0_i32, %c0_i32_0, %c0_i32_1 : i32, i32, i32
  }
  func.func @transform_4(%arg0: i32) -> (i32, i32) {
    %c0_i32 = arith.constant 0 : i32
    %c0_i32_0 = arith.constant 0 : i32
    %c0_i32_1 = arith.constant 0 : i32
    return %c0_i32, %c0_i32_0 : i32, i32
  }
  func.func @transform_5(%arg0: i32) -> (i32, i32) {
    %c0_i32 = arith.constant 0 : i32
    %c0_i32_0 = arith.constant 0 : i32
    %c0_i32_1 = arith.constant 0 : i32
    return %c0_i32, %c0_i32_0 : i32, i32
  }
  func.func @transform_6(%arg0: i32) -> (i32, i32) {
    %c0_i32 = arith.constant 0 : i32
    %c0_i32_0 = arith.constant 0 : i32
    %c0_i32_1 = arith.constant 0 : i32
    return %c0_i32, %c0_i32_0 : i32, i32
  }
}

</mosaic_0001>

<bundles_post_ra>
// kernel: tile.6
= control target key start
LH: loop header
LB: loop body
LE: loop exit
PB: predicated region body
PF: predicated region fallthrough
CT: control target
= control target key end

     0   :  { %s46_s0 = inlined_call_operand.vmem [shape: f32[324], index: 0, kind: input, shape index: {}]   ;;  %s47_s1 = inlined_call_operand.vmem [shape: f32[2,324], index: 1, kind: output, shape index: {}]  }
   0x1   :  { %v4_v0 = vld [vmem:[%s46_s0] ss:$0 sm:$0xff]  ;;  %v14_v1 = vld [vmem:[%s46_s0 + $0x1] ss:$0 sm:$0xff]  ;;  %v16_v2 = vld [vmem:[%s46_s0 + $0x2] ss:$0 sm:$0xff] }
   0x2   :  { %5 = vst [vmem:[%s47_s1] sm:$0x3] %v4_v0  ;;  %15 = vst [vmem:[%s47_s1 + $0x2] sm:$0x3] %v14_v1 }
   0x3   :  { %17 = vst [vmem:[%s47_s1 + $0x4] sm:$0x3] %v16_v2 }

// kernel: tile.7
= control target key start
LH: loop header
LB: loop body
LE: loop exit
PB: predicated region body
PF: predicated region fallthrough
CT: control target
= control target key end

     0   :  { %vm30_vm0 = vcmask 1042434   ;;  %s20_s12 = smov 3  ;;  %vm32_vm1 = vcmask 490496   ;;  %vm17_vm2 = vcmask 556032   ;;  %s45_s13 = smov 3  ;;  %vm36_vm3 = vcmask 64512   ;;  %s140_s0 = inlined_call_operand.vmem [shape: f32[2,324], index: 0, kind: input, shape index: {}]   ;;  %s141_s1 = inlined_call_operand.vmem [shape: f32[1,648], index: 1, kind: output, shape index: {}]  }
   0x1   :  { %v92_v0 = vld [vmem:[%s140_s0 + $0x4] sm:$0x3]  ;;  %v93_v1 = vld [vmem:[%s140_s0 + $0x2] sm:$0x3]  ;;  %v13_v2 = vld [vmem:[%s140_s0] sm:$0x3] }
   0x2   :  { %8 = vst [vmem:[#allocation1 + $0x10] sm:$0x3] %v92_v0  ;;  %12 = vst [vmem:[#allocation1 + $0x8] sm:$0x3] %v93_v1  ;;  %s26_s0 = smov 3  ;;  %s100_s14 = smov 68  }
   0x3   :  { %14 = vst [vmem:[#allocation1] sm:$0x3] %v13_v2  ;;  %vm39_vm4 = vcmask 1048096  }
   0x9   :  { %v24_v3 = vld [vmem:[#allocation1 + $0x11] sm:$0x1]   ;;  %v29_v5 = vld [vmem:[#allocation1 + $0x7] sm:$0x4]   ;;  %v16_v8 = vld [vmem:[#allocation1 + $0x10] sm:$0x1]  }
   0xa   :  { %v27_v4 = vld [vmem:[#allocation1 + $0x11] ss:$-16 sm:%s26_s0]   ;;  %v21_v7 = vld [vmem:[#allocation1] ss:$8 sm:%s20_s12]   ;;  %19 = vst.msk [vmem:[#allocation0 + $0x10] sm:$0x1] %vm17_vm2, %v16_v8  }
   0xb   :  { %v31_v6 = vsel %vm30_vm0, %v29_v5, %v27_v4  ;;  %22 = vst [vmem:[#allocation0] ss:$8 sm:$0x3] %v21_v7   ;;  %v46_v10 = vld [vmem:[#allocation1 + $0x9] ss:$-8 sm:%s45_s13]  }
   0xc   :  { %v33_v9 = vsel %vm32_vm1, %v31_v6, %v24_v3 }
   0xd   :  { %34 = vrot.lane.b32.xlu0 %v33_v9, %s100_s14 }
  0x11   :  { %47 = vrot.lane.b32.xlu0 %v46_v10, %s100_s14 }
  0x12   :  { %v55_v11 = vld [vmem:[#allocation0] sm:$0x1]  ;;  %v59_v12 = vld [vmem:[#allocation0 + $0x8] sm:$0x1] }
  0x13   :  { %57 = vst [vmem:[%s141_s1] sm:$0x1] %v55_v11  ;;  %94 = vst [vmem:[%s141_s1 + $0x1] sm:$0x1] %v59_v12 }
  0x7f   :  { %v35_v13 = vpop.permute.xlu0 %34  }
  0x80   :  { %38 = vst.msk [vmem:[#allocation0 + $0x28] sm:$0x1] %vm36_vm3, %v35_v13  }
  0x81   :  { %41 = vst.msk [vmem:[#allocation0 + $0x20] ss:$-16 sm:$0x3] %vm39_vm4, %v35_v13   ;;  %43 = vst.msk [vmem:[#allocation0 + $0x16] sm:$0x4] %vm39_vm4, %v35_v13  }
  0x83   :  { %v48_v14 = vpop.permute.xlu0 %47  }
  0x84   :  { %51 = vst.msk [vmem:[#allocation0 + $0x20] ss:$-8 sm:$0x3] %vm17_vm2, %v48_v14  }
  0x87   :  { %v82_v16 = vld [vmem:[#allocation0 + $0x28] sm:$0x1] }
  0x88   :  { %v64_v15 = vld [vmem:[#allocation0 + $0x10] sm:$0x1]  ;;  %98 = vst [vmem:[%s141_s1 + $0x5] sm:$0x1] %v82_v16 }
  0x89   :  { %95 = vst [vmem:[%s141_s1 + $0x2] sm:$0x1] %v64_v15 }
  0x8b   :  { %v70_v17 = vld [vmem:[#allocation0 + $0x18] sm:$0x1]  ;;  %v76_v18 = vld [vmem:[#allocation0 + $0x20] sm:$0x1] }
  0x8c   :  { %96 = vst [vmem:[%s141_s1 + $0x3] sm:$0x1] %v70_v17  ;;  %97 = vst [vmem:[%s141_s1 + $0x4] sm:$0x1] %v76_v18 }

// kernel: loss_forward.4
= control target key start
LH: loop header
LB: loop body
LE: loop exit
PB: predicated region body
PF: predicated region fallthrough
CT: control target
= control target key end

     0   :  { %v3479_v2 = vmov 0   ;;  %s3480_s27 = smov 127   ;;  %s3482_s28 = smov 110   ;;  %vm80_vm0 = vcmask 1039360   ;;  %vm90_vm1 = vcmask 1043456   ;;  %vm86_vm2 = vcmask 64512   ;;  %s4264_s0 = inlined_call_operand.vmem [shape: bf16[8,686], index: 0, kind: input, shape index: {}]   ;;  %s4265_s1 = inlined_call_operand.vmem [shape: bf16[9,16,8], index: 1, kind: input, shape index: {}]   ;;  %s4266_s2 = inlined_call_operand.vmem [shape: f32[16,1], index: 2, kind: input, shape index: {}]   ;;  %s4267_s5 = inlined_call_operand.vmem [shape: f32[1,648], index: 5, kind: input, shape index: {}]   ;;  %s4268_s4 = inlined_call_operand.vmem [shape: f32[8,1], index: 4, kind: input, shape index: {}]   ;;  %s4269_s3 = inlined_call_operand.vmem [shape: bf16[9,8,16], index: 3, kind: input, shape index: {}]   ;;  %s4270_s6 = inlined_call_operand.vmem [shape: bf16[8,686], index: 6, kind: output, shape index: {}]  }
   0x1   :  { %v25_v0 = vld [vmem:[%s4264_s0] sm:$0xff]  ;;  %v26_v1 = vld [vmem:[%s4264_s0 + $0x8] sm:$0xff]  ;;  %141 = vmatprep.mubr.bf16.mxu0 %v3479_v2  ;;  %184 = vmatprep.mubr.bf16.mxu1 %v3479_v2  ;;  %v27_v5 = vld [vmem:[%s4264_s0 + $0x10] sm:$0xff]  ;;  %s3481_s0 = smov 126   ;;  %s3483_s29 = smov 109   ;;  %vm410_vm3 = vcmask 1031168  }
   0x2   :  { %v3532_v3 = vcombine.low %v25_v0, %v25_v0  ;;  %v3534_v4 = vcombine.low %v26_v1, %v26_v1  ;;  %3462 = vset.pattern.permute.xlu0 %v3479_v2  ;;  %3463 = vset.pattern.permute.xlu1 %v3479_v2  ;;  %v3545_v6 = vcombine.high %v25_v0, %v25_v0  ;;  %s3484_s30 = smov 108   ;;  %s3485_s7 = smov 92   ;;  %v3470_v17 = vld [vmem:[%s4265_s1 + $0x8] sm:$0xff]   ;;  %v46_v30 = vld [vmem:[%s4266_s2] sm:$0xff]  ;;  %vm595_vm4 = vcmask 900096   ;;  %v3472_v52 = vld [vmem:[%s4265_s1 + $0x10] sm:$0xff]  }
   0x3   :  { %v3547_v7 = vcombine.low %v27_v5, %v27_v5  ;;  %v3551_v8 = vcombine.high %v27_v5, %v27_v5  ;;  %v3561_v9 = vcombine.high %v26_v1, %v26_v1  ;;  %s3486_s8 = smov 91   ;;  %s3487_s9 = smov 90   ;;  %v47_v31 = vld [vmem:[%s4266_s2 + $0x8] sm:$0xff]  ;;  %v3471_v35 = vld [vmem:[%s4265_s1] sm:$0xff]   ;;  %vm780_vm5 = vcmask 891904  }
   0x4   :  { %68 = vrot.lane.b32.xlu0 %v3532_v3, %s3480_s27  ;;  %72 = vrot.lane.b32.xlu1 %v3534_v4, %s3480_s27  ;;  %v247_v25 = vsel %vm90_vm1, %v3532_v3, 0  ;;  %v253_v33 = vsel %vm90_vm1, %v3534_v4, 0  ;;  %vm965_vm6 = vcmask 883712   ;;  %vm1150_vm7 = vcmask 752640  }
   0x5   :  { %v259_v37 = vsel %vm90_vm1, %v3547_v7, 0  ;;  %vm1335_vm8 = vcmask 744448   ;;  %vm1520_vm9 = vcmask 736256   ;;  %vm1789_vm10 = vcmask 154624  }
   0x6   :  { %vm1804_vm11 = vcmask 220160   ;;  %vm1843_vm12 = vcmask 130048   ;;  %vm3326_vm13 = vmneg %vm1789_vm10  ;;  %vm3247_vm14 = vcmask 375812  }
   0x7   :  { %vm3248_vm15 = vmor %vm3247_vm14, %vm90_vm1 }
   0x8   :  { %70 = vrot.lane.b32.xlu0 %v3545_v6, %s3480_s27  ;;  %76 = vrot.lane.b32.xlu1 %v3547_v7, %s3480_s27 }
   0xc   :  { %78 = vrot.lane.b32.xlu0 %v3551_v8, %s3480_s27  ;;  %398 = vrot.lane.b32.xlu1 %v3532_v3, %s3481_s0 }
  0x10   :  { %400 = vrot.lane.b32.xlu0 %v3545_v6, %s3481_s0  ;;  %402 = vrot.lane.b32.xlu1 %v3534_v4, %s3481_s0 }
  0x14   :  { %74 = vrot.lane.b32.xlu0 %v3561_v9, %s3480_s27  ;;  %406 = vrot.lane.b32.xlu1 %v3547_v7, %s3481_s0 }
  0x18   :  { %408 = vrot.lane.b32.xlu0 %v3551_v8, %s3481_s0  ;;  %583 = vrot.lane.b32.xlu1 %v3532_v3, %s3482_s28 }
  0x1c   :  { %585 = vrot.lane.b32.xlu0 %v3545_v6, %s3482_s28  ;;  %587 = vrot.lane.b32.xlu1 %v3534_v4, %s3482_s28 }
  0x20   :  { %591 = vrot.lane.b32.xlu0 %v3547_v7, %s3482_s28  ;;  %593 = vrot.lane.b32.xlu1 %v3551_v8, %s3482_s28 }
  0x24   :  { %404 = vrot.lane.b32.xlu0 %v3561_v9, %s3481_s0  ;;  %768 = vrot.lane.b32.xlu1 %v3532_v3, %s3483_s29 }
  0x28   :  { %770 = vrot.lane.b32.xlu0 %v3545_v6, %s3483_s29  ;;  %772 = vrot.lane.b32.xlu1 %v3534_v4, %s3483_s29 }
  0x2c   :  { %589 = vrot.lane.b32.xlu0 %v3561_v9, %s3482_s28  ;;  %776 = vrot.lane.b32.xlu1 %v3547_v7, %s3483_s29 }
  0x30   :  { %778 = vrot.lane.b32.xlu0 %v3551_v8, %s3483_s29  ;;  %953 = vrot.lane.b32.xlu1 %v3532_v3, %s3484_s30 }
  0x34   :  { %955 = vrot.lane.b32.xlu0 %v3545_v6, %s3484_s30  ;;  %957 = vrot.lane.b32.xlu1 %v3534_v4, %s3484_s30 }
  0x38   :  { %774 = vrot.lane.b32.xlu0 %v3561_v9, %s3483_s29  ;;  %961 = vrot.lane.b32.xlu1 %v3547_v7, %s3484_s30 }
  0x3c   :  { %959 = vrot.lane.b32.xlu1 %v3561_v9, %s3484_s30  ;;  %963 = vrot.lane.b32.xlu0 %v3551_v8, %s3484_s30 }
  0x40   :  { %1140 = vrot.lane.b32.xlu1 %v3545_v6, %s3485_s7  ;;  %1138 = vrot.lane.b32.xlu0 %v3532_v3, %s3485_s7 }
  0x44   :  { %1146 = vrot.lane.b32.xlu1 %v3547_v7, %s3485_s7  ;;  %1142 = vrot.lane.b32.xlu0 %v3534_v4, %s3485_s7 }
  0x48   :  { %1144 = vrot.lane.b32.xlu1 %v3561_v9, %s3485_s7  ;;  %1148 = vrot.lane.b32.xlu0 %v3551_v8, %s3485_s7 }
  0x4c   :  { %1323 = vrot.lane.b32.xlu0 %v3532_v3, %s3486_s8  ;;  %1325 = vrot.lane.b32.xlu1 %v3545_v6, %s3486_s8 }
  0x50   :  { %1327 = vrot.lane.b32.xlu0 %v3534_v4, %s3486_s8  ;;  %1329 = vrot.lane.b32.xlu1 %v3561_v9, %s3486_s8 }
  0x54   :  { %1331 = vrot.lane.b32.xlu0 %v3547_v7, %s3486_s8  ;;  %1333 = vrot.lane.b32.xlu1 %v3551_v8, %s3486_s8 }
  0x58   :  { %1508 = vrot.lane.b32.xlu0 %v3532_v3, %s3487_s9  ;;  %1510 = vrot.lane.b32.xlu1 %v3545_v6, %s3487_s9 }
  0x5c   :  { %1512 = vrot.lane.b32.xlu0 %v3534_v4, %s3487_s9  ;;  %1514 = vrot.lane.b32.xlu1 %v3561_v9, %s3487_s9 }
  0x60   :  { %1516 = vrot.lane.b32.xlu0 %v3547_v7, %s3487_s9  ;;  %1518 = vrot.lane.b32.xlu1 %v3551_v8, %s3487_s9  ;;  %v3473_v7 = vld [vmem:[%s4265_s1 + $0x18] sm:$0xff]  }
  0x64   :  { %1690 = vperm.xlu0 %3462, %v46_v30   ;;  %1695 = vperm.xlu1 %3463, %v47_v31  }
  0x76   :  { %v69_v10 = vpop.permute.xlu0 %68  ;;  %v73_v11 = vpop.permute.xlu1 %72 }
  0x7a   :  { %v71_v12 = vpop.permute.xlu0 %70  ;;  %v77_v13 = vpop.permute.xlu1 %76 }
  0x7b   :  { %v82_v14 = vsel %vm80_vm0, %v71_v12, %v73_v11  ;;  %v81_v15 = vsel %vm80_vm0, %v69_v10, %v71_v12 }
  0x7c   :  { %3261 = vmatprep.subr.msk.bf16.mxu0 %vm90_vm1, %v82_v14  ;;  %v92_v16 = vsel %vm90_vm1, %v81_v15, 0 }
  0x7d   :  { %110 = vmatpush1.bf16.msra.mxu0 %v92_v16 }
  0x7e   :  { %v79_v18 = vpop.permute.xlu0 %78  ;;  %v399_v19 = vpop.permute.xlu1 %398 }
  0x7f   :  { %v85_v20 = vsel %vm80_vm0, %v77_v13, %v79_v18  ;;  %3265 = vmatprep.subr.msk.bf16.mxu0 %vm90_vm1, %v79_v18 }
  0x80   :  { %3262 = vmatmul.mubr.msk.bf16.vlgmr.msra.gmra.mrb[0].mxu0 %vm86_vm2, %v3470_v17  ;;  %v104_v21 = vsel %vm90_vm1, %v85_v20, 0 }
  0x81   :  { %196 = vmatpush1.bf16.msra.mxu0 %v104_v21  ;;  %227 = vmatprep.mubr.bf16.mxu0 %v3479_v2 }
  0x82   :  { %v401_v22 = vpop.permute.xlu0 %400  ;;  %3268 = vmatprep.subr.msk.bf16.mxu0 %vm90_vm1, %v3545_v6  ;;  %v403_v23 = vpop.permute.xlu1 %402 }
  0x83   :  { %v412_v39 = vsel %vm410_vm3, %v401_v22, %v403_v23  ;;  %v411_v42 = vsel %vm410_vm3, %v399_v19, %v401_v22  ;;  %v3474_v22 = vld [vmem:[%s4265_s1 + $0x20] sm:$0xff]  }
  0x84   :  { %v420_v43 = vsel %vm90_vm1, %v411_v42, 0 }
  0x86   :  { %v75_v24 = vpop.permute.xlu0 %74  ;;  %v407_v26 = vpop.permute.xlu1 %406 }
  0x87   :  { %v84_v27 = vsel %vm80_vm0, %v75_v24, %v77_v13  ;;  %v83_v28 = vsel %vm80_vm0, %v73_v11, %v75_v24 }
  0x88   :  { %3263 = vmatprep.subr.msk.bf16.mxu1 %vm90_vm1, %v84_v27  ;;  %3266 = vmatmul.mubr.msk.bf16.vlgmr.msra.gmra.mrb[4].mxu0 %vm86_vm2, %v3470_v17  ;;  %v98_v29 = vsel %vm90_vm1, %v83_v28, 0 }
  0x89   :  { %153 = vmatpush1.bf16.msra.mxu1 %v98_v29  ;;  %265 = vmatpush1.bf16.msra.mxu0 %v247_v25 }
  0x8a   :  { %v409_v32 = vpop.permute.xlu0 %408  ;;  %296 = vmatprep.mubr.bf16.mxu0 %v3479_v2  ;;  %3270 = vmatprep.subr.msk.bf16.mxu1 %vm90_vm1, %v3561_v9  ;;  %v584_v34 = vpop.permute.xlu1 %583 }
  0x8b   :  { %3272 = vmatprep.subr.msk.bf16.mxu0 %vm90_vm1, %v3551_v8  ;;  %v415_v51 = vsel %vm410_vm3, %v407_v26, %v409_v32 }
  0x8c   :  { %3264 = vmatmul.mubr.msk.bf16.vlgmr.msra.gmra.mrb[0].mxu1 %vm86_vm2, %v3470_v17  ;;  %v432_v53 = vsel %vm90_vm1, %v415_v51, 0 }
  0x8d   :  { %308 = vmatpush1.bf16.msra.mxu1 %v253_v33  ;;  %339 = vmatprep.mubr.bf16.mxu1 %v3479_v2 }
  0x8e   :  { %v586_v36 = vpop.permute.xlu0 %585  ;;  %v588_v38 = vpop.permute.xlu1 %587 }
  0x8f   :  { %v597_v56 = vsel %vm595_vm4, %v586_v36, %v588_v38  ;;  %v596_v62 = vsel %vm595_vm4, %v584_v34, %v586_v36 }
  0x90   :  { %3269 = vmatmul.mubr.msk.bf16.vlgmr.msra.gmra.mrb[0].mxu0 %vm86_vm2, %v3471_v35  ;;  %v605_v63 = vsel %vm90_vm1, %v596_v62, 0 }
  0x91   :  { %351 = vmatpush1.bf16.msra.mxu0 %v259_v37  ;;  %382 = vmatprep.mubr.bf16.mxu0 %v3479_v2 }
  0x92   :  { %v592_v40 = vpop.permute.xlu0 %591  ;;  %3275 = vmatprep.subr.msk.bf16.mxu0 %vm90_vm1, %v412_v39  ;;  %v594_v41 = vpop.permute.xlu1 %593 }
  0x93   :  { %v600_v5 = vsel %vm595_vm4, %v592_v40, %v594_v41 }
  0x94   :  { %v617_v9 = vsel %vm90_vm1, %v600_v5, 0 }
  0x96   :  { %v405_v44 = vpop.permute.xlu0 %404  ;;  %v3692_v45 = vpop.permute.xlu1 %768 }
  0x97   :  { %v413_v46 = vsel %vm410_vm3, %v403_v23, %v405_v44  ;;  %v414_v47 = vsel %vm410_vm3, %v405_v44, %v407_v26 }
  0x98   :  { %3271 = vmatmul.mubr.msk.bf16.vlgmr.msra.gmra.mrb[0].mxu1 %vm86_vm2, %v3471_v35  ;;  %3273 = vmatmul.mubr.msk.bf16.vlgmr.msra.gmra.mrb[4].mxu0 %vm86_vm2, %v3471_v35  ;;  %v426_v48 = vsel %vm90_vm1, %v413_v46, 0  ;;  %v3475_v35 = vld [vmem:[%s4265_s1 + $0x28] sm:$0xff]  }
  0x99   :  { %438 = vmatpush1.bf16.msra.mxu0 %v420_v43  ;;  %3277 = vmatprep.subr.msk.bf16.mxu1 %vm90_vm1, %v414_v47 }
  0x9a   :  { %481 = vmatpush1.bf16.msra.mxu1 %v426_v48  ;;  %469 = vmatprep.mubr.bf16.mxu0 %v3479_v2  ;;  %v771_v49 = vpop.permute.xlu0 %770  ;;  %v773_v50 = vpop.permute.xlu1 %772 }
  0x9b   :  { %512 = vmatprep.mubr.bf16.mxu1 %v3479_v2  ;;  %3279 = vmatprep.subr.msk.bf16.mxu0 %vm90_vm1, %v409_v32  ;;  %v782_v12 = vsel %vm780_vm5, %v771_v49, %v773_v50  ;;  %v781_v17 = vsel %vm780_vm5, %v3692_v45, %v771_v49  ;;  %v3476_v49 = vld [vmem:[%s4265_s1 + $0x30] sm:$0xff]  }
  0x9c   :  { %v790_v18 = vsel %vm90_vm1, %v781_v17, 0 }
  0x9e   :  { %v590_v54 = vpop.permute.xlu0 %589  ;;  %v3708_v55 = vpop.permute.xlu1 %776 }
  0x9f   :  { %v598_v57 = vsel %vm595_vm4, %v588_v38, %v590_v54  ;;  %v599_v58 = vsel %vm595_vm4, %v590_v54, %v592_v40 }
  0xa0   :  { %3276 = vmatmul.mubr.msk.bf16.vlgmr.msra.gmra.mrb[0].mxu0 %vm86_vm2, %v3472_v52  ;;  %3284 = vmatprep.subr.msk.bf16.mxu1 %vm90_vm1, %v599_v58  ;;  %v611_v59 = vsel %vm90_vm1, %v598_v57, 0  ;;  %v3477_v57 = vld [vmem:[%s4265_s1 + $0x38] sm:$0xff]  }
  0xa1   :  { %524 = vmatpush1.bf16.msra.mxu0 %v432_v53  ;;  %555 = vmatprep.mubr.bf16.mxu0 %v3479_v2 }
  0xa2   :  { %3282 = vmatprep.subr.msk.bf16.mxu0 %vm90_vm1, %v597_v56  ;;  %v779_v60 = vpop.permute.xlu0 %778  ;;  %v3718_v61 = vpop.permute.xlu1 %953 }
  0xa3   :  { %v785_v26 = vsel %vm780_vm5, %v3708_v55, %v779_v60 }
  0xa4   :  { %3278 = vmatmul.mubr.msk.bf16.vlgmr.msra.gmra.mrb[0].mxu1 %vm86_vm2, %v3472_v52  ;;  %v802_v28 = vsel %vm90_vm1, %v785_v26, 0 }
  0xa5   :  { %666 = vmatpush1.bf16.msra.mxu1 %v611_v59  ;;  %697 = vmatprep.mubr.bf16.mxu1 %v3479_v2 }
  0xa6   :  { %v956_v0 = vpop.permute.xlu0 %955  ;;  %v958_v1 = vpop.permute.xlu1 %957 }
  0xa7   :  { %v967_v31 = vsel %vm965_vm6, %v956_v0, %v958_v1  ;;  %v966_v34 = vsel %vm965_vm6, %v3718_v61, %v956_v0  ;;  %v3478_v0 = vld [vmem:[%s4265_s1 + $0x40] sm:$0xff]  }
  0xa8   :  { %3280 = vmatmul.mubr.msk.bf16.vlgmr.msra.gmra.mrb[4].mxu0 %vm86_vm2, %v3472_v52  ;;  %v975_v37 = vsel %vm90_vm1, %v966_v34, 0 }
  0xa9   :  { %623 = vmatpush1.bf16.msra.mxu0 %v605_v63  ;;  %654 = vmatprep.mubr.bf16.mxu0 %v3479_v2 }
  0xaa   :  { %3286 = vmatprep.subr.msk.bf16.mxu0 %vm90_vm1, %v594_v41  ;;  %v775_v3 = vpop.permute.xlu0 %774  ;;  %v3727_v4 = vpop.permute.xlu1 %961 }
  0xab   :  { %v784_v6 = vsel %vm780_vm5, %v775_v3, %v3708_v55  ;;  %v783_v8 = vsel %vm780_vm5, %v773_v50, %v775_v3 }
  0xac   :  { %3291 = vmatprep.subr.msk.bf16.mxu1 %vm90_vm1, %v784_v6  ;;  %v796_v13 = vsel %vm90_vm1, %v783_v8, 0 }
  0xae   :  { %v960_v10 = vpop.permute.xlu1 %959  ;;  %v964_v11 = vpop.permute.xlu0 %963 }
  0xaf   :  { %v969_v14 = vsel %vm965_vm6, %v960_v10, %v3727_v4  ;;  %v968_v21 = vsel %vm965_vm6, %v958_v1, %v960_v10  ;;  %v970_v44 = vsel %vm965_vm6, %v3727_v4, %v964_v11  ;;  %v1723_v10 = vlaneseq }
  0xb0   :  { %3283 = vmatmul.mubr.msk.bf16.vlgmr.msra.gmra.mrb[0].mxu0 %vm86_vm2, %v3473_v7  ;;  %3285 = vmatmul.mubr.msk.bf16.vlgmr.msra.gmra.mrb[0].mxu1 %vm86_vm2, %v3473_v7  ;;  %v981_v23 = vsel %vm90_vm1, %v968_v21, 0  ;;  %v987_v45 = vsel %vm90_vm1, %v970_v44, 0 }
  0xb1   :  { %709 = vmatpush1.bf16.msra.mxu0 %v617_v9  ;;  %740 = vmatprep.mubr.bf16.mxu0 %v3479_v2 }
  0xb2   :  { %3289 = vmatprep.subr.msk.bf16.mxu0 %vm90_vm1, %v782_v12  ;;  %851 = vmatpush1.bf16.msra.mxu1 %v796_v13  ;;  %v3746_v15 = vpop.permute.xlu1 %1140  ;;  %v3748_v16 = vpop.permute.xlu0 %1138 }
  0xb3   :  { %882 = vmatprep.mubr.bf16.mxu1 %v3479_v2  ;;  %3298 = vmatprep.subr.msk.bf16.mxu1 %vm90_vm1, %v969_v14  ;;  %v1151_v53 = vsel %vm1150_vm7, %v3748_v16, %v3746_v15 }
  0xb4   :  { %v1160_v55 = vsel %vm90_vm1, %v1151_v53, 0 }
  0xb6   :  { %v3755_v19 = vpop.permute.xlu1 %1146  ;;  %v1143_v20 = vpop.permute.xlu0 %1142 }
  0xb7   :  { %v1152_v47 = vsel %vm1150_vm7, %v3746_v15, %v1143_v20  ;;  %v24_v15 = vld [vmem:[%s4267_s5] sm:$0x3f]  ;;  %s3488_s5 = smov 19  }
  0xb8   :  { %3287 = vmatmul.mubr.msk.bf16.vlgmr.msra.gmra.mrb[4].mxu0 %vm86_vm2, %v3473_v7 }
  0xb9   :  { %808 = vmatpush1.bf16.msra.mxu0 %v790_v18  ;;  %839 = vmatprep.mubr.bf16.mxu0 %v3479_v2 }
  0xba   :  { %3293 = vmatprep.subr.msk.bf16.mxu0 %vm90_vm1, %v779_v60  ;;  %v1145_v24 = vpop.permute.xlu1 %1144  ;;  %v1149_v25 = vpop.permute.xlu0 %1148 }
  0xbb   :  { %v1154_v27 = vsel %vm1150_vm7, %v1145_v24, %v3755_v19  ;;  %v1153_v36 = vsel %vm1150_vm7, %v1143_v20, %v1145_v24  ;;  %v1155_v56 = vsel %vm1150_vm7, %v3755_v19, %v1149_v25 }
  0xbc   :  { %3292 = vmatmul.mubr.msk.bf16.vlgmr.msra.gmra.mrb[0].mxu1 %vm86_vm2, %v3474_v22  ;;  %v1166_v40 = vsel %vm90_vm1, %v1153_v36, 0  ;;  %v1172_v59 = vsel %vm90_vm1, %v1155_v56, 0 }
  0xbd   :  { %1036 = vmatpush1.bf16.msra.mxu1 %v981_v23  ;;  %1067 = vmatprep.mubr.bf16.mxu1 %v3479_v2 }
  0xbe   :  { %3305 = vmatprep.subr.msk.bf16.mxu1 %vm90_vm1, %v1154_v27  ;;  %v3773_v29 = vpop.permute.xlu0 %1323  ;;  %v3775_v30 = vpop.permute.xlu1 %1325 }
  0xbf   :  { %v1336_v62 = vsel %vm1335_vm8, %v3773_v29, %v3775_v30 }
  0xc0   :  { %3290 = vmatmul.mubr.msk.bf16.vlgmr.msra.gmra.mrb[0].mxu0 %vm86_vm2, %v3474_v22  ;;  %v1345_v63 = vsel %vm90_vm1, %v1336_v62, 0 }
  0xc1   :  { %894 = vmatpush1.bf16.msra.mxu0 %v802_v28  ;;  %925 = vmatprep.mubr.bf16.mxu0 %v3479_v2 }
  0xc2   :  { %3296 = vmatprep.subr.msk.bf16.mxu0 %vm90_vm1, %v967_v31  ;;  %v1328_v32 = vpop.permute.xlu0 %1327  ;;  %v1330_v33 = vpop.permute.xlu1 %1329 }
  0xc3   :  { %v1338_v48 = vsel %vm1335_vm8, %v1328_v32, %v1330_v33  ;;  %v1337_v60 = vsel %vm1335_vm8, %v3775_v30, %v1328_v32 }
  0xc4   :  { %v1351_v51 = vsel %vm90_vm1, %v1338_v48, 0 }
  0xc6   :  { %v1332_v38 = vpop.permute.xlu0 %1331  ;;  %v1334_v39 = vpop.permute.xlu1 %1333 }
  0xc7   :  { %v1339_v41 = vsel %vm1335_vm8, %v1330_v33, %v1332_v38  ;;  %v1340_v1 = vsel %vm1335_vm8, %v1332_v38, %v1334_v39 }
  0xc8   :  { %3294 = vmatmul.mubr.msk.bf16.vlgmr.msra.gmra.mrb[4].mxu0 %vm86_vm2, %v3474_v22  ;;  %3299 = vmatmul.mubr.msk.bf16.vlgmr.msra.gmra.mrb[0].mxu1 %vm86_vm2, %v3475_v35  ;;  %v1357_v3 = vsel %vm90_vm1, %v1340_v1, 0 }
  0xc9   :  { %993 = vmatpush1.bf16.msra.mxu0 %v975_v37  ;;  %1024 = vmatprep.mubr.bf16.mxu0 %v3479_v2 }
  0xca   :  { %1221 = vmatpush1.bf16.msra.mxu1 %v1166_v40  ;;  %3300 = vmatprep.subr.msk.bf16.mxu0 %vm90_vm1, %v964_v11  ;;  %v1509_v42 = vpop.permute.xlu0 %1508  ;;  %v1511_v43 = vpop.permute.xlu1 %1510  ;;  %v3864_v11 = vshrl.u32 %v1723_v10, 7 }
  0xcb   :  { %1252 = vmatprep.mubr.bf16.mxu1 %v3479_v2  ;;  %3312 = vmatprep.subr.msk.bf16.mxu1 %vm90_vm1, %v1339_v41  ;;  %v1521_v5 = vsel %vm1520_vm9, %v1509_v42, %v1511_v43 }
  0xcc   :  { %v1530_v6 = vsel %vm90_vm1, %v1521_v5, 0  ;;  %v1733_v13 = vsub.s32 2, %v3864_v11  ;;  %v1737_v16 = vsub.s32 3, %v3864_v11  ;;  %v1725_v37 = vsub.s32 0, %v3864_v11 }
  0xce   :  { %v1513_v46 = vpop.permute.xlu0 %1512  ;;  %v1515_v50 = vpop.permute.xlu1 %1514  ;;  %v3871_v23 = vrot.slane %v24_v15, %v1733_v13  ;;  %v3873_v27 = vrot.slane %v24_v15, %v1737_v16 }
  0xcf   :  { %v1523_v58 = vsel %vm1520_vm9, %v1513_v46, %v1515_v50  ;;  %v1522_v4 = vsel %vm1520_vm9, %v1511_v43, %v1513_v46 }
  0xd0   :  { %3297 = vmatmul.mubr.msk.bf16.vlgmr.msra.gmra.mrb[0].mxu0 %vm86_vm2, %v3475_v35  ;;  %v1536_v61 = vsel %vm90_vm1, %v1523_v58, 0 }
  0xd1   :  { %1079 = vmatpush1.bf16.msra.mxu0 %v987_v45  ;;  %1110 = vmatprep.mubr.bf16.mxu0 %v3479_v2  ;;  %v3881_v45 = vrot.slane %v24_v15, %v1725_v37 }
  0xd2   :  { %3303 = vmatprep.subr.msk.bf16.mxu0 %vm90_vm1, %v1152_v47  ;;  %v1517_v52 = vpop.permute.xlu0 %1516  ;;  %v1519_v7 = vpop.permute.xlu1 %1518 }
  0xd3   :  { %v1524_v54 = vsel %vm1520_vm9, %v1515_v50, %v1517_v52  ;;  %v1525_v8 = vsel %vm1520_vm9, %v1517_v52, %v1519_v7 }
  0xd4   :  { %3306 = vmatmul.mubr.msk.bf16.vlgmr.msra.gmra.mrb[0].mxu1 %vm86_vm2, %v3476_v49  ;;  %v1542_v9 = vsel %vm90_vm1, %v1525_v8, 0 }
  0xd5   :  { %1406 = vmatpush1.bf16.msra.mxu1 %v1351_v51  ;;  %1437 = vmatprep.mubr.bf16.mxu1 %v3479_v2 }
  0xd6   :  { %3319 = vmatprep.subr.msk.bf16.mxu1 %vm90_vm1, %v1524_v54 }
  0xd8   :  { %3301 = vmatmul.mubr.msk.bf16.vlgmr.msra.gmra.mrb[4].mxu0 %vm86_vm2, %v3475_v35 }
  0xd9   :  { %1178 = vmatpush1.bf16.msra.mxu0 %v1160_v55  ;;  %1209 = vmatprep.mubr.bf16.mxu0 %v3479_v2  ;;  %v1741_v55 = vsub.s32 4, %v3864_v11 }
  0xda   :  { %3307 = vmatprep.subr.msk.bf16.mxu0 %vm90_vm1, %v1149_v25 }
  0xe0   :  { %3304 = vmatmul.mubr.msk.bf16.vlgmr.msra.gmra.mrb[0].mxu0 %vm86_vm2, %v3476_v49  ;;  %3313 = vmatmul.mubr.msk.bf16.vlgmr.msra.gmra.mrb[0].mxu1 %vm86_vm2, %v3477_v57 }
  0xe1   :  { %1264 = vmatpush1.bf16.msra.mxu0 %v1172_v59  ;;  %1295 = vmatprep.mubr.bf16.mxu0 %v3479_v2  ;;  %v1745_v59 = vsub.s32 5, %v3864_v11 }
  0xe2   :  { %3310 = vmatprep.subr.msk.bf16.mxu0 %vm90_vm1, %v1337_v60  ;;  %1591 = vmatpush1.bf16.msra.mxu1 %v1536_v61 }
  0xe3   :  { %1622 = vmatprep.mubr.bf16.mxu1 %v3479_v2  ;;  %v1691_v12 = vpop.permute.xlu0 %1690  ;;  %v1696_v17 = vpop.permute.xlu1 %1695  ;;  %v3894_v8 = vrot.slane %v24_v15, %v1745_v59 }
  0xe8   :  { %3308 = vmatmul.mubr.msk.bf16.vlgmr.msra.gmra.mrb[4].mxu0 %vm86_vm2, %v3476_v49 }
  0xe9   :  { %1363 = vmatpush1.bf16.msra.mxu0 %v1345_v63  ;;  %1394 = vmatprep.mubr.bf16.mxu0 %v3479_v2 }
  0xea   :  { %3314 = vmatprep.subr.msk.bf16.mxu0 %vm90_vm1, %v1334_v39  ;;  %v1729_v39 = vsub.s32 1, %v3864_v11 }
  0xec   :  { %3320 = vmatmul.mubr.msk.bf16.vlgmr.msra.gmra.mrb[0].mxu1 %vm86_vm2, %v3478_v0  ;;  %v3883_v49 = vrot.slane %v24_v15, %v1729_v39  ;;  %v1809_v39 = vld [vmem:[%s4269_s3 + $0x4] sm:$0xf] }
  0xed   :  { %1879 = vmatprep.mubr.bf16.mxu1 %v3479_v2 }
  0xf0   :  { %3311 = vmatmul.mubr.msk.bf16.vlgmr.msra.gmra.mrb[0].mxu0 %vm86_vm2, %v3477_v57 }
  0xf1   :  { %1449 = vmatpush1.bf16.msra.mxu0 %v1357_v3  ;;  %1480 = vmatprep.mubr.bf16.mxu0 %v3479_v2 }
  0xf2   :  { %3317 = vmatprep.subr.msk.bf16.mxu0 %vm90_vm1, %v1522_v4  ;;  %v3891_v4 = vrot.slane %v24_v15, %v1741_v55 }
  0xf8   :  { %3315 = vmatmul.mubr.msk.bf16.vlgmr.msra.gmra.mrb[4].mxu0 %vm86_vm2, %v3477_v57 }
  0xf9   :  { %1548 = vmatpush1.bf16.msra.mxu0 %v1530_v6  ;;  %1579 = vmatprep.mubr.bf16.mxu0 %v3479_v2 }
  0xfa   :  { %3321 = vmatprep.subr.msk.bf16.mxu0 %vm90_vm1, %v1519_v7 }
 0x100   :  { %3318 = vmatmul.mubr.msk.bf16.vlgmr.msra.gmra.mrb[0].mxu0 %vm86_vm2, %v3478_v0 }
 0x101   :  { %1634 = vmatpush1.bf16.msra.mxu0 %v1542_v9  ;;  %1665 = vmatprep.mubr.bf16.mxu0 %v3479_v2 }
 0x108   :  { %3322 = vmatmul.mubr.msk.bf16.vlgmr.msra.gmra.mrb[4].mxu0 %vm86_vm2, %v3478_v0 }
 0x109   :  { %2309 = vmatprep.mubr.bf16.mxu0 %v3479_v2 }
 0x1bf   :  { %v1624_v14 = vpop.f32.mrb[0].mxu1 }
 0x1c0   :  { %v1626_v18 = vpop.f32.mrb[1].mxu1  ;;  %v1700_v19 = vadd.f32 %v1691_v12, %v1624_v14 }
 0x1c1   :  { %v1701_v20 = vadd.f32 %v1691_v12, %v1626_v18  ;;  %v1628_v21 = vpop.f32.mrb[2].mxu1 }
 0x1c2   :  { %v1706_v22 = vadd.f32 %v1696_v17, %v1628_v21  ;;  %v1630_v24 = vpop.f32.mrb[3].mxu1  ;;  %v1712_v25 = vmax.f32 %v1700_v19, 0.0 }
 0x1c3   :  { %v1713_v26 = vmax.f32 %v1701_v20, 0.0  ;;  %v1707_v28 = vadd.f32 %v1696_v17, %v1630_v24 }
 0x1c4   :  { %v1718_v29 = vmax.f32 %v1706_v22, 0.0  ;;  %v1755_v32 = vmul.f32 %v3871_v23, %v1712_v25 }
 0x1c5   :  { %v1719_v30 = vmax.f32 %v1707_v28, 0.0  ;;  %v1756_v33 = vmul.f32 %v3873_v27, %v1713_v26 }
 0x1c6   :  { %v1761_v31 = vmul.f32 %v3871_v23, %v1718_v29 }
 0x1c7   :  { %v1762_v34 = vmul.f32 %v3873_v27, %v1719_v30 }
 0x1c8   :  { %v1767_v35 = vpack.c.bf16 %v1761_v31, %v1755_v32 }
 0x1c9   :  { %v1768_v36 = vpack.c.bf16 %v1762_v34, %v1756_v33  ;;  %v1817_v33 = vld [vmem:[%s4268_s4] sm:$0xff] }
 0x1d3   :  { %v1581_v38 = vpop.f32.mrb[0].mxu0 }
 0x1d4   :  { %v1698_v40 = vadd.f32 %v1691_v12, %v1581_v38  ;;  %v1583_v41 = vpop.f32.mrb[1].mxu0 }
 0x1d5   :  { %v1699_v42 = vadd.f32 %v1691_v12, %v1583_v41  ;;  %v1585_v43 = vpop.f32.mrb[2].mxu0 }
 0x1d6   :  { %v1710_v44 = vmax.f32 %v1698_v40, 0.0  ;;  %v1704_v46 = vadd.f32 %v1696_v17, %v1585_v43  ;;  %v1587_v47 = vpop.f32.mrb[3].mxu0 }
 0x1d7   :  { %v1711_v48 = vmax.f32 %v1699_v42, 0.0  ;;  %v1705_v50 = vadd.f32 %v1696_v17, %v1587_v47 }
 0x1d8   :  { %v1716_v51 = vmax.f32 %v1704_v46, 0.0  ;;  %v1753_v53 = vmul.f32 %v3881_v45, %v1710_v44 }
 0x1d9   :  { %v1717_v52 = vmax.f32 %v1705_v50, 0.0  ;;  %v1754_v56 = vmul.f32 %v3883_v49, %v1711_v48 }
 0x1da   :  { %v1759_v54 = vmul.f32 %v3881_v45, %v1716_v51 }
 0x1db   :  { %v1760_v57 = vmul.f32 %v3883_v49, %v1717_v52  ;;  %v1667_v58 = vpop.f32.mrb[4].mxu0 }
 0x1dc   :  { %v1702_v60 = vadd.f32 %v1691_v12, %v1667_v58  ;;  %v1669_v61 = vpop.f32.mrb[5].mxu0  ;;  %v1765_v62 = vpack.c.bf16 %v1759_v54, %v1753_v53 }
 0x1dd   :  { %v1703_v63 = vadd.f32 %v1691_v12, %v1669_v61  ;;  %v1671_v0 = vpop.f32.mrb[6].mxu0  ;;  %v1766_v1 = vpack.c.bf16 %v1760_v57, %v1754_v56  ;;  %v1808_v57 = vld [vmem:[%s4269_s3] sm:$0xf] }
 0x1de   :  { %v1714_v3 = vmax.f32 %v1702_v60, 0.0  ;;  %v1708_v5 = vadd.f32 %v1696_v17, %v1671_v0  ;;  %1777 = vrot.lane.b32.xlu1 %v1765_v62, %s3488_s5  ;;  %v1673_v6 = vpop.f32.mrb[7].mxu0  ;;  %v4053_v62 = vld [vmem:[%s4269_s3 + $0xc] sm:$0xf] }
 0x1df   :  { %v1715_v7 = vmax.f32 %v1703_v63, 0.0  ;;  %v1709_v9 = vadd.f32 %v1696_v17, %v1673_v6  ;;  %1779 = vrot.lane.b32.xlu0 %v1766_v1, %s3488_s5 }
 0x1e0   :  { %v1720_v10 = vmax.f32 %v1708_v5, 0.0  ;;  %v1757_v12 = vmul.f32 %v3891_v4, %v1714_v3 }
 0x1e1   :  { %v1721_v11 = vmax.f32 %v1709_v9, 0.0  ;;  %v1758_v14 = vmul.f32 %v3894_v8, %v1715_v7 }
 0x1e2   :  { %v1763_v13 = vmul.f32 %v3891_v4, %v1720_v10  ;;  %1781 = vrot.lane.b32.xlu1 %v1767_v35, %s3488_s5 }
 0x1e3   :  { %v1764_v16 = vmul.f32 %v3894_v8, %v1721_v11  ;;  %1783 = vrot.lane.b32.xlu0 %v1768_v36, %s3488_s5 }
 0x1e4   :  { %v1769_v18 = vpack.c.bf16 %v1763_v13, %v1757_v12 }
 0x1e5   :  { %v1770_v15 = vpack.c.bf16 %v1764_v16, %v1758_v14 }
 0x1e6   :  { %1785 = vrot.lane.b32.xlu1 %v1769_v18, %s3488_s5  ;;  %v4095_v18 = vld [vmem:[%s4269_s3 + $0x10] sm:$0xf] }
 0x1e7   :  { %1787 = vrot.lane.b32.xlu0 %v1770_v15, %s3488_s5 }
 0x250   :  { %v3905_v17 = vpop.permute.xlu1 %1777 }
 0x251   :  { %v1780_v19 = vpop.permute.xlu0 %1779  ;;  %v1802_v25 = vsel %vm1789_vm10, 0, %v3905_v17 }
 0x252   :  { %v3909_v20 = vsel %vm1789_vm10, %v3905_v17, %v1780_v19 }
 0x253   :  { %1822 = vrot.lane.b32.xlu1 %v3909_v20, %s3480_s27 }
 0x254   :  { %v1782_v21 = vpop.permute.xlu1 %1781 }
 0x255   :  { %v3914_v22 = vsel %vm1789_vm10, %v1780_v19, %v1782_v21  ;;  %v1784_v24 = vpop.permute.xlu0 %1783  ;;  %v1810_v19 = vld [vmem:[%s4269_s3 + $0x8] sm:$0xf] }
 0x256   :  { %1824 = vrot.lane.b32.xlu0 %v3914_v22, %s3480_s27  ;;  %v3922_v28 = vsel %vm1789_vm10, %v1782_v21, %v1784_v24 }
 0x257   :  { %1820 = vrot.lane.b32.xlu1 %v1802_v25, %s3480_s27 }
 0x258   :  { %v1786_v26 = vpop.permute.xlu1 %1785 }
 0x259   :  { %v3925_v29 = vsel %vm1789_vm10, %v1784_v24, %v1786_v26  ;;  %v1788_v30 = vpop.permute.xlu0 %1787 }
 0x25a   :  { %v3928_v31 = vsel %vm1789_vm10, %v1786_v26, %v1788_v30  ;;  %1826 = vrot.lane.b32.xlu0 %v3922_v28, %s3480_s27  ;;  %v4118_v26 = vld [vmem:[%s4269_s3 + $0x14] sm:$0xf] }
 0x25b   :  { %1828 = vrot.lane.b32.xlu1 %v3925_v29, %s3480_s27  ;;  %v1806_v32 = vsel %vm1804_vm11, %v3928_v31, 0 }
 0x25e   :  { %1830 = vrot.lane.b32.xlu0 %v1806_v32, %s3480_s27 }
 0x25f   :  { %2098 = vrot.lane.b32.xlu1 %v3909_v20, %s3481_s0 }
 0x262   :  { %2100 = vrot.lane.b32.xlu0 %v3914_v22, %s3481_s0 }
 0x263   :  { %2096 = vrot.lane.b32.xlu1 %v1802_v25, %s3481_s0 }
 0x266   :  { %2102 = vrot.lane.b32.xlu0 %v3922_v28, %s3481_s0 }
 0x267   :  { %2104 = vrot.lane.b32.xlu1 %v3925_v29, %s3481_s0 }
 0x26a   :  { %2106 = vrot.lane.b32.xlu0 %v1806_v32, %s3481_s0 }
 0x26b   :  { %2257 = vrot.lane.b32.xlu1 %v3922_v28, %s3482_s28 }
 0x26e   :  { %2259 = vrot.lane.b32.xlu0 %v3925_v29, %s3482_s28 }
 0x26f   :  { %2253 = vrot.lane.b32.xlu1 %v3909_v20, %s3482_s28 }
 0x272   :  { %2255 = vrot.lane.b32.xlu0 %v3914_v22, %s3482_s28 }
 0x273   :  { %2251 = vrot.lane.b32.xlu1 %v1802_v25, %s3482_s28 }
 0x276   :  { %2408 = vrot.lane.b32.xlu0 %v3909_v20, %s3483_s29 }
 0x277   :  { %2410 = vrot.lane.b32.xlu1 %v3914_v22, %s3483_s29 }
 0x27a   :  { %2406 = vrot.lane.b32.xlu0 %v1802_v25, %s3483_s29 }
 0x27b   :  { %2261 = vrot.lane.b32.xlu1 %v1806_v32, %s3482_s28 }
 0x27e   :  { %2412 = vrot.lane.b32.xlu0 %v3922_v28, %s3483_s29 }
 0x27f   :  { %2414 = vrot.lane.b32.xlu1 %v3925_v29, %s3483_s29 }
 0x282   :  { %2416 = vrot.lane.b32.xlu0 %v1806_v32, %s3483_s29 }
 0x283   :  { %2567 = vrot.lane.b32.xlu1 %v3922_v28, %s3484_s30 }
 0x286   :  { %2569 = vrot.lane.b32.xlu0 %v3925_v29, %s3484_s30 }
 0x287   :  { %2563 = vrot.lane.b32.xlu1 %v3909_v20, %s3484_s30 }
 0x28a   :  { %2565 = vrot.lane.b32.xlu0 %v3914_v22, %s3484_s30 }
 0x28b   :  { %2561 = vrot.lane.b32.xlu1 %v1802_v25, %s3484_s30 }
 0x28e   :  { %2718 = vrot.lane.b32.xlu0 %v3909_v20, %s3485_s7 }
 0x28f   :  { %2720 = vrot.lane.b32.xlu1 %v3914_v22, %s3485_s7 }
 0x292   :  { %2716 = vrot.lane.b32.xlu0 %v1802_v25, %s3485_s7 }
 0x293   :  { %2571 = vrot.lane.b32.xlu1 %v1806_v32, %s3484_s30 }
 0x296   :  { %2722 = vrot.lane.b32.xlu0 %v3922_v28, %s3485_s7 }
 0x297   :  { %2724 = vrot.lane.b32.xlu1 %v3925_v29, %s3485_s7 }
 0x29a   :  { %2726 = vrot.lane.b32.xlu0 %v1806_v32, %s3485_s7 }
 0x29b   :  { %2877 = vrot.lane.b32.xlu1 %v3922_v28, %s3486_s8 }
 0x29e   :  { %2879 = vrot.lane.b32.xlu0 %v3925_v29, %s3486_s8 }
 0x29f   :  { %2873 = vrot.lane.b32.xlu1 %v3909_v20, %s3486_s8 }
 0x2a2   :  { %2875 = vrot.lane.b32.xlu0 %v3914_v22, %s3486_s8 }
 0x2a3   :  { %2871 = vrot.lane.b32.xlu1 %v1802_v25, %s3486_s8 }
 0x2a6   :  { %3028 = vrot.lane.b32.xlu0 %v3909_v20, %s3487_s9 }
 0x2a7   :  { %3030 = vrot.lane.b32.xlu1 %v3914_v22, %s3487_s9 }
 0x2aa   :  { %3026 = vrot.lane.b32.xlu0 %v1802_v25, %s3487_s9 }
 0x2ab   :  { %2881 = vrot.lane.b32.xlu1 %v1806_v32, %s3486_s8 }
 0x2ae   :  { %3032 = vrot.lane.b32.xlu0 %v3922_v28, %s3487_s9 }
 0x2af   :  { %3034 = vrot.lane.b32.xlu1 %v3925_v29, %s3487_s9 }
 0x2b2   :  { %3036 = vrot.lane.b32.xlu0 %v1806_v32, %s3487_s9 }
 0x2b3   :  { %3183 = vperm.xlu1 %3463, %v1817_v33  }
 0x2c5   :  { %v1823_v34 = vpop.permute.xlu1 %1822 }
 0x2c8   :  { %v1825_v35 = vpop.permute.xlu0 %1824 }
 0x2c9   :  { %v1821_v36 = vpop.permute.xlu1 %1820  ;;  %v1833_v37 = vsel %vm80_vm0, %v1823_v34, %v1825_v35 }
 0x2ca   :  { %v1832_v38 = vsel %vm80_vm0, %v1821_v36, %v1823_v34  ;;  %1847 = vmatprep.subr.bf16.mxu1 %v1833_v37 }
 0x2cb   :  { %1848 = vmatpush1.bf16.msra.mxu1 %v1832_v38 }
 0x2cc   :  { %v1827_v40 = vpop.permute.xlu0 %1826 }
 0x2cd   :  { %v1829_v41 = vpop.permute.xlu1 %1828  ;;  %v1834_v43 = vsel %vm80_vm0, %v1825_v35, %v1827_v40 }
 0x2ce   :  { %3323 = vmatmul.mubr.msk.bf16.vlgmr.msra.gmra.mrb[4].mxu1 %vm1843_vm12, %v1809_v39  ;;  %v1835_v42 = vsel %vm80_vm0, %v1827_v40, %v1829_v41 }
 0x2cf   :  { %1888 = vmatprep.subr.bf16.mxu1 %v1835_v42  ;;  %1920 = vmatprep.mubr.bf16.mxu1 %v3479_v2 }
 0x2d0   :  { %1889 = vmatpush1.bf16.msra.mxu1 %v1834_v43  ;;  %v1831_v44 = vpop.permute.xlu0 %1830  ;;  %v4162_v43 = vld [vmem:[%s4269_s3 + $0x18] sm:$0xf] }
 0x2d1   :  { %v2099_v46 = vpop.permute.xlu1 %2098  ;;  %1929 = vmatprep.subr.bf16.mxu1 %v1831_v44  ;;  %v1836_v50 = vsel %vm80_vm0, %v1829_v41, %v1831_v44 }
 0x2d4   :  { %v4019_v47 = vpop.permute.xlu0 %2100 }
 0x2d5   :  { %v2097_v48 = vpop.permute.xlu1 %2096  ;;  %v2109_v6 = vsel %vm410_vm3, %v2099_v46, %v4019_v47 }
 0x2d6   :  { %3324 = vmatmul.mubr.msk.bf16.vlgmr.msra.gmra.mrb[8].mxu1 %vm1843_vm12, %v1809_v39  ;;  %v2108_v14 = vsel %vm410_vm3, %v2097_v48, %v2099_v46 }
 0x2d7   :  { %1930 = vmatpush1.bf16.msra.mxu1 %v1836_v50  ;;  %1961 = vmatprep.mubr.bf16.mxu1 %v3479_v2 }
 0x2d8   :  { %1973 = vmatprep.subr.bf16.mxu1 %v3909_v20  ;;  %v4025_v51 = vpop.permute.xlu0 %2102 }
 0x2d9   :  { %v4027_v52 = vpop.permute.xlu1 %2104  ;;  %v2110_v24 = vsel %vm410_vm3, %v4019_v47, %v4025_v51 }
 0x2da   :  { %v2111_v16 = vsel %vm410_vm3, %v4025_v51, %v4027_v52 }
 0x2dc   :  { %v4029_v53 = vpop.permute.xlu0 %2106 }
 0x2dd   :  { %v4032_v54 = vpop.permute.xlu1 %2257  ;;  %v2112_v32 = vsel %vm410_vm3, %v4027_v52, %v4029_v53 }
 0x2de   :  { %3325 = vmatmul.mubr.msk.bf16.vlgmr.msra.gmra.mrb[12].mxu1 %vm1843_vm12, %v1809_v39 }
 0x2df   :  { %3327 = vmatpush1.bf16.msk.msra.mxu1 %vm3326_vm13, %v3905_v17  ;;  %2005 = vmatprep.mubr.bf16.mxu1 %v3479_v2 }
 0x2e0   :  { %2014 = vmatprep.subr.bf16.mxu1 %v3922_v28  ;;  %v4038_v55 = vpop.permute.xlu0 %2259 }
 0x2e1   :  { %v2254_v56 = vpop.permute.xlu1 %2253  ;;  %v2266_v34 = vsel %vm595_vm4, %v4032_v54, %v4038_v55 }
 0x2e4   :  { %v4043_v58 = vpop.permute.xlu0 %2255 }
 0x2e5   :  { %v2252_v59 = vpop.permute.xlu1 %2251  ;;  %v2264_v60 = vsel %vm595_vm4, %v2254_v56, %v4043_v58  ;;  %v2265_v41 = vsel %vm595_vm4, %v4043_v58, %v4032_v54 }
 0x2e6   :  { %v2263_v61 = vsel %vm595_vm4, %v2252_v59, %v2254_v56  ;;  %3328 = vmatmul.mubr.msk.bf16.vlgmr.msra.gmra.mrb[16].mxu1 %vm1843_vm12, %v1808_v57  ;;  %2277 = vmatprep.subr.bf16.mxu0 %v2264_v60 }
 0x2e7   :  { %2015 = vmatpush1.bf16.msra.mxu1 %v3914_v22  ;;  %2278 = vmatpush1.bf16.msra.mxu0 %v2263_v61 }
 0x2e8   :  { %3330 = vmatprep.subr.msk.bf16.mxu1 %vm1804_vm11, %v3928_v31  ;;  %v4057_v63 = vpop.permute.xlu0 %2408  ;;  %2046 = vmatprep.mubr.bf16.mxu1 %v3479_v2 }
 0x2e9   :  { %v4060_v0 = vpop.permute.xlu1 %2410 }
 0x2ea   :  { %3335 = vmatmul.mubr.msk.bf16.vlgmr.msra.gmra.mrb[8].mxu0 %vm1843_vm12, %v4053_v62  ;;  %v2419_v42 = vsel %vm780_vm5, %v4057_v63, %v4060_v0 }
 0x2eb   :  { %2391 = vmatprep.mubr.bf16.mxu0 %v3479_v2 }
 0x2ec   :  { %v4065_v1 = vpop.permute.xlu0 %2406 }
 0x2ed   :  { %v2262_v3 = vpop.permute.xlu1 %2261  ;;  %v2418_v51 = vsel %vm780_vm5, %v4065_v1, %v4057_v63 }
 0x2ee   :  { %v2267_v5 = vsel %vm595_vm4, %v4038_v55, %v2262_v3  ;;  %3329 = vmatmul.mubr.msk.bf16.vlgmr.msra.gmra.mrb[20].mxu1 %vm1843_vm12, %v1808_v57  ;;  %2359 = vmatprep.subr.bf16.mxu0 %v2262_v3 }
 0x2ef   :  { %2056 = vmatpush1.bf16.msra.mxu1 %v3925_v29  ;;  %2360 = vmatpush1.bf16.msra.mxu0 %v2267_v5  ;;  %v1816_v5 = vld [vmem:[%s4269_s3 + $0x20] sm:$0xf] }
 0x2f0   :  { %2122 = vmatprep.subr.bf16.mxu1 %v2109_v6  ;;  %v2413_v7 = vpop.permute.xlu0 %2412  ;;  %2087 = vmatprep.mubr.bf16.mxu1 %v3479_v2 }
 0x2f1   :  { %v4074_v9 = vpop.permute.xlu1 %2414  ;;  %v2420_v11 = vsel %vm780_vm5, %v4060_v0, %v2413_v7 }
 0x2f2   :  { %v2421_v10 = vsel %vm780_vm5, %v2413_v7, %v4074_v9  ;;  %3337 = vmatmul.mubr.msk.bf16.vlgmr.msra.gmra.mrb[12].mxu0 %vm1843_vm12, %v4053_v62 }
 0x2f3   :  { %2473 = vmatprep.subr.bf16.mxu0 %v2421_v10  ;;  %2505 = vmatprep.mubr.bf16.mxu0 %v3479_v2 }
 0x2f4   :  { %2474 = vmatpush1.bf16.msra.mxu0 %v2420_v11  ;;  %v4083_v12 = vpop.permute.xlu0 %2416 }
 0x2f5   :  { %v4085_v13 = vpop.permute.xlu1 %2567  ;;  %v2422_v58 = vsel %vm780_vm5, %v4074_v9, %v4083_v12 }
 0x2f6   :  { %3331 = vmatmul.mubr.msk.bf16.vlgmr.msra.gmra.mrb[24].mxu1 %vm1843_vm12, %v1808_v57 }
 0x2f7   :  { %2123 = vmatpush1.bf16.msra.mxu1 %v2108_v14  ;;  %2154 = vmatprep.mubr.bf16.mxu1 %v3479_v2 }
 0x2f8   :  { %2163 = vmatprep.subr.bf16.mxu1 %v2111_v16  ;;  %v4098_v15 = vpop.permute.xlu0 %2569 }
 0x2f9   :  { %v2564_v17 = vpop.permute.xlu1 %2563  ;;  %v2576_v60 = vsel %vm965_vm6, %v4085_v13, %v4098_v15 }
 0x2fa   :  { %3339 = vmatmul.mubr.msk.bf16.vlgmr.msra.gmra.mrb[16].mxu0 %vm1843_vm12, %v4095_v18 }
 0x2fb   :  { %2619 = vmatprep.mubr.bf16.mxu0 %v3479_v2 }
 0x2fc   :  { %v4106_v20 = vpop.permute.xlu0 %2565 }
 0x2fd   :  { %v2562_v21 = vpop.permute.xlu1 %2561  ;;  %v2574_v22 = vsel %vm965_vm6, %v2564_v17, %v4106_v20  ;;  %v2575_v1 = vsel %vm965_vm6, %v4106_v20, %v4085_v13 }
 0x2fe   :  { %v2573_v25 = vsel %vm965_vm6, %v2562_v21, %v2564_v17  ;;  %3332 = vmatmul.mubr.msk.bf16.vlgmr.msra.gmra.mrb[28].mxu1 %vm1843_vm12, %v1810_v19  ;;  %2587 = vmatprep.subr.bf16.mxu0 %v2574_v22 }
 0x2ff   :  { %2164 = vmatpush1.bf16.msra.mxu1 %v2110_v24  ;;  %2588 = vmatpush1.bf16.msra.mxu0 %v2573_v25 }
 0x300   :  { %2204 = vmatprep.subr.bf16.mxu1 %v4029_v53  ;;  %v4121_v28 = vpop.permute.xlu0 %2718  ;;  %2195 = vmatprep.mubr.bf16.mxu1 %v3479_v2  ;;  %v1815_v53 = vld [vmem:[%s4269_s3 + $0x1c] sm:$0xf] }
 0x301   :  { %v4124_v29 = vpop.permute.xlu1 %2720 }
 0x302   :  { %3341 = vmatmul.mubr.msk.bf16.vlgmr.msra.gmra.mrb[20].mxu0 %vm1843_vm12, %v4118_v26  ;;  %v2729_v3 = vsel %vm1150_vm7, %v4121_v28, %v4124_v29 }
 0x303   :  { %2701 = vmatprep.mubr.bf16.mxu0 %v3479_v2 }
 0x304   :  { %v4129_v30 = vpop.permute.xlu0 %2716 }
 0x305   :  { %v2572_v31 = vpop.permute.xlu1 %2571  ;;  %v2728_v6 = vsel %vm1150_vm7, %v4129_v30, %v4121_v28 }
 0x306   :  { %v2577_v33 = vsel %vm965_vm6, %v4098_v15, %v2572_v31  ;;  %3333 = vmatmul.mubr.msk.bf16.vlgmr.msra.gmra.mrb[32].mxu1 %vm1843_vm12, %v1810_v19  ;;  %2669 = vmatprep.subr.bf16.mxu0 %v2572_v31 }
 0x307   :  { %2205 = vmatpush1.bf16.msra.mxu1 %v2112_v32  ;;  %2670 = vmatpush1.bf16.msra.mxu0 %v2577_v33 }
 0x308   :  { %2318 = vmatprep.subr.bf16.mxu1 %v2266_v34  ;;  %v2723_v35 = vpop.permute.xlu0 %2722  ;;  %2236 = vmatprep.mubr.bf16.mxu1 %v3479_v2 }
 0x309   :  { %v4141_v36 = vpop.permute.xlu1 %2724  ;;  %v2730_v38 = vsel %vm1150_vm7, %v4124_v29, %v2723_v35 }
 0x30a   :  { %v2731_v37 = vsel %vm1150_vm7, %v2723_v35, %v4141_v36  ;;  %3343 = vmatmul.mubr.msk.bf16.vlgmr.msra.gmra.mrb[24].mxu0 %vm1843_vm12, %v4118_v26 }
 0x30b   :  { %2783 = vmatprep.subr.bf16.mxu0 %v2731_v37  ;;  %2815 = vmatprep.mubr.bf16.mxu0 %v3479_v2 }
 0x30c   :  { %2784 = vmatpush1.bf16.msra.mxu0 %v2730_v38  ;;  %v2727_v39 = vpop.permute.xlu0 %2726 }
 0x30d   :  { %v4150_v40 = vpop.permute.xlu1 %2877  ;;  %v2732_v7 = vsel %vm1150_vm7, %v4141_v36, %v2727_v39 }
 0x30e   :  { %3334 = vmatmul.mubr.msk.bf16.vlgmr.msra.gmra.mrb[36].mxu1 %vm1843_vm12, %v1810_v19 }
 0x30f   :  { %2319 = vmatpush1.bf16.msra.mxu1 %v2265_v41  ;;  %2350 = vmatprep.mubr.bf16.mxu1 %v3479_v2 }
 0x310   :  { %2432 = vmatprep.subr.bf16.mxu1 %v2419_v42  ;;  %v2880_v44 = vpop.permute.xlu0 %2879 }
 0x311   :  { %v2874_v46 = vpop.permute.xlu1 %2873  ;;  %v2886_v9 = vsel %vm1335_vm8, %v4150_v40, %v2880_v44 }
 0x312   :  { %3345 = vmatmul.mubr.msk.bf16.vlgmr.msra.gmra.mrb[28].mxu0 %vm1843_vm12, %v4162_v43 }
 0x313   :  { %2929 = vmatprep.mubr.bf16.mxu0 %v3479_v2 }
 0x314   :  { %v2876_v47 = vpop.permute.xlu0 %2875 }
 0x315   :  { %v2872_v48 = vpop.permute.xlu1 %2871  ;;  %v2884_v50 = vsel %vm1335_vm8, %v2874_v46, %v2876_v47  ;;  %v2885_v10 = vsel %vm1335_vm8, %v2876_v47, %v4150_v40 }
 0x316   :  { %v2883_v52 = vsel %vm1335_vm8, %v2872_v48, %v2874_v46  ;;  %3336 = vmatmul.mubr.msk.bf16.vlgmr.msra.gmra.mrb[40].mxu1 %vm1843_vm12, %v4053_v62  ;;  %2897 = vmatprep.subr.bf16.mxu0 %v2884_v50 }
 0x317   :  { %2433 = vmatpush1.bf16.msra.mxu1 %v2418_v51  ;;  %2898 = vmatpush1.bf16.msra.mxu0 %v2883_v52 }
 0x318   :  { %2514 = vmatprep.subr.bf16.mxu1 %v4083_v12  ;;  %v3029_v54 = vpop.permute.xlu0 %3028  ;;  %2464 = vmatprep.mubr.bf16.mxu1 %v3479_v2 }
 0x319   :  { %v3031_v55 = vpop.permute.xlu1 %3030 }
 0x31a   :  { %3347 = vmatmul.mubr.msk.bf16.vlgmr.msra.gmra.mrb[32].mxu0 %vm1843_vm12, %v1815_v53  ;;  %v3039_v11 = vsel %vm1520_vm9, %v3029_v54, %v3031_v55 }
 0x31b   :  { %3011 = vmatprep.mubr.bf16.mxu0 %v3479_v2 }
 0x31c   :  { %v3027_v56 = vpop.permute.xlu0 %3026 }
 0x31d   :  { %v2882_v57 = vpop.permute.xlu1 %2881  ;;  %v3038_v12 = vsel %vm1520_vm9, %v3027_v56, %v3029_v54 }
 0x31e   :  { %v2887_v59 = vsel %vm1335_vm8, %v2880_v44, %v2882_v57  ;;  %3338 = vmatmul.mubr.msk.bf16.vlgmr.msra.gmra.mrb[44].mxu1 %vm1843_vm12, %v4095_v18  ;;  %2979 = vmatprep.subr.bf16.mxu0 %v2882_v57 }
 0x31f   :  { %2515 = vmatpush1.bf16.msra.mxu1 %v2422_v58  ;;  %2980 = vmatpush1.bf16.msra.mxu0 %v2887_v59 }
 0x320   :  { %2628 = vmatprep.subr.bf16.mxu1 %v2576_v60  ;;  %v3033_v61 = vpop.permute.xlu0 %3032  ;;  %2546 = vmatprep.mubr.bf16.mxu1 %v3479_v2 }
 0x321   :  { %v3035_v62 = vpop.permute.xlu1 %3034  ;;  %v3040_v0 = vsel %vm1520_vm9, %v3031_v55, %v3033_v61 }
 0x322   :  { %v3041_v63 = vsel %vm1520_vm9, %v3033_v61, %v3035_v62  ;;  %3349 = vmatmul.mubr.msk.bf16.vlgmr.msra.gmra.mrb[36].mxu0 %vm1843_vm12, %v1815_v53 }
 0x323   :  { %3093 = vmatprep.subr.bf16.mxu0 %v3041_v63  ;;  %3125 = vmatprep.mubr.bf16.mxu0 %v3479_v2 }
 0x324   :  { %3094 = vmatpush1.bf16.msra.mxu0 %v3040_v0  ;;  %v3037_v13 = vpop.permute.xlu0 %3036 }
 0x325   :  { %v3042_v14 = vsel %vm1520_vm9, %v3035_v62, %v3037_v13 }
 0x326   :  { %3340 = vmatmul.mubr.msk.bf16.vlgmr.msra.gmra.mrb[48].mxu1 %vm1843_vm12, %v4095_v18 }
 0x327   :  { %2629 = vmatpush1.bf16.msra.mxu1 %v2575_v1  ;;  %2660 = vmatprep.mubr.bf16.mxu1 %v3479_v2 }
 0x328   :  { %2742 = vmatprep.subr.bf16.mxu1 %v2729_v3 }
 0x32a   :  { %3351 = vmatmul.mubr.msk.bf16.vlgmr.msra.gmra.mrb[40].mxu0 %vm1843_vm12, %v1816_v5 }
 0x32e   :  { %3342 = vmatmul.mubr.msk.bf16.vlgmr.msra.gmra.mrb[52].mxu1 %vm1843_vm12, %v4118_v26 }
 0x32f   :  { %2743 = vmatpush1.bf16.msra.mxu1 %v2728_v6  ;;  %2774 = vmatprep.mubr.bf16.mxu1 %v3479_v2 }
 0x330   :  { %2824 = vmatprep.subr.bf16.mxu1 %v2727_v39 }
 0x336   :  { %3344 = vmatmul.mubr.msk.bf16.vlgmr.msra.gmra.mrb[56].mxu1 %vm1843_vm12, %v4162_v43 }
 0x337   :  { %2825 = vmatpush1.bf16.msra.mxu1 %v2732_v7  ;;  %2856 = vmatprep.mubr.bf16.mxu1 %v3479_v2 }
 0x338   :  { %2938 = vmatprep.subr.bf16.mxu1 %v2886_v9 }
 0x33e   :  { %3346 = vmatmul.mubr.msk.bf16.vlgmr.msra.gmra.mrb[60].mxu1 %vm1843_vm12, %v4162_v43 }
 0x33f   :  { %2939 = vmatpush1.bf16.msra.mxu1 %v2885_v10  ;;  %2970 = vmatprep.mubr.bf16.mxu1 %v3479_v2 }
 0x340   :  { %3052 = vmatprep.subr.bf16.mxu1 %v3039_v11 }
 0x346   :  { %3348 = vmatmul.mubr.msk.bf16.vlgmr.msra.gmra.mrb[64].mxu1 %vm1843_vm12, %v1815_v53 }
 0x347   :  { %3053 = vmatpush1.bf16.msra.mxu1 %v3038_v12  ;;  %3084 = vmatprep.mubr.bf16.mxu1 %v3479_v2 }
 0x348   :  { %3134 = vmatprep.subr.bf16.mxu1 %v3037_v13 }
 0x34e   :  { %3350 = vmatmul.mubr.msk.bf16.vlgmr.msra.gmra.mrb[68].mxu1 %vm1843_vm12, %v1816_v5 }
 0x34f   :  { %3135 = vmatpush1.bf16.msra.mxu1 %v3042_v14  ;;  %3166 = vmatprep.mubr.bf16.mxu1 %v3479_v2 }
 0x356   :  { %3352 = vmatmul.mubr.msk.bf16.vlgmr.msra.gmra.mrb[72].mxu1 %vm1843_vm12, %v1816_v5 }
 0x3a1   :  { %v1881_v16 = vpop.f32.mrb[4].mxu1 }
 0x3a2   :  { %v1883_v18 = vpop.f32.mrb[5].mxu1 }
 0x3a3   :  { %v1885_v15 = vpop.f32.mrb[6].mxu1 }
 0x3a4   :  { %v1886_v17 = vpop.f32.mrb[7].mxu1 }
 0x3a9   :  { %v1922_v19 = vpop.f32.mrb[8].mxu1 }
 0x3aa   :  { %v1924_v20 = vpop.f32.mrb[9].mxu1 }
 0x3ab   :  { %v1926_v21 = vpop.f32.mrb[10].mxu1 }
 0x3ac   :  { %v1927_v22 = vpop.f32.mrb[11].mxu1 }
 0x3b1   :  { %v1963_v24 = vpop.f32.mrb[12].mxu1 }
 0x3b2   :  { %v1965_v25 = vpop.f32.mrb[13].mxu1 }
 0x3b3   :  { %v1967_v26 = vpop.f32.mrb[14].mxu1 }
 0x3b4   :  { %v1968_v28 = vpop.f32.mrb[15].mxu1 }
 0x3b9   :  { %v2007_v29 = vpop.f32.mrb[16].mxu1 }
 0x3ba   :  { %v2008_v30 = vadd.f32 %v2007_v29, %v1881_v16  ;;  %v2009_v31 = vpop.f32.mrb[17].mxu1 }
 0x3bb   :  { %v2010_v32 = vadd.f32 %v2009_v31, %v1883_v18  ;;  %v2011_v33 = vpop.f32.mrb[18].mxu1 }
 0x3bc   :  { %v2012_v2 = vpop.f32.mrb[19].mxu1 }
 0x3bd   :  { %v2311_v34 = vpop.f32.mrb[8].mxu0 }
 0x3be   :  { %v2313_v35 = vpop.f32.mrb[9].mxu0 }
 0x3bf   :  { %v2315_v36 = vpop.f32.mrb[10].mxu0 }
 0x3c0   :  { %v2316_v37 = vpop.f32.mrb[11].mxu0 }
 0x3c1   :  { %v2048_v38 = vpop.f32.mrb[20].mxu1 }
 0x3c2   :  { %v2049_v39 = vadd.f32 %v2048_v38, %v1922_v19  ;;  %v2050_v40 = vpop.f32.mrb[21].mxu1 }
 0x3c3   :  { %v2051_v41 = vadd.f32 %v2050_v40, %v1924_v20  ;;  %v2052_v42 = vpop.f32.mrb[22].mxu1 }
 0x3c4   :  { %v2053_v43 = vpop.f32.mrb[23].mxu1 }
 0x3c5   :  { %v2393_v44 = vpop.f32.mrb[12].mxu0 }
 0x3c6   :  { %v2395_v46 = vpop.f32.mrb[13].mxu0 }
 0x3c7   :  { %v2397_v47 = vpop.f32.mrb[14].mxu0 }
 0x3c8   :  { %v2398_v48 = vpop.f32.mrb[15].mxu0 }
 0x3c9   :  { %v2089_v50 = vpop.f32.mrb[24].mxu1 }
 0x3ca   :  { %v2090_v51 = vadd.f32 %v2089_v50, %v1963_v24  ;;  %v2091_v52 = vpop.f32.mrb[25].mxu1 }
 0x3cb   :  { %v2092_v53 = vadd.f32 %v2091_v52, %v1965_v25  ;;  %v2093_v54 = vpop.f32.mrb[26].mxu1 }
 0x3cc   :  { %v2094_v55 = vpop.f32.mrb[27].mxu1 }
 0x3cd   :  { %v2507_v56 = vpop.f32.mrb[16].mxu0 }
 0x3ce   :  { %v2509_v57 = vpop.f32.mrb[17].mxu0 }
 0x3cf   :  { %v2511_v58 = vpop.f32.mrb[18].mxu0 }
 0x3d0   :  { %v2512_v59 = vpop.f32.mrb[19].mxu0 }
 0x3d1   :  { %v2156_v60 = vpop.f32.mrb[28].mxu1 }
 0x3d2   :  { %v2245_v61 = vadd.f32 %v2156_v60, %v2008_v30  ;;  %v2158_v62 = vpop.f32.mrb[29].mxu1 }
 0x3d3   :  { %v2246_v63 = vadd.f32 %v2158_v62, %v2010_v32  ;;  %v2160_v0 = vpop.f32.mrb[30].mxu1 }
 0x3d4   :  { %v2400_v1 = vadd.f32 %v2311_v34, %v2245_v61  ;;  %v2161_v3 = vpop.f32.mrb[31].mxu1 }
 0x3d5   :  { %v2401_v5 = vadd.f32 %v2313_v35, %v2246_v63  ;;  %v2621_v6 = vpop.f32.mrb[20].mxu0 }
 0x3d6   :  { %v2623_v7 = vpop.f32.mrb[21].mxu0 }
 0x3d7   :  { %v2625_v9 = vpop.f32.mrb[22].mxu0 }
 0x3d8   :  { %v2626_v10 = vpop.f32.mrb[23].mxu0 }
 0x3d9   :  { %v2197_v11 = vpop.f32.mrb[32].mxu1 }
 0x3da   :  { %v2247_v12 = vadd.f32 %v2197_v11, %v2049_v39  ;;  %v2199_v13 = vpop.f32.mrb[33].mxu1 }
 0x3db   :  { %v2248_v14 = vadd.f32 %v2199_v13, %v2051_v41  ;;  %v2201_v16 = vpop.f32.mrb[34].mxu1 }
 0x3dc   :  { %v2202_v18 = vpop.f32.mrb[35].mxu1 }
 0x3dd   :  { %v2703_v15 = vpop.f32.mrb[24].mxu0 }
 0x3de   :  { %v2705_v17 = vpop.f32.mrb[25].mxu0 }
 0x3df   :  { %v2707_v19 = vpop.f32.mrb[26].mxu0 }
 0x3e0   :  { %v2708_v20 = vpop.f32.mrb[27].mxu0 }
 0x3e1   :  { %v2238_v21 = vpop.f32.mrb[36].mxu1 }
 0x3e2   :  { %v2249_v22 = vadd.f32 %v2238_v21, %v2090_v51  ;;  %v2240_v24 = vpop.f32.mrb[37].mxu1 }
 0x3e3   :  { %v2250_v25 = vadd.f32 %v2240_v24, %v2092_v53  ;;  %v2242_v26 = vpop.f32.mrb[38].mxu1 }
 0x3e4   :  { %v2404_v28 = vadd.f32 %v2393_v44, %v2249_v22  ;;  %v2243_v29 = vpop.f32.mrb[39].mxu1 }
 0x3e5   :  { %v2405_v30 = vadd.f32 %v2395_v46, %v2250_v25  ;;  %v2817_v31 = vpop.f32.mrb[28].mxu0 }
 0x3e6   :  { %v2819_v32 = vpop.f32.mrb[29].mxu0 }
 0x3e7   :  { %v2821_v33 = vpop.f32.mrb[30].mxu0 }
 0x3e8   :  { %v2822_v2 = vpop.f32.mrb[31].mxu0 }
 0x3e9   :  { %v2352_v34 = vpop.f32.mrb[40].mxu1 }
 0x3ea   :  { %v2402_v35 = vadd.f32 %v2352_v34, %v2247_v12  ;;  %v2354_v36 = vpop.f32.mrb[41].mxu1 }
 0x3eb   :  { %v2403_v37 = vadd.f32 %v2354_v36, %v2248_v14  ;;  %v2356_v38 = vpop.f32.mrb[42].mxu1 }
 0x3ec   :  { %v2557_v39 = vadd.f32 %v2507_v56, %v2402_v35  ;;  %v2357_v40 = vpop.f32.mrb[43].mxu1 }
 0x3ed   :  { %v2558_v41 = vadd.f32 %v2509_v57, %v2403_v37  ;;  %v2931_v42 = vpop.f32.mrb[32].mxu0 }
 0x3ee   :  { %v2933_v43 = vpop.f32.mrb[33].mxu0 }
 0x3ef   :  { %v2935_v47 = vpop.f32.mrb[34].mxu0 }
 0x3f0   :  { %v2936_v48 = vpop.f32.mrb[35].mxu0 }
 0x3f1   :  { %v2466_v50 = vpop.f32.mrb[44].mxu1 }
 0x3f2   :  { %v2555_v44 = vadd.f32 %v2466_v50, %v2400_v1  ;;  %v2468_v51 = vpop.f32.mrb[45].mxu1 }
 0x3f3   :  { %v2556_v46 = vadd.f32 %v2468_v51, %v2401_v5  ;;  %v2470_v52 = vpop.f32.mrb[46].mxu1 }
 0x3f4   :  { %v2710_v53 = vadd.f32 %v2621_v6, %v2555_v44  ;;  %v2471_v54 = vpop.f32.mrb[47].mxu1 }
 0x3f5   :  { %v2711_v55 = vadd.f32 %v2623_v7, %v2556_v46  ;;  %v3013_v58 = vpop.f32.mrb[36].mxu0 }
 0x3f6   :  { %v3015_v59 = vpop.f32.mrb[37].mxu0 }
 0x3f7   :  { %v3017_v60 = vpop.f32.mrb[38].mxu0 }
 0x3f8   :  { %v3018_v61 = vpop.f32.mrb[39].mxu0 }
 0x3f9   :  { %v2548_v62 = vpop.f32.mrb[48].mxu1 }
 0x3fa   :  { %v2559_v56 = vadd.f32 %v2548_v62, %v2404_v28  ;;  %v2550_v63 = vpop.f32.mrb[49].mxu1 }
 0x3fb   :  { %v2560_v57 = vadd.f32 %v2550_v63, %v2405_v30  ;;  %v2552_v0 = vpop.f32.mrb[50].mxu1 }
 0x3fc   :  { %v2714_v3 = vadd.f32 %v2703_v15, %v2559_v56  ;;  %v2553_v9 = vpop.f32.mrb[51].mxu1 }
 0x3fd   :  { %v2715_v10 = vadd.f32 %v2705_v17, %v2560_v57  ;;  %v3127_v11 = vpop.f32.mrb[40].mxu0 }
 0x3fe   :  { %v3129_v1 = vpop.f32.mrb[41].mxu0 }
 0x3ff   :  { %v3131_v12 = vpop.f32.mrb[42].mxu0 }
 0x400   :  { %v3132_v5 = vpop.f32.mrb[43].mxu0 }
 0x401   :  { %v2662_v13 = vpop.f32.mrb[52].mxu1 }
 0x402   :  { %v2712_v6 = vadd.f32 %v2662_v13, %v2557_v39  ;;  %v2664_v14 = vpop.f32.mrb[53].mxu1 }
 0x403   :  { %v2713_v7 = vadd.f32 %v2664_v14, %v2558_v41  ;;  %v2666_v16 = vpop.f32.mrb[54].mxu1 }
 0x404   :  { %v2867_v18 = vadd.f32 %v2817_v31, %v2712_v6  ;;  %v2667_v19 = vpop.f32.mrb[55].mxu1 }
 0x405   :  { %v2868_v20 = vadd.f32 %v2819_v32, %v2713_v7 }
 0x409   :  { %v2776_v21 = vpop.f32.mrb[56].mxu1 }
 0x40a   :  { %v2865_v22 = vadd.f32 %v2776_v21, %v2710_v53  ;;  %v2778_v24 = vpop.f32.mrb[57].mxu1 }
 0x40b   :  { %v2866_v25 = vadd.f32 %v2778_v24, %v2711_v55  ;;  %v2780_v26 = vpop.f32.mrb[58].mxu1 }
 0x40c   :  { %v3020_v15 = vadd.f32 %v2931_v42, %v2865_v22  ;;  %v2781_v28 = vpop.f32.mrb[59].mxu1 }
 0x40d   :  { %v3021_v17 = vadd.f32 %v2933_v43, %v2866_v25  ;;  %v3184_v43 = vpop.permute.xlu1 %3183 }
 0x411   :  { %v2858_v29 = vpop.f32.mrb[60].mxu1 }
 0x412   :  { %v2869_v30 = vadd.f32 %v2858_v29, %v2714_v3  ;;  %v2860_v33 = vpop.f32.mrb[61].mxu1 }
 0x413   :  { %v2870_v2 = vadd.f32 %v2860_v33, %v2715_v10  ;;  %v2862_v34 = vpop.f32.mrb[62].mxu1 }
 0x414   :  { %v3024_v35 = vadd.f32 %v3013_v58, %v2869_v30  ;;  %v2863_v36 = vpop.f32.mrb[63].mxu1 }
 0x415   :  { %v3025_v37 = vadd.f32 %v3015_v59, %v2870_v2 }
 0x419   :  { %v2972_v38 = vpop.f32.mrb[64].mxu1 }
 0x41a   :  { %v3022_v31 = vadd.f32 %v2972_v38, %v2867_v18  ;;  %v2974_v39 = vpop.f32.mrb[65].mxu1 }
 0x41b   :  { %v3023_v32 = vadd.f32 %v2974_v39, %v2868_v20  ;;  %v2976_v40 = vpop.f32.mrb[66].mxu1 }
 0x41c   :  { %v3177_v41 = vadd.f32 %v3127_v11, %v3022_v31  ;;  %v2977_v47 = vpop.f32.mrb[67].mxu1 }
 0x41d   :  { %v3178_v48 = vadd.f32 %v3129_v1, %v3023_v32 }
 0x41e   :  { %v3188_v0 = vadd.f32 %v3184_v43, %v3177_v41 }
 0x41f   :  { %v3189_v10 = vadd.f32 %v3184_v43, %v3178_v48 }
 0x420   :  { %v3194_v1 = vmul.f32 %v3188_v0, %v3871_v23 }
 0x421   :  { %v3086_v50 = vpop.f32.mrb[68].mxu1  ;;  %v3195_v5 = vmul.f32 %v3189_v10, %v3873_v27 }
 0x422   :  { %v3175_v42 = vadd.f32 %v3086_v50, %v3020_v15  ;;  %v3088_v44 = vpop.f32.mrb[69].mxu1  ;;  %v3200_v6 = vpack.c.bf16 %v3194_v1, %v3194_v1 }
 0x423   :  { %v3176_v51 = vadd.f32 %v3088_v44, %v3021_v17  ;;  %v3090_v46 = vpop.f32.mrb[70].mxu1  ;;  %v3201_v14 = vpack.c.bf16 %v3195_v5, %v3195_v5 }
 0x424   :  { %v3186_v52 = vadd.f32 %v3184_v43, %v3175_v42  ;;  %v3091_v53 = vpop.f32.mrb[71].mxu1 }
 0x425   :  { %v3187_v54 = vadd.f32 %v3184_v43, %v3176_v51 }
 0x426   :  { %v3192_v55 = vmul.f32 %v3186_v52, %v3881_v45 }
 0x427   :  { %v3193_v58 = vmul.f32 %v3187_v54, %v3883_v49 }
 0x428   :  { %v3198_v59 = vpack.c.bf16 %v3192_v55, %v3192_v55 }
 0x429   :  { %v3199_v60 = vpack.c.bf16 %v3193_v58, %v3193_v58  ;;  %v3168_v61 = vpop.f32.mrb[72].mxu1 }
 0x42a   :  { %v3179_v62 = vadd.f32 %v3168_v61, %v3024_v35  ;;  %3210 = vrot.lane.b32.xlu0 %v3198_v59, %s3488_s5  ;;  %v3170_v56 = vpop.f32.mrb[73].mxu1 }
 0x42b   :  { %v3180_v63 = vadd.f32 %v3170_v56, %v3025_v37  ;;  %3212 = vrot.lane.b32.xlu1 %v3199_v60, %s3488_s5  ;;  %v3172_v57 = vpop.f32.mrb[74].mxu1 }
 0x42c   :  { %v3190_v3 = vadd.f32 %v3184_v43, %v3179_v62  ;;  %v3173_v9 = vpop.f32.mrb[75].mxu1 }
 0x42d   :  { %v3191_v11 = vadd.f32 %v3184_v43, %v3180_v63 }
 0x42e   :  { %v3196_v45 = vmul.f32 %v3190_v3, %v3891_v4 }
 0x42f   :  { %v3197_v49 = vmul.f32 %v3191_v11, %v3894_v8 }
 0x430   :  { %v3202_v12 = vpack.c.bf16 %v3196_v45, %v3196_v45 }
 0x431   :  { %v3203_v13 = vpack.c.bf16 %v3197_v49, %v3197_v49 }
 0x432   :  { %3218 = vrot.lane.b32.xlu0 %v3202_v12, %s3488_s5 }
 0x433   :  { %3220 = vrot.lane.b32.xlu1 %v3203_v13, %s3488_s5 }
 0x436   :  { %3214 = vrot.lane.b32.xlu0 %v3200_v6, %s3488_s5 }
 0x437   :  { %3216 = vrot.lane.b32.xlu1 %v3201_v14, %s3488_s5 }
 0x49c   :  { %v3211_v7 = vpop.permute.xlu0 %3210 }
 0x49d   :  { %v3228_v4 = vsel %vm1789_vm10, 0, %v3211_v7  ;;  %v3213_v8 = vpop.permute.xlu1 %3212 }
 0x49e   :  { %v3222_v23 = vsel %vm1789_vm10, %v3211_v7, %v3213_v8 }
 0x49f   :  { %v3353_v16 = vcombine.low %v3228_v4, %v3222_v23 }
 0x4a1   :  { %3245 = vst [vmem:[%s4270_s6] sm:$0xff] %v3353_v16 }
 0x4a4   :  { %v3219_v27 = vpop.permute.xlu0 %3218 }
 0x4a5   :  { %v3221_v18 = vpop.permute.xlu1 %3220 }
 0x4a6   :  { %v3226_v19 = vsel %vm1789_vm10, %v3219_v27, %v3221_v18 }
 0x4a7   :  { %v3230_v24 = vsel %vm1804_vm11, %v3226_v19, 0 }
 0x4a8   :  { %v3215_v20 = vpop.permute.xlu0 %3214 }
 0x4a9   :  { %v3223_v21 = vsel %vm1789_vm10, %v3213_v8, %v3215_v20  ;;  %v3217_v22 = vpop.permute.xlu1 %3216 }
 0x4aa   :  { %v3224_v25 = vsel %vm1789_vm10, %v3215_v20, %v3217_v22  ;;  %v3225_v26 = vsel %vm1789_vm10, %v3217_v22, %v3219_v27 }
 0x4ab   :  { %v3354_v15 = vcombine.low %v3223_v21, %v3224_v25  ;;  %v3355_v28 = vcombine.low %v3225_v26, %v3230_v24 }
 0x4ad   :  { %3246 = vst [vmem:[%s4270_s6 + $0x8] sm:$0xff] %v3354_v15  ;;  %3249 = vst.msk [vmem:[%s4270_s6 + $0x10] sm:$0xff] %vm3248_vm15, %v3355_v28 }

// kernel: loss_forward.5
= control target key start
LH: loop header
LB: loop body
LE: loop exit
PB: predicated region body
PF: predicated region fallthrough
CT: control target
= control target key end

     0   :  { %s3600_s27 = smov 127   ;;  %v3601_v7 = vmov 0   ;;  %s4422_s0 = inlined_call_operand.vmem [shape: bf16[8,686], index: 0, kind: input, shape index: {}]   ;;  %s4423_s1 = inlined_call_operand.vmem [shape: bf16[9,16,8], index: 1, kind: input, shape index: {}]   ;;  %s4424_s2 = inlined_call_operand.vmem [shape: f32[16,1], index: 2, kind: input, shape index: {}]   ;;  %s4425_s3 = inlined_call_operand.vmem [shape: bf16[9,8,16], index: 3, kind: input, shape index: {}]   ;;  %s4426_s4 = inlined_call_operand.vmem [shape: f32[8,1], index: 4, kind: input, shape index: {}]   ;;  %s4427_s5 = inlined_call_operand.vmem [shape: f32[1,648], index: 5, kind: input, shape index: {}]   ;;  %s4428_s6 = inlined_call_operand.hbm [shape: f32[1,1], index: 6, kind: output, shape index: {}]  }
   0x1   :  { %v26_v0 = vld [vmem:[%s4422_s0] sm:$0xff]  ;;  %v27_v1 = vld [vmem:[%s4422_s0 + $0x8] sm:$0xff]  ;;  %v28_v4 = vld [vmem:[%s4422_s0 + $0x10] sm:$0xff]  ;;  %142 = vmatprep.mubr.bf16.mxu0 %v3601_v7  ;;  %185 = vmatprep.mubr.bf16.mxu1 %v3601_v7 }
   0x2   :  { %v3652_v2 = vcombine.low %v26_v0, %v26_v0  ;;  %v3654_v3 = vcombine.low %v27_v1, %v27_v1  ;;  %v3663_v5 = vcombine.high %v26_v0, %v26_v0  ;;  %v3665_v6 = vcombine.low %v28_v4, %v28_v4  ;;  %3547 = vset.pattern.permute.xlu0 %v3601_v7 }
   0x3   :  { %3548 = vset.pattern.permute.xlu1 %v3601_v7  ;;  %v3673_v8 = vcombine.high %v28_v4, %v28_v4 }
   0x4   :  { %69 = vrot.lane.b32.xlu0 %v3652_v2, %s3600_s27  ;;  %73 = vrot.lane.b32.xlu1 %v3654_v3, %s3600_s27 }
   0x8   :  { %71 = vrot.lane.b32.xlu0 %v3663_v5, %s3600_s27  ;;  %77 = vrot.lane.b32.xlu1 %v3665_v6, %s3600_s27 }
   0x9   :  { %11 = vsyncpa [#allocation3], 0  ;;  %s3602_s0 = smov 126   ;;  %v3683_v9 = vcombine.high %v27_v1, %v27_v1  ;;  %s3603_s28 = smov 110   ;;  %vm81_vm0 = vcmask 1039360   ;;  %vm91_vm1 = vcmask 1043456  }
   0xa   :  { %s3604_s29 = smov 109   ;;  %s3605_s30 = smov 108   ;;  %v3555_v17 = vld [vmem:[%s4423_s1 + $0x8] sm:$0xff]   ;;  %vm87_vm2 = vcmask 64512   ;;  %v248_v25 = vsel %vm91_vm1, %v3652_v2, 0  ;;  %v47_v30 = vld [vmem:[%s4424_s2] sm:$0xff] }
   0xb   :  { %s3606_s7 = smov 92   ;;  %s3607_s8 = smov 91   ;;  %v48_v31 = vld [vmem:[%s4424_s2 + $0x8] sm:$0xff]  ;;  %v254_v33 = vsel %vm91_vm1, %v3654_v3, 0  ;;  %v3556_v35 = vld [vmem:[%s4423_s1] sm:$0xff]   ;;  %vm411_vm3 = vcmask 1031168  }
   0xc   :  { %79 = vrot.lane.b32.xlu0 %v3673_v8, %s3600_s27  ;;  %399 = vrot.lane.b32.xlu1 %v3652_v2, %s3602_s0  ;;  %s3608_s9 = smov 90   ;;  %v260_v37 = vsel %vm91_vm1, %v3665_v6, 0  ;;  %vm596_vm4 = vcmask 900096   ;;  %v3557_v52 = vld [vmem:[%s4423_s1 + $0x10] sm:$0xff]   ;;  %vm781_vm5 = vcmask 891904   ;;  %vm966_vm6 = vcmask 883712  }
   0xd   :  { %vm1151_vm7 = vcmask 752640   ;;  %vm1336_vm8 = vcmask 744448   ;;  %vm1521_vm9 = vcmask 736256   ;;  %vm1790_vm10 = vcmask 154624   ;;  %s3588_s11 = scalar_lea.hbm %s4428_s6, 16 }
   0xe   :  { %vm1805_vm11 = vcmask 220160   ;;  %vm1844_vm12 = vcmask 130048   ;;  %vm3411_vm13 = vmneg %vm1790_vm10  ;;  %p3589_p0 = scmp.ne.s32.totalorder %s4428_s6, %s3588_s11  ;;  %p3592_p1 = scmp.lt.u32.totalorder %s3588_s11, %s4428_s6 }
  0x10   :  { %401 = vrot.lane.b32.xlu0 %v3663_v5, %s3602_s0  ;;  %403 = vrot.lane.b32.xlu1 %v3654_v3, %s3602_s0  ;;  %p3594_p2 = pnand %p3592_p1, %p3589_p0 }
  0x14   :  { %75 = vrot.lane.b32.xlu0 %v3683_v9, %s3600_s27  ;;  %407 = vrot.lane.b32.xlu1 %v3665_v6, %s3602_s0 }
  0x18   :  { %409 = vrot.lane.b32.xlu0 %v3673_v8, %s3602_s0  ;;  %584 = vrot.lane.b32.xlu1 %v3652_v2, %s3603_s28 }
  0x1c   :  { %586 = vrot.lane.b32.xlu0 %v3663_v5, %s3603_s28  ;;  %588 = vrot.lane.b32.xlu1 %v3654_v3, %s3603_s28 }
  0x20   :  { %592 = vrot.lane.b32.xlu0 %v3665_v6, %s3603_s28  ;;  %594 = vrot.lane.b32.xlu1 %v3673_v8, %s3603_s28 }
  0x24   :  { %405 = vrot.lane.b32.xlu0 %v3683_v9, %s3602_s0  ;;  %769 = vrot.lane.b32.xlu1 %v3652_v2, %s3604_s29 }
  0x28   :  { %771 = vrot.lane.b32.xlu0 %v3663_v5, %s3604_s29  ;;  %773 = vrot.lane.b32.xlu1 %v3654_v3, %s3604_s29 }
  0x2c   :  { %590 = vrot.lane.b32.xlu0 %v3683_v9, %s3603_s28  ;;  %777 = vrot.lane.b32.xlu1 %v3665_v6, %s3604_s29 }
  0x30   :  { %779 = vrot.lane.b32.xlu0 %v3673_v8, %s3604_s29  ;;  %954 = vrot.lane.b32.xlu1 %v3652_v2, %s3605_s30 }
  0x34   :  { %956 = vrot.lane.b32.xlu0 %v3663_v5, %s3605_s30  ;;  %958 = vrot.lane.b32.xlu1 %v3654_v3, %s3605_s30 }
  0x38   :  { %775 = vrot.lane.b32.xlu0 %v3683_v9, %s3604_s29  ;;  %962 = vrot.lane.b32.xlu1 %v3665_v6, %s3605_s30 }
  0x3c   :  { %960 = vrot.lane.b32.xlu1 %v3683_v9, %s3605_s30  ;;  %964 = vrot.lane.b32.xlu0 %v3673_v8, %s3605_s30 }
  0x40   :  { %1141 = vrot.lane.b32.xlu1 %v3663_v5, %s3606_s7  ;;  %1139 = vrot.lane.b32.xlu0 %v3652_v2, %s3606_s7 }
  0x44   :  { %1147 = vrot.lane.b32.xlu1 %v3665_v6, %s3606_s7  ;;  %1143 = vrot.lane.b32.xlu0 %v3654_v3, %s3606_s7 }
  0x48   :  { %1145 = vrot.lane.b32.xlu1 %v3683_v9, %s3606_s7  ;;  %1149 = vrot.lane.b32.xlu0 %v3673_v8, %s3606_s7 }
  0x4c   :  { %1324 = vrot.lane.b32.xlu0 %v3652_v2, %s3607_s8  ;;  %1326 = vrot.lane.b32.xlu1 %v3663_v5, %s3607_s8 }
  0x50   :  { %1328 = vrot.lane.b32.xlu0 %v3654_v3, %s3607_s8  ;;  %1330 = vrot.lane.b32.xlu1 %v3683_v9, %s3607_s8 }
  0x54   :  { %1332 = vrot.lane.b32.xlu0 %v3665_v6, %s3607_s8  ;;  %1334 = vrot.lane.b32.xlu1 %v3673_v8, %s3607_s8 }
  0x58   :  { %1509 = vrot.lane.b32.xlu0 %v3652_v2, %s3608_s9  ;;  %1511 = vrot.lane.b32.xlu1 %v3663_v5, %s3608_s9 }
  0x5c   :  { %1513 = vrot.lane.b32.xlu0 %v3654_v3, %s3608_s9  ;;  %1515 = vrot.lane.b32.xlu1 %v3683_v9, %s3608_s9 }
  0x60   :  { %1517 = vrot.lane.b32.xlu0 %v3665_v6, %s3608_s9  ;;  %1519 = vrot.lane.b32.xlu1 %v3673_v8, %s3608_s9  ;;  %v3558_v6 = vld [vmem:[%s4423_s1 + $0x18] sm:$0xff]  }
  0x64   :  { %1691 = vperm.xlu0 %3547, %v47_v30   ;;  %1696 = vperm.xlu1 %3548, %v48_v31  }
  0x76   :  { %v70_v10 = vpop.permute.xlu0 %69  ;;  %v74_v11 = vpop.permute.xlu1 %73 }
  0x7a   :  { %v72_v12 = vpop.permute.xlu0 %71  ;;  %v78_v13 = vpop.permute.xlu1 %77 }
  0x7b   :  { %v83_v14 = vsel %vm81_vm0, %v72_v12, %v74_v11  ;;  %v82_v15 = vsel %vm81_vm0, %v70_v10, %v72_v12 }
  0x7c   :  { %3346 = vmatprep.subr.msk.bf16.mxu0 %vm91_vm1, %v83_v14  ;;  %v93_v16 = vsel %vm91_vm1, %v82_v15, 0 }
  0x7d   :  { %111 = vmatpush1.bf16.msra.mxu0 %v93_v16 }
  0x7e   :  { %v80_v18 = vpop.permute.xlu0 %79  ;;  %v400_v19 = vpop.permute.xlu1 %399 }
  0x7f   :  { %v86_v20 = vsel %vm81_vm0, %v78_v13, %v80_v18  ;;  %3350 = vmatprep.subr.msk.bf16.mxu0 %vm91_vm1, %v80_v18 }
  0x80   :  { %3347 = vmatmul.mubr.msk.bf16.vlgmr.msra.gmra.mrb[0].mxu0 %vm87_vm2, %v3555_v17  ;;  %v105_v21 = vsel %vm91_vm1, %v86_v20, 0 }
  0x81   :  { %197 = vmatpush1.bf16.msra.mxu0 %v105_v21  ;;  %228 = vmatprep.mubr.bf16.mxu0 %v3601_v7 }
  0x82   :  { %v402_v22 = vpop.permute.xlu0 %401  ;;  %3353 = vmatprep.subr.msk.bf16.mxu0 %vm91_vm1, %v3663_v5  ;;  %v404_v23 = vpop.permute.xlu1 %403 }
  0x83   :  { %v413_v39 = vsel %vm411_vm3, %v402_v22, %v404_v23  ;;  %v412_v42 = vsel %vm411_vm3, %v400_v19, %v402_v22  ;;  %v3559_v22 = vld [vmem:[%s4423_s1 + $0x20] sm:$0xff]  }
  0x84   :  { %v421_v43 = vsel %vm91_vm1, %v412_v42, 0 }
  0x86   :  { %v76_v24 = vpop.permute.xlu0 %75  ;;  %v408_v26 = vpop.permute.xlu1 %407 }
  0x87   :  { %v85_v27 = vsel %vm81_vm0, %v76_v24, %v78_v13  ;;  %v84_v28 = vsel %vm81_vm0, %v74_v11, %v76_v24 }
  0x88   :  { %3348 = vmatprep.subr.msk.bf16.mxu1 %vm91_vm1, %v85_v27  ;;  %3351 = vmatmul.mubr.msk.bf16.vlgmr.msra.gmra.mrb[4].mxu0 %vm87_vm2, %v3555_v17  ;;  %v99_v29 = vsel %vm91_vm1, %v84_v28, 0 }
  0x89   :  { %154 = vmatpush1.bf16.msra.mxu1 %v99_v29  ;;  %266 = vmatpush1.bf16.msra.mxu0 %v248_v25 }
  0x8a   :  { %v410_v32 = vpop.permute.xlu0 %409  ;;  %297 = vmatprep.mubr.bf16.mxu0 %v3601_v7  ;;  %3355 = vmatprep.subr.msk.bf16.mxu1 %vm91_vm1, %v3683_v9  ;;  %v585_v34 = vpop.permute.xlu1 %584 }
  0x8b   :  { %3357 = vmatprep.subr.msk.bf16.mxu0 %vm91_vm1, %v3673_v8  ;;  %v416_v51 = vsel %vm411_vm3, %v408_v26, %v410_v32 }
  0x8c   :  { %3349 = vmatmul.mubr.msk.bf16.vlgmr.msra.gmra.mrb[0].mxu1 %vm87_vm2, %v3555_v17  ;;  %v433_v53 = vsel %vm91_vm1, %v416_v51, 0 }
  0x8d   :  { %309 = vmatpush1.bf16.msra.mxu1 %v254_v33  ;;  %340 = vmatprep.mubr.bf16.mxu1 %v3601_v7 }
  0x8e   :  { %v587_v36 = vpop.permute.xlu0 %586  ;;  %v589_v38 = vpop.permute.xlu1 %588 }
  0x8f   :  { %v598_v56 = vsel %vm596_vm4, %v587_v36, %v589_v38  ;;  %v597_v62 = vsel %vm596_vm4, %v585_v34, %v587_v36 }
  0x90   :  { %3354 = vmatmul.mubr.msk.bf16.vlgmr.msra.gmra.mrb[0].mxu0 %vm87_vm2, %v3556_v35  ;;  %v606_v63 = vsel %vm91_vm1, %v597_v62, 0 }
  0x91   :  { %352 = vmatpush1.bf16.msra.mxu0 %v260_v37  ;;  %383 = vmatprep.mubr.bf16.mxu0 %v3601_v7 }
  0x92   :  { %v593_v40 = vpop.permute.xlu0 %592  ;;  %3360 = vmatprep.subr.msk.bf16.mxu0 %vm91_vm1, %v413_v39  ;;  %v595_v41 = vpop.permute.xlu1 %594 }
  0x93   :  { %v601_v4 = vsel %vm596_vm4, %v593_v40, %v595_v41 }
  0x94   :  { %v618_v9 = vsel %vm91_vm1, %v601_v4, 0 }
  0x96   :  { %v406_v44 = vpop.permute.xlu0 %405  ;;  %v3814_v45 = vpop.permute.xlu1 %769 }
  0x97   :  { %v414_v46 = vsel %vm411_vm3, %v404_v23, %v406_v44  ;;  %v415_v47 = vsel %vm411_vm3, %v406_v44, %v408_v26 }
  0x98   :  { %3356 = vmatmul.mubr.msk.bf16.vlgmr.msra.gmra.mrb[0].mxu1 %vm87_vm2, %v3556_v35  ;;  %3358 = vmatmul.mubr.msk.bf16.vlgmr.msra.gmra.mrb[4].mxu0 %vm87_vm2, %v3556_v35  ;;  %v427_v48 = vsel %vm91_vm1, %v414_v46, 0  ;;  %v3560_v35 = vld [vmem:[%s4423_s1 + $0x28] sm:$0xff]  }
  0x99   :  { %439 = vmatpush1.bf16.msra.mxu0 %v421_v43  ;;  %3362 = vmatprep.subr.msk.bf16.mxu1 %vm91_vm1, %v415_v47 }
  0x9a   :  { %482 = vmatpush1.bf16.msra.mxu1 %v427_v48  ;;  %470 = vmatprep.mubr.bf16.mxu0 %v3601_v7  ;;  %v772_v49 = vpop.permute.xlu0 %771  ;;  %v774_v50 = vpop.permute.xlu1 %773 }
  0x9b   :  { %513 = vmatprep.mubr.bf16.mxu1 %v3601_v7  ;;  %3364 = vmatprep.subr.msk.bf16.mxu0 %vm91_vm1, %v410_v32  ;;  %v783_v12 = vsel %vm781_vm5, %v772_v49, %v774_v50  ;;  %v782_v17 = vsel %vm781_vm5, %v3814_v45, %v772_v49  ;;  %v3561_v49 = vld [vmem:[%s4423_s1 + $0x30] sm:$0xff]  }
  0x9c   :  { %v791_v18 = vsel %vm91_vm1, %v782_v17, 0 }
  0x9e   :  { %v591_v54 = vpop.permute.xlu0 %590  ;;  %v3830_v55 = vpop.permute.xlu1 %777 }
  0x9f   :  { %v599_v57 = vsel %vm596_vm4, %v589_v38, %v591_v54  ;;  %v600_v58 = vsel %vm596_vm4, %v591_v54, %v593_v40 }
  0xa0   :  { %3361 = vmatmul.mubr.msk.bf16.vlgmr.msra.gmra.mrb[0].mxu0 %vm87_vm2, %v3557_v52  ;;  %3369 = vmatprep.subr.msk.bf16.mxu1 %vm91_vm1, %v600_v58  ;;  %v612_v59 = vsel %vm91_vm1, %v599_v57, 0  ;;  %v3562_v57 = vld [vmem:[%s4423_s1 + $0x38] sm:$0xff]  }
  0xa1   :  { %525 = vmatpush1.bf16.msra.mxu0 %v433_v53  ;;  %556 = vmatprep.mubr.bf16.mxu0 %v3601_v7 }
  0xa2   :  { %3367 = vmatprep.subr.msk.bf16.mxu0 %vm91_vm1, %v598_v56  ;;  %v780_v60 = vpop.permute.xlu0 %779  ;;  %v3840_v61 = vpop.permute.xlu1 %954 }
  0xa3   :  { %v786_v26 = vsel %vm781_vm5, %v3830_v55, %v780_v60 }
  0xa4   :  { %3363 = vmatmul.mubr.msk.bf16.vlgmr.msra.gmra.mrb[0].mxu1 %vm87_vm2, %v3557_v52  ;;  %v803_v28 = vsel %vm91_vm1, %v786_v26, 0 }
  0xa5   :  { %667 = vmatpush1.bf16.msra.mxu1 %v612_v59  ;;  %698 = vmatprep.mubr.bf16.mxu1 %v3601_v7 }
  0xa6   :  { %v957_v0 = vpop.permute.xlu0 %956  ;;  %v959_v1 = vpop.permute.xlu1 %958 }
  0xa7   :  { %v968_v31 = vsel %vm966_vm6, %v957_v0, %v959_v1  ;;  %v967_v34 = vsel %vm966_vm6, %v3840_v61, %v957_v0  ;;  %v3563_v0 = vld [vmem:[%s4423_s1 + $0x40] sm:$0xff]  }
  0xa8   :  { %3365 = vmatmul.mubr.msk.bf16.vlgmr.msra.gmra.mrb[4].mxu0 %vm87_vm2, %v3557_v52  ;;  %v976_v37 = vsel %vm91_vm1, %v967_v34, 0 }
  0xa9   :  { %624 = vmatpush1.bf16.msra.mxu0 %v606_v63  ;;  %655 = vmatprep.mubr.bf16.mxu0 %v3601_v7 }
  0xaa   :  { %3371 = vmatprep.subr.msk.bf16.mxu0 %vm91_vm1, %v595_v41  ;;  %v776_v2 = vpop.permute.xlu0 %775  ;;  %v3849_v3 = vpop.permute.xlu1 %962 }
  0xab   :  { %v785_v5 = vsel %vm781_vm5, %v776_v2, %v3830_v55  ;;  %v784_v8 = vsel %vm781_vm5, %v774_v50, %v776_v2 }
  0xac   :  { %3376 = vmatprep.subr.msk.bf16.mxu1 %vm91_vm1, %v785_v5  ;;  %v797_v13 = vsel %vm91_vm1, %v784_v8, 0 }
  0xae   :  { %v961_v10 = vpop.permute.xlu1 %960  ;;  %v965_v11 = vpop.permute.xlu0 %964 }
  0xaf   :  { %v970_v14 = vsel %vm966_vm6, %v961_v10, %v3849_v3  ;;  %v969_v21 = vsel %vm966_vm6, %v959_v1, %v961_v10  ;;  %v971_v44 = vsel %vm966_vm6, %v3849_v3, %v965_v11  ;;  %v1724_v10 = vlaneseq }
  0xb0   :  { %3368 = vmatmul.mubr.msk.bf16.vlgmr.msra.gmra.mrb[0].mxu0 %vm87_vm2, %v3558_v6  ;;  %3370 = vmatmul.mubr.msk.bf16.vlgmr.msra.gmra.mrb[0].mxu1 %vm87_vm2, %v3558_v6  ;;  %v982_v23 = vsel %vm91_vm1, %v969_v21, 0  ;;  %v988_v45 = vsel %vm91_vm1, %v971_v44, 0 }
  0xb1   :  { %710 = vmatpush1.bf16.msra.mxu0 %v618_v9  ;;  %741 = vmatprep.mubr.bf16.mxu0 %v3601_v7 }
  0xb2   :  { %3374 = vmatprep.subr.msk.bf16.mxu0 %vm91_vm1, %v783_v12  ;;  %852 = vmatpush1.bf16.msra.mxu1 %v797_v13  ;;  %v3868_v15 = vpop.permute.xlu1 %1141  ;;  %v3870_v16 = vpop.permute.xlu0 %1139 }
  0xb3   :  { %883 = vmatprep.mubr.bf16.mxu1 %v3601_v7  ;;  %3383 = vmatprep.subr.msk.bf16.mxu1 %vm91_vm1, %v970_v14  ;;  %v1152_v53 = vsel %vm1151_vm7, %v3870_v16, %v3868_v15 }
  0xb4   :  { %v1161_v55 = vsel %vm91_vm1, %v1152_v53, 0 }
  0xb6   :  { %v3877_v19 = vpop.permute.xlu1 %1147  ;;  %v1144_v20 = vpop.permute.xlu0 %1143 }
  0xb7   :  { %v1153_v47 = vsel %vm1151_vm7, %v3868_v15, %v1144_v20  ;;  %v25_v15 = vld [vmem:[%s4427_s5] sm:$0x3f]  ;;  %s3609_s5 = smov 19  }
  0xb8   :  { %3372 = vmatmul.mubr.msk.bf16.vlgmr.msra.gmra.mrb[4].mxu0 %vm87_vm2, %v3558_v6 }
  0xb9   :  { %809 = vmatpush1.bf16.msra.mxu0 %v791_v18  ;;  %840 = vmatprep.mubr.bf16.mxu0 %v3601_v7 }
  0xba   :  { %3378 = vmatprep.subr.msk.bf16.mxu0 %vm91_vm1, %v780_v60  ;;  %v1146_v24 = vpop.permute.xlu1 %1145  ;;  %v1150_v25 = vpop.permute.xlu0 %1149 }
  0xbb   :  { %v1155_v27 = vsel %vm1151_vm7, %v1146_v24, %v3877_v19  ;;  %v1154_v36 = vsel %vm1151_vm7, %v1144_v20, %v1146_v24  ;;  %v1156_v56 = vsel %vm1151_vm7, %v3877_v19, %v1150_v25 }
  0xbc   :  { %3377 = vmatmul.mubr.msk.bf16.vlgmr.msra.gmra.mrb[0].mxu1 %vm87_vm2, %v3559_v22  ;;  %v1167_v40 = vsel %vm91_vm1, %v1154_v36, 0  ;;  %v1173_v59 = vsel %vm91_vm1, %v1156_v56, 0 }
  0xbd   :  { %1037 = vmatpush1.bf16.msra.mxu1 %v982_v23  ;;  %1068 = vmatprep.mubr.bf16.mxu1 %v3601_v7 }
  0xbe   :  { %3390 = vmatprep.subr.msk.bf16.mxu1 %vm91_vm1, %v1155_v27  ;;  %v3895_v29 = vpop.permute.xlu0 %1324  ;;  %v3897_v30 = vpop.permute.xlu1 %1326 }
  0xbf   :  { %v1337_v62 = vsel %vm1336_vm8, %v3895_v29, %v3897_v30 }
  0xc0   :  { %3375 = vmatmul.mubr.msk.bf16.vlgmr.msra.gmra.mrb[0].mxu0 %vm87_vm2, %v3559_v22  ;;  %v1346_v63 = vsel %vm91_vm1, %v1337_v62, 0 }
  0xc1   :  { %895 = vmatpush1.bf16.msra.mxu0 %v803_v28  ;;  %926 = vmatprep.mubr.bf16.mxu0 %v3601_v7 }
  0xc2   :  { %3381 = vmatprep.subr.msk.bf16.mxu0 %vm91_vm1, %v968_v31  ;;  %v1329_v32 = vpop.permute.xlu0 %1328  ;;  %v1331_v33 = vpop.permute.xlu1 %1330 }
  0xc3   :  { %v1339_v48 = vsel %vm1336_vm8, %v1329_v32, %v1331_v33  ;;  %v1338_v60 = vsel %vm1336_vm8, %v3897_v30, %v1329_v32 }
  0xc4   :  { %v1352_v51 = vsel %vm91_vm1, %v1339_v48, 0 }
  0xc6   :  { %v1333_v38 = vpop.permute.xlu0 %1332  ;;  %v1335_v39 = vpop.permute.xlu1 %1334 }
  0xc7   :  { %v1340_v41 = vsel %vm1336_vm8, %v1331_v33, %v1333_v38  ;;  %v1341_v1 = vsel %vm1336_vm8, %v1333_v38, %v1335_v39 }
  0xc8   :  { %3379 = vmatmul.mubr.msk.bf16.vlgmr.msra.gmra.mrb[4].mxu0 %vm87_vm2, %v3559_v22  ;;  %3384 = vmatmul.mubr.msk.bf16.vlgmr.msra.gmra.mrb[0].mxu1 %vm87_vm2, %v3560_v35  ;;  %v1358_v2 = vsel %vm91_vm1, %v1341_v1, 0 }
  0xc9   :  { %994 = vmatpush1.bf16.msra.mxu0 %v976_v37  ;;  %1025 = vmatprep.mubr.bf16.mxu0 %v3601_v7 }
  0xca   :  { %1222 = vmatpush1.bf16.msra.mxu1 %v1167_v40  ;;  %3385 = vmatprep.subr.msk.bf16.mxu0 %vm91_vm1, %v965_v11  ;;  %v1510_v42 = vpop.permute.xlu0 %1509  ;;  %v1512_v43 = vpop.permute.xlu1 %1511  ;;  %v3986_v11 = vshrl.u32 %v1724_v10, 7 }
  0xcb   :  { %1253 = vmatprep.mubr.bf16.mxu1 %v3601_v7  ;;  %3397 = vmatprep.subr.msk.bf16.mxu1 %vm91_vm1, %v1340_v41  ;;  %v1522_v4 = vsel %vm1521_vm9, %v1510_v42, %v1512_v43 }
  0xcc   :  { %v1531_v5 = vsel %vm91_vm1, %v1522_v4, 0  ;;  %v1734_v13 = vsub.s32 2, %v3986_v11  ;;  %v1738_v16 = vsub.s32 3, %v3986_v11  ;;  %v1726_v37 = vsub.s32 0, %v3986_v11 }
  0xce   :  { %v1514_v46 = vpop.permute.xlu0 %1513  ;;  %v1516_v50 = vpop.permute.xlu1 %1515  ;;  %v3993_v23 = vrot.slane %v25_v15, %v1734_v13  ;;  %v3995_v27 = vrot.slane %v25_v15, %v1738_v16 }
  0xcf   :  { %v1524_v58 = vsel %vm1521_vm9, %v1514_v46, %v1516_v50  ;;  %v1523_v3 = vsel %vm1521_vm9, %v1512_v43, %v1514_v46 }
  0xd0   :  { %3382 = vmatmul.mubr.msk.bf16.vlgmr.msra.gmra.mrb[0].mxu0 %vm87_vm2, %v3560_v35  ;;  %v1537_v61 = vsel %vm91_vm1, %v1524_v58, 0 }
  0xd1   :  { %1080 = vmatpush1.bf16.msra.mxu0 %v988_v45  ;;  %1111 = vmatprep.mubr.bf16.mxu0 %v3601_v7  ;;  %v4003_v45 = vrot.slane %v25_v15, %v1726_v37 }
  0xd2   :  { %3388 = vmatprep.subr.msk.bf16.mxu0 %vm91_vm1, %v1153_v47  ;;  %v1518_v52 = vpop.permute.xlu0 %1517  ;;  %v1520_v6 = vpop.permute.xlu1 %1519 }
  0xd3   :  { %v1525_v54 = vsel %vm1521_vm9, %v1516_v50, %v1518_v52  ;;  %v1526_v8 = vsel %vm1521_vm9, %v1518_v52, %v1520_v6 }
  0xd4   :  { %3391 = vmatmul.mubr.msk.bf16.vlgmr.msra.gmra.mrb[0].mxu1 %vm87_vm2, %v3561_v49  ;;  %v1543_v9 = vsel %vm91_vm1, %v1526_v8, 0 }
  0xd5   :  { %1407 = vmatpush1.bf16.msra.mxu1 %v1352_v51  ;;  %1438 = vmatprep.mubr.bf16.mxu1 %v3601_v7 }
  0xd6   :  { %3404 = vmatprep.subr.msk.bf16.mxu1 %vm91_vm1, %v1525_v54 }
  0xd8   :  { %3386 = vmatmul.mubr.msk.bf16.vlgmr.msra.gmra.mrb[4].mxu0 %vm87_vm2, %v3560_v35 }
  0xd9   :  { %1179 = vmatpush1.bf16.msra.mxu0 %v1161_v55  ;;  %1210 = vmatprep.mubr.bf16.mxu0 %v3601_v7  ;;  %v1742_v55 = vsub.s32 4, %v3986_v11 }
  0xda   :  { %3392 = vmatprep.subr.msk.bf16.mxu0 %vm91_vm1, %v1150_v25 }
  0xe0   :  { %3389 = vmatmul.mubr.msk.bf16.vlgmr.msra.gmra.mrb[0].mxu0 %vm87_vm2, %v3561_v49  ;;  %3398 = vmatmul.mubr.msk.bf16.vlgmr.msra.gmra.mrb[0].mxu1 %vm87_vm2, %v3562_v57 }
  0xe1   :  { %1265 = vmatpush1.bf16.msra.mxu0 %v1173_v59  ;;  %1296 = vmatprep.mubr.bf16.mxu0 %v3601_v7  ;;  %v1746_v59 = vsub.s32 5, %v3986_v11 }
  0xe2   :  { %3395 = vmatprep.subr.msk.bf16.mxu0 %vm91_vm1, %v1338_v60  ;;  %1592 = vmatpush1.bf16.msra.mxu1 %v1537_v61 }
  0xe3   :  { %1623 = vmatprep.mubr.bf16.mxu1 %v3601_v7  ;;  %v1692_v12 = vpop.permute.xlu0 %1691  ;;  %v1697_v17 = vpop.permute.xlu1 %1696  ;;  %v4015_v8 = vrot.slane %v25_v15, %v1746_v59  ;;  %v1809_v59 = vld [vmem:[%s4425_s3] sm:$0xf] }
  0xe8   :  { %3393 = vmatmul.mubr.msk.bf16.vlgmr.msra.gmra.mrb[4].mxu0 %vm87_vm2, %v3561_v49 }
  0xe9   :  { %1364 = vmatpush1.bf16.msra.mxu0 %v1346_v63  ;;  %1395 = vmatprep.mubr.bf16.mxu0 %v3601_v7 }
  0xea   :  { %3399 = vmatprep.subr.msk.bf16.mxu0 %vm91_vm1, %v1335_v39  ;;  %v1730_v39 = vsub.s32 1, %v3986_v11 }
  0xec   :  { %3405 = vmatmul.mubr.msk.bf16.vlgmr.msra.gmra.mrb[0].mxu1 %vm87_vm2, %v3563_v0  ;;  %v4005_v49 = vrot.slane %v25_v15, %v1730_v39  ;;  %v1810_v39 = vld [vmem:[%s4425_s3 + $0x4] sm:$0xf] }
  0xed   :  { %1880 = vmatprep.mubr.bf16.mxu1 %v3601_v7 }
  0xf0   :  { %3396 = vmatmul.mubr.msk.bf16.vlgmr.msra.gmra.mrb[0].mxu0 %vm87_vm2, %v3562_v57 }
  0xf1   :  { %1450 = vmatpush1.bf16.msra.mxu0 %v1358_v2  ;;  %1481 = vmatprep.mubr.bf16.mxu0 %v3601_v7 }
  0xf2   :  { %3402 = vmatprep.subr.msk.bf16.mxu0 %vm91_vm1, %v1523_v3  ;;  %v4013_v3 = vrot.slane %v25_v15, %v1742_v55 }
  0xf8   :  { %3400 = vmatmul.mubr.msk.bf16.vlgmr.msra.gmra.mrb[4].mxu0 %vm87_vm2, %v3562_v57 }
  0xf9   :  { %1549 = vmatpush1.bf16.msra.mxu0 %v1531_v5  ;;  %1580 = vmatprep.mubr.bf16.mxu0 %v3601_v7 }
  0xfa   :  { %3406 = vmatprep.subr.msk.bf16.mxu0 %vm91_vm1, %v1520_v6 }
 0x100   :  { %3403 = vmatmul.mubr.msk.bf16.vlgmr.msra.gmra.mrb[0].mxu0 %vm87_vm2, %v3563_v0 }
 0x101   :  { %1635 = vmatpush1.bf16.msra.mxu0 %v1543_v9  ;;  %1666 = vmatprep.mubr.bf16.mxu0 %v3601_v7 }
 0x108   :  { %3407 = vmatmul.mubr.msk.bf16.vlgmr.msra.gmra.mrb[4].mxu0 %vm87_vm2, %v3563_v0  ;;  %vm3301_vm2 = vcmask 1040384  }
 0x109   :  { %2310 = vmatprep.mubr.bf16.mxu0 %v3601_v7 }
 0x1bf   :  { %v1625_v14 = vpop.f32.mrb[0].mxu1 }
 0x1c0   :  { %v1627_v18 = vpop.f32.mrb[1].mxu1  ;;  %v1701_v19 = vadd.f32 %v1692_v12, %v1625_v14 }
 0x1c1   :  { %v1702_v20 = vadd.f32 %v1692_v12, %v1627_v18  ;;  %v1629_v21 = vpop.f32.mrb[2].mxu1 }
 0x1c2   :  { %v1707_v22 = vadd.f32 %v1697_v17, %v1629_v21  ;;  %v1631_v24 = vpop.f32.mrb[3].mxu1  ;;  %v1713_v25 = vmax.f32 %v1701_v19, 0.0 }
 0x1c3   :  { %v1714_v26 = vmax.f32 %v1702_v20, 0.0  ;;  %v1708_v28 = vadd.f32 %v1697_v17, %v1631_v24 }
 0x1c4   :  { %v1719_v29 = vmax.f32 %v1707_v22, 0.0  ;;  %v1756_v32 = vmul.f32 %v3993_v23, %v1713_v25 }
 0x1c5   :  { %v1720_v30 = vmax.f32 %v1708_v28, 0.0  ;;  %v1757_v33 = vmul.f32 %v3995_v27, %v1714_v26 }
 0x1c6   :  { %v1762_v31 = vmul.f32 %v3993_v23, %v1719_v29 }
 0x1c7   :  { %v1763_v34 = vmul.f32 %v3995_v27, %v1720_v30 }
 0x1c8   :  { %v1768_v35 = vpack.c.bf16 %v1762_v31, %v1756_v32 }
 0x1c9   :  { %v1769_v36 = vpack.c.bf16 %v1763_v34, %v1757_v33  ;;  %v1818_v33 = vld [vmem:[%s4426_s4] sm:$0xff] }
 0x1d3   :  { %v1582_v38 = vpop.f32.mrb[0].mxu0 }
 0x1d4   :  { %v1699_v40 = vadd.f32 %v1692_v12, %v1582_v38  ;;  %v1584_v41 = vpop.f32.mrb[1].mxu0 }
 0x1d5   :  { %v1700_v42 = vadd.f32 %v1692_v12, %v1584_v41  ;;  %v1586_v43 = vpop.f32.mrb[2].mxu0 }
 0x1d6   :  { %v1711_v44 = vmax.f32 %v1699_v40, 0.0  ;;  %v1705_v46 = vadd.f32 %v1697_v17, %v1586_v43  ;;  %v1588_v47 = vpop.f32.mrb[3].mxu0 }
 0x1d7   :  { %v1712_v48 = vmax.f32 %v1700_v42, 0.0  ;;  %v1706_v50 = vadd.f32 %v1697_v17, %v1588_v47 }
 0x1d8   :  { %v1717_v51 = vmax.f32 %v1705_v46, 0.0  ;;  %v1754_v53 = vmul.f32 %v4003_v45, %v1711_v44 }
 0x1d9   :  { %v1718_v52 = vmax.f32 %v1706_v50, 0.0  ;;  %v1755_v56 = vmul.f32 %v4005_v49, %v1712_v48 }
 0x1da   :  { %v1760_v54 = vmul.f32 %v4003_v45, %v1717_v51 }
 0x1db   :  { %v1761_v57 = vmul.f32 %v4005_v49, %v1718_v52  ;;  %v1668_v58 = vpop.f32.mrb[4].mxu0 }
 0x1dc   :  { %v1703_v60 = vadd.f32 %v1692_v12, %v1668_v58  ;;  %v1670_v61 = vpop.f32.mrb[5].mxu0  ;;  %v1766_v62 = vpack.c.bf16 %v1760_v54, %v1754_v53 }
 0x1dd   :  { %v1704_v63 = vadd.f32 %v1692_v12, %v1670_v61  ;;  %v1672_v0 = vpop.f32.mrb[6].mxu0  ;;  %v1767_v1 = vpack.c.bf16 %v1761_v57, %v1755_v56 }
 0x1de   :  { %v1715_v2 = vmax.f32 %v1703_v60, 0.0  ;;  %v1709_v4 = vadd.f32 %v1697_v17, %v1672_v0  ;;  %v1674_v5 = vpop.f32.mrb[7].mxu0  ;;  %1778 = vrot.lane.b32.xlu1 %v1766_v62, %s3609_s5  ;;  %v4163_v60 = vld [vmem:[%s4425_s3 + $0xc] sm:$0xf] }
 0x1df   :  { %v1716_v6 = vmax.f32 %v1704_v63, 0.0  ;;  %v1710_v9 = vadd.f32 %v1697_v17, %v1674_v5  ;;  %1780 = vrot.lane.b32.xlu0 %v1767_v1, %s3609_s5 }
 0x1e0   :  { %v1721_v10 = vmax.f32 %v1709_v4, 0.0  ;;  %v1758_v13 = vmul.f32 %v4013_v3, %v1715_v2 }
 0x1e1   :  { %v1722_v11 = vmax.f32 %v1710_v9, 0.0  ;;  %v1759_v14 = vmul.f32 %v4015_v8, %v1716_v6 }
 0x1e2   :  { %v1764_v12 = vmul.f32 %v4013_v3, %v1721_v10  ;;  %1782 = vrot.lane.b32.xlu1 %v1768_v35, %s3609_s5 }
 0x1e3   :  { %v1765_v16 = vmul.f32 %v4015_v8, %v1722_v11  ;;  %1784 = vrot.lane.b32.xlu0 %v1769_v36, %s3609_s5 }
 0x1e4   :  { %v1770_v18 = vpack.c.bf16 %v1764_v12, %v1758_v13  ;;  %v4204_v12 = vld [vmem:[%s4425_s3 + $0x10] sm:$0xf] }
 0x1e5   :  { %v1771_v19 = vpack.c.bf16 %v1765_v16, %v1759_v14 }
 0x1e6   :  { %1786 = vrot.lane.b32.xlu1 %v1770_v18, %s3609_s5 }
 0x1e7   :  { %1788 = vrot.lane.b32.xlu0 %v1771_v19, %s3609_s5 }
 0x250   :  { %v4021_v15 = vpop.permute.xlu1 %1778 }
 0x251   :  { %v1781_v17 = vpop.permute.xlu0 %1780  ;;  %v1803_v25 = vsel %vm1790_vm10, 0, %v4021_v15 }
 0x252   :  { %v4025_v20 = vsel %vm1790_vm10, %v4021_v15, %v1781_v17 }
 0x253   :  { %1823 = vrot.lane.b32.xlu1 %v4025_v20, %s3600_s27 }
 0x254   :  { %v1783_v21 = vpop.permute.xlu1 %1782 }
 0x255   :  { %v4030_v22 = vsel %vm1790_vm10, %v1781_v17, %v1783_v21  ;;  %v1785_v24 = vpop.permute.xlu0 %1784 }
 0x256   :  { %1825 = vrot.lane.b32.xlu0 %v4030_v22, %s3600_s27  ;;  %v4038_v28 = vsel %vm1790_vm10, %v1783_v21, %v1785_v24  ;;  %v1811_v21 = vld [vmem:[%s4425_s3 + $0x8] sm:$0xf] }
 0x257   :  { %1821 = vrot.lane.b32.xlu1 %v1803_v25, %s3600_s27 }
 0x258   :  { %v1787_v26 = vpop.permute.xlu1 %1786 }
 0x259   :  { %v4041_v29 = vsel %vm1790_vm10, %v1785_v24, %v1787_v26  ;;  %v1789_v30 = vpop.permute.xlu0 %1788  ;;  %v4228_v24 = vld [vmem:[%s4425_s3 + $0x14] sm:$0xf] }
 0x25a   :  { %v4044_v31 = vsel %vm1790_vm10, %v1787_v26, %v1789_v30  ;;  %1827 = vrot.lane.b32.xlu0 %v4038_v28, %s3600_s27 }
 0x25b   :  { %1829 = vrot.lane.b32.xlu1 %v4041_v29, %s3600_s27  ;;  %v1807_v32 = vsel %vm1805_vm11, %v4044_v31, 0 }
 0x25e   :  { %1831 = vrot.lane.b32.xlu0 %v1807_v32, %s3600_s27 }
 0x25f   :  { %2099 = vrot.lane.b32.xlu1 %v4025_v20, %s3602_s0 }
 0x262   :  { %2101 = vrot.lane.b32.xlu0 %v4030_v22, %s3602_s0 }
 0x263   :  { %2097 = vrot.lane.b32.xlu1 %v1803_v25, %s3602_s0 }
 0x266   :  { %2103 = vrot.lane.b32.xlu0 %v4038_v28, %s3602_s0 }
 0x267   :  { %2105 = vrot.lane.b32.xlu1 %v4041_v29, %s3602_s0 }
 0x26a   :  { %2107 = vrot.lane.b32.xlu0 %v1807_v32, %s3602_s0 }
 0x26b   :  { %2254 = vrot.lane.b32.xlu1 %v4025_v20, %s3603_s28 }
 0x26e   :  { %2256 = vrot.lane.b32.xlu0 %v4030_v22, %s3603_s28 }
 0x26f   :  { %2252 = vrot.lane.b32.xlu1 %v1803_v25, %s3603_s28 }
 0x272   :  { %2258 = vrot.lane.b32.xlu0 %v4038_v28, %s3603_s28 }
 0x273   :  { %2260 = vrot.lane.b32.xlu1 %v4041_v29, %s3603_s28 }
 0x276   :  { %2262 = vrot.lane.b32.xlu0 %v1807_v32, %s3603_s28 }
 0x277   :  { %2409 = vrot.lane.b32.xlu1 %v4025_v20, %s3604_s29 }
 0x27a   :  { %2411 = vrot.lane.b32.xlu0 %v4030_v22, %s3604_s29 }
 0x27b   :  { %2407 = vrot.lane.b32.xlu1 %v1803_v25, %s3604_s29 }
 0x27e   :  { %2413 = vrot.lane.b32.xlu0 %v4038_v28, %s3604_s29 }
 0x27f   :  { %2415 = vrot.lane.b32.xlu1 %v4041_v29, %s3604_s29 }
 0x282   :  { %2417 = vrot.lane.b32.xlu0 %v1807_v32, %s3604_s29 }
 0x283   :  { %2564 = vrot.lane.b32.xlu1 %v4025_v20, %s3605_s30 }
 0x286   :  { %2566 = vrot.lane.b32.xlu0 %v4030_v22, %s3605_s30 }
 0x287   :  { %2562 = vrot.lane.b32.xlu1 %v1803_v25, %s3605_s30 }
 0x28a   :  { %2568 = vrot.lane.b32.xlu0 %v4038_v28, %s3605_s30 }
 0x28b   :  { %2570 = vrot.lane.b32.xlu1 %v4041_v29, %s3605_s30 }
 0x28e   :  { %2572 = vrot.lane.b32.xlu0 %v1807_v32, %s3605_s30 }
 0x28f   :  { %2719 = vrot.lane.b32.xlu1 %v4025_v20, %s3606_s7 }
 0x292   :  { %2721 = vrot.lane.b32.xlu0 %v4030_v22, %s3606_s7 }
 0x293   :  { %2717 = vrot.lane.b32.xlu1 %v1803_v25, %s3606_s7 }
 0x296   :  { %2723 = vrot.lane.b32.xlu0 %v4038_v28, %s3606_s7 }
 0x297   :  { %2725 = vrot.lane.b32.xlu1 %v4041_v29, %s3606_s7 }
 0x29a   :  { %2727 = vrot.lane.b32.xlu0 %v1807_v32, %s3606_s7 }
 0x29b   :  { %2874 = vrot.lane.b32.xlu1 %v4025_v20, %s3607_s8 }
 0x29e   :  { %2876 = vrot.lane.b32.xlu0 %v4030_v22, %s3607_s8 }
 0x29f   :  { %2872 = vrot.lane.b32.xlu1 %v1803_v25, %s3607_s8 }
 0x2a2   :  { %2878 = vrot.lane.b32.xlu0 %v4038_v28, %s3607_s8 }
 0x2a3   :  { %2880 = vrot.lane.b32.xlu1 %v4041_v29, %s3607_s8 }
 0x2a6   :  { %2882 = vrot.lane.b32.xlu0 %v1807_v32, %s3607_s8 }
 0x2a7   :  { %3029 = vrot.lane.b32.xlu1 %v4025_v20, %s3608_s9 }
 0x2aa   :  { %3031 = vrot.lane.b32.xlu0 %v4030_v22, %s3608_s9 }
 0x2ab   :  { %3027 = vrot.lane.b32.xlu1 %v1803_v25, %s3608_s9 }
 0x2ae   :  { %3033 = vrot.lane.b32.xlu0 %v4038_v28, %s3608_s9 }
 0x2af   :  { %3035 = vrot.lane.b32.xlu1 %v4041_v29, %s3608_s9 }
 0x2b2   :  { %3037 = vrot.lane.b32.xlu0 %v1807_v32, %s3608_s9 }
 0x2b3   :  { %3184 = vperm.xlu1 %3548, %v1818_v33  }
 0x2c5   :  { %v1824_v34 = vpop.permute.xlu1 %1823 }
 0x2c8   :  { %v1826_v35 = vpop.permute.xlu0 %1825 }
 0x2c9   :  { %v1822_v36 = vpop.permute.xlu1 %1821  ;;  %v1834_v37 = vsel %vm81_vm0, %v1824_v34, %v1826_v35 }
 0x2ca   :  { %v1833_v38 = vsel %vm81_vm0, %v1822_v36, %v1824_v34  ;;  %1848 = vmatprep.subr.bf16.mxu1 %v1834_v37 }
 0x2cb   :  { %1849 = vmatpush1.bf16.msra.mxu1 %v1833_v38 }
 0x2cc   :  { %v1828_v40 = vpop.permute.xlu0 %1827 }
 0x2cd   :  { %v1830_v41 = vpop.permute.xlu1 %1829  ;;  %v1835_v43 = vsel %vm81_vm0, %v1826_v35, %v1828_v40 }
 0x2ce   :  { %3408 = vmatmul.mubr.msk.bf16.vlgmr.msra.gmra.mrb[4].mxu1 %vm1844_vm12, %v1810_v39  ;;  %v1836_v42 = vsel %vm81_vm0, %v1828_v40, %v1830_v41  ;;  %v4271_v40 = vld [vmem:[%s4425_s3 + $0x18] sm:$0xf] }
 0x2cf   :  { %1889 = vmatprep.subr.bf16.mxu1 %v1836_v42  ;;  %1921 = vmatprep.mubr.bf16.mxu1 %v3601_v7 }
 0x2d0   :  { %v1832_v44 = vpop.permute.xlu0 %1831  ;;  %1890 = vmatpush1.bf16.msra.mxu1 %v1835_v43 }
 0x2d1   :  { %1930 = vmatprep.subr.bf16.mxu1 %v1832_v44  ;;  %v2100_v46 = vpop.permute.xlu1 %2099  ;;  %v1837_v50 = vsel %vm81_vm0, %v1830_v41, %v1832_v44 }
 0x2d4   :  { %v4135_v47 = vpop.permute.xlu0 %2101 }
 0x2d5   :  { %v2098_v48 = vpop.permute.xlu1 %2097  ;;  %v2110_v5 = vsel %vm411_vm3, %v2100_v46, %v4135_v47 }
 0x2d6   :  { %3409 = vmatmul.mubr.msk.bf16.vlgmr.msra.gmra.mrb[8].mxu1 %vm1844_vm12, %v1810_v39  ;;  %v2109_v16 = vsel %vm411_vm3, %v2098_v48, %v2100_v46 }
 0x2d7   :  { %1931 = vmatpush1.bf16.msra.mxu1 %v1837_v50  ;;  %1962 = vmatprep.mubr.bf16.mxu1 %v3601_v7 }
 0x2d8   :  { %1974 = vmatprep.subr.bf16.mxu1 %v4025_v20  ;;  %v4141_v51 = vpop.permute.xlu0 %2103 }
 0x2d9   :  { %v4143_v52 = vpop.permute.xlu1 %2105  ;;  %v2111_v26 = vsel %vm411_vm3, %v4135_v47, %v4141_v51 }
 0x2da   :  { %v2112_v18 = vsel %vm411_vm3, %v4141_v51, %v4143_v52  ;;  %v1816_v51 = vld [vmem:[%s4425_s3 + $0x1c] sm:$0xf] }
 0x2dc   :  { %v4145_v53 = vpop.permute.xlu0 %2107 }
 0x2dd   :  { %v2255_v54 = vpop.permute.xlu1 %2254  ;;  %v2113_v33 = vsel %vm411_vm3, %v4143_v52, %v4145_v53 }
 0x2de   :  { %3410 = vmatmul.mubr.msk.bf16.vlgmr.msra.gmra.mrb[12].mxu1 %vm1844_vm12, %v1810_v39 }
 0x2df   :  { %3412 = vmatpush1.bf16.msk.msra.mxu1 %vm3411_vm13, %v4021_v15  ;;  %2006 = vmatprep.mubr.bf16.mxu1 %v3601_v7 }
 0x2e0   :  { %2015 = vmatprep.subr.bf16.mxu1 %v4038_v28  ;;  %v4152_v55 = vpop.permute.xlu0 %2256 }
 0x2e1   :  { %v2253_v56 = vpop.permute.xlu1 %2252  ;;  %v2265_v57 = vsel %vm596_vm4, %v2255_v54, %v4152_v55 }
 0x2e2   :  { %v2264_v58 = vsel %vm596_vm4, %v2253_v56, %v2255_v54  ;;  %2278 = vmatprep.subr.bf16.mxu0 %v2265_v57 }
 0x2e3   :  { %2279 = vmatpush1.bf16.msra.mxu0 %v2264_v58 }
 0x2e4   :  { %v4165_v61 = vpop.permute.xlu0 %2258 }
 0x2e5   :  { %v4167_v62 = vpop.permute.xlu1 %2260  ;;  %v2266_v42 = vsel %vm596_vm4, %v4152_v55, %v4165_v61 }
 0x2e6   :  { %3413 = vmatmul.mubr.msk.bf16.vlgmr.msra.gmra.mrb[16].mxu1 %vm1844_vm12, %v1809_v59  ;;  %3420 = vmatmul.mubr.msk.bf16.vlgmr.msra.gmra.mrb[8].mxu0 %vm1844_vm12, %v4163_v60  ;;  %v2267_v34 = vsel %vm596_vm4, %v4165_v61, %v4167_v62 }
 0x2e7   :  { %2016 = vmatpush1.bf16.msra.mxu1 %v4030_v22  ;;  %2047 = vmatprep.mubr.bf16.mxu1 %v3601_v7 }
 0x2e8   :  { %3415 = vmatprep.subr.msk.bf16.mxu1 %vm1805_vm11, %v4044_v31  ;;  %v2263_v63 = vpop.permute.xlu0 %2262  ;;  %2392 = vmatprep.mubr.bf16.mxu0 %v3601_v7 }
 0x2e9   :  { %v2268_v0 = vsel %vm596_vm4, %v4167_v62, %v2263_v63  ;;  %2360 = vmatprep.subr.bf16.mxu0 %v2263_v63  ;;  %v4179_v1 = vpop.permute.xlu1 %2409 }
 0x2ea   :  { %2361 = vmatpush1.bf16.msra.mxu0 %v2268_v0 }
 0x2ec   :  { %v4181_v2 = vpop.permute.xlu0 %2411 }
 0x2ed   :  { %v4183_v4 = vpop.permute.xlu1 %2407  ;;  %v2420_v43 = vsel %vm781_vm5, %v4179_v1, %v4181_v2 }
 0x2ee   :  { %3414 = vmatmul.mubr.msk.bf16.vlgmr.msra.gmra.mrb[20].mxu1 %vm1844_vm12, %v1809_v59  ;;  %3422 = vmatmul.mubr.msk.bf16.vlgmr.msra.gmra.mrb[12].mxu0 %vm1844_vm12, %v4163_v60 }
 0x2ef   :  { %2057 = vmatpush1.bf16.msra.mxu1 %v4041_v29  ;;  %2088 = vmatprep.mubr.bf16.mxu1 %v3601_v7 }
 0x2f0   :  { %2123 = vmatprep.subr.bf16.mxu1 %v2110_v5  ;;  %v2414_v6 = vpop.permute.xlu0 %2413  ;;  %2506 = vmatprep.mubr.bf16.mxu0 %v3601_v7 }
 0x2f1   :  { %v4193_v9 = vpop.permute.xlu1 %2415  ;;  %v2421_v11 = vsel %vm781_vm5, %v4181_v2, %v2414_v6 }
 0x2f2   :  { %v2422_v10 = vsel %vm781_vm5, %v2414_v6, %v4193_v9 }
 0x2f3   :  { %2474 = vmatprep.subr.bf16.mxu0 %v2422_v10 }
 0x2f4   :  { %v4199_v13 = vpop.permute.xlu0 %2417  ;;  %2475 = vmatpush1.bf16.msra.mxu0 %v2421_v11 }
 0x2f5   :  { %v2565_v14 = vpop.permute.xlu1 %2564 }
 0x2f6   :  { %3416 = vmatmul.mubr.msk.bf16.vlgmr.msra.gmra.mrb[24].mxu1 %vm1844_vm12, %v1809_v59  ;;  %v2423_v59 = vsel %vm781_vm5, %v4193_v9, %v4199_v13 }
 0x2f7   :  { %2124 = vmatpush1.bf16.msra.mxu1 %v2109_v16  ;;  %3424 = vmatmul.mubr.msk.bf16.vlgmr.msra.gmra.mrb[16].mxu0 %vm1844_vm12, %v4204_v12 }
 0x2f8   :  { %2164 = vmatprep.subr.bf16.mxu1 %v2112_v18  ;;  %v4213_v19 = vpop.permute.xlu0 %2566  ;;  %2155 = vmatprep.mubr.bf16.mxu1 %v3601_v7 }
 0x2f9   :  { %v2563_v15 = vpop.permute.xlu1 %2562  ;;  %v2575_v17 = vsel %vm966_vm6, %v2565_v14, %v4213_v19  ;;  %2620 = vmatprep.mubr.bf16.mxu0 %v3601_v7 }
 0x2fa   :  { %v2574_v20 = vsel %vm966_vm6, %v2563_v15, %v2565_v14  ;;  %2588 = vmatprep.subr.bf16.mxu0 %v2575_v17 }
 0x2fb   :  { %2589 = vmatpush1.bf16.msra.mxu0 %v2574_v20 }
 0x2fc   :  { %v4223_v22 = vpop.permute.xlu0 %2568 }
 0x2fd   :  { %v4230_v25 = vpop.permute.xlu1 %2570  ;;  %v2576_v2 = vsel %vm966_vm6, %v4213_v19, %v4223_v22 }
 0x2fe   :  { %3417 = vmatmul.mubr.msk.bf16.vlgmr.msra.gmra.mrb[28].mxu1 %vm1844_vm12, %v1811_v21 }
 0x2ff   :  { %2165 = vmatpush1.bf16.msra.mxu1 %v2111_v26  ;;  %3426 = vmatmul.mubr.msk.bf16.vlgmr.msra.gmra.mrb[20].mxu0 %vm1844_vm12, %v4228_v24 }
 0x300   :  { %2205 = vmatprep.subr.bf16.mxu1 %v4145_v53  ;;  %v2573_v28 = vpop.permute.xlu0 %2572  ;;  %2196 = vmatprep.mubr.bf16.mxu1 %v3601_v7  ;;  %v2419_v53 = vsel %vm781_vm5, %v4183_v4, %v4179_v1  ;;  %v1817_v1 = vld [vmem:[%s4425_s3 + $0x20] sm:$0xf]  ;;  %vm3311_vm5 = vcmask 57344  }
 0x301   :  { %v2578_v29 = vsel %vm966_vm6, %v4230_v25, %v2573_v28  ;;  %2670 = vmatprep.subr.bf16.mxu0 %v2573_v28  ;;  %v4242_v30 = vpop.permute.xlu1 %2719  ;;  %2702 = vmatprep.mubr.bf16.mxu0 %v3601_v7 }
 0x302   :  { %2671 = vmatpush1.bf16.msra.mxu0 %v2578_v29 }
 0x304   :  { %v4245_v31 = vpop.permute.xlu0 %2721 }
 0x305   :  { %v4247_v32 = vpop.permute.xlu1 %2717  ;;  %v2730_v4 = vsel %vm1151_vm7, %v4242_v30, %v4245_v31 }
 0x306   :  { %3418 = vmatmul.mubr.msk.bf16.vlgmr.msra.gmra.mrb[32].mxu1 %vm1844_vm12, %v1811_v21  ;;  %v2729_v5 = vsel %vm1151_vm7, %v4247_v32, %v4242_v30 }
 0x307   :  { %2206 = vmatpush1.bf16.msra.mxu1 %v2113_v33  ;;  %3428 = vmatmul.mubr.msk.bf16.vlgmr.msra.gmra.mrb[24].mxu0 %vm1844_vm12, %v4228_v24 }
 0x308   :  { %2319 = vmatprep.subr.bf16.mxu1 %v2267_v34  ;;  %v2724_v35 = vpop.permute.xlu0 %2723  ;;  %2237 = vmatprep.mubr.bf16.mxu1 %v3601_v7 }
 0x309   :  { %v4259_v36 = vpop.permute.xlu1 %2725  ;;  %2816 = vmatprep.mubr.bf16.mxu0 %v3601_v7  ;;  %v2731_v38 = vsel %vm1151_vm7, %v4245_v31, %v2724_v35 }
 0x30a   :  { %v2732_v37 = vsel %vm1151_vm7, %v2724_v35, %v4259_v36 }
 0x30b   :  { %2784 = vmatprep.subr.bf16.mxu0 %v2732_v37 }
 0x30c   :  { %v4266_v39 = vpop.permute.xlu0 %2727  ;;  %2785 = vmatpush1.bf16.msra.mxu0 %v2731_v38 }
 0x30d   :  { %v2875_v41 = vpop.permute.xlu1 %2874  ;;  %v2733_v6 = vsel %vm1151_vm7, %v4259_v36, %v4266_v39 }
 0x30e   :  { %3419 = vmatmul.mubr.msk.bf16.vlgmr.msra.gmra.mrb[36].mxu1 %vm1844_vm12, %v1811_v21 }
 0x30f   :  { %2320 = vmatpush1.bf16.msra.mxu1 %v2266_v42  ;;  %3430 = vmatmul.mubr.msk.bf16.vlgmr.msra.gmra.mrb[28].mxu0 %vm1844_vm12, %v4271_v40 }
 0x310   :  { %2433 = vmatprep.subr.bf16.mxu1 %v2420_v43  ;;  %v2877_v44 = vpop.permute.xlu0 %2876  ;;  %2351 = vmatprep.mubr.bf16.mxu1 %v3601_v7 }
 0x311   :  { %v2873_v46 = vpop.permute.xlu1 %2872  ;;  %v2885_v47 = vsel %vm1336_vm8, %v2875_v41, %v2877_v44  ;;  %2930 = vmatprep.mubr.bf16.mxu0 %v3601_v7 }
 0x312   :  { %v2884_v48 = vsel %vm1336_vm8, %v2873_v46, %v2875_v41  ;;  %2898 = vmatprep.subr.bf16.mxu0 %v2885_v47 }
 0x313   :  { %2899 = vmatpush1.bf16.msra.mxu0 %v2884_v48 }
 0x314   :  { %v2879_v50 = vpop.permute.xlu0 %2878 }
 0x315   :  { %v2881_v52 = vpop.permute.xlu1 %2880  ;;  %v2886_v10 = vsel %vm1336_vm8, %v2877_v44, %v2879_v50 }
 0x316   :  { %3421 = vmatmul.mubr.msk.bf16.vlgmr.msra.gmra.mrb[40].mxu1 %vm1844_vm12, %v4163_v60  ;;  %v2577_v60 = vsel %vm966_vm6, %v4223_v22, %v4230_v25  ;;  %v2887_v9 = vsel %vm1336_vm8, %v2879_v50, %v2881_v52 }
 0x317   :  { %2434 = vmatpush1.bf16.msra.mxu1 %v2419_v53  ;;  %3432 = vmatmul.mubr.msk.bf16.vlgmr.msra.gmra.mrb[32].mxu0 %vm1844_vm12, %v1816_v51 }
 0x318   :  { %2515 = vmatprep.subr.bf16.mxu1 %v4199_v13  ;;  %v2883_v54 = vpop.permute.xlu0 %2882  ;;  %2465 = vmatprep.mubr.bf16.mxu1 %v3601_v7 }
 0x319   :  { %v2888_v55 = vsel %vm1336_vm8, %v2881_v52, %v2883_v54  ;;  %2980 = vmatprep.subr.bf16.mxu0 %v2883_v54  ;;  %v3030_v56 = vpop.permute.xlu1 %3029  ;;  %3012 = vmatprep.mubr.bf16.mxu0 %v3601_v7 }
 0x31a   :  { %2981 = vmatpush1.bf16.msra.mxu0 %v2888_v55 }
 0x31c   :  { %v3032_v57 = vpop.permute.xlu0 %3031 }
 0x31d   :  { %v3028_v58 = vpop.permute.xlu1 %3027  ;;  %v3040_v11 = vsel %vm1521_vm9, %v3030_v56, %v3032_v57 }
 0x31e   :  { %3423 = vmatmul.mubr.msk.bf16.vlgmr.msra.gmra.mrb[44].mxu1 %vm1844_vm12, %v4204_v12  ;;  %v3039_v13 = vsel %vm1521_vm9, %v3028_v58, %v3030_v56 }
 0x31f   :  { %2516 = vmatpush1.bf16.msra.mxu1 %v2423_v59  ;;  %3434 = vmatmul.mubr.msk.bf16.vlgmr.msra.gmra.mrb[36].mxu0 %vm1844_vm12, %v1816_v51 }
 0x320   :  { %2629 = vmatprep.subr.bf16.mxu1 %v2577_v60  ;;  %v3034_v61 = vpop.permute.xlu0 %3033  ;;  %2547 = vmatprep.mubr.bf16.mxu1 %v3601_v7 }
 0x321   :  { %v3036_v62 = vpop.permute.xlu1 %3035  ;;  %3126 = vmatprep.mubr.bf16.mxu0 %v3601_v7  ;;  %v3041_v0 = vsel %vm1521_vm9, %v3032_v57, %v3034_v61 }
 0x322   :  { %v3042_v63 = vsel %vm1521_vm9, %v3034_v61, %v3036_v62 }
 0x323   :  { %3094 = vmatprep.subr.bf16.mxu0 %v3042_v63 }
 0x324   :  { %3095 = vmatpush1.bf16.msra.mxu0 %v3041_v0 }
 0x326   :  { %3425 = vmatmul.mubr.msk.bf16.vlgmr.msra.gmra.mrb[48].mxu1 %vm1844_vm12, %v4204_v12  ;;  %v3038_v12 = vpop.permute.xlu0 %3037 }
 0x327   :  { %2630 = vmatpush1.bf16.msra.mxu1 %v2576_v2  ;;  %2661 = vmatprep.mubr.bf16.mxu1 %v3601_v7  ;;  %v3043_v14 = vsel %vm1521_vm9, %v3036_v62, %v3038_v12 }
 0x328   :  { %2743 = vmatprep.subr.bf16.mxu1 %v2730_v4  ;;  %3436 = vmatmul.mubr.msk.bf16.vlgmr.msra.gmra.mrb[40].mxu0 %vm1844_vm12, %v1817_v1 }
 0x32e   :  { %3427 = vmatmul.mubr.msk.bf16.vlgmr.msra.gmra.mrb[52].mxu1 %vm1844_vm12, %v4228_v24 }
 0x32f   :  { %2744 = vmatpush1.bf16.msra.mxu1 %v2729_v5  ;;  %2775 = vmatprep.mubr.bf16.mxu1 %v3601_v7 }
 0x330   :  { %2825 = vmatprep.subr.bf16.mxu1 %v4266_v39 }
 0x336   :  { %3429 = vmatmul.mubr.msk.bf16.vlgmr.msra.gmra.mrb[56].mxu1 %vm1844_vm12, %v4271_v40 }
 0x337   :  { %2826 = vmatpush1.bf16.msra.mxu1 %v2733_v6  ;;  %2857 = vmatprep.mubr.bf16.mxu1 %v3601_v7 }
 0x338   :  { %2939 = vmatprep.subr.bf16.mxu1 %v2887_v9 }
 0x33e   :  { %3431 = vmatmul.mubr.msk.bf16.vlgmr.msra.gmra.mrb[60].mxu1 %vm1844_vm12, %v4271_v40 }
 0x33f   :  { %2940 = vmatpush1.bf16.msra.mxu1 %v2886_v10  ;;  %2971 = vmatprep.mubr.bf16.mxu1 %v3601_v7 }
 0x340   :  { %3053 = vmatprep.subr.bf16.mxu1 %v3040_v11 }
 0x346   :  { %3433 = vmatmul.mubr.msk.bf16.vlgmr.msra.gmra.mrb[64].mxu1 %vm1844_vm12, %v1816_v51 }
 0x347   :  { %3054 = vmatpush1.bf16.msra.mxu1 %v3039_v13  ;;  %3085 = vmatprep.mubr.bf16.mxu1 %v3601_v7 }
 0x348   :  { %3135 = vmatprep.subr.bf16.mxu1 %v3038_v12 }
 0x34e   :  { %3435 = vmatmul.mubr.msk.bf16.vlgmr.msra.gmra.mrb[68].mxu1 %vm1844_vm12, %v1817_v1 }
 0x34f   :  { %3136 = vmatpush1.bf16.msra.mxu1 %v3043_v14  ;;  %3167 = vmatprep.mubr.bf16.mxu1 %v3601_v7 }
 0x356   :  { %3437 = vmatmul.mubr.msk.bf16.vlgmr.msra.gmra.mrb[72].mxu1 %vm1844_vm12, %v1817_v1 }
 0x3a1   :  { %v1882_v16 = vpop.f32.mrb[4].mxu1 }
 0x3a2   :  { %v1884_v18 = vpop.f32.mrb[5].mxu1 }
 0x3a3   :  { %v1886_v19 = vpop.f32.mrb[6].mxu1 }
 0x3a4   :  { %v1887_v15 = vpop.f32.mrb[7].mxu1 }
 0x3a9   :  { %v1923_v17 = vpop.f32.mrb[8].mxu1 }
 0x3aa   :  { %v1925_v20 = vpop.f32.mrb[9].mxu1 }
 0x3ab   :  { %v1927_v21 = vpop.f32.mrb[10].mxu1 }
 0x3ac   :  { %v1928_v22 = vpop.f32.mrb[11].mxu1 }
 0x3b1   :  { %v1964_v24 = vpop.f32.mrb[12].mxu1 }
 0x3b2   :  { %v1966_v25 = vpop.f32.mrb[13].mxu1 }
 0x3b3   :  { %v1968_v26 = vpop.f32.mrb[14].mxu1 }
 0x3b4   :  { %v1969_v28 = vpop.f32.mrb[15].mxu1 }
 0x3b9   :  { %v2008_v29 = vpop.f32.mrb[16].mxu1  ;;  %v2312_v30 = vpop.f32.mrb[8].mxu0 }
 0x3ba   :  { %v2009_v31 = vadd.f32 %v2008_v29, %v1882_v16  ;;  %v2010_v32 = vpop.f32.mrb[17].mxu1  ;;  %v2314_v33 = vpop.f32.mrb[9].mxu0 }
 0x3bb   :  { %v2011_v7 = vadd.f32 %v2010_v32, %v1884_v18  ;;  %v2012_v34 = vpop.f32.mrb[18].mxu1  ;;  %v2316_v35 = vpop.f32.mrb[10].mxu0 }
 0x3bc   :  { %v2013_v36 = vpop.f32.mrb[19].mxu1  ;;  %v2317_v37 = vpop.f32.mrb[11].mxu0 }
 0x3c1   :  { %v2049_v38 = vpop.f32.mrb[20].mxu1  ;;  %v2394_v39 = vpop.f32.mrb[12].mxu0 }
 0x3c2   :  { %v2050_v40 = vadd.f32 %v2049_v38, %v1923_v17  ;;  %v2051_v41 = vpop.f32.mrb[21].mxu1  ;;  %v2396_v42 = vpop.f32.mrb[13].mxu0 }
 0x3c3   :  { %v2052_v43 = vadd.f32 %v2051_v41, %v1925_v20  ;;  %v2053_v44 = vpop.f32.mrb[22].mxu1  ;;  %v2398_v46 = vpop.f32.mrb[14].mxu0 }
 0x3c4   :  { %v2054_v47 = vpop.f32.mrb[23].mxu1  ;;  %v2399_v48 = vpop.f32.mrb[15].mxu0 }
 0x3c9   :  { %v2090_v50 = vpop.f32.mrb[24].mxu1 }
 0x3ca   :  { %v2091_v51 = vadd.f32 %v2090_v50, %v1964_v24  ;;  %v2092_v52 = vpop.f32.mrb[25].mxu1  ;;  %v2508_v53 = vpop.f32.mrb[16].mxu0 }
 0x3cb   :  { %v2093_v54 = vadd.f32 %v2092_v52, %v1966_v25  ;;  %v2094_v55 = vpop.f32.mrb[26].mxu1  ;;  %v2510_v56 = vpop.f32.mrb[17].mxu0 }
 0x3cc   :  { %v2095_v57 = vpop.f32.mrb[27].mxu1  ;;  %v2512_v58 = vpop.f32.mrb[18].mxu0 }
 0x3cd   :  { %v2513_v59 = vpop.f32.mrb[19].mxu0 }
 0x3d1   :  { %v2157_v60 = vpop.f32.mrb[28].mxu1 }
 0x3d2   :  { %v2246_v61 = vadd.f32 %v2157_v60, %v2009_v31  ;;  %v2159_v62 = vpop.f32.mrb[29].mxu1  ;;  %v2622_v63 = vpop.f32.mrb[20].mxu0 }
 0x3d3   :  { %v2247_v0 = vadd.f32 %v2159_v62, %v2011_v7  ;;  %v2161_v1 = vpop.f32.mrb[30].mxu1  ;;  %v2624_v2 = vpop.f32.mrb[21].mxu0 }
 0x3d4   :  { %v2401_v4 = vadd.f32 %v2312_v30, %v2246_v61  ;;  %v2162_v5 = vpop.f32.mrb[31].mxu1  ;;  %v2626_v6 = vpop.f32.mrb[22].mxu0 }
 0x3d5   :  { %v2402_v9 = vadd.f32 %v2314_v33, %v2247_v0  ;;  %v2627_v10 = vpop.f32.mrb[23].mxu0 }
 0x3d9   :  { %v2198_v11 = vpop.f32.mrb[32].mxu1 }
 0x3da   :  { %v2248_v13 = vadd.f32 %v2198_v11, %v2050_v40  ;;  %v2200_v12 = vpop.f32.mrb[33].mxu1  ;;  %v2704_v14 = vpop.f32.mrb[24].mxu0 }
 0x3db   :  { %v2249_v16 = vadd.f32 %v2200_v12, %v2052_v43  ;;  %v2202_v18 = vpop.f32.mrb[34].mxu1  ;;  %v2706_v19 = vpop.f32.mrb[25].mxu0 }
 0x3dc   :  { %v2203_v15 = vpop.f32.mrb[35].mxu1  ;;  %v2708_v17 = vpop.f32.mrb[26].mxu0 }
 0x3dd   :  { %v2709_v20 = vpop.f32.mrb[27].mxu0 }
 0x3e1   :  { %v2239_v21 = vpop.f32.mrb[36].mxu1 }
 0x3e2   :  { %v2250_v22 = vadd.f32 %v2239_v21, %v2091_v51  ;;  %v2241_v24 = vpop.f32.mrb[37].mxu1  ;;  %v2818_v25 = vpop.f32.mrb[28].mxu0 }
 0x3e3   :  { %v2251_v26 = vadd.f32 %v2241_v24, %v2093_v54  ;;  %v2243_v28 = vpop.f32.mrb[38].mxu1  ;;  %v2820_v29 = vpop.f32.mrb[29].mxu0 }
 0x3e4   :  { %v2405_v30 = vadd.f32 %v2394_v39, %v2250_v22  ;;  %v2244_v31 = vpop.f32.mrb[39].mxu1  ;;  %v2822_v32 = vpop.f32.mrb[30].mxu0 }
 0x3e5   :  { %v2406_v33 = vadd.f32 %v2396_v42, %v2251_v26  ;;  %v2823_v7 = vpop.f32.mrb[31].mxu0 }
 0x3e9   :  { %v2353_v34 = vpop.f32.mrb[40].mxu1 }
 0x3ea   :  { %v2403_v35 = vadd.f32 %v2353_v34, %v2248_v13  ;;  %v2355_v36 = vpop.f32.mrb[41].mxu1  ;;  %v2932_v37 = vpop.f32.mrb[32].mxu0 }
 0x3eb   :  { %v2404_v38 = vadd.f32 %v2355_v36, %v2249_v16  ;;  %v2357_v40 = vpop.f32.mrb[42].mxu1  ;;  %v2934_v41 = vpop.f32.mrb[33].mxu0 }
 0x3ec   :  { %v2558_v43 = vadd.f32 %v2508_v53, %v2403_v35  ;;  %v2358_v44 = vpop.f32.mrb[43].mxu1  ;;  %v2936_v46 = vpop.f32.mrb[34].mxu0 }
 0x3ed   :  { %v2559_v47 = vadd.f32 %v2510_v56, %v2404_v38  ;;  %v2937_v48 = vpop.f32.mrb[35].mxu0 }
 0x3ee   :  { %v3185_v48 = vpop.permute.xlu1 %3184 }
 0x3f1   :  { %v2467_v50 = vpop.f32.mrb[44].mxu1 }
 0x3f2   :  { %v2556_v51 = vadd.f32 %v2467_v50, %v2401_v4  ;;  %v2469_v52 = vpop.f32.mrb[45].mxu1  ;;  %v3014_v39 = vpop.f32.mrb[36].mxu0 }
 0x3f3   :  { %v2557_v54 = vadd.f32 %v2469_v52, %v2402_v9  ;;  %v2471_v55 = vpop.f32.mrb[46].mxu1  ;;  %v3016_v42 = vpop.f32.mrb[37].mxu0 }
 0x3f4   :  { %v2711_v57 = vadd.f32 %v2622_v63, %v2556_v51  ;;  %v2472_v58 = vpop.f32.mrb[47].mxu1  ;;  %v3018_v59 = vpop.f32.mrb[38].mxu0 }
 0x3f5   :  { %v2712_v60 = vadd.f32 %v2624_v2, %v2557_v54  ;;  %v3019_v61 = vpop.f32.mrb[39].mxu0 }
 0x3f9   :  { %v2549_v62 = vpop.f32.mrb[48].mxu1 }
 0x3fa   :  { %v2560_v0 = vadd.f32 %v2549_v62, %v2405_v30  ;;  %v2551_v1 = vpop.f32.mrb[49].mxu1 }
 0x3fb   :  { %v2561_v53 = vadd.f32 %v2551_v1, %v2406_v33  ;;  %v2553_v5 = vpop.f32.mrb[50].mxu1  ;;  %v3128_v6 = vpop.f32.mrb[40].mxu0 }
 0x3fc   :  { %v2715_v56 = vadd.f32 %v2704_v14, %v2560_v0  ;;  %v2554_v10 = vpop.f32.mrb[51].mxu1  ;;  %v3130_v11 = vpop.f32.mrb[41].mxu0 }
 0x3fd   :  { %v2716_v4 = vadd.f32 %v2706_v19, %v2561_v53  ;;  %v3132_v13 = vpop.f32.mrb[42].mxu0 }
 0x3fe   :  { %v3133_v12 = vpop.f32.mrb[43].mxu0 }
 0x401   :  { %v2663_v9 = vpop.f32.mrb[52].mxu1 }
 0x402   :  { %v2713_v16 = vadd.f32 %v2663_v9, %v2558_v43  ;;  %v2665_v18 = vpop.f32.mrb[53].mxu1 }
 0x403   :  { %v2714_v63 = vadd.f32 %v2665_v18, %v2559_v47  ;;  %v2667_v15 = vpop.f32.mrb[54].mxu1 }
 0x404   :  { %v2868_v17 = vadd.f32 %v2818_v25, %v2713_v16  ;;  %v2668_v2 = vpop.f32.mrb[55].mxu1 }
 0x405   :  { %v2869_v20 = vadd.f32 %v2820_v29, %v2714_v63 }
 0x409   :  { %v2777_v21 = vpop.f32.mrb[56].mxu1 }
 0x40a   :  { %v2866_v22 = vadd.f32 %v2777_v21, %v2711_v57  ;;  %v2779_v24 = vpop.f32.mrb[57].mxu1 }
 0x40b   :  { %v2867_v26 = vadd.f32 %v2779_v24, %v2712_v60  ;;  %v2781_v28 = vpop.f32.mrb[58].mxu1 }
 0x40c   :  { %v3021_v30 = vadd.f32 %v2932_v37, %v2866_v22  ;;  %v2782_v14 = vpop.f32.mrb[59].mxu1 }
 0x40d   :  { %v3022_v31 = vadd.f32 %v2934_v41, %v2867_v26 }
 0x411   :  { %v2859_v32 = vpop.f32.mrb[60].mxu1 }
 0x412   :  { %v2870_v19 = vadd.f32 %v2859_v32, %v2715_v56  ;;  %v2861_v33 = vpop.f32.mrb[61].mxu1 }
 0x413   :  { %v2871_v7 = vadd.f32 %v2861_v33, %v2716_v4  ;;  %v2863_v34 = vpop.f32.mrb[62].mxu1 }
 0x414   :  { %v3025_v35 = vadd.f32 %v3014_v39, %v2870_v19  ;;  %v2864_v36 = vpop.f32.mrb[63].mxu1 }
 0x415   :  { %v3026_v38 = vadd.f32 %v3016_v42, %v2871_v7 }
 0x419   :  { %v2973_v40 = vpop.f32.mrb[64].mxu1 }
 0x41a   :  { %v3023_v25 = vadd.f32 %v2973_v40, %v2868_v17  ;;  %v2975_v43 = vpop.f32.mrb[65].mxu1 }
 0x41b   :  { %v3024_v29 = vadd.f32 %v2975_v43, %v2869_v20  ;;  %v2977_v44 = vpop.f32.mrb[66].mxu1 }
 0x41c   :  { %v3178_v46 = vadd.f32 %v3128_v6, %v3023_v25  ;;  %v2978_v47 = vpop.f32.mrb[67].mxu1 }
 0x41d   :  { %v3179_v50 = vadd.f32 %v3130_v11, %v3024_v29 }
 0x41e   :  { %v3189_v37 = vadd.f32 %v3185_v48, %v3178_v46 }
 0x41f   :  { %v3190_v51 = vadd.f32 %v3185_v48, %v3179_v50 }
 0x420   :  { %v4352_v41 = vmul.f32 %v3189_v37, %v3993_v23 }
 0x421   :  { %v4355_v52 = vmul.f32 %v3190_v51, %v3995_v27  ;;  %v3087_v39 = vpop.f32.mrb[68].mxu1 }
 0x422   :  { %v3213_v54 = vand.u32 2147483647, %v4352_v41  ;;  %v3176_v55 = vadd.f32 %v3087_v39, %v3021_v30  ;;  %v3089_v42 = vpop.f32.mrb[69].mxu1  ;;  %v3201_v43 = vmax.f32 %v4352_v41, 0.0 }
 0x423   :  { %v3214_v57 = vand.u32 2147483647, %v4355_v52  ;;  %v3177_v58 = vadd.f32 %v3089_v42, %v3022_v31  ;;  %v3091_v59 = vpop.f32.mrb[70].mxu1  ;;  %v3202_v50 = vmax.f32 %v4355_v52, 0.0 }
 0x424   :  { %v3219_v60 = vsub.f32 0.0, %v3213_v54  ;;  %v3187_v61 = vadd.f32 %v3185_v48, %v3176_v55  ;;  %v3092_v62 = vpop.f32.mrb[71].mxu1  ;;  %v3207_v55 = vsub.f32 %v3201_v43, %v4352_v41 }
 0x425   :  { %v3220_v0 = vsub.f32 0.0, %v3214_v57  ;;  %v3188_v1 = vadd.f32 %v3185_v48, %v3177_v58 }
 0x426   :  { %v3227_v53 = vmul.f32 1.442695, %v3219_v60  ;;  %v4360_v5 = vmul.f32 %v3187_v61, %v4003_v45 }
 0x427   :  { %v3229_v6 = vmul.f32 1.442695, %v3220_v0  ;;  %v4363_v56 = vmul.f32 %v3188_v1, %v4005_v49 }
 0x428   :  { %3564 = vpow2.f32 %v3227_v53  ;;  %v3211_v10 = vand.u32 2147483647, %v4360_v5  ;;  %v3199_v39 = vmax.f32 %v4360_v5, 0.0  ;;  %v3208_v53 = vsub.f32 %v3202_v50, %v4355_v52 }
 0x429   :  { %3566 = vpow2.f32 %v3229_v6  ;;  %v3212_v11 = vand.u32 2147483647, %v4363_v56  ;;  %v3169_v4 = vpop.f32.mrb[72].mxu1 }
 0x42a   :  { %v3217_v13 = vsub.f32 0.0, %v3211_v10  ;;  %v3180_v12 = vadd.f32 %v3169_v4, %v3025_v35  ;;  %v3171_v9 = vpop.f32.mrb[73].mxu1  ;;  %v3200_v10 = vmax.f32 %v4363_v56, 0.0  ;;  %v3205_v41 = vsub.f32 %v3199_v39, %v4360_v5 }
 0x42b   :  { %v3218_v16 = vsub.f32 0.0, %v3212_v11  ;;  %v3181_v18 = vadd.f32 %v3171_v9, %v3026_v38  ;;  %v3173_v63 = vpop.f32.mrb[74].mxu1 }
 0x42c   :  { %v3223_v15 = vmul.f32 1.442695, %v3217_v13  ;;  %v3191_v17 = vadd.f32 %v3185_v48, %v3180_v12  ;;  %v3174_v2 = vpop.f32.mrb[75].mxu1 }
 0x42d   :  { %v3225_v20 = vmul.f32 1.442695, %v3218_v16  ;;  %v3192_v21 = vadd.f32 %v3185_v48, %v3181_v18 }
 0x42e   :  { %3568 = vpow2.f32 %v3223_v15  ;;  %v4368_v22 = vmul.f32 %v3191_v17, %v4013_v3 }
 0x42f   :  { %3570 = vpow2.f32 %v3225_v20  ;;  %v4371_v24 = vmul.f32 %v3192_v21, %v4015_v8 }
 0x430   :  { %v3215_v26 = vand.u32 2147483647, %v4368_v22 }
 0x431   :  { %v3216_v28 = vand.u32 2147483647, %v4371_v24 }
 0x432   :  { %v3565_v30 = vpop.eup %3564  ;;  %v3221_v14 = vsub.f32 0.0, %v3215_v26 }
 0x433   :  { %v3567_v31 = vpop.eup %3566  ;;  %v3253_v32 = vadd.f32 1.0, %v3565_v30  ;;  %v3222_v7 = vsub.f32 0.0, %v3216_v28  ;;  %v3256_v25 = vmul.f32 -0.5, %v3565_v30  ;;  %v3259_v51 = vand.u32 2147483647, %v3565_v30 }
 0x434   :  { %v3262_v19 = vadd.f32 1.0, %v3567_v31  ;;  %v3231_v33 = vmul.f32 1.442695, %v3221_v14  ;;  %v3265_v29 = vmul.f32 -0.5, %v3567_v31  ;;  %v3268_v58 = vand.u32 2147483647, %v3567_v31 }
 0x435   :  { %3572 = vlog2.f32 %v3253_v32  ;;  %v3233_v34 = vmul.f32 1.442695, %v3222_v7  ;;  %v3257_v48 = vadd.f32 1.0, %v3256_v25  ;;  %vm4381_vm14 = vcmp.lt.f32.partialorder %v3259_v51, 0.0004427343 }
 0x436   :  { %3574 = vlog2.f32 %v3262_v19  ;;  %v3266_v57 = vadd.f32 1.0, %v3265_v29  ;;  %vm4388_vm15 = vcmp.lt.f32.partialorder %v3268_v58, 0.0004427343  ;;  %v3206_v28 = vsub.f32 %v3200_v10, %v4363_v56 }
 0x437   :  { %3576 = vpow2.f32 %v3231_v33  ;;  %v3258_v1 = vmul.f32 %v3565_v30, %v3257_v48  ;;  %v3204_v25 = vmax.f32 %v4371_v24, 0.0 }
 0x438   :  { %v3569_v35 = vpop.eup %3568  ;;  %3578 = vpow2.f32 %v3233_v34  ;;  %v3267_v9 = vmul.f32 %v3567_v31, %v3266_v57 }
 0x439   :  { %v3571_v36 = vpop.eup %3570  ;;  %v3235_v38 = vadd.f32 1.0, %v3569_v35  ;;  %v3238_v44 = vmul.f32 -0.5, %v3569_v35  ;;  %v3241_v60 = vand.u32 2147483647, %v3569_v35 }
 0x43a   :  { %v3244_v40 = vadd.f32 1.0, %v3571_v36  ;;  %v3247_v46 = vmul.f32 -0.5, %v3571_v36  ;;  %v3250_v4 = vand.u32 2147483647, %v3571_v36 }
 0x43b   :  { %3580 = vlog2.f32 %v3235_v38  ;;  %v3239_v59 = vadd.f32 1.0, %v3238_v44  ;;  %vm3242_vm0 = vcmp.lt.f32.partialorder %v3241_v60, 0.0004427343 }
 0x43c   :  { %3582 = vlog2.f32 %v3244_v40  ;;  %v3248_v61 = vadd.f32 1.0, %v3247_v46  ;;  %vm3251_vm1 = vcmp.lt.f32.partialorder %v3250_v4, 0.0004427343 }
 0x43d   :  { %v3240_v15 = vmul.f32 %v3569_v35, %v3239_v59  ;;  %v3203_v35 = vmax.f32 %v4368_v22, 0.0 }
 0x43e   :  { %v3249_v17 = vmul.f32 %v3571_v36, %v3248_v61 }
 0x43f   :  { %v3573_v47 = vpop.eup %3572 }
 0x440   :  { %v3575_v37 = vpop.eup %3574  ;;  %v3255_v42 = vmul.f32 0.6931472, %v3573_v47 }
 0x441   :  { %v3577_v54 = vpop.eup %3576  ;;  %v3264_v6 = vmul.f32 0.6931472, %v3575_v37 }
 0x442   :  { %v3271_v62 = vadd.f32 1.0, %v3577_v54  ;;  %v3579_v0 = vpop.eup %3578  ;;  %v3261_v12 = vsel %vm4381_vm14, %v3258_v1, %v3255_v42  ;;  %v3274_v20 = vmul.f32 -0.5, %v3577_v54  ;;  %v3277_v36 = vand.u32 2147483647, %v3577_v54 }
 0x443   :  { %v3280_v52 = vadd.f32 1.0, %v3579_v0  ;;  %v3270_v5 = vsel %vm4388_vm15, %v3267_v9, %v3264_v6  ;;  %v3291_v21 = vadd.f32 %v3261_v12, %v3207_v55  ;;  %v3283_v19 = vmul.f32 -0.5, %v3579_v0 }
 0x444   :  { %3584 = vlog2.f32 %v3271_v62  ;;  %v3292_v31 = vadd.f32 %v3270_v5, %v3208_v53  ;;  %v3275_v7 = vadd.f32 1.0, %v3274_v20  ;;  %v3286_v47 = vand.u32 2147483647, %v3579_v0 }
 0x445   :  { %v3581_v13 = vpop.eup %3580  ;;  %3586 = vlog2.f32 %v3280_v52  ;;  %v3297_v38 = vmul.f32 %v3291_v21, %v3993_v23  ;;  %v3284_v43 = vadd.f32 1.0, %v3283_v19  ;;  %vm3278_vm3 = vcmp.lt.f32.partialorder %v3277_v36, 0.0004427343 }
 0x446   :  { %v3583_v18 = vpop.eup %3582  ;;  %v3237_v63 = vmul.f32 0.6931472, %v3581_v13  ;;  %v3298_v29 = vmul.f32 %v3292_v31, %v3995_v27  ;;  %v3276_v46 = vmul.f32 %v3577_v54, %v3275_v7  ;;  %v3210_v27 = vsub.f32 %v3204_v25, %v4371_v24 }
 0x447   :  { %v3246_v2 = vmul.f32 0.6931472, %v3583_v18  ;;  %v3305_v50 = vsel %vm3301_vm2, %v3297_v38, 0.0  ;;  %v3285_v55 = vmul.f32 %v3579_v0, %v3284_v43  ;;  %vm3287_vm4 = vcmp.lt.f32.partialorder %v3286_v47, 0.0004427343 }
 0x448   :  { %v3243_v26 = vsel %vm3242_vm0, %v3240_v15, %v3237_v63  ;;  %v3307_v57 = vsel %vm3301_vm2, %v3298_v29, 0.0 }
 0x449   :  { %v3289_v30 = vadd.f32 %v3243_v26, %v3205_v41  ;;  %v3252_v14 = vsel %vm3251_vm1, %v3249_v17, %v3246_v2 }
 0x44a   :  { %v3290_v32 = vadd.f32 %v3252_v14, %v3206_v28 }
 0x44b   :  { %v3295_v33 = vmul.f32 %v3289_v30, %v4003_v45 }
 0x44c   :  { %v3296_v34 = vmul.f32 %v3290_v32, %v4005_v49  ;;  %v3209_v49 = vsub.f32 %v3203_v35, %v4368_v22 }
 0x44d   :  { %v3302_v40 = vsel %vm3301_vm2, %v3295_v33, 0.0 }
 0x44e   :  { %v3585_v56 = vpop.eup %3584  ;;  %v3303_v44 = vsel %vm3301_vm2, %v3296_v34, 0.0 }
 0x44f   :  { %v3273_v45 = vmul.f32 0.6931472, %v3585_v56  ;;  %v3304_v48 = vadd.f32 %v3303_v44, %v3302_v40  ;;  %v3587_v23 = vpop.eup %3586 }
 0x450   :  { %v3282_v39 = vmul.f32 0.6931472, %v3587_v23 }
 0x451   :  { %v3279_v37 = vsel %vm3278_vm3, %v3276_v46, %v3273_v45  ;;  %v3306_v51 = vadd.f32 %v3305_v50, %v3304_v48 }
 0x452   :  { %v3293_v42 = vadd.f32 %v3279_v37, %v3209_v49  ;;  %v3288_v54 = vsel %vm3287_vm4, %v3285_v55, %v3282_v39 }
 0x453   :  { %v3308_v58 = vadd.f32 %v3307_v57, %v3306_v51  ;;  %v3294_v60 = vadd.f32 %v3288_v54, %v3210_v27 }
 0x454   :  { %v3299_v59 = vmul.f32 %v3293_v42, %v4013_v3 }
 0x455   :  { %v3300_v61 = vmul.f32 %v3294_v60, %v4015_v8 }
 0x456   :  { %v3309_v22 = vsel %vm3301_vm2, %v3299_v59, 0.0 }
 0x457   :  { %v3310_v62 = vadd.f32 %v3309_v22, %v3308_v58  ;;  %v3312_v1 = vsel %vm3311_vm5, %v3300_v61, 0.0 }
 0x459   :  { %v3313_v53 = vadd.f32 %v3312_v1, %v3310_v62 }
 0x45b   :  { %3314 = vadd.xlane.f32.xlu0 %v3313_v53 }
 0x4e8   :  { %v3315_v0 = vpop.xlane.xlu0 %3314 }
 0x4e9   :  { %v3316_v6 = vrot.slane %v3315_v0, 4 }
 0x4eb   :  { %v3317_v10 = vadd.f32 %v3316_v6, %v3315_v0 }
 0x4ed   :  { %v3318_v11 = vrot.slane %v3317_v10, 2 }
 0x4ef   :  { %v3319_v24 = vadd.f32 %v3318_v11, %v3317_v10 }
 0x4f1   :  { %v3320_v41 = vrot.slane %v3319_v24, 1 }
 0x4f3   :  { %v3321_v4 = vadd.f32 %v3320_v41, %v3319_v24 }
 0x4f5   :  { %3534 = vpush %v3321_v4 }
 0x526   :  { %s3535_s3 = spop %3534 }
 0x527   :  { %s3323_s25 = smul.f32 0.001953125, %s3535_s3 }
 0x529   :  { %3325 = sst [smem:[#allocation2]] %s3323_s25 }
 0x52a   :  { %3597 = shalt.err (!%p3594_p2)
}
 0x52b   :  { %s3610_s5 = smov [#allocation2]  }
 0x52c   :  { %3333 = dma.smem_to_hbm %s3610_s5, 16, %s4428_s6, [#allocation3]  }
 0x52d   :  { %3598 = dma.done.wait [#allocation3], 16  }
 0x52e   :  { %3599 = vsyncadd [#allocation3], 4294967280 }
 0x52f   :  { %3337 = sfence }
 0x530   :  { %3338 = vsyncpa [#allocation3], 1 }

// kernel: loss_forward.6
= control target key start
LH: loop header
LB: loop body
LE: loop exit
PB: predicated region body
PF: predicated region fallthrough
CT: control target
= control target key end

     0   :  { %s3606_s27 = smov 127   ;;  %v3607_v7 = vmov 0   ;;  %s4440_s0 = inlined_call_operand.vmem [shape: bf16[8,686], index: 0, kind: input, shape index: {}]   ;;  %s4441_s1 = inlined_call_operand.vmem [shape: bf16[9,16,8], index: 1, kind: input, shape index: {}]   ;;  %s4442_s2 = inlined_call_operand.vmem [shape: f32[16,1], index: 2, kind: input, shape index: {}]   ;;  %s4443_s3 = inlined_call_operand.vmem [shape: bf16[9,8,16], index: 3, kind: input, shape index: {}]   ;;  %s4444_s4 = inlined_call_operand.vmem [shape: f32[8,1], index: 4, kind: input, shape index: {}]   ;;  %s4445_s5 = inlined_call_operand.vmem [shape: f32[1,648], index: 5, kind: input, shape index: {}]   ;;  %s4446_s6 = inlined_call_operand.hbm [shape: f32[1,1], index: 6, kind: output, shape index: {}]  }
   0x1   :  { %v26_v0 = vld [vmem:[%s4440_s0] sm:$0xff]  ;;  %v27_v1 = vld [vmem:[%s4440_s0 + $0x8] sm:$0xff]  ;;  %v28_v4 = vld [vmem:[%s4440_s0 + $0x10] sm:$0xff]  ;;  %142 = vmatprep.mubr.bf16.mxu0 %v3607_v7  ;;  %185 = vmatprep.mubr.bf16.mxu1 %v3607_v7 }
   0x2   :  { %v3658_v2 = vcombine.low %v26_v0, %v26_v0  ;;  %v3660_v3 = vcombine.low %v27_v1, %v27_v1  ;;  %v3669_v5 = vcombine.high %v26_v0, %v26_v0  ;;  %v3671_v6 = vcombine.low %v28_v4, %v28_v4  ;;  %3553 = vset.pattern.permute.xlu0 %v3607_v7 }
   0x3   :  { %3554 = vset.pattern.permute.xlu1 %v3607_v7  ;;  %v3679_v8 = vcombine.high %v28_v4, %v28_v4 }
   0x4   :  { %69 = vrot.lane.b32.xlu0 %v3658_v2, %s3606_s27  ;;  %73 = vrot.lane.b32.xlu1 %v3660_v3, %s3606_s27 }
   0x8   :  { %71 = vrot.lane.b32.xlu0 %v3669_v5, %s3606_s27  ;;  %77 = vrot.lane.b32.xlu1 %v3671_v6, %s3606_s27 }
   0x9   :  { %11 = vsyncpa [#allocation3], 0  ;;  %s3608_s0 = smov 126   ;;  %v3689_v9 = vcombine.high %v27_v1, %v27_v1  ;;  %s3609_s28 = smov 110   ;;  %vm81_vm0 = vcmask 1039360   ;;  %vm91_vm1 = vcmask 1043456  }
   0xa   :  { %s3610_s29 = smov 109   ;;  %s3611_s30 = smov 108   ;;  %v3561_v17 = vld [vmem:[%s4441_s1 + $0x8] sm:$0xff]   ;;  %vm87_vm2 = vcmask 64512   ;;  %v248_v25 = vsel %vm91_vm1, %v3658_v2, 0  ;;  %v47_v30 = vld [vmem:[%s4442_s2] sm:$0xff] }
   0xb   :  { %s3612_s7 = smov 92   ;;  %s3613_s8 = smov 91   ;;  %v48_v31 = vld [vmem:[%s4442_s2 + $0x8] sm:$0xff]  ;;  %v254_v33 = vsel %vm91_vm1, %v3660_v3, 0  ;;  %v3562_v35 = vld [vmem:[%s4441_s1] sm:$0xff]   ;;  %vm411_vm3 = vcmask 1031168  }
   0xc   :  { %79 = vrot.lane.b32.xlu0 %v3679_v8, %s3606_s27  ;;  %399 = vrot.lane.b32.xlu1 %v3658_v2, %s3608_s0  ;;  %s3614_s9 = smov 90   ;;  %v260_v37 = vsel %vm91_vm1, %v3671_v6, 0  ;;  %vm596_vm4 = vcmask 900096   ;;  %v3563_v52 = vld [vmem:[%s4441_s1 + $0x10] sm:$0xff]   ;;  %vm781_vm5 = vcmask 891904   ;;  %vm966_vm6 = vcmask 883712  }
   0xd   :  { %vm1151_vm7 = vcmask 752640   ;;  %vm1336_vm8 = vcmask 744448   ;;  %vm1521_vm9 = vcmask 736256   ;;  %vm1790_vm10 = vcmask 154624   ;;  %s3594_s11 = scalar_lea.hbm %s4446_s6, 16 }
   0xe   :  { %vm1805_vm11 = vcmask 220160   ;;  %vm1844_vm12 = vcmask 130048   ;;  %vm3417_vm13 = vmneg %vm1790_vm10  ;;  %p3595_p0 = scmp.ne.s32.totalorder %s4446_s6, %s3594_s11  ;;  %p3598_p1 = scmp.lt.u32.totalorder %s3594_s11, %s4446_s6 }
  0x10   :  { %401 = vrot.lane.b32.xlu0 %v3669_v5, %s3608_s0  ;;  %403 = vrot.lane.b32.xlu1 %v3660_v3, %s3608_s0  ;;  %p3600_p2 = pnand %p3598_p1, %p3595_p0 }
  0x14   :  { %75 = vrot.lane.b32.xlu0 %v3689_v9, %s3606_s27  ;;  %407 = vrot.lane.b32.xlu1 %v3671_v6, %s3608_s0 }
  0x18   :  { %409 = vrot.lane.b32.xlu0 %v3679_v8, %s3608_s0  ;;  %584 = vrot.lane.b32.xlu1 %v3658_v2, %s3609_s28 }
  0x1c   :  { %586 = vrot.lane.b32.xlu0 %v3669_v5, %s3609_s28  ;;  %588 = vrot.lane.b32.xlu1 %v3660_v3, %s3609_s28 }
  0x20   :  { %592 = vrot.lane.b32.xlu0 %v3671_v6, %s3609_s28  ;;  %594 = vrot.lane.b32.xlu1 %v3679_v8, %s3609_s28 }
  0x24   :  { %405 = vrot.lane.b32.xlu0 %v3689_v9, %s3608_s0  ;;  %769 = vrot.lane.b32.xlu1 %v3658_v2, %s3610_s29 }
  0x28   :  { %771 = vrot.lane.b32.xlu0 %v3669_v5, %s3610_s29  ;;  %773 = vrot.lane.b32.xlu1 %v3660_v3, %s3610_s29 }
  0x2c   :  { %590 = vrot.lane.b32.xlu0 %v3689_v9, %s3609_s28  ;;  %777 = vrot.lane.b32.xlu1 %v3671_v6, %s3610_s29 }
  0x30   :  { %779 = vrot.lane.b32.xlu0 %v3679_v8, %s3610_s29  ;;  %954 = vrot.lane.b32.xlu1 %v3658_v2, %s3611_s30 }
  0x34   :  { %956 = vrot.lane.b32.xlu0 %v3669_v5, %s3611_s30  ;;  %958 = vrot.lane.b32.xlu1 %v3660_v3, %s3611_s30 }
  0x38   :  { %775 = vrot.lane.b32.xlu0 %v3689_v9, %s3610_s29  ;;  %962 = vrot.lane.b32.xlu1 %v3671_v6, %s3611_s30 }
  0x3c   :  { %960 = vrot.lane.b32.xlu1 %v3689_v9, %s3611_s30  ;;  %964 = vrot.lane.b32.xlu0 %v3679_v8, %s3611_s30 }
  0x40   :  { %1141 = vrot.lane.b32.xlu1 %v3669_v5, %s3612_s7  ;;  %1139 = vrot.lane.b32.xlu0 %v3658_v2, %s3612_s7 }
  0x44   :  { %1147 = vrot.lane.b32.xlu1 %v3671_v6, %s3612_s7  ;;  %1143 = vrot.lane.b32.xlu0 %v3660_v3, %s3612_s7 }
  0x48   :  { %1145 = vrot.lane.b32.xlu1 %v3689_v9, %s3612_s7  ;;  %1149 = vrot.lane.b32.xlu0 %v3679_v8, %s3612_s7 }
  0x4c   :  { %1324 = vrot.lane.b32.xlu0 %v3658_v2, %s3613_s8  ;;  %1326 = vrot.lane.b32.xlu1 %v3669_v5, %s3613_s8 }
  0x50   :  { %1328 = vrot.lane.b32.xlu0 %v3660_v3, %s3613_s8  ;;  %1330 = vrot.lane.b32.xlu1 %v3689_v9, %s3613_s8 }
  0x54   :  { %1332 = vrot.lane.b32.xlu0 %v3671_v6, %s3613_s8  ;;  %1334 = vrot.lane.b32.xlu1 %v3679_v8, %s3613_s8 }
  0x58   :  { %1509 = vrot.lane.b32.xlu0 %v3658_v2, %s3614_s9  ;;  %1511 = vrot.lane.b32.xlu1 %v3669_v5, %s3614_s9 }
  0x5c   :  { %1513 = vrot.lane.b32.xlu0 %v3660_v3, %s3614_s9  ;;  %1515 = vrot.lane.b32.xlu1 %v3689_v9, %s3614_s9 }
  0x60   :  { %1517 = vrot.lane.b32.xlu0 %v3671_v6, %s3614_s9  ;;  %1519 = vrot.lane.b32.xlu1 %v3679_v8, %s3614_s9  ;;  %v3564_v6 = vld [vmem:[%s4441_s1 + $0x18] sm:$0xff]  }
  0x64   :  { %1691 = vperm.xlu0 %3553, %v47_v30   ;;  %1696 = vperm.xlu1 %3554, %v48_v31  }
  0x76   :  { %v70_v10 = vpop.permute.xlu0 %69  ;;  %v74_v11 = vpop.permute.xlu1 %73 }
  0x7a   :  { %v72_v12 = vpop.permute.xlu0 %71  ;;  %v78_v13 = vpop.permute.xlu1 %77 }
  0x7b   :  { %v83_v14 = vsel %vm81_vm0, %v72_v12, %v74_v11  ;;  %v82_v15 = vsel %vm81_vm0, %v70_v10, %v72_v12 }
  0x7c   :  { %3352 = vmatprep.subr.msk.bf16.mxu0 %vm91_vm1, %v83_v14  ;;  %v93_v16 = vsel %vm91_vm1, %v82_v15, 0 }
  0x7d   :  { %111 = vmatpush1.bf16.msra.mxu0 %v93_v16 }
  0x7e   :  { %v80_v18 = vpop.permute.xlu0 %79  ;;  %v400_v19 = vpop.permute.xlu1 %399 }
  0x7f   :  { %v86_v20 = vsel %vm81_vm0, %v78_v13, %v80_v18  ;;  %3356 = vmatprep.subr.msk.bf16.mxu0 %vm91_vm1, %v80_v18 }
  0x80   :  { %3353 = vmatmul.mubr.msk.bf16.vlgmr.msra.gmra.mrb[0].mxu0 %vm87_vm2, %v3561_v17  ;;  %v105_v21 = vsel %vm91_vm1, %v86_v20, 0 }
  0x81   :  { %197 = vmatpush1.bf16.msra.mxu0 %v105_v21  ;;  %228 = vmatprep.mubr.bf16.mxu0 %v3607_v7 }
  0x82   :  { %v402_v22 = vpop.permute.xlu0 %401  ;;  %3359 = vmatprep.subr.msk.bf16.mxu0 %vm91_vm1, %v3669_v5  ;;  %v404_v23 = vpop.permute.xlu1 %403 }
  0x83   :  { %v413_v39 = vsel %vm411_vm3, %v402_v22, %v404_v23  ;;  %v412_v42 = vsel %vm411_vm3, %v400_v19, %v402_v22  ;;  %v3565_v22 = vld [vmem:[%s4441_s1 + $0x20] sm:$0xff]  }
  0x84   :  { %v421_v43 = vsel %vm91_vm1, %v412_v42, 0 }
  0x86   :  { %v76_v24 = vpop.permute.xlu0 %75  ;;  %v408_v26 = vpop.permute.xlu1 %407 }
  0x87   :  { %v85_v27 = vsel %vm81_vm0, %v76_v24, %v78_v13  ;;  %v84_v28 = vsel %vm81_vm0, %v74_v11, %v76_v24 }
  0x88   :  { %3354 = vmatprep.subr.msk.bf16.mxu1 %vm91_vm1, %v85_v27  ;;  %3357 = vmatmul.mubr.msk.bf16.vlgmr.msra.gmra.mrb[4].mxu0 %vm87_vm2, %v3561_v17  ;;  %v99_v29 = vsel %vm91_vm1, %v84_v28, 0 }
  0x89   :  { %154 = vmatpush1.bf16.msra.mxu1 %v99_v29  ;;  %266 = vmatpush1.bf16.msra.mxu0 %v248_v25 }
  0x8a   :  { %v410_v32 = vpop.permute.xlu0 %409  ;;  %297 = vmatprep.mubr.bf16.mxu0 %v3607_v7  ;;  %3361 = vmatprep.subr.msk.bf16.mxu1 %vm91_vm1, %v3689_v9  ;;  %v585_v34 = vpop.permute.xlu1 %584 }
  0x8b   :  { %3363 = vmatprep.subr.msk.bf16.mxu0 %vm91_vm1, %v3679_v8  ;;  %v416_v51 = vsel %vm411_vm3, %v408_v26, %v410_v32 }
  0x8c   :  { %3355 = vmatmul.mubr.msk.bf16.vlgmr.msra.gmra.mrb[0].mxu1 %vm87_vm2, %v3561_v17  ;;  %v433_v53 = vsel %vm91_vm1, %v416_v51, 0 }
  0x8d   :  { %309 = vmatpush1.bf16.msra.mxu1 %v254_v33  ;;  %340 = vmatprep.mubr.bf16.mxu1 %v3607_v7 }
  0x8e   :  { %v587_v36 = vpop.permute.xlu0 %586  ;;  %v589_v38 = vpop.permute.xlu1 %588 }
  0x8f   :  { %v598_v56 = vsel %vm596_vm4, %v587_v36, %v589_v38  ;;  %v597_v62 = vsel %vm596_vm4, %v585_v34, %v587_v36 }
  0x90   :  { %3360 = vmatmul.mubr.msk.bf16.vlgmr.msra.gmra.mrb[0].mxu0 %vm87_vm2, %v3562_v35  ;;  %v606_v63 = vsel %vm91_vm1, %v597_v62, 0 }
  0x91   :  { %352 = vmatpush1.bf16.msra.mxu0 %v260_v37  ;;  %383 = vmatprep.mubr.bf16.mxu0 %v3607_v7 }
  0x92   :  { %v593_v40 = vpop.permute.xlu0 %592  ;;  %3366 = vmatprep.subr.msk.bf16.mxu0 %vm91_vm1, %v413_v39  ;;  %v595_v41 = vpop.permute.xlu1 %594 }
  0x93   :  { %v601_v4 = vsel %vm596_vm4, %v593_v40, %v595_v41 }
  0x94   :  { %v618_v9 = vsel %vm91_vm1, %v601_v4, 0 }
  0x96   :  { %v406_v44 = vpop.permute.xlu0 %405  ;;  %v3820_v45 = vpop.permute.xlu1 %769 }
  0x97   :  { %v414_v46 = vsel %vm411_vm3, %v404_v23, %v406_v44  ;;  %v415_v47 = vsel %vm411_vm3, %v406_v44, %v408_v26 }
  0x98   :  { %3362 = vmatmul.mubr.msk.bf16.vlgmr.msra.gmra.mrb[0].mxu1 %vm87_vm2, %v3562_v35  ;;  %3364 = vmatmul.mubr.msk.bf16.vlgmr.msra.gmra.mrb[4].mxu0 %vm87_vm2, %v3562_v35  ;;  %v427_v48 = vsel %vm91_vm1, %v414_v46, 0  ;;  %v3566_v35 = vld [vmem:[%s4441_s1 + $0x28] sm:$0xff]  }
  0x99   :  { %439 = vmatpush1.bf16.msra.mxu0 %v421_v43  ;;  %3368 = vmatprep.subr.msk.bf16.mxu1 %vm91_vm1, %v415_v47 }
  0x9a   :  { %482 = vmatpush1.bf16.msra.mxu1 %v427_v48  ;;  %470 = vmatprep.mubr.bf16.mxu0 %v3607_v7  ;;  %v772_v49 = vpop.permute.xlu0 %771  ;;  %v774_v50 = vpop.permute.xlu1 %773 }
  0x9b   :  { %513 = vmatprep.mubr.bf16.mxu1 %v3607_v7  ;;  %3370 = vmatprep.subr.msk.bf16.mxu0 %vm91_vm1, %v410_v32  ;;  %v783_v12 = vsel %vm781_vm5, %v772_v49, %v774_v50  ;;  %v782_v17 = vsel %vm781_vm5, %v3820_v45, %v772_v49  ;;  %v3567_v49 = vld [vmem:[%s4441_s1 + $0x30] sm:$0xff]  }
  0x9c   :  { %v791_v18 = vsel %vm91_vm1, %v782_v17, 0 }
  0x9e   :  { %v591_v54 = vpop.permute.xlu0 %590  ;;  %v3836_v55 = vpop.permute.xlu1 %777 }
  0x9f   :  { %v599_v57 = vsel %vm596_vm4, %v589_v38, %v591_v54  ;;  %v600_v58 = vsel %vm596_vm4, %v591_v54, %v593_v40 }
  0xa0   :  { %3367 = vmatmul.mubr.msk.bf16.vlgmr.msra.gmra.mrb[0].mxu0 %vm87_vm2, %v3563_v52  ;;  %3375 = vmatprep.subr.msk.bf16.mxu1 %vm91_vm1, %v600_v58  ;;  %v612_v59 = vsel %vm91_vm1, %v599_v57, 0  ;;  %v3568_v57 = vld [vmem:[%s4441_s1 + $0x38] sm:$0xff]  }
  0xa1   :  { %525 = vmatpush1.bf16.msra.mxu0 %v433_v53  ;;  %556 = vmatprep.mubr.bf16.mxu0 %v3607_v7 }
  0xa2   :  { %3373 = vmatprep.subr.msk.bf16.mxu0 %vm91_vm1, %v598_v56  ;;  %v780_v60 = vpop.permute.xlu0 %779  ;;  %v3846_v61 = vpop.permute.xlu1 %954 }
  0xa3   :  { %v786_v26 = vsel %vm781_vm5, %v3836_v55, %v780_v60 }
  0xa4   :  { %3369 = vmatmul.mubr.msk.bf16.vlgmr.msra.gmra.mrb[0].mxu1 %vm87_vm2, %v3563_v52  ;;  %v803_v28 = vsel %vm91_vm1, %v786_v26, 0 }
  0xa5   :  { %667 = vmatpush1.bf16.msra.mxu1 %v612_v59  ;;  %698 = vmatprep.mubr.bf16.mxu1 %v3607_v7 }
  0xa6   :  { %v957_v0 = vpop.permute.xlu0 %956  ;;  %v959_v1 = vpop.permute.xlu1 %958 }
  0xa7   :  { %v968_v31 = vsel %vm966_vm6, %v957_v0, %v959_v1  ;;  %v967_v34 = vsel %vm966_vm6, %v3846_v61, %v957_v0  ;;  %v3569_v0 = vld [vmem:[%s4441_s1 + $0x40] sm:$0xff]  }
  0xa8   :  { %3371 = vmatmul.mubr.msk.bf16.vlgmr.msra.gmra.mrb[4].mxu0 %vm87_vm2, %v3563_v52  ;;  %v976_v37 = vsel %vm91_vm1, %v967_v34, 0 }
  0xa9   :  { %624 = vmatpush1.bf16.msra.mxu0 %v606_v63  ;;  %655 = vmatprep.mubr.bf16.mxu0 %v3607_v7 }
  0xaa   :  { %3377 = vmatprep.subr.msk.bf16.mxu0 %vm91_vm1, %v595_v41  ;;  %v776_v2 = vpop.permute.xlu0 %775  ;;  %v3855_v3 = vpop.permute.xlu1 %962 }
  0xab   :  { %v785_v5 = vsel %vm781_vm5, %v776_v2, %v3836_v55  ;;  %v784_v8 = vsel %vm781_vm5, %v774_v50, %v776_v2 }
  0xac   :  { %3382 = vmatprep.subr.msk.bf16.mxu1 %vm91_vm1, %v785_v5  ;;  %v797_v13 = vsel %vm91_vm1, %v784_v8, 0 }
  0xae   :  { %v961_v10 = vpop.permute.xlu1 %960  ;;  %v965_v11 = vpop.permute.xlu0 %964 }
  0xaf   :  { %v970_v14 = vsel %vm966_vm6, %v961_v10, %v3855_v3  ;;  %v969_v21 = vsel %vm966_vm6, %v959_v1, %v961_v10  ;;  %v971_v44 = vsel %vm966_vm6, %v3855_v3, %v965_v11  ;;  %v1724_v10 = vlaneseq }
  0xb0   :  { %3374 = vmatmul.mubr.msk.bf16.vlgmr.msra.gmra.mrb[0].mxu0 %vm87_vm2, %v3564_v6  ;;  %3376 = vmatmul.mubr.msk.bf16.vlgmr.msra.gmra.mrb[0].mxu1 %vm87_vm2, %v3564_v6  ;;  %v982_v23 = vsel %vm91_vm1, %v969_v21, 0  ;;  %v988_v45 = vsel %vm91_vm1, %v971_v44, 0 }
  0xb1   :  { %710 = vmatpush1.bf16.msra.mxu0 %v618_v9  ;;  %741 = vmatprep.mubr.bf16.mxu0 %v3607_v7 }
  0xb2   :  { %3380 = vmatprep.subr.msk.bf16.mxu0 %vm91_vm1, %v783_v12  ;;  %852 = vmatpush1.bf16.msra.mxu1 %v797_v13  ;;  %v3874_v15 = vpop.permute.xlu1 %1141  ;;  %v3876_v16 = vpop.permute.xlu0 %1139 }
  0xb3   :  { %883 = vmatprep.mubr.bf16.mxu1 %v3607_v7  ;;  %3389 = vmatprep.subr.msk.bf16.mxu1 %vm91_vm1, %v970_v14  ;;  %v1152_v53 = vsel %vm1151_vm7, %v3876_v16, %v3874_v15 }
  0xb4   :  { %v1161_v55 = vsel %vm91_vm1, %v1152_v53, 0 }
  0xb6   :  { %v3883_v19 = vpop.permute.xlu1 %1147  ;;  %v1144_v20 = vpop.permute.xlu0 %1143 }
  0xb7   :  { %v1153_v47 = vsel %vm1151_vm7, %v3874_v15, %v1144_v20  ;;  %v25_v15 = vld [vmem:[%s4445_s5] sm:$0x3f]  ;;  %s3615_s5 = smov 19  }
  0xb8   :  { %3378 = vmatmul.mubr.msk.bf16.vlgmr.msra.gmra.mrb[4].mxu0 %vm87_vm2, %v3564_v6 }
  0xb9   :  { %809 = vmatpush1.bf16.msra.mxu0 %v791_v18  ;;  %840 = vmatprep.mubr.bf16.mxu0 %v3607_v7 }
  0xba   :  { %3384 = vmatprep.subr.msk.bf16.mxu0 %vm91_vm1, %v780_v60  ;;  %v1146_v24 = vpop.permute.xlu1 %1145  ;;  %v1150_v25 = vpop.permute.xlu0 %1149 }
  0xbb   :  { %v1155_v27 = vsel %vm1151_vm7, %v1146_v24, %v3883_v19  ;;  %v1154_v36 = vsel %vm1151_vm7, %v1144_v20, %v1146_v24  ;;  %v1156_v56 = vsel %vm1151_vm7, %v3883_v19, %v1150_v25 }
  0xbc   :  { %3383 = vmatmul.mubr.msk.bf16.vlgmr.msra.gmra.mrb[0].mxu1 %vm87_vm2, %v3565_v22  ;;  %v1167_v40 = vsel %vm91_vm1, %v1154_v36, 0  ;;  %v1173_v59 = vsel %vm91_vm1, %v1156_v56, 0 }
  0xbd   :  { %1037 = vmatpush1.bf16.msra.mxu1 %v982_v23  ;;  %1068 = vmatprep.mubr.bf16.mxu1 %v3607_v7 }
  0xbe   :  { %3396 = vmatprep.subr.msk.bf16.mxu1 %vm91_vm1, %v1155_v27  ;;  %v3901_v29 = vpop.permute.xlu0 %1324  ;;  %v3903_v30 = vpop.permute.xlu1 %1326 }
  0xbf   :  { %v1337_v62 = vsel %vm1336_vm8, %v3901_v29, %v3903_v30 }
  0xc0   :  { %3381 = vmatmul.mubr.msk.bf16.vlgmr.msra.gmra.mrb[0].mxu0 %vm87_vm2, %v3565_v22  ;;  %v1346_v63 = vsel %vm91_vm1, %v1337_v62, 0 }
  0xc1   :  { %895 = vmatpush1.bf16.msra.mxu0 %v803_v28  ;;  %926 = vmatprep.mubr.bf16.mxu0 %v3607_v7 }
  0xc2   :  { %3387 = vmatprep.subr.msk.bf16.mxu0 %vm91_vm1, %v968_v31  ;;  %v1329_v32 = vpop.permute.xlu0 %1328  ;;  %v1331_v33 = vpop.permute.xlu1 %1330 }
  0xc3   :  { %v1339_v48 = vsel %vm1336_vm8, %v1329_v32, %v1331_v33  ;;  %v1338_v60 = vsel %vm1336_vm8, %v3903_v30, %v1329_v32 }
  0xc4   :  { %v1352_v51 = vsel %vm91_vm1, %v1339_v48, 0 }
  0xc6   :  { %v1333_v38 = vpop.permute.xlu0 %1332  ;;  %v1335_v39 = vpop.permute.xlu1 %1334 }
  0xc7   :  { %v1340_v41 = vsel %vm1336_vm8, %v1331_v33, %v1333_v38  ;;  %v1341_v1 = vsel %vm1336_vm8, %v1333_v38, %v1335_v39 }
  0xc8   :  { %3385 = vmatmul.mubr.msk.bf16.vlgmr.msra.gmra.mrb[4].mxu0 %vm87_vm2, %v3565_v22  ;;  %3390 = vmatmul.mubr.msk.bf16.vlgmr.msra.gmra.mrb[0].mxu1 %vm87_vm2, %v3566_v35  ;;  %v1358_v2 = vsel %vm91_vm1, %v1341_v1, 0 }
  0xc9   :  { %994 = vmatpush1.bf16.msra.mxu0 %v976_v37  ;;  %1025 = vmatprep.mubr.bf16.mxu0 %v3607_v7 }
  0xca   :  { %1222 = vmatpush1.bf16.msra.mxu1 %v1167_v40  ;;  %3391 = vmatprep.subr.msk.bf16.mxu0 %vm91_vm1, %v965_v11  ;;  %v1510_v42 = vpop.permute.xlu0 %1509  ;;  %v1512_v43 = vpop.permute.xlu1 %1511  ;;  %v3992_v11 = vshrl.u32 %v1724_v10, 7 }
  0xcb   :  { %1253 = vmatprep.mubr.bf16.mxu1 %v3607_v7  ;;  %3403 = vmatprep.subr.msk.bf16.mxu1 %vm91_vm1, %v1340_v41  ;;  %v1522_v4 = vsel %vm1521_vm9, %v1510_v42, %v1512_v43 }
  0xcc   :  { %v1531_v5 = vsel %vm91_vm1, %v1522_v4, 0  ;;  %v1734_v13 = vsub.s32 2, %v3992_v11  ;;  %v1738_v16 = vsub.s32 3, %v3992_v11  ;;  %v1726_v37 = vsub.s32 0, %v3992_v11 }
  0xce   :  { %v1514_v46 = vpop.permute.xlu0 %1513  ;;  %v1516_v50 = vpop.permute.xlu1 %1515  ;;  %v3999_v23 = vrot.slane %v25_v15, %v1734_v13  ;;  %v4001_v27 = vrot.slane %v25_v15, %v1738_v16 }
  0xcf   :  { %v1524_v58 = vsel %vm1521_vm9, %v1514_v46, %v1516_v50  ;;  %v1523_v3 = vsel %vm1521_vm9, %v1512_v43, %v1514_v46 }
  0xd0   :  { %3388 = vmatmul.mubr.msk.bf16.vlgmr.msra.gmra.mrb[0].mxu0 %vm87_vm2, %v3566_v35  ;;  %v1537_v61 = vsel %vm91_vm1, %v1524_v58, 0 }
  0xd1   :  { %1080 = vmatpush1.bf16.msra.mxu0 %v988_v45  ;;  %1111 = vmatprep.mubr.bf16.mxu0 %v3607_v7  ;;  %v4009_v45 = vrot.slane %v25_v15, %v1726_v37 }
  0xd2   :  { %3394 = vmatprep.subr.msk.bf16.mxu0 %vm91_vm1, %v1153_v47  ;;  %v1518_v52 = vpop.permute.xlu0 %1517  ;;  %v1520_v6 = vpop.permute.xlu1 %1519 }
  0xd3   :  { %v1525_v54 = vsel %vm1521_vm9, %v1516_v50, %v1518_v52  ;;  %v1526_v8 = vsel %vm1521_vm9, %v1518_v52, %v1520_v6 }
  0xd4   :  { %3397 = vmatmul.mubr.msk.bf16.vlgmr.msra.gmra.mrb[0].mxu1 %vm87_vm2, %v3567_v49  ;;  %v1543_v9 = vsel %vm91_vm1, %v1526_v8, 0 }
  0xd5   :  { %1407 = vmatpush1.bf16.msra.mxu1 %v1352_v51  ;;  %1438 = vmatprep.mubr.bf16.mxu1 %v3607_v7 }
  0xd6   :  { %3410 = vmatprep.subr.msk.bf16.mxu1 %vm91_vm1, %v1525_v54 }
  0xd8   :  { %3392 = vmatmul.mubr.msk.bf16.vlgmr.msra.gmra.mrb[4].mxu0 %vm87_vm2, %v3566_v35 }
  0xd9   :  { %1179 = vmatpush1.bf16.msra.mxu0 %v1161_v55  ;;  %1210 = vmatprep.mubr.bf16.mxu0 %v3607_v7  ;;  %v1742_v55 = vsub.s32 4, %v3992_v11 }
  0xda   :  { %3398 = vmatprep.subr.msk.bf16.mxu0 %vm91_vm1, %v1150_v25 }
  0xe0   :  { %3395 = vmatmul.mubr.msk.bf16.vlgmr.msra.gmra.mrb[0].mxu0 %vm87_vm2, %v3567_v49  ;;  %3404 = vmatmul.mubr.msk.bf16.vlgmr.msra.gmra.mrb[0].mxu1 %vm87_vm2, %v3568_v57 }
  0xe1   :  { %1265 = vmatpush1.bf16.msra.mxu0 %v1173_v59  ;;  %1296 = vmatprep.mubr.bf16.mxu0 %v3607_v7  ;;  %v1746_v59 = vsub.s32 5, %v3992_v11 }
  0xe2   :  { %3401 = vmatprep.subr.msk.bf16.mxu0 %vm91_vm1, %v1338_v60  ;;  %1592 = vmatpush1.bf16.msra.mxu1 %v1537_v61 }
  0xe3   :  { %1623 = vmatprep.mubr.bf16.mxu1 %v3607_v7  ;;  %v1692_v12 = vpop.permute.xlu0 %1691  ;;  %v1697_v17 = vpop.permute.xlu1 %1696  ;;  %v4021_v8 = vrot.slane %v25_v15, %v1746_v59  ;;  %v1809_v59 = vld [vmem:[%s4443_s3] sm:$0xf] }
  0xe8   :  { %3399 = vmatmul.mubr.msk.bf16.vlgmr.msra.gmra.mrb[4].mxu0 %vm87_vm2, %v3567_v49 }
  0xe9   :  { %1364 = vmatpush1.bf16.msra.mxu0 %v1346_v63  ;;  %1395 = vmatprep.mubr.bf16.mxu0 %v3607_v7 }
  0xea   :  { %3405 = vmatprep.subr.msk.bf16.mxu0 %vm91_vm1, %v1335_v39  ;;  %v1730_v39 = vsub.s32 1, %v3992_v11 }
  0xec   :  { %3411 = vmatmul.mubr.msk.bf16.vlgmr.msra.gmra.mrb[0].mxu1 %vm87_vm2, %v3569_v0  ;;  %v4011_v49 = vrot.slane %v25_v15, %v1730_v39  ;;  %v1810_v39 = vld [vmem:[%s4443_s3 + $0x4] sm:$0xf] }
  0xed   :  { %1880 = vmatprep.mubr.bf16.mxu1 %v3607_v7 }
  0xf0   :  { %3402 = vmatmul.mubr.msk.bf16.vlgmr.msra.gmra.mrb[0].mxu0 %vm87_vm2, %v3568_v57 }
  0xf1   :  { %1450 = vmatpush1.bf16.msra.mxu0 %v1358_v2  ;;  %1481 = vmatprep.mubr.bf16.mxu0 %v3607_v7 }
  0xf2   :  { %3408 = vmatprep.subr.msk.bf16.mxu0 %vm91_vm1, %v1523_v3  ;;  %v4019_v3 = vrot.slane %v25_v15, %v1742_v55 }
  0xf8   :  { %3406 = vmatmul.mubr.msk.bf16.vlgmr.msra.gmra.mrb[4].mxu0 %vm87_vm2, %v3568_v57 }
  0xf9   :  { %1549 = vmatpush1.bf16.msra.mxu0 %v1531_v5  ;;  %1580 = vmatprep.mubr.bf16.mxu0 %v3607_v7 }
  0xfa   :  { %3412 = vmatprep.subr.msk.bf16.mxu0 %vm91_vm1, %v1520_v6 }
 0x100   :  { %3409 = vmatmul.mubr.msk.bf16.vlgmr.msra.gmra.mrb[0].mxu0 %vm87_vm2, %v3569_v0 }
 0x101   :  { %1635 = vmatpush1.bf16.msra.mxu0 %v1543_v9  ;;  %1666 = vmatprep.mubr.bf16.mxu0 %v3607_v7 }
 0x108   :  { %3413 = vmatmul.mubr.msk.bf16.vlgmr.msra.gmra.mrb[4].mxu0 %vm87_vm2, %v3569_v0  ;;  %vm3307_vm2 = vcmask 1040384  }
 0x109   :  { %2310 = vmatprep.mubr.bf16.mxu0 %v3607_v7 }
 0x1bf   :  { %v1625_v14 = vpop.f32.mrb[0].mxu1 }
 0x1c0   :  { %v1627_v18 = vpop.f32.mrb[1].mxu1  ;;  %v1701_v19 = vadd.f32 %v1692_v12, %v1625_v14 }
 0x1c1   :  { %v1702_v20 = vadd.f32 %v1692_v12, %v1627_v18  ;;  %v1629_v21 = vpop.f32.mrb[2].mxu1 }
 0x1c2   :  { %v1707_v22 = vadd.f32 %v1697_v17, %v1629_v21  ;;  %v1631_v24 = vpop.f32.mrb[3].mxu1  ;;  %v1713_v25 = vmax.f32 %v1701_v19, 0.0 }
 0x1c3   :  { %v1714_v26 = vmax.f32 %v1702_v20, 0.0  ;;  %v1708_v28 = vadd.f32 %v1697_v17, %v1631_v24 }
 0x1c4   :  { %v1719_v29 = vmax.f32 %v1707_v22, 0.0  ;;  %v1756_v32 = vmul.f32 %v3999_v23, %v1713_v25 }
 0x1c5   :  { %v1720_v30 = vmax.f32 %v1708_v28, 0.0  ;;  %v1757_v33 = vmul.f32 %v4001_v27, %v1714_v26 }
 0x1c6   :  { %v1762_v31 = vmul.f32 %v3999_v23, %v1719_v29 }
 0x1c7   :  { %v1763_v34 = vmul.f32 %v4001_v27, %v1720_v30 }
 0x1c8   :  { %v1768_v35 = vpack.c.bf16 %v1762_v31, %v1756_v32 }
 0x1c9   :  { %v1769_v36 = vpack.c.bf16 %v1763_v34, %v1757_v33  ;;  %v1818_v33 = vld [vmem:[%s4444_s4] sm:$0xff] }
 0x1d3   :  { %v1582_v38 = vpop.f32.mrb[0].mxu0 }
 0x1d4   :  { %v1699_v40 = vadd.f32 %v1692_v12, %v1582_v38  ;;  %v1584_v41 = vpop.f32.mrb[1].mxu0 }
 0x1d5   :  { %v1700_v42 = vadd.f32 %v1692_v12, %v1584_v41  ;;  %v1586_v43 = vpop.f32.mrb[2].mxu0 }
 0x1d6   :  { %v1711_v44 = vmax.f32 %v1699_v40, 0.0  ;;  %v1705_v46 = vadd.f32 %v1697_v17, %v1586_v43  ;;  %v1588_v47 = vpop.f32.mrb[3].mxu0 }
 0x1d7   :  { %v1712_v48 = vmax.f32 %v1700_v42, 0.0  ;;  %v1706_v50 = vadd.f32 %v1697_v17, %v1588_v47 }
 0x1d8   :  { %v1717_v51 = vmax.f32 %v1705_v46, 0.0  ;;  %v1754_v53 = vmul.f32 %v4009_v45, %v1711_v44 }
 0x1d9   :  { %v1718_v52 = vmax.f32 %v1706_v50, 0.0  ;;  %v1755_v56 = vmul.f32 %v4011_v49, %v1712_v48 }
 0x1da   :  { %v1760_v54 = vmul.f32 %v4009_v45, %v1717_v51 }
 0x1db   :  { %v1761_v57 = vmul.f32 %v4011_v49, %v1718_v52  ;;  %v1668_v58 = vpop.f32.mrb[4].mxu0 }
 0x1dc   :  { %v1703_v60 = vadd.f32 %v1692_v12, %v1668_v58  ;;  %v1670_v61 = vpop.f32.mrb[5].mxu0  ;;  %v1766_v62 = vpack.c.bf16 %v1760_v54, %v1754_v53 }
 0x1dd   :  { %v1704_v63 = vadd.f32 %v1692_v12, %v1670_v61  ;;  %v1672_v0 = vpop.f32.mrb[6].mxu0  ;;  %v1767_v1 = vpack.c.bf16 %v1761_v57, %v1755_v56 }
 0x1de   :  { %v1715_v2 = vmax.f32 %v1703_v60, 0.0  ;;  %v1709_v4 = vadd.f32 %v1697_v17, %v1672_v0  ;;  %v1674_v5 = vpop.f32.mrb[7].mxu0  ;;  %1778 = vrot.lane.b32.xlu1 %v1766_v62, %s3615_s5  ;;  %v4169_v60 = vld [vmem:[%s4443_s3 + $0xc] sm:$0xf] }
 0x1df   :  { %v1716_v6 = vmax.f32 %v1704_v63, 0.0  ;;  %v1710_v9 = vadd.f32 %v1697_v17, %v1674_v5  ;;  %1780 = vrot.lane.b32.xlu0 %v1767_v1, %s3615_s5 }
 0x1e0   :  { %v1721_v10 = vmax.f32 %v1709_v4, 0.0  ;;  %v1758_v13 = vmul.f32 %v4019_v3, %v1715_v2 }
 0x1e1   :  { %v1722_v11 = vmax.f32 %v1710_v9, 0.0  ;;  %v1759_v14 = vmul.f32 %v4021_v8, %v1716_v6 }
 0x1e2   :  { %v1764_v12 = vmul.f32 %v4019_v3, %v1721_v10  ;;  %1782 = vrot.lane.b32.xlu1 %v1768_v35, %s3615_s5 }
 0x1e3   :  { %v1765_v16 = vmul.f32 %v4021_v8, %v1722_v11  ;;  %1784 = vrot.lane.b32.xlu0 %v1769_v36, %s3615_s5 }
 0x1e4   :  { %v1770_v18 = vpack.c.bf16 %v1764_v12, %v1758_v13  ;;  %v4210_v12 = vld [vmem:[%s4443_s3 + $0x10] sm:$0xf] }
 0x1e5   :  { %v1771_v19 = vpack.c.bf16 %v1765_v16, %v1759_v14 }
 0x1e6   :  { %1786 = vrot.lane.b32.xlu1 %v1770_v18, %s3615_s5 }
 0x1e7   :  { %1788 = vrot.lane.b32.xlu0 %v1771_v19, %s3615_s5 }
 0x250   :  { %v4027_v15 = vpop.permute.xlu1 %1778 }
 0x251   :  { %v1781_v17 = vpop.permute.xlu0 %1780  ;;  %v1803_v25 = vsel %vm1790_vm10, 0, %v4027_v15 }
 0x252   :  { %v4031_v20 = vsel %vm1790_vm10, %v4027_v15, %v1781_v17 }
 0x253   :  { %1823 = vrot.lane.b32.xlu1 %v4031_v20, %s3606_s27 }
 0x254   :  { %v1783_v21 = vpop.permute.xlu1 %1782 }
 0x255   :  { %v4036_v22 = vsel %vm1790_vm10, %v1781_v17, %v1783_v21  ;;  %v1785_v24 = vpop.permute.xlu0 %1784 }
 0x256   :  { %1825 = vrot.lane.b32.xlu0 %v4036_v22, %s3606_s27  ;;  %v4044_v28 = vsel %vm1790_vm10, %v1783_v21, %v1785_v24  ;;  %v1811_v21 = vld [vmem:[%s4443_s3 + $0x8] sm:$0xf] }
 0x257   :  { %1821 = vrot.lane.b32.xlu1 %v1803_v25, %s3606_s27 }
 0x258   :  { %v1787_v26 = vpop.permute.xlu1 %1786 }
 0x259   :  { %v4047_v29 = vsel %vm1790_vm10, %v1785_v24, %v1787_v26  ;;  %v1789_v30 = vpop.permute.xlu0 %1788  ;;  %v4234_v24 = vld [vmem:[%s4443_s3 + $0x14] sm:$0xf] }
 0x25a   :  { %v4050_v31 = vsel %vm1790_vm10, %v1787_v26, %v1789_v30  ;;  %1827 = vrot.lane.b32.xlu0 %v4044_v28, %s3606_s27 }
 0x25b   :  { %1829 = vrot.lane.b32.xlu1 %v4047_v29, %s3606_s27  ;;  %v1807_v32 = vsel %vm1805_vm11, %v4050_v31, 0 }
 0x25e   :  { %1831 = vrot.lane.b32.xlu0 %v1807_v32, %s3606_s27 }
 0x25f   :  { %2099 = vrot.lane.b32.xlu1 %v4031_v20, %s3608_s0 }
 0x262   :  { %2101 = vrot.lane.b32.xlu0 %v4036_v22, %s3608_s0 }
 0x263   :  { %2097 = vrot.lane.b32.xlu1 %v1803_v25, %s3608_s0 }
 0x266   :  { %2103 = vrot.lane.b32.xlu0 %v4044_v28, %s3608_s0 }
 0x267   :  { %2105 = vrot.lane.b32.xlu1 %v4047_v29, %s3608_s0 }
 0x26a   :  { %2107 = vrot.lane.b32.xlu0 %v1807_v32, %s3608_s0 }
 0x26b   :  { %2254 = vrot.lane.b32.xlu1 %v4031_v20, %s3609_s28 }
 0x26e   :  { %2256 = vrot.lane.b32.xlu0 %v4036_v22, %s3609_s28 }
 0x26f   :  { %2252 = vrot.lane.b32.xlu1 %v1803_v25, %s3609_s28 }
 0x272   :  { %2258 = vrot.lane.b32.xlu0 %v4044_v28, %s3609_s28 }
 0x273   :  { %2260 = vrot.lane.b32.xlu1 %v4047_v29, %s3609_s28 }
 0x276   :  { %2262 = vrot.lane.b32.xlu0 %v1807_v32, %s3609_s28 }
 0x277   :  { %2409 = vrot.lane.b32.xlu1 %v4031_v20, %s3610_s29 }
 0x27a   :  { %2411 = vrot.lane.b32.xlu0 %v4036_v22, %s3610_s29 }
 0x27b   :  { %2407 = vrot.lane.b32.xlu1 %v1803_v25, %s3610_s29 }
 0x27e   :  { %2413 = vrot.lane.b32.xlu0 %v4044_v28, %s3610_s29 }
 0x27f   :  { %2415 = vrot.lane.b32.xlu1 %v4047_v29, %s3610_s29 }
 0x282   :  { %2417 = vrot.lane.b32.xlu0 %v1807_v32, %s3610_s29 }
 0x283   :  { %2564 = vrot.lane.b32.xlu1 %v4031_v20, %s3611_s30 }
 0x286   :  { %2566 = vrot.lane.b32.xlu0 %v4036_v22, %s3611_s30 }
 0x287   :  { %2562 = vrot.lane.b32.xlu1 %v1803_v25, %s3611_s30 }
 0x28a   :  { %2568 = vrot.lane.b32.xlu0 %v4044_v28, %s3611_s30 }
 0x28b   :  { %2570 = vrot.lane.b32.xlu1 %v4047_v29, %s3611_s30 }
 0x28e   :  { %2572 = vrot.lane.b32.xlu0 %v1807_v32, %s3611_s30 }
 0x28f   :  { %2719 = vrot.lane.b32.xlu1 %v4031_v20, %s3612_s7 }
 0x292   :  { %2721 = vrot.lane.b32.xlu0 %v4036_v22, %s3612_s7 }
 0x293   :  { %2717 = vrot.lane.b32.xlu1 %v1803_v25, %s3612_s7 }
 0x296   :  { %2723 = vrot.lane.b32.xlu0 %v4044_v28, %s3612_s7 }
 0x297   :  { %2725 = vrot.lane.b32.xlu1 %v4047_v29, %s3612_s7 }
 0x29a   :  { %2727 = vrot.lane.b32.xlu0 %v1807_v32, %s3612_s7 }
 0x29b   :  { %2874 = vrot.lane.b32.xlu1 %v4031_v20, %s3613_s8 }
 0x29e   :  { %2876 = vrot.lane.b32.xlu0 %v4036_v22, %s3613_s8 }
 0x29f   :  { %2872 = vrot.lane.b32.xlu1 %v1803_v25, %s3613_s8 }
 0x2a2   :  { %2878 = vrot.lane.b32.xlu0 %v4044_v28, %s3613_s8 }
 0x2a3   :  { %2880 = vrot.lane.b32.xlu1 %v4047_v29, %s3613_s8 }
 0x2a6   :  { %2882 = vrot.lane.b32.xlu0 %v1807_v32, %s3613_s8 }
 0x2a7   :  { %3029 = vrot.lane.b32.xlu1 %v4031_v20, %s3614_s9 }
 0x2aa   :  { %3031 = vrot.lane.b32.xlu0 %v4036_v22, %s3614_s9 }
 0x2ab   :  { %3027 = vrot.lane.b32.xlu1 %v1803_v25, %s3614_s9 }
 0x2ae   :  { %3033 = vrot.lane.b32.xlu0 %v4044_v28, %s3614_s9 }
 0x2af   :  { %3035 = vrot.lane.b32.xlu1 %v4047_v29, %s3614_s9 }
 0x2b2   :  { %3037 = vrot.lane.b32.xlu0 %v1807_v32, %s3614_s9 }
 0x2b3   :  { %3184 = vperm.xlu1 %3554, %v1818_v33  }
 0x2c5   :  { %v1824_v34 = vpop.permute.xlu1 %1823 }
 0x2c8   :  { %v1826_v35 = vpop.permute.xlu0 %1825 }
 0x2c9   :  { %v1822_v36 = vpop.permute.xlu1 %1821  ;;  %v1834_v37 = vsel %vm81_vm0, %v1824_v34, %v1826_v35 }
 0x2ca   :  { %v1833_v38 = vsel %vm81_vm0, %v1822_v36, %v1824_v34  ;;  %1848 = vmatprep.subr.bf16.mxu1 %v1834_v37 }
 0x2cb   :  { %1849 = vmatpush1.bf16.msra.mxu1 %v1833_v38 }
 0x2cc   :  { %v1828_v40 = vpop.permute.xlu0 %1827 }
 0x2cd   :  { %v1830_v41 = vpop.permute.xlu1 %1829  ;;  %v1835_v43 = vsel %vm81_vm0, %v1826_v35, %v1828_v40 }
 0x2ce   :  { %3414 = vmatmul.mubr.msk.bf16.vlgmr.msra.gmra.mrb[4].mxu1 %vm1844_vm12, %v1810_v39  ;;  %v1836_v42 = vsel %vm81_vm0, %v1828_v40, %v1830_v41  ;;  %v4277_v40 = vld [vmem:[%s4443_s3 + $0x18] sm:$0xf] }
 0x2cf   :  { %1889 = vmatprep.subr.bf16.mxu1 %v1836_v42  ;;  %1921 = vmatprep.mubr.bf16.mxu1 %v3607_v7 }
 0x2d0   :  { %v1832_v44 = vpop.permute.xlu0 %1831  ;;  %1890 = vmatpush1.bf16.msra.mxu1 %v1835_v43 }
 0x2d1   :  { %1930 = vmatprep.subr.bf16.mxu1 %v1832_v44  ;;  %v2100_v46 = vpop.permute.xlu1 %2099  ;;  %v1837_v50 = vsel %vm81_vm0, %v1830_v41, %v1832_v44 }
 0x2d4   :  { %v4141_v47 = vpop.permute.xlu0 %2101 }
 0x2d5   :  { %v2098_v48 = vpop.permute.xlu1 %2097  ;;  %v2110_v5 = vsel %vm411_vm3, %v2100_v46, %v4141_v47 }
 0x2d6   :  { %3415 = vmatmul.mubr.msk.bf16.vlgmr.msra.gmra.mrb[8].mxu1 %vm1844_vm12, %v1810_v39  ;;  %v2109_v16 = vsel %vm411_vm3, %v2098_v48, %v2100_v46 }
 0x2d7   :  { %1931 = vmatpush1.bf16.msra.mxu1 %v1837_v50  ;;  %1962 = vmatprep.mubr.bf16.mxu1 %v3607_v7 }
 0x2d8   :  { %1974 = vmatprep.subr.bf16.mxu1 %v4031_v20  ;;  %v4147_v51 = vpop.permute.xlu0 %2103 }
 0x2d9   :  { %v4149_v52 = vpop.permute.xlu1 %2105  ;;  %v2111_v26 = vsel %vm411_vm3, %v4141_v47, %v4147_v51 }
 0x2da   :  { %v2112_v18 = vsel %vm411_vm3, %v4147_v51, %v4149_v52  ;;  %v1816_v51 = vld [vmem:[%s4443_s3 + $0x1c] sm:$0xf] }
 0x2dc   :  { %v4151_v53 = vpop.permute.xlu0 %2107 }
 0x2dd   :  { %v2255_v54 = vpop.permute.xlu1 %2254  ;;  %v2113_v33 = vsel %vm411_vm3, %v4149_v52, %v4151_v53 }
 0x2de   :  { %3416 = vmatmul.mubr.msk.bf16.vlgmr.msra.gmra.mrb[12].mxu1 %vm1844_vm12, %v1810_v39 }
 0x2df   :  { %3418 = vmatpush1.bf16.msk.msra.mxu1 %vm3417_vm13, %v4027_v15  ;;  %2006 = vmatprep.mubr.bf16.mxu1 %v3607_v7 }
 0x2e0   :  { %2015 = vmatprep.subr.bf16.mxu1 %v4044_v28  ;;  %v4158_v55 = vpop.permute.xlu0 %2256 }
 0x2e1   :  { %v2253_v56 = vpop.permute.xlu1 %2252  ;;  %v2265_v57 = vsel %vm596_vm4, %v2255_v54, %v4158_v55 }
 0x2e2   :  { %v2264_v58 = vsel %vm596_vm4, %v2253_v56, %v2255_v54  ;;  %2278 = vmatprep.subr.bf16.mxu0 %v2265_v57 }
 0x2e3   :  { %2279 = vmatpush1.bf16.msra.mxu0 %v2264_v58 }
 0x2e4   :  { %v4171_v61 = vpop.permute.xlu0 %2258 }
 0x2e5   :  { %v4173_v62 = vpop.permute.xlu1 %2260  ;;  %v2266_v42 = vsel %vm596_vm4, %v4158_v55, %v4171_v61 }
 0x2e6   :  { %3419 = vmatmul.mubr.msk.bf16.vlgmr.msra.gmra.mrb[16].mxu1 %vm1844_vm12, %v1809_v59  ;;  %3426 = vmatmul.mubr.msk.bf16.vlgmr.msra.gmra.mrb[8].mxu0 %vm1844_vm12, %v4169_v60  ;;  %v2267_v34 = vsel %vm596_vm4, %v4171_v61, %v4173_v62 }
 0x2e7   :  { %2016 = vmatpush1.bf16.msra.mxu1 %v4036_v22  ;;  %2047 = vmatprep.mubr.bf16.mxu1 %v3607_v7 }
 0x2e8   :  { %3421 = vmatprep.subr.msk.bf16.mxu1 %vm1805_vm11, %v4050_v31  ;;  %v2263_v63 = vpop.permute.xlu0 %2262  ;;  %2392 = vmatprep.mubr.bf16.mxu0 %v3607_v7 }
 0x2e9   :  { %v2268_v0 = vsel %vm596_vm4, %v4173_v62, %v2263_v63  ;;  %2360 = vmatprep.subr.bf16.mxu0 %v2263_v63  ;;  %v4185_v1 = vpop.permute.xlu1 %2409 }
 0x2ea   :  { %2361 = vmatpush1.bf16.msra.mxu0 %v2268_v0 }
 0x2ec   :  { %v4187_v2 = vpop.permute.xlu0 %2411 }
 0x2ed   :  { %v4189_v4 = vpop.permute.xlu1 %2407  ;;  %v2420_v43 = vsel %vm781_vm5, %v4185_v1, %v4187_v2 }
 0x2ee   :  { %3420 = vmatmul.mubr.msk.bf16.vlgmr.msra.gmra.mrb[20].mxu1 %vm1844_vm12, %v1809_v59  ;;  %3428 = vmatmul.mubr.msk.bf16.vlgmr.msra.gmra.mrb[12].mxu0 %vm1844_vm12, %v4169_v60 }
 0x2ef   :  { %2057 = vmatpush1.bf16.msra.mxu1 %v4047_v29  ;;  %2088 = vmatprep.mubr.bf16.mxu1 %v3607_v7 }
 0x2f0   :  { %2123 = vmatprep.subr.bf16.mxu1 %v2110_v5  ;;  %v2414_v6 = vpop.permute.xlu0 %2413  ;;  %2506 = vmatprep.mubr.bf16.mxu0 %v3607_v7 }
 0x2f1   :  { %v4199_v9 = vpop.permute.xlu1 %2415  ;;  %v2421_v11 = vsel %vm781_vm5, %v4187_v2, %v2414_v6 }
 0x2f2   :  { %v2422_v10 = vsel %vm781_vm5, %v2414_v6, %v4199_v9 }
 0x2f3   :  { %2474 = vmatprep.subr.bf16.mxu0 %v2422_v10 }
 0x2f4   :  { %v4205_v13 = vpop.permute.xlu0 %2417  ;;  %2475 = vmatpush1.bf16.msra.mxu0 %v2421_v11 }
 0x2f5   :  { %v2565_v14 = vpop.permute.xlu1 %2564 }
 0x2f6   :  { %3422 = vmatmul.mubr.msk.bf16.vlgmr.msra.gmra.mrb[24].mxu1 %vm1844_vm12, %v1809_v59  ;;  %v2423_v59 = vsel %vm781_vm5, %v4199_v9, %v4205_v13 }
 0x2f7   :  { %2124 = vmatpush1.bf16.msra.mxu1 %v2109_v16  ;;  %3430 = vmatmul.mubr.msk.bf16.vlgmr.msra.gmra.mrb[16].mxu0 %vm1844_vm12, %v4210_v12 }
 0x2f8   :  { %2164 = vmatprep.subr.bf16.mxu1 %v2112_v18  ;;  %v4219_v19 = vpop.permute.xlu0 %2566  ;;  %2155 = vmatprep.mubr.bf16.mxu1 %v3607_v7 }
 0x2f9   :  { %v2563_v15 = vpop.permute.xlu1 %2562  ;;  %v2575_v17 = vsel %vm966_vm6, %v2565_v14, %v4219_v19  ;;  %2620 = vmatprep.mubr.bf16.mxu0 %v3607_v7 }
 0x2fa   :  { %v2574_v20 = vsel %vm966_vm6, %v2563_v15, %v2565_v14  ;;  %2588 = vmatprep.subr.bf16.mxu0 %v2575_v17 }
 0x2fb   :  { %2589 = vmatpush1.bf16.msra.mxu0 %v2574_v20 }
 0x2fc   :  { %v4229_v22 = vpop.permute.xlu0 %2568 }
 0x2fd   :  { %v4236_v25 = vpop.permute.xlu1 %2570  ;;  %v2576_v2 = vsel %vm966_vm6, %v4219_v19, %v4229_v22 }
 0x2fe   :  { %3423 = vmatmul.mubr.msk.bf16.vlgmr.msra.gmra.mrb[28].mxu1 %vm1844_vm12, %v1811_v21 }
 0x2ff   :  { %2165 = vmatpush1.bf16.msra.mxu1 %v2111_v26  ;;  %3432 = vmatmul.mubr.msk.bf16.vlgmr.msra.gmra.mrb[20].mxu0 %vm1844_vm12, %v4234_v24 }
 0x300   :  { %2205 = vmatprep.subr.bf16.mxu1 %v4151_v53  ;;  %v2573_v28 = vpop.permute.xlu0 %2572  ;;  %2196 = vmatprep.mubr.bf16.mxu1 %v3607_v7  ;;  %v2419_v53 = vsel %vm781_vm5, %v4189_v4, %v4185_v1  ;;  %v1817_v1 = vld [vmem:[%s4443_s3 + $0x20] sm:$0xf]  ;;  %vm3317_vm5 = vcmask 57344  }
 0x301   :  { %v2578_v29 = vsel %vm966_vm6, %v4236_v25, %v2573_v28  ;;  %2670 = vmatprep.subr.bf16.mxu0 %v2573_v28  ;;  %v4248_v30 = vpop.permute.xlu1 %2719  ;;  %2702 = vmatprep.mubr.bf16.mxu0 %v3607_v7 }
 0x302   :  { %2671 = vmatpush1.bf16.msra.mxu0 %v2578_v29 }
 0x304   :  { %v4251_v31 = vpop.permute.xlu0 %2721 }
 0x305   :  { %v4253_v32 = vpop.permute.xlu1 %2717  ;;  %v2730_v4 = vsel %vm1151_vm7, %v4248_v30, %v4251_v31 }
 0x306   :  { %3424 = vmatmul.mubr.msk.bf16.vlgmr.msra.gmra.mrb[32].mxu1 %vm1844_vm12, %v1811_v21  ;;  %v2729_v5 = vsel %vm1151_vm7, %v4253_v32, %v4248_v30 }
 0x307   :  { %2206 = vmatpush1.bf16.msra.mxu1 %v2113_v33  ;;  %3434 = vmatmul.mubr.msk.bf16.vlgmr.msra.gmra.mrb[24].mxu0 %vm1844_vm12, %v4234_v24 }
 0x308   :  { %2319 = vmatprep.subr.bf16.mxu1 %v2267_v34  ;;  %v2724_v35 = vpop.permute.xlu0 %2723  ;;  %2237 = vmatprep.mubr.bf16.mxu1 %v3607_v7 }
 0x309   :  { %v4265_v36 = vpop.permute.xlu1 %2725  ;;  %2816 = vmatprep.mubr.bf16.mxu0 %v3607_v7  ;;  %v2731_v38 = vsel %vm1151_vm7, %v4251_v31, %v2724_v35 }
 0x30a   :  { %v2732_v37 = vsel %vm1151_vm7, %v2724_v35, %v4265_v36 }
 0x30b   :  { %2784 = vmatprep.subr.bf16.mxu0 %v2732_v37 }
 0x30c   :  { %v4272_v39 = vpop.permute.xlu0 %2727  ;;  %2785 = vmatpush1.bf16.msra.mxu0 %v2731_v38 }
 0x30d   :  { %v2875_v41 = vpop.permute.xlu1 %2874  ;;  %v2733_v6 = vsel %vm1151_vm7, %v4265_v36, %v4272_v39 }
 0x30e   :  { %3425 = vmatmul.mubr.msk.bf16.vlgmr.msra.gmra.mrb[36].mxu1 %vm1844_vm12, %v1811_v21 }
 0x30f   :  { %2320 = vmatpush1.bf16.msra.mxu1 %v2266_v42  ;;  %3436 = vmatmul.mubr.msk.bf16.vlgmr.msra.gmra.mrb[28].mxu0 %vm1844_vm12, %v4277_v40 }
 0x310   :  { %2433 = vmatprep.subr.bf16.mxu1 %v2420_v43  ;;  %v2877_v44 = vpop.permute.xlu0 %2876  ;;  %2351 = vmatprep.mubr.bf16.mxu1 %v3607_v7 }
 0x311   :  { %v2873_v46 = vpop.permute.xlu1 %2872  ;;  %v2885_v47 = vsel %vm1336_vm8, %v2875_v41, %v2877_v44  ;;  %2930 = vmatprep.mubr.bf16.mxu0 %v3607_v7 }
 0x312   :  { %v2884_v48 = vsel %vm1336_vm8, %v2873_v46, %v2875_v41  ;;  %2898 = vmatprep.subr.bf16.mxu0 %v2885_v47 }
 0x313   :  { %2899 = vmatpush1.bf16.msra.mxu0 %v2884_v48 }
 0x314   :  { %v2879_v50 = vpop.permute.xlu0 %2878 }
 0x315   :  { %v2881_v52 = vpop.permute.xlu1 %2880  ;;  %v2886_v10 = vsel %vm1336_vm8, %v2877_v44, %v2879_v50 }
 0x316   :  { %3427 = vmatmul.mubr.msk.bf16.vlgmr.msra.gmra.mrb[40].mxu1 %vm1844_vm12, %v4169_v60  ;;  %v2577_v60 = vsel %vm966_vm6, %v4229_v22, %v4236_v25  ;;  %v2887_v9 = vsel %vm1336_vm8, %v2879_v50, %v2881_v52 }
 0x317   :  { %2434 = vmatpush1.bf16.msra.mxu1 %v2419_v53  ;;  %3438 = vmatmul.mubr.msk.bf16.vlgmr.msra.gmra.mrb[32].mxu0 %vm1844_vm12, %v1816_v51 }
 0x318   :  { %2515 = vmatprep.subr.bf16.mxu1 %v4205_v13  ;;  %v2883_v54 = vpop.permute.xlu0 %2882  ;;  %2465 = vmatprep.mubr.bf16.mxu1 %v3607_v7 }
 0x319   :  { %v2888_v55 = vsel %vm1336_vm8, %v2881_v52, %v2883_v54  ;;  %2980 = vmatprep.subr.bf16.mxu0 %v2883_v54  ;;  %v3030_v56 = vpop.permute.xlu1 %3029  ;;  %3012 = vmatprep.mubr.bf16.mxu0 %v3607_v7 }
 0x31a   :  { %2981 = vmatpush1.bf16.msra.mxu0 %v2888_v55 }
 0x31c   :  { %v3032_v57 = vpop.permute.xlu0 %3031 }
 0x31d   :  { %v3028_v58 = vpop.permute.xlu1 %3027  ;;  %v3040_v11 = vsel %vm1521_vm9, %v3030_v56, %v3032_v57 }
 0x31e   :  { %3429 = vmatmul.mubr.msk.bf16.vlgmr.msra.gmra.mrb[44].mxu1 %vm1844_vm12, %v4210_v12  ;;  %v3039_v13 = vsel %vm1521_vm9, %v3028_v58, %v3030_v56 }
 0x31f   :  { %2516 = vmatpush1.bf16.msra.mxu1 %v2423_v59  ;;  %3440 = vmatmul.mubr.msk.bf16.vlgmr.msra.gmra.mrb[36].mxu0 %vm1844_vm12, %v1816_v51 }
 0x320   :  { %2629 = vmatprep.subr.bf16.mxu1 %v2577_v60  ;;  %v3034_v61 = vpop.permute.xlu0 %3033  ;;  %2547 = vmatprep.mubr.bf16.mxu1 %v3607_v7 }
 0x321   :  { %v3036_v62 = vpop.permute.xlu1 %3035  ;;  %3126 = vmatprep.mubr.bf16.mxu0 %v3607_v7  ;;  %v3041_v0 = vsel %vm1521_vm9, %v3032_v57, %v3034_v61 }
 0x322   :  { %v3042_v63 = vsel %vm1521_vm9, %v3034_v61, %v3036_v62 }
 0x323   :  { %3094 = vmatprep.subr.bf16.mxu0 %v3042_v63 }
 0x324   :  { %3095 = vmatpush1.bf16.msra.mxu0 %v3041_v0 }
 0x326   :  { %3431 = vmatmul.mubr.msk.bf16.vlgmr.msra.gmra.mrb[48].mxu1 %vm1844_vm12, %v4210_v12  ;;  %v3038_v12 = vpop.permute.xlu0 %3037 }
 0x327   :  { %2630 = vmatpush1.bf16.msra.mxu1 %v2576_v2  ;;  %2661 = vmatprep.mubr.bf16.mxu1 %v3607_v7  ;;  %v3043_v14 = vsel %vm1521_vm9, %v3036_v62, %v3038_v12 }
 0x328   :  { %2743 = vmatprep.subr.bf16.mxu1 %v2730_v4  ;;  %3442 = vmatmul.mubr.msk.bf16.vlgmr.msra.gmra.mrb[40].mxu0 %vm1844_vm12, %v1817_v1 }
 0x32e   :  { %3433 = vmatmul.mubr.msk.bf16.vlgmr.msra.gmra.mrb[52].mxu1 %vm1844_vm12, %v4234_v24 }
 0x32f   :  { %2744 = vmatpush1.bf16.msra.mxu1 %v2729_v5  ;;  %2775 = vmatprep.mubr.bf16.mxu1 %v3607_v7 }
 0x330   :  { %2825 = vmatprep.subr.bf16.mxu1 %v4272_v39 }
 0x336   :  { %3435 = vmatmul.mubr.msk.bf16.vlgmr.msra.gmra.mrb[56].mxu1 %vm1844_vm12, %v4277_v40 }
 0x337   :  { %2826 = vmatpush1.bf16.msra.mxu1 %v2733_v6  ;;  %2857 = vmatprep.mubr.bf16.mxu1 %v3607_v7 }
 0x338   :  { %2939 = vmatprep.subr.bf16.mxu1 %v2887_v9 }
 0x33e   :  { %3437 = vmatmul.mubr.msk.bf16.vlgmr.msra.gmra.mrb[60].mxu1 %vm1844_vm12, %v4277_v40 }
 0x33f   :  { %2940 = vmatpush1.bf16.msra.mxu1 %v2886_v10  ;;  %2971 = vmatprep.mubr.bf16.mxu1 %v3607_v7 }
 0x340   :  { %3053 = vmatprep.subr.bf16.mxu1 %v3040_v11 }
 0x346   :  { %3439 = vmatmul.mubr.msk.bf16.vlgmr.msra.gmra.mrb[64].mxu1 %vm1844_vm12, %v1816_v51 }
 0x347   :  { %3054 = vmatpush1.bf16.msra.mxu1 %v3039_v13  ;;  %3085 = vmatprep.mubr.bf16.mxu1 %v3607_v7 }
 0x348   :  { %3135 = vmatprep.subr.bf16.mxu1 %v3038_v12 }
 0x34e   :  { %3441 = vmatmul.mubr.msk.bf16.vlgmr.msra.gmra.mrb[68].mxu1 %vm1844_vm12, %v1817_v1 }
 0x34f   :  { %3136 = vmatpush1.bf16.msra.mxu1 %v3043_v14  ;;  %3167 = vmatprep.mubr.bf16.mxu1 %v3607_v7 }
 0x356   :  { %3443 = vmatmul.mubr.msk.bf16.vlgmr.msra.gmra.mrb[72].mxu1 %vm1844_vm12, %v1817_v1 }
 0x3a1   :  { %v1882_v16 = vpop.f32.mrb[4].mxu1 }
 0x3a2   :  { %v1884_v18 = vpop.f32.mrb[5].mxu1 }
 0x3a3   :  { %v1886_v19 = vpop.f32.mrb[6].mxu1 }
 0x3a4   :  { %v1887_v15 = vpop.f32.mrb[7].mxu1 }
 0x3a9   :  { %v1923_v17 = vpop.f32.mrb[8].mxu1 }
 0x3aa   :  { %v1925_v20 = vpop.f32.mrb[9].mxu1 }
 0x3ab   :  { %v1927_v21 = vpop.f32.mrb[10].mxu1 }
 0x3ac   :  { %v1928_v22 = vpop.f32.mrb[11].mxu1 }
 0x3b1   :  { %v1964_v24 = vpop.f32.mrb[12].mxu1 }
 0x3b2   :  { %v1966_v25 = vpop.f32.mrb[13].mxu1 }
 0x3b3   :  { %v1968_v26 = vpop.f32.mrb[14].mxu1 }
 0x3b4   :  { %v1969_v28 = vpop.f32.mrb[15].mxu1 }
 0x3b9   :  { %v2008_v29 = vpop.f32.mrb[16].mxu1  ;;  %v2312_v30 = vpop.f32.mrb[8].mxu0 }
 0x3ba   :  { %v2009_v31 = vadd.f32 %v2008_v29, %v1882_v16  ;;  %v2010_v32 = vpop.f32.mrb[17].mxu1  ;;  %v2314_v33 = vpop.f32.mrb[9].mxu0 }
 0x3bb   :  { %v2011_v7 = vadd.f32 %v2010_v32, %v1884_v18  ;;  %v2012_v34 = vpop.f32.mrb[18].mxu1  ;;  %v2316_v35 = vpop.f32.mrb[10].mxu0 }
 0x3bc   :  { %v2013_v36 = vpop.f32.mrb[19].mxu1  ;;  %v2317_v37 = vpop.f32.mrb[11].mxu0 }
 0x3c1   :  { %v2049_v38 = vpop.f32.mrb[20].mxu1  ;;  %v2394_v39 = vpop.f32.mrb[12].mxu0 }
 0x3c2   :  { %v2050_v40 = vadd.f32 %v2049_v38, %v1923_v17  ;;  %v2051_v41 = vpop.f32.mrb[21].mxu1  ;;  %v2396_v42 = vpop.f32.mrb[13].mxu0 }
 0x3c3   :  { %v2052_v43 = vadd.f32 %v2051_v41, %v1925_v20  ;;  %v2053_v44 = vpop.f32.mrb[22].mxu1  ;;  %v2398_v46 = vpop.f32.mrb[14].mxu0 }
 0x3c4   :  { %v2054_v47 = vpop.f32.mrb[23].mxu1  ;;  %v2399_v48 = vpop.f32.mrb[15].mxu0 }
 0x3c9   :  { %v2090_v50 = vpop.f32.mrb[24].mxu1 }
 0x3ca   :  { %v2091_v51 = vadd.f32 %v2090_v50, %v1964_v24  ;;  %v2092_v52 = vpop.f32.mrb[25].mxu1  ;;  %v2508_v53 = vpop.f32.mrb[16].mxu0 }
 0x3cb   :  { %v2093_v54 = vadd.f32 %v2092_v52, %v1966_v25  ;;  %v2094_v55 = vpop.f32.mrb[26].mxu1  ;;  %v2510_v56 = vpop.f32.mrb[17].mxu0 }
 0x3cc   :  { %v2095_v57 = vpop.f32.mrb[27].mxu1  ;;  %v2512_v58 = vpop.f32.mrb[18].mxu0 }
 0x3cd   :  { %v2513_v59 = vpop.f32.mrb[19].mxu0 }
 0x3d1   :  { %v2157_v60 = vpop.f32.mrb[28].mxu1 }
 0x3d2   :  { %v2246_v61 = vadd.f32 %v2157_v60, %v2009_v31  ;;  %v2159_v62 = vpop.f32.mrb[29].mxu1  ;;  %v2622_v63 = vpop.f32.mrb[20].mxu0 }
 0x3d3   :  { %v2247_v0 = vadd.f32 %v2159_v62, %v2011_v7  ;;  %v2161_v1 = vpop.f32.mrb[30].mxu1  ;;  %v2624_v2 = vpop.f32.mrb[21].mxu0 }
 0x3d4   :  { %v2401_v4 = vadd.f32 %v2312_v30, %v2246_v61  ;;  %v2162_v5 = vpop.f32.mrb[31].mxu1  ;;  %v2626_v6 = vpop.f32.mrb[22].mxu0 }
 0x3d5   :  { %v2402_v9 = vadd.f32 %v2314_v33, %v2247_v0  ;;  %v2627_v10 = vpop.f32.mrb[23].mxu0 }
 0x3d9   :  { %v2198_v11 = vpop.f32.mrb[32].mxu1 }
 0x3da   :  { %v2248_v13 = vadd.f32 %v2198_v11, %v2050_v40  ;;  %v2200_v12 = vpop.f32.mrb[33].mxu1  ;;  %v2704_v14 = vpop.f32.mrb[24].mxu0 }
 0x3db   :  { %v2249_v16 = vadd.f32 %v2200_v12, %v2052_v43  ;;  %v2202_v18 = vpop.f32.mrb[34].mxu1  ;;  %v2706_v19 = vpop.f32.mrb[25].mxu0 }
 0x3dc   :  { %v2203_v15 = vpop.f32.mrb[35].mxu1  ;;  %v2708_v17 = vpop.f32.mrb[26].mxu0 }
 0x3dd   :  { %v2709_v20 = vpop.f32.mrb[27].mxu0 }
 0x3e1   :  { %v2239_v21 = vpop.f32.mrb[36].mxu1 }
 0x3e2   :  { %v2250_v22 = vadd.f32 %v2239_v21, %v2091_v51  ;;  %v2241_v24 = vpop.f32.mrb[37].mxu1  ;;  %v2818_v25 = vpop.f32.mrb[28].mxu0 }
 0x3e3   :  { %v2251_v26 = vadd.f32 %v2241_v24, %v2093_v54  ;;  %v2243_v28 = vpop.f32.mrb[38].mxu1  ;;  %v2820_v29 = vpop.f32.mrb[29].mxu0 }
 0x3e4   :  { %v2405_v30 = vadd.f32 %v2394_v39, %v2250_v22  ;;  %v2244_v31 = vpop.f32.mrb[39].mxu1  ;;  %v2822_v32 = vpop.f32.mrb[30].mxu0 }
 0x3e5   :  { %v2406_v33 = vadd.f32 %v2396_v42, %v2251_v26  ;;  %v2823_v7 = vpop.f32.mrb[31].mxu0 }
 0x3e9   :  { %v2353_v34 = vpop.f32.mrb[40].mxu1 }
 0x3ea   :  { %v2403_v35 = vadd.f32 %v2353_v34, %v2248_v13  ;;  %v2355_v36 = vpop.f32.mrb[41].mxu1  ;;  %v2932_v37 = vpop.f32.mrb[32].mxu0 }
 0x3eb   :  { %v2404_v38 = vadd.f32 %v2355_v36, %v2249_v16  ;;  %v2357_v40 = vpop.f32.mrb[42].mxu1  ;;  %v2934_v41 = vpop.f32.mrb[33].mxu0 }
 0x3ec   :  { %v2558_v43 = vadd.f32 %v2508_v53, %v2403_v35  ;;  %v2358_v44 = vpop.f32.mrb[43].mxu1  ;;  %v2936_v46 = vpop.f32.mrb[34].mxu0 }
 0x3ed   :  { %v2559_v47 = vadd.f32 %v2510_v56, %v2404_v38  ;;  %v2937_v48 = vpop.f32.mrb[35].mxu0 }
 0x3ee   :  { %v3185_v48 = vpop.permute.xlu1 %3184 }
 0x3f1   :  { %v2467_v50 = vpop.f32.mrb[44].mxu1 }
 0x3f2   :  { %v2556_v51 = vadd.f32 %v2467_v50, %v2401_v4  ;;  %v2469_v52 = vpop.f32.mrb[45].mxu1  ;;  %v3014_v39 = vpop.f32.mrb[36].mxu0 }
 0x3f3   :  { %v2557_v54 = vadd.f32 %v2469_v52, %v2402_v9  ;;  %v2471_v55 = vpop.f32.mrb[46].mxu1  ;;  %v3016_v42 = vpop.f32.mrb[37].mxu0 }
 0x3f4   :  { %v2711_v57 = vadd.f32 %v2622_v63, %v2556_v51  ;;  %v2472_v58 = vpop.f32.mrb[47].mxu1  ;;  %v3018_v59 = vpop.f32.mrb[38].mxu0 }
 0x3f5   :  { %v2712_v60 = vadd.f32 %v2624_v2, %v2557_v54  ;;  %v3019_v61 = vpop.f32.mrb[39].mxu0 }
 0x3f9   :  { %v2549_v62 = vpop.f32.mrb[48].mxu1 }
 0x3fa   :  { %v2560_v0 = vadd.f32 %v2549_v62, %v2405_v30  ;;  %v2551_v1 = vpop.f32.mrb[49].mxu1 }
 0x3fb   :  { %v2561_v53 = vadd.f32 %v2551_v1, %v2406_v33  ;;  %v2553_v5 = vpop.f32.mrb[50].mxu1  ;;  %v3128_v6 = vpop.f32.mrb[40].mxu0 }
 0x3fc   :  { %v2715_v56 = vadd.f32 %v2704_v14, %v2560_v0  ;;  %v2554_v10 = vpop.f32.mrb[51].mxu1  ;;  %v3130_v11 = vpop.f32.mrb[41].mxu0 }
 0x3fd   :  { %v2716_v4 = vadd.f32 %v2706_v19, %v2561_v53  ;;  %v3132_v13 = vpop.f32.mrb[42].mxu0 }
 0x3fe   :  { %v3133_v12 = vpop.f32.mrb[43].mxu0 }
 0x401   :  { %v2663_v9 = vpop.f32.mrb[52].mxu1 }
 0x402   :  { %v2713_v16 = vadd.f32 %v2663_v9, %v2558_v43  ;;  %v2665_v18 = vpop.f32.mrb[53].mxu1 }
 0x403   :  { %v2714_v63 = vadd.f32 %v2665_v18, %v2559_v47  ;;  %v2667_v15 = vpop.f32.mrb[54].mxu1 }
 0x404   :  { %v2868_v17 = vadd.f32 %v2818_v25, %v2713_v16  ;;  %v2668_v2 = vpop.f32.mrb[55].mxu1 }
 0x405   :  { %v2869_v20 = vadd.f32 %v2820_v29, %v2714_v63 }
 0x409   :  { %v2777_v21 = vpop.f32.mrb[56].mxu1 }
 0x40a   :  { %v2866_v22 = vadd.f32 %v2777_v21, %v2711_v57  ;;  %v2779_v24 = vpop.f32.mrb[57].mxu1 }
 0x40b   :  { %v2867_v26 = vadd.f32 %v2779_v24, %v2712_v60  ;;  %v2781_v28 = vpop.f32.mrb[58].mxu1 }
 0x40c   :  { %v3021_v30 = vadd.f32 %v2932_v37, %v2866_v22  ;;  %v2782_v14 = vpop.f32.mrb[59].mxu1 }
 0x40d   :  { %v3022_v31 = vadd.f32 %v2934_v41, %v2867_v26 }
 0x411   :  { %v2859_v32 = vpop.f32.mrb[60].mxu1 }
 0x412   :  { %v2870_v19 = vadd.f32 %v2859_v32, %v2715_v56  ;;  %v2861_v33 = vpop.f32.mrb[61].mxu1 }
 0x413   :  { %v2871_v7 = vadd.f32 %v2861_v33, %v2716_v4  ;;  %v2863_v34 = vpop.f32.mrb[62].mxu1 }
 0x414   :  { %v3025_v35 = vadd.f32 %v3014_v39, %v2870_v19  ;;  %v2864_v36 = vpop.f32.mrb[63].mxu1 }
 0x415   :  { %v3026_v38 = vadd.f32 %v3016_v42, %v2871_v7 }
 0x419   :  { %v2973_v40 = vpop.f32.mrb[64].mxu1 }
 0x41a   :  { %v3023_v25 = vadd.f32 %v2973_v40, %v2868_v17  ;;  %v2975_v43 = vpop.f32.mrb[65].mxu1 }
 0x41b   :  { %v3024_v29 = vadd.f32 %v2975_v43, %v2869_v20  ;;  %v2977_v44 = vpop.f32.mrb[66].mxu1 }
 0x41c   :  { %v3178_v46 = vadd.f32 %v3128_v6, %v3023_v25  ;;  %v2978_v47 = vpop.f32.mrb[67].mxu1 }
 0x41d   :  { %v3179_v50 = vadd.f32 %v3130_v11, %v3024_v29 }
 0x41e   :  { %v3189_v37 = vadd.f32 %v3185_v48, %v3178_v46 }
 0x41f   :  { %v3190_v51 = vadd.f32 %v3185_v48, %v3179_v50 }
 0x420   :  { %v4358_v41 = vmul.f32 %v3189_v37, %v3999_v23 }
 0x421   :  { %v4361_v52 = vmul.f32 %v3190_v51, %v4001_v27  ;;  %v3087_v39 = vpop.f32.mrb[68].mxu1 }
 0x422   :  { %v3219_v54 = vand.u32 2147483647, %v4358_v41  ;;  %v3176_v55 = vadd.f32 %v3087_v39, %v3021_v30  ;;  %v3089_v42 = vpop.f32.mrb[69].mxu1  ;;  %v3201_v25 = vmax.f32 %v4358_v41, 0.0  ;;  %v3207_v43 = vmul.f32 0.0, %v4358_v41 }
 0x423   :  { %v3220_v57 = vand.u32 2147483647, %v4361_v52  ;;  %v3177_v58 = vadd.f32 %v3089_v42, %v3022_v31  ;;  %v3091_v59 = vpop.f32.mrb[70].mxu1  ;;  %v3202_v44 = vmax.f32 %v4361_v52, 0.0  ;;  %v3208_v46 = vmul.f32 0.0, %v4361_v52 }
 0x424   :  { %v3225_v60 = vsub.f32 0.0, %v3219_v54  ;;  %v3187_v61 = vadd.f32 %v3185_v48, %v3176_v55  ;;  %v3092_v62 = vpop.f32.mrb[71].mxu1  ;;  %v3213_v37 = vsub.f32 %v3201_v25, %v3207_v43 }
 0x425   :  { %v3226_v0 = vsub.f32 0.0, %v3220_v57  ;;  %v3188_v1 = vadd.f32 %v3185_v48, %v3177_v58  ;;  %v3214_v42 = vsub.f32 %v3202_v44, %v3208_v46 }
 0x426   :  { %v3233_v53 = vmul.f32 1.442695, %v3225_v60  ;;  %v4366_v5 = vmul.f32 %v3187_v61, %v4009_v45 }
 0x427   :  { %v3235_v6 = vmul.f32 1.442695, %v3226_v0  ;;  %v4369_v56 = vmul.f32 %v3188_v1, %v4011_v49 }
 0x428   :  { %3570 = vpow2.f32 %v3233_v53  ;;  %v3217_v10 = vand.u32 2147483647, %v4366_v5  ;;  %v3199_v57 = vmax.f32 %v4366_v5, 0.0  ;;  %v3205_v41 = vmul.f32 0.0, %v4366_v5 }
 0x429   :  { %3572 = vpow2.f32 %v3235_v6  ;;  %v3218_v11 = vand.u32 2147483647, %v4369_v56  ;;  %v3169_v4 = vpop.f32.mrb[72].mxu1  ;;  %v3200_v53 = vmax.f32 %v4369_v56, 0.0 }
 0x42a   :  { %v3223_v13 = vsub.f32 0.0, %v3217_v10  ;;  %v3180_v12 = vadd.f32 %v3169_v4, %v3025_v35  ;;  %v3171_v9 = vpop.f32.mrb[73].mxu1 }
 0x42b   :  { %v3224_v16 = vsub.f32 0.0, %v3218_v11  ;;  %v3181_v18 = vadd.f32 %v3171_v9, %v3026_v38  ;;  %v3173_v63 = vpop.f32.mrb[74].mxu1 }
 0x42c   :  { %v3229_v15 = vmul.f32 1.442695, %v3223_v13  ;;  %v3191_v17 = vadd.f32 %v3185_v48, %v3180_v12  ;;  %v3174_v2 = vpop.f32.mrb[75].mxu1  ;;  %v3206_v13 = vmul.f32 0.0, %v4369_v56 }
 0x42d   :  { %v3231_v20 = vmul.f32 1.442695, %v3224_v16  ;;  %v3192_v21 = vadd.f32 %v3185_v48, %v3181_v18  ;;  %v3211_v18 = vsub.f32 %v3199_v57, %v3205_v41 }
 0x42e   :  { %3574 = vpow2.f32 %v3229_v15  ;;  %v4374_v22 = vmul.f32 %v3191_v17, %v4019_v3 }
 0x42f   :  { %3576 = vpow2.f32 %v3231_v20  ;;  %v4377_v24 = vmul.f32 %v3192_v21, %v4021_v8 }
 0x430   :  { %v3221_v26 = vand.u32 2147483647, %v4374_v22 }
 0x431   :  { %v3222_v28 = vand.u32 2147483647, %v4377_v24  ;;  %v3210_v44 = vmul.f32 0.0, %v4377_v24 }
 0x432   :  { %v3571_v30 = vpop.eup %3570  ;;  %v3227_v14 = vsub.f32 0.0, %v3221_v26 }
 0x433   :  { %v3573_v31 = vpop.eup %3572  ;;  %v3259_v32 = vadd.f32 1.0, %v3571_v30  ;;  %v3228_v19 = vsub.f32 0.0, %v3222_v28  ;;  %v3262_v29 = vmul.f32 -0.5, %v3571_v30  ;;  %v3265_v55 = vand.u32 2147483647, %v3571_v30 }
 0x434   :  { %v3237_v33 = vmul.f32 1.442695, %v3227_v14  ;;  %v3268_v7 = vadd.f32 1.0, %v3573_v31  ;;  %v3271_v47 = vmul.f32 -0.5, %v3573_v31  ;;  %v3274_v52 = vand.u32 2147483647, %v3573_v31 }
 0x435   :  { %3578 = vlog2.f32 %v3259_v32  ;;  %v3239_v34 = vmul.f32 1.442695, %v3228_v19  ;;  %v3263_v51 = vadd.f32 1.0, %v3262_v29  ;;  %vm4394_vm14 = vcmp.lt.f32.partialorder %v3265_v55, 0.0004427343 }
 0x436   :  { %3580 = vpow2.f32 %v3237_v33  ;;  %v3272_v60 = vadd.f32 1.0, %v3271_v47  ;;  %vm4401_vm15 = vcmp.lt.f32.partialorder %v3274_v52, 0.0004427343 }
 0x437   :  { %3582 = vpow2.f32 %v3239_v34  ;;  %v3264_v10 = vmul.f32 %v3571_v30, %v3263_v51  ;;  %v3209_v34 = vmul.f32 0.0, %v4374_v22 }
 0x438   :  { %v3575_v35 = vpop.eup %3574  ;;  %3584 = vlog2.f32 %v3268_v7  ;;  %v3273_v63 = vmul.f32 %v3573_v31, %v3272_v60  ;;  %v3212_v31 = vsub.f32 %v3200_v53, %v3206_v13  ;;  %v3203_v7 = vmax.f32 %v4374_v22, 0.0 }
 0x439   :  { %v3577_v36 = vpop.eup %3576  ;;  %v3241_v38 = vadd.f32 1.0, %v3575_v35  ;;  %v3244_v48 = vmul.f32 -0.5, %v3575_v35  ;;  %v3247_v1 = vand.u32 2147483647, %v3575_v35 }
 0x43a   :  { %v3250_v40 = vadd.f32 1.0, %v3577_v36  ;;  %v3253_v39 = vmul.f32 -0.5, %v3577_v36  ;;  %v3256_v12 = vand.u32 2147483647, %v3577_v36 }
 0x43b   :  { %3586 = vlog2.f32 %v3241_v38  ;;  %v3245_v0 = vadd.f32 1.0, %v3244_v48  ;;  %vm3248_vm0 = vcmp.lt.f32.partialorder %v3247_v1, 0.0004427343 }
 0x43c   :  { %3588 = vlog2.f32 %v3250_v40  ;;  %v3254_v11 = vadd.f32 1.0, %v3253_v39  ;;  %vm3257_vm1 = vcmp.lt.f32.partialorder %v3256_v12, 0.0004427343 }
 0x43d   :  { %v3246_v20 = vmul.f32 %v3575_v35, %v3245_v0 }
 0x43e   :  { %v3255_v56 = vmul.f32 %v3577_v36, %v3254_v11  ;;  %v3204_v36 = vmax.f32 %v4377_v24, 0.0 }
 0x43f   :  { %v3579_v50 = vpop.eup %3578 }
 0x440   :  { %v4385_v54 = vpop.eup %3580  ;;  %v3261_v59 = vmul.f32 0.6931472, %v3579_v50  ;;  %v3215_v50 = vsub.f32 %v3203_v7, %v3209_v34 }
 0x441   :  { %v4389_v58 = vpop.eup %3582  ;;  %v3277_v61 = vadd.f32 1.0, %v4385_v54  ;;  %v3280_v21 = vmul.f32 -0.5, %v4385_v54  ;;  %v3283_v25 = vand.u32 2147483647, %v4385_v54 }
 0x442   :  { %v3585_v62 = vpop.eup %3584  ;;  %v3286_v6 = vadd.f32 1.0, %v4389_v58  ;;  %v3267_v16 = vsel %vm4394_vm14, %v3264_v10, %v3261_v59  ;;  %v3289_v30 = vmul.f32 -0.5, %v4389_v58  ;;  %v3292_v46 = vand.u32 2147483647, %v4389_v58 }
 0x443   :  { %v3270_v4 = vmul.f32 0.6931472, %v3585_v62  ;;  %3590 = vlog2.f32 %v3277_v61  ;;  %v3297_v14 = vadd.f32 %v3267_v16, %v3213_v37  ;;  %v3281_v38 = vadd.f32 1.0, %v3280_v21 }
 0x444   :  { %3592 = vlog2.f32 %v3286_v6  ;;  %v3290_v43 = vadd.f32 1.0, %v3289_v30  ;;  %vm3284_vm3 = vcmp.lt.f32.partialorder %v3283_v25, 0.0004427343  ;;  %vm3293_vm4 = vcmp.lt.f32.partialorder %v3292_v46, 0.0004427343 }
 0x445   :  { %v3587_v9 = vpop.eup %3586  ;;  %v3276_v28 = vsel %vm4401_vm15, %v3273_v63, %v3270_v4  ;;  %v3303_v48 = vmul.f32 %v3297_v14, %v3999_v23  ;;  %v3282_v55 = vmul.f32 %v4385_v54, %v3281_v38 }
 0x446   :  { %v3589_v17 = vpop.eup %3588  ;;  %v3243_v2 = vmul.f32 0.6931472, %v3587_v9  ;;  %v3298_v40 = vadd.f32 %v3276_v28, %v3214_v42  ;;  %v3291_v57 = vmul.f32 %v4389_v58, %v3290_v43 }
 0x447   :  { %v3252_v26 = vmul.f32 0.6931472, %v3589_v17  ;;  %v3311_v23 = vsel %vm3307_vm2, %v3303_v48, 0.0 }
 0x448   :  { %v3249_v32 = vsel %vm3248_vm0, %v3246_v20, %v3243_v2  ;;  %v3304_v42 = vmul.f32 %v3298_v40, %v4001_v27 }
 0x449   :  { %v3295_v19 = vadd.f32 %v3249_v32, %v3211_v18  ;;  %v3258_v33 = vsel %vm3257_vm1, %v3255_v56, %v3252_v26 }
 0x44a   :  { %v3296_v35 = vadd.f32 %v3258_v33, %v3212_v31  ;;  %v3313_v54 = vsel %vm3307_vm2, %v3304_v42, 0.0 }
 0x44b   :  { %v3301_v29 = vmul.f32 %v3295_v19, %v4009_v45 }
 0x44c   :  { %v3302_v47 = vmul.f32 %v3296_v35, %v4011_v49  ;;  %v3216_v49 = vsub.f32 %v3204_v36, %v3210_v44 }
 0x44d   :  { %v3591_v22 = vpop.eup %3590  ;;  %v3308_v37 = vsel %vm3307_vm2, %v3301_v29, 0.0 }
 0x44e   :  { %v3593_v51 = vpop.eup %3592  ;;  %v3279_v39 = vmul.f32 0.6931472, %v3591_v22  ;;  %v3309_v45 = vsel %vm3307_vm2, %v3302_v47, 0.0 }
 0x44f   :  { %v3288_v24 = vmul.f32 0.6931472, %v3593_v51  ;;  %v3310_v41 = vadd.f32 %v3309_v45, %v3308_v37 }
 0x450   :  { %v3285_v59 = vsel %vm3284_vm3, %v3282_v55, %v3279_v39 }
 0x451   :  { %v3294_v60 = vsel %vm3293_vm4, %v3291_v57, %v3288_v24  ;;  %v3299_v52 = vadd.f32 %v3285_v59, %v3215_v50  ;;  %v3312_v61 = vadd.f32 %v3311_v23, %v3310_v41 }
 0x452   :  { %v3300_v62 = vadd.f32 %v3294_v60, %v3216_v49 }
 0x453   :  { %v3305_v27 = vmul.f32 %v3299_v52, %v4019_v3  ;;  %v3314_v0 = vadd.f32 %v3313_v54, %v3312_v61 }
 0x454   :  { %v3306_v1 = vmul.f32 %v3300_v62, %v4021_v8 }
 0x455   :  { %v3315_v58 = vsel %vm3307_vm2, %v3305_v27, 0.0 }
 0x456   :  { %v3316_v53 = vadd.f32 %v3315_v58, %v3314_v0  ;;  %v3318_v6 = vsel %vm3317_vm5, %v3306_v1, 0.0 }
 0x458   :  { %v3319_v10 = vadd.f32 %v3318_v6, %v3316_v53 }
 0x45a   :  { %3320 = vadd.xlane.f32.xlu0 %v3319_v10 }
 0x4e7   :  { %v3321_v11 = vpop.xlane.xlu0 %3320 }
 0x4e8   :  { %v3322_v4 = vrot.slane %v3321_v11, 4 }
 0x4ea   :  { %v3323_v5 = vadd.f32 %v3322_v4, %v3321_v11 }
 0x4ec   :  { %v3324_v13 = vrot.slane %v3323_v5, 2 }
 0x4ee   :  { %v3325_v12 = vadd.f32 %v3324_v13, %v3323_v5 }
 0x4f0   :  { %v3326_v9 = vrot.slane %v3325_v12, 1 }
 0x4f2   :  { %v3327_v16 = vadd.f32 %v3326_v9, %v3325_v12 }
 0x4f4   :  { %3540 = vpush %v3327_v16 }
 0x525   :  { %s3541_s3 = spop %3540 }
 0x526   :  { %s3329_s25 = smul.f32 0.001953125, %s3541_s3 }
 0x528   :  { %3331 = sst [smem:[#allocation2]] %s3329_s25 }
 0x529   :  { %3603 = shalt.err (!%p3600_p2)
}
 0x52a   :  { %s3616_s5 = smov [#allocation2]  }
 0x52b   :  { %3339 = dma.smem_to_hbm %s3616_s5, 16, %s4446_s6, [#allocation3]  }
 0x52c   :  { %3604 = dma.done.wait [#allocation3], 16  }
 0x52d   :  { %3605 = vsyncadd [#allocation3], 4294967280 }
 0x52e   :  { %3343 = sfence }
 0x52f   :  { %3344 = vsyncpa [#allocation3], 1 }

// kernel: loss_forward.7
= control target key start
LH: loop header
LB: loop body
LE: loop exit
PB: predicated region body
PF: predicated region fallthrough
CT: control target
= control target key end

     0   :  { %14 = vsyncpa [#allocation3], 0  ;;  %s7265_s11 = smov 127   ;;  %v7266_v7 = vmov 0   ;;  %s7267_s12 = smov 126   ;;  %s8829_s0 = inlined_call_operand.vmem [shape: bf16[8,686], index: 0, kind: input, shape index: {}]   ;;  %s8830_s1 = inlined_call_operand.vmem [shape: bf16[8,686], index: 1, kind: input, shape index: {}]   ;;  %s8831_s2 = inlined_call_operand.vmem [shape: bf16[9,16,8], index: 2, kind: input, shape index: {}]   ;;  %s8832_s3 = inlined_call_operand.vmem [shape: f32[16,1], index: 3, kind: input, shape index: {}]   ;;  %s8833_s4 = inlined_call_operand.vmem [shape: bf16[9,16,16], index: 4, kind: input, shape index: {}]   ;;  %s8834_s5 = inlined_call_operand.vmem [shape: f32[16,1], index: 5, kind: input, shape index: {}]   ;;  %s8835_s6 = inlined_call_operand.vmem [shape: f32[1,648], index: 6, kind: input, shape index: {}]   ;;  %s8836_s7 = inlined_call_operand.hbm [shape: f32[1,1], index: 7, kind: output, shape index: {0}]   ;;  %s8837_s8 = inlined_call_operand.hbm [shape: f32[1,1], index: 8, kind: output, shape index: {1}]  }
   0x1   :  { %v33_v0 = vld [vmem:[%s8829_s0 + $0x8] sm:$0xff]  ;;  %v32_v1 = vld [vmem:[%s8829_s0] sm:$0xff]  ;;  %v34_v4 = vld [vmem:[%s8829_s0 + $0x10] sm:$0xff]  ;;  %151 = vmatprep.mubr.bf16.mxu0 %v7266_v7  ;;  %7203 = vset.pattern.permute.xlu1 %v7266_v7 }
   0x2   :  { %v7328_v2 = vcombine.low %v33_v0, %v33_v0  ;;  %v7330_v3 = vcombine.low %v32_v1, %v32_v1  ;;  %v7339_v5 = vcombine.high %v33_v0, %v33_v0  ;;  %v7341_v6 = vcombine.high %v32_v1, %v32_v1  ;;  %7204 = vset.pattern.permute.xlu0 %v7266_v7 }
   0x3   :  { %1904 = vmatprep.mubr.bf16.mxu1 %v7266_v7  ;;  %v7351_v8 = vcombine.low %v34_v4, %v34_v4  ;;  %v7353_v9 = vcombine.high %v34_v4, %v34_v4 }
   0x4   :  { %82 = vrot.lane.b32.xlu1 %v7328_v2, %s7265_s11  ;;  %78 = vrot.lane.b32.xlu0 %v7330_v3, %s7265_s11 }
   0x8   :  { %84 = vrot.lane.b32.xlu1 %v7339_v5, %s7265_s11  ;;  %80 = vrot.lane.b32.xlu0 %v7341_v6, %s7265_s11 }
   0xc   :  { %86 = vrot.lane.b32.xlu0 %v7351_v8, %s7265_s11  ;;  %88 = vrot.lane.b32.xlu1 %v7353_v9, %s7265_s11 }
  0x10   :  { %408 = vrot.lane.b32.xlu0 %v7330_v3, %s7267_s12  ;;  %410 = vrot.lane.b32.xlu1 %v7341_v6, %s7267_s12 }
  0x11   :  { %15 = vsyncpa [#allocation5], 0  ;;  %s7268_s13 = smov 110   ;;  %s7269_s14 = smov 109   ;;  %v35_v10 = vld [vmem:[%s8830_s1] sm:$0xff]  ;;  %v36_v13 = vld [vmem:[%s8830_s1 + $0x8] sm:$0xff] }
  0x12   :  { %s7270_s15 = smov 108   ;;  %s7271_s16 = smov 92   ;;  %v7446_v11 = vcombine.low %v35_v10, %v35_v10  ;;  %v7448_v12 = vcombine.high %v35_v10, %v35_v10  ;;  %v7457_v14 = vcombine.low %v36_v13, %v36_v13  ;;  %v7459_v15 = vcombine.high %v36_v13, %v36_v13  ;;  %v37_v16 = vld [vmem:[%s8830_s1 + $0x10] sm:$0xff]  ;;  %v7495_v26 = vld [vmem:[%s8831_s2 + $0x8] sm:$0xff]   ;;  %v7546_v35 = vld [vmem:[%s8831_s2] sm:$0xff]  }
  0x13   :  { %s7272_s17 = smov 91   ;;  %s7273_s18 = smov 90   ;;  %v7468_v17 = vcombine.low %v37_v16, %v37_v16  ;;  %v7470_v18 = vcombine.high %v37_v16, %v37_v16  ;;  %vm90_vm0 = vcmask 1039360   ;;  %vm100_vm1 = vcmask 1043456   ;;  %v7596_v47 = vld [vmem:[%s8831_s2 + $0x10] sm:$0xff]   ;;  %v7639_v62 = vld [vmem:[%s8831_s2 + $0x18] sm:$0xff]  }
  0x14   :  { %412 = vrot.lane.b32.xlu0 %v7328_v2, %s7267_s12  ;;  %414 = vrot.lane.b32.xlu1 %v7339_v5, %s7267_s12  ;;  %vm96_vm2 = vcmask 64512   ;;  %v257_v34 = vsel %vm100_vm1, %v7330_v3, 0  ;;  %v263_v36 = vsel %vm100_vm1, %v7328_v2, 0  ;;  %vm420_vm3 = vcmask 1031168   ;;  %s7241_s29 = scalar_lea.hbm %s8836_s7, 16 }
  0x15   :  { %v269_v40 = vsel %vm100_vm1, %v7351_v8, 0  ;;  %vm605_vm4 = vcmask 900096   ;;  %vm790_vm5 = vcmask 891904   ;;  %vm975_vm6 = vcmask 883712   ;;  %p7242_p0 = scmp.ne.s32.totalorder %s8836_s7, %s7241_s29  ;;  %p7245_p1 = scmp.lt.u32.totalorder %s7241_s29, %s8836_s7 }
  0x16   :  { %vm1160_vm7 = vcmask 752640   ;;  %vm1345_vm8 = vcmask 744448   ;;  %vm1530_vm9 = vcmask 736256   ;;  %vm1799_vm10 = vcmask 154624  }
  0x17   :  { %vm1814_vm11 = vcmask 220160   ;;  %vm1868_vm12 = vcmask 130048   ;;  %vm8207_vm13 = vmneg %vm1799_vm10  ;;  %vm6565_vm14 = vcmask 375808   ;;  %p7247_p2 = pnand %p7245_p1, %p7242_p0 }
  0x18   :  { %416 = vrot.lane.b32.xlu0 %v7351_v8, %s7267_s12  ;;  %418 = vrot.lane.b32.xlu1 %v7353_v9, %s7267_s12 }
  0x1c   :  { %593 = vrot.lane.b32.xlu0 %v7330_v3, %s7268_s13  ;;  %595 = vrot.lane.b32.xlu1 %v7341_v6, %s7268_s13 }
  0x20   :  { %597 = vrot.lane.b32.xlu0 %v7328_v2, %s7268_s13  ;;  %599 = vrot.lane.b32.xlu1 %v7339_v5, %s7268_s13 }
  0x24   :  { %601 = vrot.lane.b32.xlu0 %v7351_v8, %s7268_s13  ;;  %603 = vrot.lane.b32.xlu1 %v7353_v9, %s7268_s13 }
  0x28   :  { %778 = vrot.lane.b32.xlu0 %v7330_v3, %s7269_s14  ;;  %780 = vrot.lane.b32.xlu1 %v7341_v6, %s7269_s14 }
  0x2c   :  { %782 = vrot.lane.b32.xlu0 %v7328_v2, %s7269_s14  ;;  %784 = vrot.lane.b32.xlu1 %v7339_v5, %s7269_s14 }
  0x30   :  { %786 = vrot.lane.b32.xlu0 %v7351_v8, %s7269_s14  ;;  %788 = vrot.lane.b32.xlu1 %v7353_v9, %s7269_s14 }
  0x34   :  { %963 = vrot.lane.b32.xlu0 %v7330_v3, %s7270_s15  ;;  %965 = vrot.lane.b32.xlu1 %v7341_v6, %s7270_s15 }
  0x38   :  { %967 = vrot.lane.b32.xlu0 %v7328_v2, %s7270_s15  ;;  %969 = vrot.lane.b32.xlu1 %v7339_v5, %s7270_s15 }
  0x3c   :  { %971 = vrot.lane.b32.xlu0 %v7351_v8, %s7270_s15  ;;  %973 = vrot.lane.b32.xlu1 %v7353_v9, %s7270_s15 }
  0x40   :  { %1148 = vrot.lane.b32.xlu0 %v7330_v3, %s7271_s16  ;;  %1150 = vrot.lane.b32.xlu1 %v7341_v6, %s7271_s16 }
  0x44   :  { %1152 = vrot.lane.b32.xlu0 %v7328_v2, %s7271_s16  ;;  %1154 = vrot.lane.b32.xlu1 %v7339_v5, %s7271_s16 }
  0x48   :  { %1156 = vrot.lane.b32.xlu0 %v7351_v8, %s7271_s16  ;;  %1158 = vrot.lane.b32.xlu1 %v7353_v9, %s7271_s16 }
  0x4c   :  { %1333 = vrot.lane.b32.xlu0 %v7330_v3, %s7272_s17  ;;  %1335 = vrot.lane.b32.xlu1 %v7341_v6, %s7272_s17 }
  0x50   :  { %1337 = vrot.lane.b32.xlu0 %v7328_v2, %s7272_s17  ;;  %1339 = vrot.lane.b32.xlu1 %v7339_v5, %s7272_s17 }
  0x54   :  { %1341 = vrot.lane.b32.xlu0 %v7351_v8, %s7272_s17  ;;  %1343 = vrot.lane.b32.xlu1 %v7353_v9, %s7272_s17 }
  0x58   :  { %1518 = vrot.lane.b32.xlu0 %v7330_v3, %s7273_s18  ;;  %1520 = vrot.lane.b32.xlu1 %v7341_v6, %s7273_s18 }
  0x5c   :  { %1522 = vrot.lane.b32.xlu0 %v7328_v2, %s7273_s18  ;;  %1524 = vrot.lane.b32.xlu1 %v7339_v5, %s7273_s18 }
  0x60   :  { %1526 = vrot.lane.b32.xlu0 %v7351_v8, %s7273_s18  ;;  %1528 = vrot.lane.b32.xlu1 %v7353_v9, %s7273_s18 }
  0x64   :  { %3403 = vrot.lane.b32.xlu0 %v7446_v11, %s7265_s11  ;;  %3405 = vrot.lane.b32.xlu1 %v7448_v12, %s7265_s11 }
  0x68   :  { %3407 = vrot.lane.b32.xlu0 %v7457_v14, %s7265_s11  ;;  %3409 = vrot.lane.b32.xlu1 %v7459_v15, %s7265_s11 }
  0x6c   :  { %3411 = vrot.lane.b32.xlu0 %v7468_v17, %s7265_s11  ;;  %3413 = vrot.lane.b32.xlu1 %v7470_v18, %s7265_s11 }
  0x70   :  { %3714 = vrot.lane.b32.xlu0 %v7446_v11, %s7267_s12  ;;  %3716 = vrot.lane.b32.xlu1 %v7448_v12, %s7267_s12 }
  0x74   :  { %3718 = vrot.lane.b32.xlu0 %v7457_v14, %s7267_s12  ;;  %3720 = vrot.lane.b32.xlu1 %v7459_v15, %s7267_s12 }
  0x76   :  { %v83_v19 = vpop.permute.xlu1 %82  ;;  %v79_v20 = vpop.permute.xlu0 %78 }
  0x78   :  { %3722 = vrot.lane.b32.xlu0 %v7468_v17, %s7267_s12  ;;  %3724 = vrot.lane.b32.xlu1 %v7470_v18, %s7267_s12 }
  0x7a   :  { %v85_v21 = vpop.permute.xlu1 %84  ;;  %v81_v22 = vpop.permute.xlu0 %80 }
  0x7b   :  { %v92_v23 = vsel %vm90_vm0, %v81_v22, %v83_v19  ;;  %v91_v24 = vsel %vm90_vm0, %v79_v20, %v81_v22  ;;  %v93_v27 = vsel %vm90_vm0, %v83_v19, %v85_v21  ;;  %v7664_v20 = vld [vmem:[%s8831_s2 + $0x20] sm:$0xff]  }
  0x7c   :  { %6612 = vmatprep.subr.msk.bf16.mxu0 %vm100_vm1, %v92_v23  ;;  %v102_v25 = vsel %vm100_vm1, %v91_v24, 0  ;;  %3890 = vrot.lane.b32.xlu0 %v7446_v11, %s7268_s13  ;;  %v108_v30 = vsel %vm100_vm1, %v93_v27, 0 }
  0x7d   :  { %120 = vmatpush1.bf16.msra.mxu0 %v102_v25  ;;  %3892 = vrot.lane.b32.xlu1 %v7448_v12, %s7268_s13 }
  0x7e   :  { %v87_v28 = vpop.permute.xlu0 %86  ;;  %v89_v31 = vpop.permute.xlu1 %88 }
  0x7f   :  { %v94_v29 = vsel %vm90_vm0, %v85_v21, %v87_v28  ;;  %v95_v32 = vsel %vm90_vm0, %v87_v28, %v89_v31 }
  0x80   :  { %6613 = vmatmul.mubr.msk.bf16.vlgmr.msra.gmra.mrb[0].mxu0 %vm96_vm2, %v7495_v26  ;;  %6614 = vmatprep.subr.msk.bf16.mxu0 %vm100_vm1, %v94_v29  ;;  %v114_v33 = vsel %vm100_vm1, %v95_v32, 0 }
  0x81   :  { %163 = vmatpush1.bf16.msra.mxu0 %v108_v30  ;;  %194 = vmatprep.mubr.bf16.mxu0 %v7266_v7 }
  0x82   :  { %6616 = vmatprep.subr.msk.bf16.mxu0 %vm100_vm1, %v89_v31  ;;  %3894 = vrot.lane.b32.xlu0 %v7457_v14, %s7268_s13  ;;  %v409_v37 = vpop.permute.xlu0 %408  ;;  %v411_v38 = vpop.permute.xlu1 %410 }
  0x83   :  { %3896 = vrot.lane.b32.xlu1 %v7459_v15, %s7268_s13  ;;  %v421_v42 = vsel %vm420_vm3, %v409_v37, %v411_v38  ;;  %v7689_v37 = vld [vmem:[%s8831_s2 + $0x28] sm:$0xff]  }
  0x84   :  { %v430_v44 = vsel %vm100_vm1, %v421_v42, 0 }
  0x86   :  { %3898 = vrot.lane.b32.xlu0 %v7468_v17, %s7268_s13  ;;  %v413_v39 = vpop.permute.xlu0 %412  ;;  %v415_v45 = vpop.permute.xlu1 %414 }
  0x87   :  { %3900 = vrot.lane.b32.xlu1 %v7470_v18, %s7268_s13  ;;  %v422_v41 = vsel %vm420_vm3, %v411_v38, %v413_v39  ;;  %v423_v48 = vsel %vm420_vm3, %v413_v39, %v415_v45 }
  0x88   :  { %6615 = vmatmul.mubr.msk.bf16.vlgmr.msra.gmra.mrb[4].mxu0 %vm96_vm2, %v7495_v26  ;;  %v436_v50 = vsel %vm100_vm1, %v423_v48, 0 }
  0x89   :  { %206 = vmatpush1.bf16.msra.mxu0 %v114_v33  ;;  %237 = vmatprep.mubr.bf16.mxu0 %v7266_v7 }
  0x8a   :  { %6619 = vmatprep.subr.msk.bf16.mxu0 %vm100_vm1, %v7341_v6  ;;  %4066 = vrot.lane.b32.xlu0 %v7446_v11, %s7269_s14  ;;  %v417_v43 = vpop.permute.xlu0 %416  ;;  %v419_v51 = vpop.permute.xlu1 %418 }
  0x8b   :  { %4068 = vrot.lane.b32.xlu1 %v7448_v12, %s7269_s14  ;;  %v424_v46 = vsel %vm420_vm3, %v415_v45, %v417_v43  ;;  %v425_v54 = vsel %vm420_vm3, %v417_v43, %v419_v51 }
  0x8c   :  { %v442_v56 = vsel %vm100_vm1, %v425_v54, 0  ;;  %v7719_v54 = vld [vmem:[%s8831_s2 + $0x30] sm:$0xff]  }
  0x8e   :  { %4070 = vrot.lane.b32.xlu0 %v7457_v14, %s7269_s14  ;;  %v594_v49 = vpop.permute.xlu0 %593  ;;  %v596_v52 = vpop.permute.xlu1 %595 }
  0x8f   :  { %4072 = vrot.lane.b32.xlu1 %v7459_v15, %s7269_s14  ;;  %v606_v57 = vsel %vm605_vm4, %v594_v49, %v596_v52 }
  0x90   :  { %6617 = vmatmul.mubr.msk.bf16.vlgmr.msra.gmra.mrb[8].mxu0 %vm96_vm2, %v7495_v26  ;;  %v615_v59 = vsel %vm100_vm1, %v606_v57, 0 }
  0x91   :  { %275 = vmatpush1.bf16.msra.mxu0 %v257_v34  ;;  %306 = vmatprep.mubr.bf16.mxu0 %v7266_v7 }
  0x92   :  { %6621 = vmatprep.subr.msk.bf16.mxu0 %vm100_vm1, %v7339_v5  ;;  %4074 = vrot.lane.b32.xlu0 %v7468_v17, %s7269_s14  ;;  %v598_v53 = vpop.permute.xlu0 %597  ;;  %v600_v60 = vpop.permute.xlu1 %599 }
  0x93   :  { %4076 = vrot.lane.b32.xlu1 %v7470_v18, %s7269_s14  ;;  %v607_v55 = vsel %vm605_vm4, %v596_v52, %v598_v53  ;;  %v608_v63 = vsel %vm605_vm4, %v598_v53, %v600_v60 }
  0x94   :  { %v621_v1 = vsel %vm100_vm1, %v608_v63, 0 }
  0x96   :  { %4242 = vrot.lane.b32.xlu0 %v7446_v11, %s7270_s15  ;;  %v602_v58 = vpop.permute.xlu0 %601  ;;  %v604_v2 = vpop.permute.xlu1 %603 }
  0x97   :  { %4244 = vrot.lane.b32.xlu1 %v7448_v12, %s7270_s15  ;;  %v609_v61 = vsel %vm605_vm4, %v600_v60, %v602_v58  ;;  %v610_v5 = vsel %vm605_vm4, %v602_v58, %v604_v2 }
  0x98   :  { %6620 = vmatmul.mubr.msk.bf16.vlgmr.msra.gmra.mrb[0].mxu0 %vm96_vm2, %v7546_v35  ;;  %v627_v8 = vsel %vm100_vm1, %v610_v5, 0 }
  0x99   :  { %318 = vmatpush1.bf16.msra.mxu0 %v263_v36  ;;  %349 = vmatprep.mubr.bf16.mxu0 %v7266_v7 }
  0x9a   :  { %6623 = vmatprep.subr.msk.bf16.mxu0 %vm100_vm1, %v7353_v9  ;;  %4246 = vrot.lane.b32.xlu0 %v7457_v14, %s7270_s15  ;;  %v779_v0 = vpop.permute.xlu0 %778  ;;  %v781_v3 = vpop.permute.xlu1 %780 }
  0x9b   :  { %4248 = vrot.lane.b32.xlu1 %v7459_v15, %s7270_s15  ;;  %v791_v9 = vsel %vm790_vm5, %v779_v0, %v781_v3 }
  0x9c   :  { %v800_v13 = vsel %vm100_vm1, %v791_v9, 0 }
  0x9e   :  { %4250 = vrot.lane.b32.xlu0 %v7468_v17, %s7270_s15  ;;  %v783_v4 = vpop.permute.xlu0 %782  ;;  %v785_v16 = vpop.permute.xlu1 %784 }
  0x9f   :  { %4252 = vrot.lane.b32.xlu1 %v7470_v18, %s7270_s15  ;;  %v792_v6 = vsel %vm790_vm5, %v781_v3, %v783_v4  ;;  %v793_v21 = vsel %vm790_vm5, %v783_v4, %v785_v16 }
  0xa0   :  { %6622 = vmatmul.mubr.msk.bf16.vlgmr.msra.gmra.mrb[4].mxu0 %vm96_vm2, %v7546_v35  ;;  %v806_v23 = vsel %vm100_vm1, %v793_v21, 0 }
  0xa1   :  { %361 = vmatpush1.bf16.msra.mxu0 %v269_v40  ;;  %392 = vmatprep.mubr.bf16.mxu0 %v7266_v7 }
  0xa2   :  { %6626 = vmatprep.subr.msk.bf16.mxu0 %vm100_vm1, %v422_v41  ;;  %4418 = vrot.lane.b32.xlu0 %v7446_v11, %s7271_s16  ;;  %v787_v10 = vpop.permute.xlu0 %786  ;;  %v789_v24 = vpop.permute.xlu1 %788 }
  0xa3   :  { %4420 = vrot.lane.b32.xlu1 %v7448_v12, %s7271_s16  ;;  %v794_v19 = vsel %vm790_vm5, %v785_v16, %v787_v10  ;;  %v795_v28 = vsel %vm790_vm5, %v787_v10, %v789_v24 }
  0xa4   :  { %v812_v30 = vsel %vm100_vm1, %v795_v28, 0 }
  0xa6   :  { %4422 = vrot.lane.b32.xlu0 %v7457_v14, %s7271_s16  ;;  %v964_v22 = vpop.permute.xlu0 %963  ;;  %v966_v25 = vpop.permute.xlu1 %965 }
  0xa7   :  { %4424 = vrot.lane.b32.xlu1 %v7459_v15, %s7271_s16  ;;  %v976_v31 = vsel %vm975_vm6, %v964_v22, %v966_v25 }
  0xa8   :  { %6624 = vmatmul.mubr.msk.bf16.vlgmr.msra.gmra.mrb[8].mxu0 %vm96_vm2, %v7546_v35  ;;  %v985_v33 = vsel %vm100_vm1, %v976_v31, 0  ;;  %v7776_v31 = vld [vmem:[%s8831_s2 + $0x40] sm:$0xff]  }
  0xa9   :  { %448 = vmatpush1.bf16.msra.mxu0 %v430_v44  ;;  %479 = vmatprep.mubr.bf16.mxu0 %v7266_v7 }
  0xaa   :  { %6628 = vmatprep.subr.msk.bf16.mxu0 %vm100_vm1, %v424_v46  ;;  %4426 = vrot.lane.b32.xlu0 %v7468_v17, %s7271_s16  ;;  %v968_v27 = vpop.permute.xlu0 %967  ;;  %v970_v34 = vpop.permute.xlu1 %969 }
  0xab   :  { %4428 = vrot.lane.b32.xlu1 %v7470_v18, %s7271_s16  ;;  %v977_v29 = vsel %vm975_vm6, %v966_v25, %v968_v27  ;;  %v978_v38 = vsel %vm975_vm6, %v968_v27, %v970_v34 }
  0xac   :  { %v991_v40 = vsel %vm100_vm1, %v978_v38, 0 }
  0xae   :  { %4594 = vrot.lane.b32.xlu0 %v7446_v11, %s7272_s17  ;;  %v972_v32 = vpop.permute.xlu0 %971  ;;  %v974_v41 = vpop.permute.xlu1 %973 }
  0xaf   :  { %4596 = vrot.lane.b32.xlu1 %v7448_v12, %s7272_s17  ;;  %v979_v36 = vsel %vm975_vm6, %v970_v34, %v972_v32  ;;  %v980_v44 = vsel %vm975_vm6, %v972_v32, %v974_v41 }
  0xb0   :  { %6627 = vmatmul.mubr.msk.bf16.vlgmr.msra.gmra.mrb[0].mxu0 %vm96_vm2, %v7596_v47  ;;  %v997_v46 = vsel %vm100_vm1, %v980_v44, 0 }
  0xb1   :  { %491 = vmatpush1.bf16.msra.mxu0 %v436_v50  ;;  %522 = vmatprep.mubr.bf16.mxu0 %v7266_v7  ;;  %v56_v50 = vld [vmem:[%s8832_s3] sm:$0xff] }
  0xb2   :  { %6630 = vmatprep.subr.msk.bf16.mxu0 %vm100_vm1, %v419_v51  ;;  %4598 = vrot.lane.b32.xlu0 %v7457_v14, %s7272_s17  ;;  %v1149_v39 = vpop.permute.xlu0 %1148  ;;  %v1151_v42 = vpop.permute.xlu1 %1150 }
  0xb3   :  { %4600 = vrot.lane.b32.xlu1 %v7459_v15, %s7272_s17  ;;  %v1161_v48 = vsel %vm1160_vm7, %v1149_v39, %v1151_v42 }
  0xb4   :  { %v1170_v51 = vsel %vm100_vm1, %v1161_v48, 0 }
  0xb6   :  { %4602 = vrot.lane.b32.xlu0 %v7468_v17, %s7272_s17  ;;  %v1153_v43 = vpop.permute.xlu0 %1152  ;;  %v1155_v52 = vpop.permute.xlu1 %1154 }
  0xb7   :  { %4604 = vrot.lane.b32.xlu1 %v7470_v18, %s7272_s17  ;;  %v1162_v45 = vsel %vm1160_vm7, %v1151_v42, %v1153_v43 }
  0xb8   :  { %6629 = vmatmul.mubr.msk.bf16.vlgmr.msra.gmra.mrb[4].mxu0 %vm96_vm2, %v7596_v47 }
  0xb9   :  { %534 = vmatpush1.bf16.msra.mxu0 %v442_v56  ;;  %565 = vmatprep.mubr.bf16.mxu0 %v7266_v7 }
  0xba   :  { %6633 = vmatprep.subr.msk.bf16.mxu0 %vm100_vm1, %v607_v55  ;;  %4770 = vrot.lane.b32.xlu0 %v7446_v11, %s7273_s18  ;;  %v1157_v49 = vpop.permute.xlu0 %1156  ;;  %v1163_v55 = vsel %vm1160_vm7, %v1153_v43, %v1155_v52  ;;  %v1159_v58 = vpop.permute.xlu1 %1158 }
  0xbb   :  { %4772 = vrot.lane.b32.xlu1 %v7448_v12, %s7273_s18  ;;  %v1164_v53 = vsel %vm1160_vm7, %v1155_v52, %v1157_v49  ;;  %v1176_v57 = vsel %vm100_vm1, %v1163_v55, 0  ;;  %v1165_v63 = vsel %vm1160_vm7, %v1157_v49, %v1159_v58  ;;  %v3568_v55 = vsel %vm100_vm1, %v7446_v11, 0 }
  0xbe   :  { %4774 = vrot.lane.b32.xlu0 %v7457_v14, %s7273_s18  ;;  %v1334_v56 = vpop.permute.xlu0 %1333  ;;  %v1336_v60 = vpop.permute.xlu1 %1335 }
  0xbf   :  { %1700 = vperm.xlu1 %7203, %v56_v50  }
  0xc0   :  { %6631 = vmatmul.mubr.msk.bf16.vlgmr.msra.gmra.mrb[8].mxu0 %vm96_vm2, %v7596_v47 }
  0xc1   :  { %633 = vmatpush1.bf16.msra.mxu0 %v615_v59  ;;  %664 = vmatprep.mubr.bf16.mxu0 %v7266_v7  ;;  %v57_v59 = vld [vmem:[%s8832_s3 + $0x8] sm:$0xff] }
  0xc2   :  { %6635 = vmatprep.subr.msk.bf16.mxu0 %vm100_vm1, %v609_v61  ;;  %1705 = vperm.xlu0 %7204, %v57_v59   ;;  %v1338_v61 = vpop.permute.xlu0 %1337  ;;  %v1340_v5 = vpop.permute.xlu1 %1339 }
  0xc3   :  { %4776 = vrot.lane.b32.xlu1 %v7459_v15, %s7273_s18  ;;  %v1347_v0 = vsel %vm1345_vm8, %v1336_v60, %v1338_v61  ;;  %v1348_v9 = vsel %vm1345_vm8, %v1338_v61, %v1340_v5 }
  0xc6   :  { %4780 = vrot.lane.b32.xlu0 %v7470_v18, %s7273_s18  ;;  %v1342_v3 = vpop.permute.xlu0 %1341  ;;  %v1344_v16 = vpop.permute.xlu1 %1343 }
  0xc7   :  { %4778 = vrot.lane.b32.xlu1 %v7468_v17, %s7273_s18  ;;  %v1350_v22 = vsel %vm1345_vm8, %v1342_v3, %v1344_v16 }
  0xc8   :  { %6634 = vmatmul.mubr.msk.bf16.vlgmr.msra.gmra.mrb[0].mxu0 %vm96_vm2, %v7639_v62 }
  0xc9   :  { %676 = vmatpush1.bf16.msra.mxu0 %v621_v1  ;;  %707 = vmatprep.mubr.bf16.mxu0 %v7266_v7  ;;  %v1182_v1 = vsel %vm100_vm1, %v1165_v63, 0 }
  0xca   :  { %6637 = vmatprep.subr.msk.bf16.mxu0 %vm100_vm1, %v604_v2  ;;  %v1346_v2 = vsel %vm1345_vm8, %v1334_v56, %v1336_v60  ;;  %v1519_v10 = vpop.permute.xlu0 %1518  ;;  %v3574_v56 = vsel %vm100_vm1, %v7457_v14, 0 }
  0xcb   :  { %v1355_v4 = vsel %vm100_vm1, %v1346_v2, 0 }
  0xce   :  { %v1523_v21 = vpop.permute.xlu0 %1522 }
  0xd0   :  { %6636 = vmatmul.mubr.msk.bf16.vlgmr.msra.gmra.mrb[4].mxu0 %vm96_vm2, %v7639_v62 }
  0xd1   :  { %719 = vmatpush1.bf16.msra.mxu0 %v627_v8  ;;  %750 = vmatprep.mubr.bf16.mxu0 %v7266_v7  ;;  %v7751_v8 = vld [vmem:[%s8831_s2 + $0x38] sm:$0xff]  }
  0xd2   :  { %6640 = vmatprep.subr.msk.bf16.mxu0 %vm100_vm1, %v792_v6  ;;  %v1349_v6 = vsel %vm1345_vm8, %v1340_v5, %v1342_v3  ;;  %v1527_v27 = vpop.permute.xlu0 %1526 }
  0xd8   :  { %6638 = vmatmul.mubr.msk.bf16.vlgmr.msra.gmra.mrb[8].mxu0 %vm96_vm2, %v7639_v62 }
  0xd9   :  { %818 = vmatpush1.bf16.msra.mxu0 %v800_v13  ;;  %849 = vmatprep.mubr.bf16.mxu0 %v7266_v7  ;;  %v1361_v13 = vsel %vm100_vm1, %v1348_v9, 0 }
  0xda   :  { %6642 = vmatprep.subr.msk.bf16.mxu0 %vm100_vm1, %v794_v19  ;;  %v1521_v19 = vpop.permute.xlu1 %1520 }
  0xdb   :  { %v1531_v25 = vsel %vm1530_vm9, %v1519_v10, %v1521_v19 }
  0xdc   :  { %v1540_v28 = vsel %vm100_vm1, %v1531_v25, 0 }
  0xe0   :  { %6641 = vmatmul.mubr.msk.bf16.vlgmr.msra.gmra.mrb[0].mxu0 %vm96_vm2, %v7664_v20 }
  0xe1   :  { %861 = vmatpush1.bf16.msra.mxu0 %v806_v23  ;;  %892 = vmatprep.mubr.bf16.mxu0 %v7266_v7  ;;  %v1532_v23 = vsel %vm1530_vm9, %v1521_v19, %v1523_v21 }
  0xe2   :  { %6644 = vmatprep.subr.msk.bf16.mxu0 %vm100_vm1, %v789_v24  ;;  %v1367_v24 = vsel %vm100_vm1, %v1350_v22, 0 }
  0xe8   :  { %6643 = vmatmul.mubr.msk.bf16.vlgmr.msra.gmra.mrb[4].mxu0 %vm96_vm2, %v7664_v20 }
  0xe9   :  { %904 = vmatpush1.bf16.msra.mxu0 %v812_v30  ;;  %935 = vmatprep.mubr.bf16.mxu0 %v7266_v7 }
  0xea   :  { %6647 = vmatprep.subr.msk.bf16.mxu0 %vm100_vm1, %v977_v29  ;;  %v1525_v29 = vpop.permute.xlu1 %1524 }
  0xeb   :  { %v1534_v30 = vsel %vm1530_vm9, %v1525_v29, %v1527_v27  ;;  %v1533_v32 = vsel %vm1530_vm9, %v1523_v21, %v1525_v29 }
  0xec   :  { %v1546_v34 = vsel %vm100_vm1, %v1533_v32, 0 }
  0xf0   :  { %6645 = vmatmul.mubr.msk.bf16.vlgmr.msra.gmra.mrb[8].mxu0 %vm96_vm2, %v7664_v20 }
  0xf1   :  { %1003 = vmatpush1.bf16.msra.mxu0 %v985_v33  ;;  %1034 = vmatprep.mubr.bf16.mxu0 %v7266_v7  ;;  %v3404_v33 = vpop.permute.xlu0 %3403 }
  0xf2   :  { %6649 = vmatprep.subr.msk.bf16.mxu0 %vm100_vm1, %v979_v36  ;;  %v1529_v36 = vpop.permute.xlu1 %1528 }
  0xf5   :  { %v3408_v39 = vpop.permute.xlu0 %3407 }
  0xf6   :  { %v3406_v38 = vpop.permute.xlu1 %3405 }
  0xf7   :  { %v3415_v43 = vsel %vm90_vm0, %v3404_v33, %v3406_v38 }
  0xf8   :  { %6648 = vmatmul.mubr.msk.bf16.vlgmr.msra.gmra.mrb[0].mxu0 %vm96_vm2, %v7689_v37 }
  0xf9   :  { %1046 = vmatpush1.bf16.msra.mxu0 %v991_v40  ;;  %1077 = vmatprep.mubr.bf16.mxu0 %v7266_v7  ;;  %v1535_v40 = vsel %vm1530_vm9, %v1527_v27, %v1529_v36  ;;  %v3412_v44 = vpop.permute.xlu0 %3411 }
  0xfa   :  { %6651 = vmatprep.subr.msk.bf16.mxu0 %vm100_vm1, %v974_v41  ;;  %v3416_v41 = vsel %vm90_vm0, %v3406_v38, %v3408_v39  ;;  %v1552_v42 = vsel %vm100_vm1, %v1535_v40, 0 }
 0x100   :  { %6650 = vmatmul.mubr.msk.bf16.vlgmr.msra.gmra.mrb[4].mxu0 %vm96_vm2, %v7689_v37 }
 0x101   :  { %1089 = vmatpush1.bf16.msra.mxu0 %v997_v46  ;;  %1120 = vmatprep.mubr.bf16.mxu0 %v7266_v7  ;;  %v3410_v46 = vpop.permute.xlu1 %3409 }
 0x102   :  { %6654 = vmatprep.subr.msk.bf16.mxu0 %vm100_vm1, %v1162_v45  ;;  %v3421_v45 = vsel %vm100_vm1, %v3415_v43, 0  ;;  %v3418_v48 = vsel %vm90_vm0, %v3410_v46, %v3412_v44  ;;  %v3417_v49 = vsel %vm90_vm0, %v3408_v39, %v3410_v46 }
 0x103   :  { %v3427_v50 = vsel %vm100_vm1, %v3417_v49, 0 }
 0x108   :  { %6652 = vmatmul.mubr.msk.bf16.vlgmr.msra.gmra.mrb[8].mxu0 %vm96_vm2, %v7689_v37 }
 0x109   :  { %1188 = vmatpush1.bf16.msra.mxu0 %v1170_v51  ;;  %1219 = vmatprep.mubr.bf16.mxu0 %v7266_v7  ;;  %v3414_v51 = vpop.permute.xlu1 %3413 }
 0x10a   :  { %6656 = vmatprep.subr.msk.bf16.mxu0 %vm100_vm1, %v1164_v53  ;;  %v3419_v52 = vsel %vm90_vm0, %v3412_v44, %v3414_v51 }
 0x10b   :  { %v3433_v53 = vsel %vm100_vm1, %v3419_v52, 0 }
 0x10d   :  { %v3717_v11 = vpop.permute.xlu1 %3716 }
 0x110   :  { %6655 = vmatmul.mubr.msk.bf16.vlgmr.msra.gmra.mrb[0].mxu0 %vm96_vm2, %v7719_v54 }
 0x111   :  { %1231 = vmatpush1.bf16.msra.mxu0 %v1176_v57  ;;  %1262 = vmatprep.mubr.bf16.mxu0 %v7266_v7  ;;  %v3715_v57 = vpop.permute.xlu0 %3714  ;;  %v3721_v59 = vpop.permute.xlu1 %3720 }
 0x112   :  { %6658 = vmatprep.subr.msk.bf16.mxu0 %vm100_vm1, %v1159_v58  ;;  %v3726_v14 = vsel %vm420_vm3, %v3715_v57, %v3717_v11 }
 0x118   :  { %6657 = vmatmul.mubr.msk.bf16.vlgmr.msra.gmra.mrb[4].mxu0 %vm96_vm2, %v7719_v54 }
 0x119   :  { %1274 = vmatpush1.bf16.msra.mxu0 %v1182_v1  ;;  %1305 = vmatprep.mubr.bf16.mxu0 %v7266_v7 }
 0x11a   :  { %6661 = vmatprep.subr.msk.bf16.mxu0 %vm100_vm1, %v1347_v0  ;;  %v3725_v0 = vpop.permute.xlu1 %3724 }
 0x120   :  { %6659 = vmatmul.mubr.msk.bf16.vlgmr.msra.gmra.mrb[8].mxu0 %vm96_vm2, %v7719_v54 }
 0x121   :  { %1373 = vmatpush1.bf16.msra.mxu0 %v1355_v4  ;;  %1404 = vmatprep.mubr.bf16.mxu0 %v7266_v7 }
 0x122   :  { %6663 = vmatprep.subr.msk.bf16.mxu0 %vm100_vm1, %v1349_v6 }
 0x128   :  { %6662 = vmatmul.mubr.msk.bf16.vlgmr.msra.gmra.mrb[0].mxu0 %vm96_vm2, %v7751_v8 }
 0x129   :  { %1416 = vmatpush1.bf16.msra.mxu0 %v1361_v13  ;;  %1447 = vmatprep.mubr.bf16.mxu0 %v7266_v7 }
 0x12a   :  { %6665 = vmatprep.subr.msk.bf16.mxu0 %vm100_vm1, %v1344_v16 }
 0x130   :  { %6664 = vmatmul.mubr.msk.bf16.vlgmr.msra.gmra.mrb[4].mxu0 %vm96_vm2, %v7751_v8 }
 0x131   :  { %1459 = vmatpush1.bf16.msra.mxu0 %v1367_v24  ;;  %1490 = vmatprep.mubr.bf16.mxu0 %v7266_v7 }
 0x132   :  { %6668 = vmatprep.subr.msk.bf16.mxu0 %vm100_vm1, %v1532_v23 }
 0x138   :  { %6666 = vmatmul.mubr.msk.bf16.vlgmr.msra.gmra.mrb[8].mxu0 %vm96_vm2, %v7751_v8 }
 0x139   :  { %1558 = vmatpush1.bf16.msra.mxu0 %v1540_v28  ;;  %1589 = vmatprep.mubr.bf16.mxu0 %v7266_v7 }
 0x13a   :  { %6670 = vmatprep.subr.msk.bf16.mxu0 %vm100_vm1, %v1534_v30 }
 0x140   :  { %6669 = vmatmul.mubr.msk.bf16.vlgmr.msra.gmra.mrb[0].mxu0 %vm96_vm2, %v7776_v31 }
 0x141   :  { %1601 = vmatpush1.bf16.msra.mxu0 %v1546_v34  ;;  %1632 = vmatprep.mubr.bf16.mxu0 %v7266_v7 }
 0x142   :  { %6672 = vmatprep.subr.msk.bf16.mxu0 %vm100_vm1, %v1529_v36 }
 0x148   :  { %6671 = vmatmul.mubr.msk.bf16.vlgmr.msra.gmra.mrb[4].mxu0 %vm96_vm2, %v7776_v31 }
 0x149   :  { %1644 = vmatpush1.bf16.msra.mxu0 %v1552_v42  ;;  %1675 = vmatprep.mubr.bf16.mxu0 %v7266_v7 }
 0x14a   :  { %6719 = vmatprep.subr.msk.bf16.mxu0 %vm100_vm1, %v3416_v41 }
 0x150   :  { %6673 = vmatmul.mubr.msk.bf16.vlgmr.msra.gmra.mrb[8].mxu0 %vm96_vm2, %v7776_v31 }
 0x151   :  { %3439 = vmatpush1.bf16.msra.mxu0 %v3421_v45  ;;  %3470 = vmatprep.mubr.bf16.mxu0 %v7266_v7 }
 0x152   :  { %6721 = vmatprep.subr.msk.bf16.mxu0 %vm100_vm1, %v3418_v48 }
 0x158   :  { %6720 = vmatmul.mubr.msk.bf16.vlgmr.msra.gmra.mrb[12].mxu0 %vm96_vm2, %v7495_v26 }
 0x159   :  { %3482 = vmatpush1.bf16.msra.mxu0 %v3427_v50  ;;  %3513 = vmatprep.mubr.bf16.mxu0 %v7266_v7 }
 0x15a   :  { %6723 = vmatprep.subr.msk.bf16.mxu0 %vm100_vm1, %v3414_v51 }
 0x160   :  { %6722 = vmatmul.mubr.msk.bf16.vlgmr.msra.gmra.mrb[16].mxu0 %vm96_vm2, %v7495_v26 }
 0x161   :  { %3525 = vmatpush1.bf16.msra.mxu0 %v3433_v53  ;;  %3556 = vmatprep.mubr.bf16.mxu0 %v7266_v7 }
 0x162   :  { %6725 = vmatprep.subr.msk.bf16.mxu0 %vm100_vm1, %v7448_v12  ;;  %v3719_v12 = vpop.permute.xlu0 %3718 }
 0x166   :  { %v3723_v58 = vpop.permute.xlu0 %3722 }
 0x167   :  { %v3729_v60 = vsel %vm420_vm3, %v3721_v59, %v3723_v58  ;;  %v3730_v2 = vsel %vm420_vm3, %v3723_v58, %v3725_v0 }
 0x168   :  { %6724 = vmatmul.mubr.msk.bf16.vlgmr.msra.gmra.mrb[20].mxu0 %vm96_vm2, %v7495_v26  ;;  %v3580_v26 = vsel %vm100_vm1, %v7468_v17, 0  ;;  %v3728_v17 = vsel %vm420_vm3, %v3719_v12, %v3721_v59  ;;  %v3744_v4 = vsel %vm100_vm1, %v3730_v2, 0 }
 0x169   :  { %3586 = vmatpush1.bf16.msra.mxu0 %v3568_v55  ;;  %3617 = vmatprep.mubr.bf16.mxu0 %v7266_v7  ;;  %v3738_v63 = vsel %vm100_vm1, %v3728_v17, 0 }
 0x16a   :  { %6727 = vmatprep.subr.msk.bf16.mxu0 %vm100_vm1, %v7459_v15  ;;  %v3727_v15 = vsel %vm420_vm3, %v3717_v11, %v3719_v12  ;;  %v3891_v61 = vpop.permute.xlu0 %3890 }
 0x16e   :  { %v3895_v1 = vpop.permute.xlu0 %3894 }
 0x170   :  { %6726 = vmatmul.mubr.msk.bf16.vlgmr.msra.gmra.mrb[12].mxu0 %vm96_vm2, %v7546_v35 }
 0x171   :  { %3629 = vmatpush1.bf16.msra.mxu0 %v3574_v56  ;;  %3660 = vmatprep.mubr.bf16.mxu0 %v7266_v7 }
 0x172   :  { %6729 = vmatprep.subr.msk.bf16.mxu0 %vm100_vm1, %v7470_v18  ;;  %v3732_v18 = vsel %vm100_vm1, %v3726_v14, 0  ;;  %v3899_v6 = vpop.permute.xlu0 %3898 }
 0x176   :  { %v4067_v19 = vpop.permute.xlu0 %4066 }
 0x178   :  { %6728 = vmatmul.mubr.msk.bf16.vlgmr.msra.gmra.mrb[16].mxu0 %vm96_vm2, %v7546_v35 }
 0x179   :  { %3672 = vmatpush1.bf16.msra.mxu0 %v3580_v26  ;;  %3703 = vmatprep.mubr.bf16.mxu0 %v7266_v7 }
 0x17a   :  { %6731 = vmatprep.subr.msk.bf16.mxu0 %vm100_vm1, %v3727_v15  ;;  %v4071_v23 = vpop.permute.xlu0 %4070 }
 0x17e   :  { %v4075_v29 = vpop.permute.xlu0 %4074 }
 0x180   :  { %6730 = vmatmul.mubr.msk.bf16.vlgmr.msra.gmra.mrb[20].mxu0 %vm96_vm2, %v7546_v35  ;;  %v3893_v35 = vpop.permute.xlu1 %3892 }
 0x181   :  { %3750 = vmatpush1.bf16.msra.mxu0 %v3732_v18  ;;  %3781 = vmatprep.mubr.bf16.mxu0 %v7266_v7  ;;  %v3903_v3 = vsel %vm605_vm4, %v3893_v35, %v3895_v1  ;;  %v3902_v5 = vsel %vm605_vm4, %v3891_v61, %v3893_v35 }
 0x182   :  { %6733 = vmatprep.subr.msk.bf16.mxu0 %vm100_vm1, %v3729_v60  ;;  %v3908_v9 = vsel %vm100_vm1, %v3902_v5, 0  ;;  %v4243_v36 = vpop.permute.xlu0 %4242 }
 0x184   :  { %v3897_v10 = vpop.permute.xlu1 %3896 }
 0x185   :  { %v3905_v13 = vsel %vm605_vm4, %v3897_v10, %v3899_v6  ;;  %v3904_v16 = vsel %vm605_vm4, %v3895_v1, %v3897_v10 }
 0x186   :  { %v3914_v21 = vsel %vm100_vm1, %v3904_v16, 0  ;;  %v4247_v40 = vpop.permute.xlu0 %4246 }
 0x188   :  { %6732 = vmatmul.mubr.msk.bf16.vlgmr.msra.gmra.mrb[12].mxu0 %vm96_vm2, %v7596_v47  ;;  %v3901_v22 = vpop.permute.xlu1 %3900 }
 0x189   :  { %3793 = vmatpush1.bf16.msra.mxu0 %v3738_v63  ;;  %3824 = vmatprep.mubr.bf16.mxu0 %v7266_v7  ;;  %v3906_v24 = vsel %vm605_vm4, %v3899_v6, %v3901_v22 }
 0x18a   :  { %6735 = vmatprep.subr.msk.bf16.mxu0 %vm100_vm1, %v3725_v0  ;;  %v3920_v27 = vsel %vm100_vm1, %v3906_v24, 0  ;;  %v4251_v45 = vpop.permute.xlu0 %4250  ;;  %v1733_v24 = vlaneseq }
 0x18e   :  { %v4419_v51 = vpop.permute.xlu0 %4418 }
 0x190   :  { %6734 = vmatmul.mubr.msk.bf16.vlgmr.msra.gmra.mrb[16].mxu0 %vm96_vm2, %v7596_v47 }
 0x191   :  { %3836 = vmatpush1.bf16.msra.mxu0 %v3744_v4  ;;  %3867 = vmatprep.mubr.bf16.mxu0 %v7266_v7 }
 0x192   :  { %6737 = vmatprep.subr.msk.bf16.mxu0 %vm100_vm1, %v3903_v3  ;;  %v4423_v55 = vpop.permute.xlu0 %4422 }
 0x196   :  { %v4427_v26 = vpop.permute.xlu0 %4426 }
 0x198   :  { %6736 = vmatmul.mubr.msk.bf16.vlgmr.msra.gmra.mrb[20].mxu0 %vm96_vm2, %v7596_v47  ;;  %v4069_v47 = vpop.permute.xlu1 %4068 }
 0x199   :  { %3926 = vmatpush1.bf16.msra.mxu0 %v3908_v9  ;;  %3957 = vmatprep.mubr.bf16.mxu0 %v7266_v7  ;;  %v4079_v25 = vsel %vm790_vm5, %v4069_v47, %v4071_v23  ;;  %v4078_v28 = vsel %vm790_vm5, %v4067_v19, %v4069_v47 }
 0x19a   :  { %6739 = vmatprep.subr.msk.bf16.mxu0 %vm100_vm1, %v3905_v13  ;;  %v4084_v30 = vsel %vm100_vm1, %v4078_v28, 0  ;;  %v4595_v60 = vpop.permute.xlu0 %4594  ;;  %v7955_v28 = vshrl.u32 %v1733_v24, 7 }
 0x19c   :  { %v4073_v32 = vpop.permute.xlu1 %4072 }
 0x19d   :  { %v4081_v33 = vsel %vm790_vm5, %v4073_v32, %v4075_v29  ;;  %v4080_v34 = vsel %vm790_vm5, %v4071_v23, %v4073_v32  ;;  %v1735_v32 = vsub.s32 0, %v7955_v28 }
 0x19e   :  { %v4090_v38 = vsel %vm100_vm1, %v4080_v34, 0  ;;  %v4599_v61 = vpop.permute.xlu0 %4598 }
 0x1a0   :  { %6738 = vmatmul.mubr.msk.bf16.vlgmr.msra.gmra.mrb[12].mxu0 %vm96_vm2, %v7639_v62  ;;  %v4077_v39 = vpop.permute.xlu1 %4076 }
 0x1a1   :  { %3969 = vmatpush1.bf16.msra.mxu0 %v3914_v21  ;;  %4000 = vmatprep.mubr.bf16.mxu0 %v7266_v7  ;;  %v4082_v41 = vsel %vm790_vm5, %v4075_v29, %v4077_v39 }
 0x1a2   :  { %6741 = vmatprep.subr.msk.bf16.mxu0 %vm100_vm1, %v3901_v22  ;;  %v4096_v43 = vsel %vm100_vm1, %v4082_v41, 0  ;;  %v4603_v3 = vpop.permute.xlu0 %4602 }
 0x1a6   :  { %v4771_v13 = vpop.permute.xlu0 %4770 }
 0x1a8   :  { %6740 = vmatmul.mubr.msk.bf16.vlgmr.msra.gmra.mrb[16].mxu0 %vm96_vm2, %v7639_v62 }
 0x1a9   :  { %4012 = vmatpush1.bf16.msra.mxu0 %v3920_v27  ;;  %4043 = vmatprep.mubr.bf16.mxu0 %v7266_v7 }
 0x1aa   :  { %6743 = vmatprep.subr.msk.bf16.mxu0 %vm100_vm1, %v4079_v25  ;;  %v4775_v21 = vpop.permute.xlu0 %4774 }
 0x1b0   :  { %6742 = vmatmul.mubr.msk.bf16.vlgmr.msra.gmra.mrb[20].mxu0 %vm96_vm2, %v7639_v62  ;;  %v4245_v62 = vpop.permute.xlu1 %4244 }
 0x1b1   :  { %4102 = vmatpush1.bf16.msra.mxu0 %v4084_v30  ;;  %4133 = vmatprep.mubr.bf16.mxu0 %v7266_v7  ;;  %v4255_v42 = vsel %vm975_vm6, %v4245_v62, %v4247_v40  ;;  %v4254_v44 = vsel %vm975_vm6, %v4243_v36, %v4245_v62  ;;  %v1739_v36 = vsub.s32 1, %v7955_v28 }
 0x1b2   :  { %6745 = vmatprep.subr.msk.bf16.mxu0 %vm100_vm1, %v4081_v33  ;;  %v4260_v46 = vsel %vm100_vm1, %v4254_v44, 0  ;;  %v7967_v33 = vld [vmem:[%s8835_s6] sm:$0x3f]  ;;  %s7274_s6 = smov 19  }
 0x1b4   :  { %v4249_v48 = vpop.permute.xlu1 %4248 }
 0x1b5   :  { %v4257_v49 = vsel %vm975_vm6, %v4249_v48, %v4251_v45  ;;  %v4256_v50 = vsel %vm975_vm6, %v4247_v40, %v4249_v48  ;;  %v7980_v48 = vrot.slane %v7967_v33, %v1739_v36 }
 0x1b6   :  { %v4266_v52 = vsel %vm100_vm1, %v4256_v50, 0 }
 0x1b8   :  { %6744 = vmatmul.mubr.msk.bf16.vlgmr.msra.gmra.mrb[12].mxu0 %vm96_vm2, %v7664_v20  ;;  %v4253_v53 = vpop.permute.xlu1 %4252 }
 0x1b9   :  { %4145 = vmatpush1.bf16.msra.mxu0 %v4090_v38  ;;  %4176 = vmatprep.mubr.bf16.mxu0 %v7266_v7  ;;  %v4258_v56 = vsel %vm975_vm6, %v4251_v45, %v4253_v53  ;;  %v7970_v38 = vpop.permute.xlu0 %1705 }
 0x1ba   :  { %6747 = vmatprep.subr.msk.bf16.mxu0 %vm100_vm1, %v4077_v39  ;;  %v4272_v11 = vsel %vm100_vm1, %v4258_v56, 0  ;;  %v1743_v56 = vsub.s32 2, %v7955_v28 }
 0x1c0   :  { %6746 = vmatmul.mubr.msk.bf16.vlgmr.msra.gmra.mrb[16].mxu0 %vm96_vm2, %v7664_v20 }
 0x1c1   :  { %4188 = vmatpush1.bf16.msra.mxu0 %v4096_v43  ;;  %4219 = vmatprep.mubr.bf16.mxu0 %v7266_v7  ;;  %v7976_v43 = vrot.slane %v7967_v33, %v1735_v32 }
 0x1c2   :  { %6749 = vmatprep.subr.msk.bf16.mxu0 %vm100_vm1, %v4255_v42 }
 0x1c8   :  { %6748 = vmatmul.mubr.msk.bf16.vlgmr.msra.gmra.mrb[20].mxu0 %vm96_vm2, %v7664_v20  ;;  %v4421_v20 = vpop.permute.xlu1 %4420 }
 0x1c9   :  { %4278 = vmatpush1.bf16.msra.mxu0 %v4260_v46  ;;  %4309 = vmatprep.mubr.bf16.mxu0 %v7266_v7  ;;  %v4431_v57 = vsel %vm1160_vm7, %v4421_v20, %v4423_v55  ;;  %v4430_v12 = vsel %vm1160_vm7, %v4419_v51, %v4421_v20 }
 0x1ca   :  { %6751 = vmatprep.subr.msk.bf16.mxu0 %vm100_vm1, %v4257_v49  ;;  %v4436_v15 = vsel %vm100_vm1, %v4430_v12, 0 }
 0x1cc   :  { %v4425_v14 = vpop.permute.xlu1 %4424 }
 0x1cd   :  { %v4433_v58 = vsel %vm1160_vm7, %v4425_v14, %v4427_v26  ;;  %v4432_v18 = vsel %vm1160_vm7, %v4423_v55, %v4425_v14 }
 0x1ce   :  { %v4442_v17 = vsel %vm100_vm1, %v4432_v18, 0 }
 0x1d0   :  { %6750 = vmatmul.mubr.msk.bf16.vlgmr.msra.gmra.mrb[12].mxu0 %vm96_vm2, %v7689_v37  ;;  %v4429_v59 = vpop.permute.xlu1 %4428 }
 0x1d1   :  { %4321 = vmatpush1.bf16.msra.mxu0 %v4266_v52  ;;  %4352 = vmatprep.mubr.bf16.mxu0 %v7266_v7  ;;  %v4434_v63 = vsel %vm1160_vm7, %v4427_v26, %v4429_v59  ;;  %v1747_v26 = vsub.s32 3, %v7955_v28 }
 0x1d2   :  { %6753 = vmatprep.subr.msk.bf16.mxu0 %vm100_vm1, %v4253_v53  ;;  %v4448_v35 = vsel %vm100_vm1, %v4434_v63, 0  ;;  %v4781_v53 = vpop.permute.xlu0 %4780 }
 0x1d8   :  { %6752 = vmatmul.mubr.msk.bf16.vlgmr.msra.gmra.mrb[16].mxu0 %vm96_vm2, %v7689_v37 }
 0x1d9   :  { %4364 = vmatpush1.bf16.msra.mxu0 %v4272_v11  ;;  %4395 = vmatprep.mubr.bf16.mxu0 %v7266_v7 }
 0x1da   :  { %6755 = vmatprep.subr.msk.bf16.mxu0 %vm100_vm1, %v4431_v57 }
 0x1e0   :  { %6754 = vmatmul.mubr.msk.bf16.vlgmr.msra.gmra.mrb[20].mxu0 %vm96_vm2, %v7689_v37  ;;  %v4597_v37 = vpop.permute.xlu1 %4596 }
 0x1e1   :  { %4454 = vmatpush1.bf16.msra.mxu0 %v4436_v15  ;;  %4485 = vmatprep.mubr.bf16.mxu0 %v7266_v7  ;;  %v4607_v0 = vsel %vm1345_vm8, %v4597_v37, %v4599_v61  ;;  %v4606_v2 = vsel %vm1345_vm8, %v4595_v60, %v4597_v37 }
 0x1e2   :  { %6757 = vmatprep.subr.msk.bf16.mxu0 %vm100_vm1, %v4433_v58  ;;  %v4612_v4 = vsel %vm100_vm1, %v4606_v2, 0 }
 0x1e4   :  { %v4601_v1 = vpop.permute.xlu1 %4600 }
 0x1e5   :  { %v4609_v6 = vsel %vm1345_vm8, %v4601_v1, %v4603_v3  ;;  %v4608_v10 = vsel %vm1345_vm8, %v4599_v61, %v4601_v1  ;;  %v7998_v61 = vrot.slane %v7967_v33, %v1743_v56  ;;  %v8003_v1 = vrot.slane %v7967_v33, %v1747_v26 }
 0x1e6   :  { %v4618_v16 = vsel %vm100_vm1, %v4608_v10, 0  ;;  %v1751_v10 = vsub.s32 4, %v7955_v28 }
 0x1e8   :  { %6756 = vmatmul.mubr.msk.bf16.vlgmr.msra.gmra.mrb[12].mxu0 %vm96_vm2, %v7719_v54  ;;  %v4605_v5 = vpop.permute.xlu1 %4604 }
 0x1e9   :  { %4497 = vmatpush1.bf16.msra.mxu0 %v4442_v17  ;;  %4528 = vmatprep.mubr.bf16.mxu0 %v7266_v7  ;;  %v4610_v19 = vsel %vm1345_vm8, %v4603_v3, %v4605_v5 }
 0x1ea   :  { %6759 = vmatprep.subr.msk.bf16.mxu0 %vm100_vm1, %v4429_v59  ;;  %v4624_v22 = vsel %vm100_vm1, %v4610_v19, 0 }
 0x1ec   :  { %v4773_v9 = vpop.permute.xlu1 %4772 }
 0x1ed   :  { %v4783_v23 = vsel %vm1530_vm9, %v4773_v9, %v4775_v21  ;;  %v4782_v27 = vsel %vm1530_vm9, %v4771_v13, %v4773_v9 }
 0x1ee   :  { %v4788_v30 = vsel %vm100_vm1, %v4782_v27, 0 }
 0x1f0   :  { %6758 = vmatmul.mubr.msk.bf16.vlgmr.msra.gmra.mrb[16].mxu0 %vm96_vm2, %v7719_v54 }
 0x1f1   :  { %4540 = vmatpush1.bf16.msra.mxu0 %v4448_v35  ;;  %4571 = vmatprep.mubr.bf16.mxu0 %v7266_v7 }
 0x1f2   :  { %6761 = vmatprep.subr.msk.bf16.mxu0 %vm100_vm1, %v4607_v0 }
 0x1f8   :  { %6760 = vmatmul.mubr.msk.bf16.vlgmr.msra.gmra.mrb[20].mxu0 %vm96_vm2, %v7719_v54  ;;  %v7945_v54 = vpop.permute.xlu1 %1700 }
 0x1f9   :  { %4630 = vmatpush1.bf16.msra.mxu0 %v4612_v4  ;;  %4661 = vmatprep.mubr.bf16.mxu0 %v7266_v7 }
 0x1fa   :  { %6763 = vmatprep.subr.msk.bf16.mxu0 %vm100_vm1, %v4609_v6 }
 0x1fc   :  { %v4777_v47 = vpop.permute.xlu1 %4776 }
 0x1fd   :  { %v4784_v62 = vsel %vm1530_vm9, %v4775_v21, %v4777_v47  ;;  %v1755_v21 = vsub.s32 5, %v7955_v28 }
 0x1fe   :  { %v4794_v51 = vsel %vm100_vm1, %v4784_v62, 0 }
 0x1ff   :  { %v8025_v28 = vrot.slane %v7967_v33, %v1755_v21 }
 0x200   :  { %6762 = vmatmul.mubr.msk.bf16.vlgmr.msra.gmra.mrb[12].mxu0 %vm96_vm2, %v7751_v8  ;;  %v4779_v25 = vpop.permute.xlu1 %4778 }
 0x201   :  { %4673 = vmatpush1.bf16.msra.mxu0 %v4618_v16  ;;  %4704 = vmatprep.mubr.bf16.mxu0 %v7266_v7  ;;  %v4785_v29 = vsel %vm1530_vm9, %v4777_v47, %v4779_v25  ;;  %v4786_v59 = vsel %vm1530_vm9, %v4779_v25, %v4781_v53 }
 0x202   :  { %6765 = vmatprep.subr.msk.bf16.mxu0 %vm100_vm1, %v4605_v5  ;;  %v4800_v4 = vsel %vm100_vm1, %v4786_v59, 0 }
 0x208   :  { %6764 = vmatmul.mubr.msk.bf16.vlgmr.msra.gmra.mrb[16].mxu0 %vm96_vm2, %v7751_v8 }
 0x209   :  { %4716 = vmatpush1.bf16.msra.mxu0 %v4624_v22  ;;  %4747 = vmatprep.mubr.bf16.mxu0 %v7266_v7 }
 0x20a   :  { %6767 = vmatprep.subr.msk.bf16.mxu0 %vm100_vm1, %v4783_v23 }
 0x210   :  { %6766 = vmatmul.mubr.msk.bf16.vlgmr.msra.gmra.mrb[20].mxu0 %vm96_vm2, %v7751_v8 }
 0x211   :  { %4806 = vmatpush1.bf16.msra.mxu0 %v4788_v30  ;;  %4837 = vmatprep.mubr.bf16.mxu0 %v7266_v7  ;;  %v8020_v30 = vrot.slane %v7967_v33, %v1751_v10 }
 0x212   :  { %6769 = vmatprep.subr.msk.bf16.mxu0 %vm100_vm1, %v4785_v29 }
 0x213   :  { %v1591_v34 = vpop.f32.mrb[0].mxu0 }
 0x214   :  { %v1708_v8 = vadd.f32 %v7945_v54, %v1591_v34  ;;  %v1593_v39 = vpop.f32.mrb[1].mxu0 }
 0x215   :  { %v1709_v40 = vadd.f32 %v7945_v54, %v1593_v39  ;;  %v1595_v41 = vpop.f32.mrb[2].mxu0 }
 0x216   :  { %v1720_v42 = vmax.f32 %v1708_v8, 0.0  ;;  %v1714_v44 = vadd.f32 %v7970_v38, %v1595_v41  ;;  %v1597_v45 = vpop.f32.mrb[3].mxu0 }
 0x217   :  { %v1721_v46 = vmax.f32 %v1709_v40, 0.0  ;;  %v1715_v49 = vadd.f32 %v7970_v38, %v1597_v45 }
 0x218   :  { %v1726_v50 = vmax.f32 %v1714_v44, 0.0  ;;  %6768 = vmatmul.mubr.msk.bf16.vlgmr.msra.gmra.mrb[12].mxu0 %vm96_vm2, %v7776_v31  ;;  %v1763_v20 = vmul.f32 %v7976_v43, %v1720_v42 }
 0x219   :  { %v1727_v52 = vmax.f32 %v1715_v49, 0.0  ;;  %4849 = vmatpush1.bf16.msra.mxu0 %v4794_v51  ;;  %4880 = vmatprep.mubr.bf16.mxu0 %v7266_v7  ;;  %v1764_v57 = vmul.f32 %v7980_v48, %v1721_v46 }
 0x21a   :  { %v1769_v55 = vmul.f32 %v7976_v43, %v1726_v50  ;;  %6771 = vmatprep.subr.msk.bf16.mxu0 %vm100_vm1, %v4781_v53 }
 0x21b   :  { %v1770_v11 = vmul.f32 %v7980_v48, %v1727_v52  ;;  %v1634_v12 = vpop.f32.mrb[4].mxu0 }
 0x21c   :  { %v1775_v15 = vpack.c.bf16 %v1769_v55, %v1763_v20  ;;  %v1710_v14 = vadd.f32 %v7945_v54, %v1634_v12  ;;  %v1636_v58 = vpop.f32.mrb[5].mxu0 }
 0x21d   :  { %v1776_v18 = vpack.c.bf16 %v1770_v11, %v1764_v57  ;;  %v1711_v60 = vadd.f32 %v7945_v54, %v1636_v58  ;;  %v1638_v17 = vpop.f32.mrb[6].mxu0 }
 0x21e   :  { %v1722_v37 = vmax.f32 %v1710_v14, 0.0  ;;  %v1716_v63 = vadd.f32 %v7970_v38, %v1638_v17  ;;  %v1640_v0 = vpop.f32.mrb[7].mxu0  ;;  %1787 = vrot.lane.b32.xlu1 %v1775_v15, %s7274_s6 }
 0x21f   :  { %v1723_v35 = vmax.f32 %v1711_v60, 0.0  ;;  %v1717_v2 = vadd.f32 %v7970_v38, %v1640_v0  ;;  %1789 = vrot.lane.b32.xlu0 %v1776_v18, %s7274_s6 }
 0x220   :  { %v1728_v3 = vmax.f32 %v1716_v63, 0.0  ;;  %6770 = vmatmul.mubr.msk.bf16.vlgmr.msra.gmra.mrb[16].mxu0 %vm96_vm2, %v7776_v31  ;;  %v1765_v6 = vmul.f32 %v7998_v61, %v1722_v37 }
 0x221   :  { %v1729_v5 = vmax.f32 %v1717_v2, 0.0  ;;  %4892 = vmatpush1.bf16.msra.mxu0 %v4800_v4  ;;  %4923 = vmatprep.mubr.bf16.mxu0 %v7266_v7  ;;  %v1766_v13 = vmul.f32 %v8003_v1, %v1723_v35 }
 0x222   :  { %v1771_v9 = vmul.f32 %v7998_v61, %v1728_v3 }
 0x223   :  { %v1772_v16 = vmul.f32 %v8003_v1, %v1729_v5  ;;  %v1677_v19 = vpop.f32.mrb[8].mxu0 }
 0x224   :  { %v1777_v22 = vpack.c.bf16 %v1771_v9, %v1765_v6  ;;  %v1712_v47 = vadd.f32 %v7945_v54, %v1677_v19  ;;  %v1679_v23 = vpop.f32.mrb[9].mxu0 }
 0x225   :  { %v1778_v24 = vpack.c.bf16 %v1772_v16, %v1766_v13  ;;  %v1713_v25 = vadd.f32 %v7945_v54, %v1679_v23  ;;  %v1681_v27 = vpop.f32.mrb[10].mxu0 }
 0x226   :  { %v1724_v29 = vmax.f32 %v1712_v47, 0.0  ;;  %v1718_v32 = vadd.f32 %v7970_v38, %v1681_v27  ;;  %v1683_v34 = vpop.f32.mrb[11].mxu0  ;;  %1791 = vrot.lane.b32.xlu1 %v1777_v22, %s7274_s6 }
 0x227   :  { %v1725_v36 = vmax.f32 %v1713_v25, 0.0  ;;  %v1719_v8 = vadd.f32 %v7970_v38, %v1683_v34  ;;  %1793 = vrot.lane.b32.xlu0 %v1778_v24, %s7274_s6 }
 0x228   :  { %v1730_v39 = vmax.f32 %v1718_v32, 0.0  ;;  %6772 = vmatmul.mubr.msk.bf16.vlgmr.msra.gmra.mrb[20].mxu0 %vm96_vm2, %v7776_v31  ;;  %v1767_v40 = vmul.f32 %v8020_v30, %v1724_v29 }
 0x229   :  { %v1731_v62 = vmax.f32 %v1719_v8, 0.0  ;;  %v1768_v42 = vmul.f32 %v8025_v28, %v1725_v36 }
 0x22a   :  { %v1773_v41 = vmul.f32 %v8020_v30, %v1730_v39 }
 0x22b   :  { %v1774_v44 = vmul.f32 %v8025_v28, %v1731_v62 }
 0x22c   :  { %v1779_v45 = vpack.c.bf16 %v1773_v41, %v1767_v40 }
 0x22d   :  { %v1780_v33 = vpack.c.bf16 %v1774_v44, %v1768_v42 }
 0x22e   :  { %1795 = vrot.lane.b32.xlu1 %v1779_v45, %s7274_s6 }
 0x22f   :  { %1797 = vrot.lane.b32.xlu0 %v1780_v33, %s7274_s6 }
 0x290   :  { %v8037_v46 = vpop.permute.xlu1 %1787 }
 0x291   :  { %v1790_v49 = vpop.permute.xlu0 %1789  ;;  %v8047_v50 = vsel %vm1799_vm10, 0, %v8037_v46 }
 0x292   :  { %v8041_v31 = vsel %vm1799_vm10, %v8037_v46, %v1790_v49 }
 0x293   :  { %1847 = vrot.lane.b32.xlu1 %v8041_v31, %s7265_s11 }
 0x297   :  { %1845 = vrot.lane.b32.xlu1 %v8047_v50, %s7265_s11 }
 0x298   :  { %v1792_v51 = vpop.permute.xlu1 %1791 }
 0x299   :  { %v8052_v52 = vsel %vm1799_vm10, %v1790_v49, %v1792_v51  ;;  %v1794_v53 = vpop.permute.xlu0 %1793 }
 0x29a   :  { %1849 = vrot.lane.b32.xlu0 %v8052_v52, %s7265_s11  ;;  %v8057_v20 = vsel %vm1799_vm10, %v1792_v51, %v1794_v53 }
 0x29e   :  { %1851 = vrot.lane.b32.xlu0 %v8057_v20, %s7265_s11 }
 0x2a0   :  { %v1796_v55 = vpop.permute.xlu1 %1795 }
 0x2a1   :  { %v8062_v56 = vsel %vm1799_vm10, %v1794_v53, %v1796_v55  ;;  %v1798_v57 = vpop.permute.xlu0 %1797 }
 0x2a2   :  { %v8065_v11 = vsel %vm1799_vm10, %v1796_v55, %v1798_v57  ;;  %1853 = vrot.lane.b32.xlu1 %v8062_v56, %s7265_s11 }
 0x2a3   :  { %v8071_v12 = vsel %vm1814_vm11, %v8065_v11, 0 }
 0x2a4   :  { %1855 = vrot.lane.b32.xlu0 %v8071_v12, %s7265_s11 }
 0x2a6   :  { %2145 = vrot.lane.b32.xlu1 %v8041_v31, %s7267_s12 }
 0x2a8   :  { %2147 = vrot.lane.b32.xlu0 %v8052_v52, %s7267_s12 }
 0x2aa   :  { %2143 = vrot.lane.b32.xlu1 %v8047_v50, %s7267_s12 }
 0x2ac   :  { %2149 = vrot.lane.b32.xlu0 %v8057_v20, %s7267_s12 }
 0x2ae   :  { %2151 = vrot.lane.b32.xlu1 %v8062_v56, %s7267_s12 }
 0x2b0   :  { %2153 = vrot.lane.b32.xlu0 %v8071_v12, %s7267_s12 }
 0x2b2   :  { %2317 = vrot.lane.b32.xlu1 %v8041_v31, %s7268_s13 }
 0x2b4   :  { %2319 = vrot.lane.b32.xlu0 %v8052_v52, %s7268_s13 }
 0x2b6   :  { %2315 = vrot.lane.b32.xlu1 %v8047_v50, %s7268_s13 }
 0x2b8   :  { %2321 = vrot.lane.b32.xlu0 %v8057_v20, %s7268_s13 }
 0x2ba   :  { %2323 = vrot.lane.b32.xlu1 %v8062_v56, %s7268_s13 }
 0x2bc   :  { %2325 = vrot.lane.b32.xlu0 %v8071_v12, %s7268_s13 }
 0x2be   :  { %2489 = vrot.lane.b32.xlu1 %v8041_v31, %s7269_s14 }
 0x2c0   :  { %2491 = vrot.lane.b32.xlu0 %v8052_v52, %s7269_s14 }
 0x2c2   :  { %2487 = vrot.lane.b32.xlu1 %v8047_v50, %s7269_s14 }
 0x2c4   :  { %2493 = vrot.lane.b32.xlu0 %v8057_v20, %s7269_s14 }
 0x2c6   :  { %2495 = vrot.lane.b32.xlu1 %v8062_v56, %s7269_s14 }
 0x2c8   :  { %2497 = vrot.lane.b32.xlu0 %v8071_v12, %s7269_s14 }
 0x2ca   :  { %2661 = vrot.lane.b32.xlu1 %v8041_v31, %s7270_s15 }
 0x2cc   :  { %2663 = vrot.lane.b32.xlu0 %v8052_v52, %s7270_s15 }
 0x2ce   :  { %2659 = vrot.lane.b32.xlu1 %v8047_v50, %s7270_s15 }
 0x2d0   :  { %2665 = vrot.lane.b32.xlu0 %v8057_v20, %s7270_s15 }
 0x2d2   :  { %2667 = vrot.lane.b32.xlu1 %v8062_v56, %s7270_s15 }
 0x2d4   :  { %2669 = vrot.lane.b32.xlu0 %v8071_v12, %s7270_s15 }
 0x2d6   :  { %2833 = vrot.lane.b32.xlu1 %v8041_v31, %s7271_s16 }
 0x2d8   :  { %2835 = vrot.lane.b32.xlu0 %v8052_v52, %s7271_s16 }
 0x2da   :  { %2831 = vrot.lane.b32.xlu1 %v8047_v50, %s7271_s16 }
 0x2dc   :  { %2837 = vrot.lane.b32.xlu0 %v8057_v20, %s7271_s16 }
 0x2de   :  { %2839 = vrot.lane.b32.xlu1 %v8062_v56, %s7271_s16 }
 0x2eb   :  { %v4839_v26 = vpop.f32.mrb[12].mxu0 }
 0x2ec   :  { %v4946_v15 = vadd.f32 %v4839_v26, %v7945_v54  ;;  %v4841_v14 = vpop.f32.mrb[13].mxu0 }
 0x2ed   :  { %v4947_v58 = vadd.f32 %v4841_v14, %v7945_v54  ;;  %v4843_v18 = vpop.f32.mrb[14].mxu0 }
 0x2ee   :  { %v4958_v59 = vmax.f32 %v4946_v15, 0.0  ;;  %v4952_v60 = vadd.f32 %v4843_v18, %v7970_v38  ;;  %v4845_v17 = vpop.f32.mrb[15].mxu0 }
 0x2ef   :  { %v4959_v37 = vmax.f32 %v4947_v58, 0.0  ;;  %v4953_v63 = vadd.f32 %v4845_v17, %v7970_v38 }
 0x2f0   :  { %v4964_v0 = vmax.f32 %v4952_v60, 0.0  ;;  %v4970_v2 = vmul.f32 %v4958_v59, %v7976_v43 }
 0x2f1   :  { %v4965_v35 = vmax.f32 %v4953_v63, 0.0  ;;  %v4971_v4 = vmul.f32 %v4959_v37, %v7980_v48 }
 0x2f2   :  { %v4976_v3 = vmul.f32 %v4964_v0, %v7976_v43  ;;  %v8178_v0 = vld [vmem:[%s8833_s4 + $0x8] sm:$0xff]  }
 0x2f3   :  { %v4977_v5 = vmul.f32 %v4965_v35, %v7980_v48  ;;  %v4882_v6 = vpop.f32.mrb[16].mxu0 }
 0x2f4   :  { %v4982_v9 = vpack.c.bf16 %v4976_v3, %v4970_v2  ;;  %v4948_v10 = vadd.f32 %v4882_v6, %v7945_v54  ;;  %v4884_v13 = vpop.f32.mrb[17].mxu0 }
 0x2f5   :  { %v4983_v16 = vpack.c.bf16 %v4977_v5, %v4971_v4  ;;  %v4949_v19 = vadd.f32 %v4884_v13, %v7945_v54  ;;  %v4886_v21 = vpop.f32.mrb[18].mxu0 }
 0x2f6   :  { %v4960_v22 = vmax.f32 %v4948_v10, 0.0  ;;  %v4954_v47 = vadd.f32 %v4886_v21, %v7970_v38  ;;  %v4888_v23 = vpop.f32.mrb[19].mxu0  ;;  %4994 = vrot.lane.b32.xlu0 %v4982_v9, %s7274_s6 }
 0x2f7   :  { %v4961_v24 = vmax.f32 %v4949_v19, 0.0  ;;  %v4955_v25 = vadd.f32 %v4888_v23, %v7970_v38  ;;  %4996 = vrot.lane.b32.xlu1 %v4983_v16, %s7274_s6 }
 0x2f8   :  { %v4966_v27 = vmax.f32 %v4954_v47, 0.0  ;;  %v4972_v32 = vmul.f32 %v4960_v22, %v7998_v61 }
 0x2f9   :  { %v4967_v29 = vmax.f32 %v4955_v25, 0.0  ;;  %v4973_v36 = vmul.f32 %v4961_v24, %v8003_v1 }
 0x2fa   :  { %v4978_v34 = vmul.f32 %v4966_v27, %v7998_v61 }
 0x2fb   :  { %v4979_v8 = vmul.f32 %v4967_v29, %v8003_v1  ;;  %v4925_v39 = vpop.f32.mrb[20].mxu0  ;;  %2841 = vrot.lane.b32.xlu1 %v8071_v12, %s7271_s16 }
 0x2fc   :  { %v4984_v62 = vpack.c.bf16 %v4978_v34, %v4972_v32  ;;  %v4950_v40 = vadd.f32 %v4925_v39, %v7945_v54  ;;  %v4927_v41 = vpop.f32.mrb[21].mxu0 }
 0x2fd   :  { %v4985_v42 = vpack.c.bf16 %v4979_v8, %v4973_v36  ;;  %v4951_v44 = vadd.f32 %v4927_v41, %v7945_v54  ;;  %v4929_v45 = vpop.f32.mrb[22].mxu0 }
 0x2fe   :  { %v4962_v33 = vmax.f32 %v4950_v40, 0.0  ;;  %v4956_v49 = vadd.f32 %v4929_v45, %v7970_v38  ;;  %v4931_v51 = vpop.f32.mrb[23].mxu0  ;;  %4998 = vrot.lane.b32.xlu0 %v4984_v62, %s7274_s6 }
 0x2ff   :  { %v4963_v53 = vmax.f32 %v4951_v44, 0.0  ;;  %v4957_v55 = vadd.f32 %v4931_v51, %v7970_v38  ;;  %v8277_v51 = vld [vmem:[%s8833_s4 + $0x18] sm:$0xff]  }
 0x300   :  { %v4968_v57 = vmax.f32 %v4956_v49, 0.0  ;;  %v4974_v15 = vmul.f32 %v4962_v33, %v8020_v30 }
 0x301   :  { %v4969_v26 = vmax.f32 %v4957_v55, 0.0  ;;  %v4975_v54 = vmul.f32 %v4963_v53, %v8025_v28 }
 0x302   :  { %v4980_v14 = vmul.f32 %v4968_v57, %v8020_v30  ;;  %3005 = vrot.lane.b32.xlu0 %v8041_v31, %s7272_s17 }
 0x303   :  { %v4981_v58 = vmul.f32 %v4969_v26, %v8025_v28 }
 0x304   :  { %v4986_v18 = vpack.c.bf16 %v4980_v14, %v4974_v15 }
 0x305   :  { %v4987_v59 = vpack.c.bf16 %v4981_v58, %v4975_v54  ;;  %v1848_v60 = vpop.permute.xlu1 %1847 }
 0x306   :  { %5000 = vrot.lane.b32.xlu0 %v4985_v42, %s7274_s6  ;;  %5002 = vrot.lane.b32.xlu1 %v4986_v18, %s7274_s6 }
 0x309   :  { %v1846_v38 = vpop.permute.xlu1 %1845 }
 0x30a   :  { %3003 = vrot.lane.b32.xlu0 %v8047_v50, %s7272_s17  ;;  %3007 = vrot.lane.b32.xlu1 %v8052_v52, %s7272_s17  ;;  %v1857_v63 = vsel %vm90_vm0, %v1846_v38, %v1848_v60 }
 0x30c   :  { %v1850_v17 = vpop.permute.xlu0 %1849 }
 0x30d   :  { %v1858_v37 = vsel %vm90_vm0, %v1848_v60, %v1850_v17 }
 0x30e   :  { %3009 = vrot.lane.b32.xlu0 %v8057_v20, %s7272_s17  ;;  %5004 = vrot.lane.b32.xlu1 %v4987_v59, %s7274_s6 }
 0x30f   :  { %1872 = vmatprep.subr.bf16.mxu1 %v1858_v37 }
 0x310   :  { %1873 = vmatpush1.bf16.msra.mxu1 %v1857_v63  ;;  %v1852_v35 = vpop.permute.xlu0 %1851 }
 0x311   :  { %v1859_v5 = vsel %vm90_vm0, %v1850_v17, %v1852_v35 }
 0x312   :  { %3013 = vrot.lane.b32.xlu0 %v8071_v12, %s7272_s17  ;;  %3011 = vrot.lane.b32.xlu1 %v8062_v56, %s7272_s17 }
 0x313   :  { %6675 = vmatmul.mubr.msk.bf16.vlgmr.msra.gmra.mrb[0].mxu1 %vm1868_vm12, %v8178_v0 }
 0x314   :  { %v1854_v2 = vpop.permute.xlu1 %1853  ;;  %1947 = vmatprep.mubr.bf16.mxu1 %v7266_v7 }
 0x315   :  { %v1860_v3 = vsel %vm90_vm0, %v1852_v35, %v1854_v2  ;;  %v8324_v35 = vld [vmem:[%s8833_s4 + $0x20] sm:$0xff]  }
 0x316   :  { %3179 = vrot.lane.b32.xlu0 %v8052_v52, %s7273_s18  ;;  %v1856_v4 = vpop.permute.xlu0 %1855  ;;  %3177 = vrot.lane.b32.xlu1 %v8041_v31, %s7273_s18 }
 0x317   :  { %1915 = vmatprep.subr.bf16.mxu1 %v1860_v3  ;;  %v1861_v10 = vsel %vm90_vm0, %v1854_v2, %v1856_v4 }
 0x318   :  { %1916 = vmatpush1.bf16.msra.mxu1 %v1859_v5  ;;  %v2146_v6 = vpop.permute.xlu1 %2145 }
 0x319   :  { %1958 = vmatprep.subr.bf16.mxu1 %v1856_v4 }
 0x31a   :  { %3181 = vrot.lane.b32.xlu0 %v8057_v20, %s7273_s18  ;;  %v2148_v9 = vpop.permute.xlu0 %2147  ;;  %3175 = vrot.lane.b32.xlu1 %v8047_v50, %s7273_s18 }
 0x31b   :  { %6676 = vmatmul.mubr.msk.bf16.vlgmr.msra.gmra.mrb[4].mxu1 %vm1868_vm12, %v8178_v0  ;;  %v2156_v24 = vsel %vm420_vm3, %v2146_v6, %v2148_v9 }
 0x31c   :  { %1959 = vmatpush1.bf16.msra.mxu1 %v1861_v10  ;;  %v2144_v13 = vpop.permute.xlu1 %2143  ;;  %1990 = vmatprep.mubr.bf16.mxu1 %v7266_v7 }
 0x31d   :  { %2009 = vmatprep.subr.bf16.mxu1 %v8041_v31  ;;  %v2155_v27 = vsel %vm420_vm3, %v2144_v13, %v2146_v6 }
 0x31e   :  { %3185 = vrot.lane.b32.xlu0 %v8071_v12, %s7273_s18  ;;  %v2150_v16 = vpop.permute.xlu0 %2149  ;;  %3183 = vrot.lane.b32.xlu1 %v8062_v56, %s7273_s18  ;;  %v8221_v12 = vld [vmem:[%s8833_s4] sm:$0xff]  }
 0x31f   :  { %v2157_v36 = vsel %vm420_vm3, %v2148_v9, %v2150_v16 }
 0x320   :  { %v2152_v19 = vpop.permute.xlu1 %2151 }
 0x322   :  { %v2154_v21 = vpop.permute.xlu0 %2153 }
 0x323   :  { %6677 = vmatmul.mubr.msk.bf16.vlgmr.msra.gmra.mrb[8].mxu1 %vm1868_vm12, %v8178_v0  ;;  %v2159_v62 = vsel %vm420_vm3, %v2152_v19, %v2154_v21 }
 0x324   :  { %6680 = vmatpush1.bf16.msk.msra.mxu1 %vm8207_vm13, %v8037_v46  ;;  %v2318_v31 = vpop.permute.xlu1 %2317  ;;  %2041 = vmatprep.mubr.bf16.mxu1 %v7266_v7 }
 0x325   :  { %2052 = vmatprep.subr.bf16.mxu1 %v8057_v20 }
 0x326   :  { %v2320_v22 = vpop.permute.xlu0 %2319 }
 0x327   :  { %v2328_v41 = vsel %vm605_vm4, %v2318_v31, %v2320_v22 }
 0x328   :  { %v2316_v47 = vpop.permute.xlu1 %2315 }
 0x329   :  { %v2327_v45 = vsel %vm605_vm4, %v2316_v47, %v2318_v31 }
 0x32a   :  { %v2322_v46 = vpop.permute.xlu0 %2321 }
 0x32b   :  { %6681 = vmatmul.mubr.msk.bf16.vlgmr.msra.gmra.mrb[0].mxu1 %vm1868_vm12, %v8221_v12  ;;  %v2329_v57 = vsel %vm605_vm4, %v2320_v22, %v2322_v46 }
 0x32c   :  { %2053 = vmatpush1.bf16.msra.mxu1 %v8052_v52  ;;  %2084 = vmatprep.mubr.bf16.mxu1 %v7266_v7  ;;  %v2324_v23 = vpop.permute.xlu1 %2323 }
 0x32d   :  { %6683 = vmatprep.subr.msk.bf16.mxu1 %vm1814_vm11, %v8065_v11  ;;  %v2158_v11 = vsel %vm420_vm3, %v2150_v16, %v2152_v19  ;;  %v2330_v49 = vsel %vm605_vm4, %v2322_v46, %v2324_v23 }
 0x32e   :  { %v2326_v20 = vpop.permute.xlu0 %2325 }
 0x32f   :  { %v2331_v14 = vsel %vm605_vm4, %v2324_v23, %v2326_v20 }
 0x330   :  { %v2490_v25 = vpop.permute.xlu1 %2489 }
 0x332   :  { %v8234_v52 = vpop.permute.xlu0 %2491 }
 0x333   :  { %6682 = vmatmul.mubr.msk.bf16.vlgmr.msra.gmra.mrb[4].mxu1 %vm1868_vm12, %v8221_v12  ;;  %v2500_v58 = vsel %vm790_vm5, %v2490_v25, %v8234_v52 }
 0x334   :  { %2096 = vmatpush1.bf16.msra.mxu1 %v8062_v56  ;;  %2127 = vmatprep.mubr.bf16.mxu1 %v7266_v7  ;;  %v2488_v29 = vpop.permute.xlu1 %2487  ;;  %v8244_v56 = vld [vmem:[%s8833_s4 + $0x10] sm:$0xff]  }
 0x335   :  { %2169 = vmatprep.subr.bf16.mxu1 %v2156_v24  ;;  %v2499_v17 = vsel %vm790_vm5, %v2488_v29, %v2490_v25  ;;  %v8391_v24 = vld [vmem:[%s8833_s4 + $0x28] sm:$0xff]  }
 0x336   :  { %v2494_v32 = vpop.permute.xlu0 %2493 }
 0x337   :  { %v2501_v4 = vsel %vm790_vm5, %v8234_v52, %v2494_v32 }
 0x338   :  { %v8246_v34 = vpop.permute.xlu1 %2495 }
 0x339   :  { %v2502_v37 = vsel %vm790_vm5, %v2494_v32, %v8246_v34  ;;  %v8445_v32 = vld [vmem:[%s8833_s4 + $0x30] sm:$0xff]  }
 0x33a   :  { %v8252_v8 = vpop.permute.xlu0 %2497 }
 0x33b   :  { %6684 = vmatmul.mubr.msk.bf16.vlgmr.msra.gmra.mrb[8].mxu1 %vm1868_vm12, %v8221_v12  ;;  %v2503_v19 = vsel %vm790_vm5, %v8246_v34, %v8252_v8 }
 0x33c   :  { %2170 = vmatpush1.bf16.msra.mxu1 %v2155_v27  ;;  %2201 = vmatprep.mubr.bf16.mxu1 %v7266_v7  ;;  %v8254_v39 = vpop.permute.xlu1 %2661 }
 0x33d   :  { %2212 = vmatprep.subr.bf16.mxu1 %v2158_v11 }
 0x33e   :  { %v8259_v40 = vpop.permute.xlu0 %2663 }
 0x340   :  { %v8263_v42 = vpop.permute.xlu1 %2659 }
 0x341   :  { %v2671_v23 = vsel %vm975_vm6, %v8263_v42, %v8254_v39 }
 0x342   :  { %v8265_v44 = vpop.permute.xlu0 %2665 }
 0x343   :  { %6686 = vmatmul.mubr.msk.bf16.vlgmr.msra.gmra.mrb[0].mxu1 %vm1868_vm12, %v8244_v56  ;;  %v2673_v25 = vsel %vm975_vm6, %v8259_v40, %v8265_v44 }
 0x344   :  { %2213 = vmatpush1.bf16.msra.mxu1 %v2157_v36  ;;  %2244 = vmatprep.mubr.bf16.mxu1 %v7266_v7  ;;  %v8268_v33 = vpop.permute.xlu1 %2667 }
 0x345   :  { %2255 = vmatprep.subr.bf16.mxu1 %v2154_v21  ;;  %v2672_v21 = vsel %vm975_vm6, %v8254_v39, %v8259_v40 }
 0x346   :  { %v8279_v53 = vpop.permute.xlu0 %2669 }
 0x347   :  { %v2675_v52 = vsel %vm975_vm6, %v8268_v33, %v8279_v53 }
 0x348   :  { %v8281_v55 = vpop.permute.xlu1 %2833 }
 0x34a   :  { %v8287_v26 = vpop.permute.xlu0 %2835 }
 0x34b   :  { %6687 = vmatmul.mubr.msk.bf16.vlgmr.msra.gmra.mrb[4].mxu1 %vm1868_vm12, %v8244_v56  ;;  %v2844_v27 = vsel %vm1160_vm7, %v8281_v55, %v8287_v26 }
 0x34c   :  { %2256 = vmatpush1.bf16.msra.mxu1 %v2159_v62  ;;  %2287 = vmatprep.mubr.bf16.mxu1 %v7266_v7  ;;  %v8289_v15 = vpop.permute.xlu1 %2831 }
 0x34d   :  { %2341 = vmatprep.subr.bf16.mxu1 %v2328_v41  ;;  %v2843_v29 = vsel %vm1160_vm7, %v8289_v15, %v8281_v55 }
 0x34e   :  { %v8294_v54 = vpop.permute.xlu0 %2837 }
 0x34f   :  { %v2845_v34 = vsel %vm1160_vm7, %v8287_v26, %v8294_v54 }
 0x350   :  { %v8299_v18 = vpop.permute.xlu1 %2839 }
 0x351   :  { %v2846_v11 = vsel %vm1160_vm7, %v8294_v54, %v8299_v18 }
 0x353   :  { %6688 = vmatmul.mubr.msk.bf16.vlgmr.msra.gmra.mrb[8].mxu1 %vm1868_vm12, %v8244_v56 }
 0x354   :  { %2342 = vmatpush1.bf16.msra.mxu1 %v2327_v45  ;;  %2373 = vmatprep.mubr.bf16.mxu1 %v7266_v7 }
 0x355   :  { %2384 = vmatprep.subr.bf16.mxu1 %v2330_v49 }
 0x35b   :  { %6690 = vmatmul.mubr.msk.bf16.vlgmr.msra.gmra.mrb[0].mxu1 %vm1868_vm12, %v8277_v51 }
 0x35c   :  { %2385 = vmatpush1.bf16.msra.mxu1 %v2329_v57  ;;  %2416 = vmatprep.mubr.bf16.mxu1 %v7266_v7 }
 0x35d   :  { %2427 = vmatprep.subr.bf16.mxu1 %v2326_v20  ;;  %v2674_v20 = vsel %vm975_vm6, %v8265_v44, %v8268_v33  ;;  %v8496_v44 = vld [vmem:[%s8833_s4 + $0x38] sm:$0xff]  }
 0x363   :  { %6691 = vmatmul.mubr.msk.bf16.vlgmr.msra.gmra.mrb[4].mxu1 %vm1868_vm12, %v8277_v51 }
 0x364   :  { %2428 = vmatpush1.bf16.msra.mxu1 %v2331_v14  ;;  %2459 = vmatprep.mubr.bf16.mxu1 %v7266_v7 }
 0x365   :  { %2513 = vmatprep.subr.bf16.mxu1 %v2500_v58 }
 0x368   :  { %v8301_v59 = vpop.permute.xlu0 %4994 }
 0x369   :  { %v4997_v60 = vpop.permute.xlu1 %4996  ;;  %v8317_v63 = vsel %vm1799_vm10, 0, %v8301_v59 }
 0x36a   :  { %v8305_v38 = vsel %vm1799_vm10, %v8301_v59, %v4997_v60 }
 0x36b   :  { %6692 = vmatmul.mubr.msk.bf16.vlgmr.msra.gmra.mrb[8].mxu1 %vm1868_vm12, %v8277_v51  ;;  %5025 = vrot.lane.b32.xlu1 %v8305_v38, %s7265_s11 }
 0x36c   :  { %2514 = vmatpush1.bf16.msra.mxu1 %v2499_v17  ;;  %2545 = vmatprep.mubr.bf16.mxu1 %v7266_v7 }
 0x36d   :  { %2556 = vmatprep.subr.bf16.mxu1 %v2502_v37  ;;  %v8335_v5 = vpop.permute.xlu1 %2841 }
 0x36e   :  { %v2847_v36 = vsel %vm1160_vm7, %v8299_v18, %v8335_v5  ;;  %v1836_v18 = vld [vmem:[%s8834_s5] sm:$0xff] }
 0x36f   :  { %5023 = vrot.lane.b32.xlu1 %v8317_v63, %s7265_s11 }
 0x370   :  { %v4999_v2 = vpop.permute.xlu0 %4998 }
 0x371   :  { %v8327_v3 = vsel %vm1799_vm10, %v4997_v60, %v4999_v2  ;;  %v8543_v60 = vld [vmem:[%s8833_s4 + $0x40] sm:$0xff]  }
 0x372   :  { %5027 = vrot.lane.b32.xlu0 %v8327_v3, %s7265_s11 }
 0x373   :  { %6694 = vmatmul.mubr.msk.bf16.vlgmr.msra.gmra.mrb[0].mxu1 %vm1868_vm12, %v8324_v35 }
 0x374   :  { %2557 = vmatpush1.bf16.msra.mxu1 %v2501_v4  ;;  %v8337_v6 = vpop.permute.xlu0 %3005  ;;  %2588 = vmatprep.mubr.bf16.mxu1 %v7266_v7 }
 0x375   :  { %2599 = vmatprep.subr.bf16.mxu1 %v8252_v8 }
 0x378   :  { %v5001_v9 = vpop.permute.xlu0 %5000  ;;  %v5003_v10 = vpop.permute.xlu1 %5002 }
 0x379   :  { %v8342_v13 = vsel %vm1799_vm10, %v4999_v2, %v5001_v9  ;;  %v8345_v16 = vsel %vm1799_vm10, %v5001_v9, %v5003_v10 }
 0x37a   :  { %5029 = vrot.lane.b32.xlu0 %v8342_v13, %s7265_s11  ;;  %5031 = vrot.lane.b32.xlu1 %v8345_v16, %s7265_s11 }
 0x37b   :  { %6695 = vmatmul.mubr.msk.bf16.vlgmr.msra.gmra.mrb[4].mxu1 %vm1868_vm12, %v8324_v35 }
 0x37c   :  { %2600 = vmatpush1.bf16.msra.mxu1 %v2503_v19  ;;  %v8359_v31 = vpop.permute.xlu1 %3007  ;;  %2631 = vmatprep.mubr.bf16.mxu1 %v7266_v7  ;;  %v3004_v39 = vpop.permute.xlu0 %3003 }
 0x37d   :  { %2685 = vmatprep.subr.bf16.mxu1 %v2672_v21  ;;  %v3016_v8 = vsel %vm1345_vm8, %v8337_v6, %v8359_v31  ;;  %v3015_v40 = vsel %vm1345_vm8, %v3004_v39, %v8337_v6 }
 0x37e   :  { %5306 = vrot.lane.b32.xlu1 %v8305_v38, %s7267_s12 }
 0x380   :  { %v5005_v22 = vpop.permute.xlu1 %5004  ;;  %v3010_v41 = vpop.permute.xlu0 %3009 }
 0x381   :  { %v8365_v47 = vsel %vm1799_vm10, %v5003_v10, %v5005_v22  ;;  %v3017_v45 = vsel %vm1345_vm8, %v8359_v31, %v3010_v41 }
 0x382   :  { %v8369_v46 = vsel %vm1814_vm11, %v8365_v47, 0  ;;  %5304 = vrot.lane.b32.xlu1 %v8317_v63, %s7267_s12 }
 0x383   :  { %6696 = vmatmul.mubr.msk.bf16.vlgmr.msra.gmra.mrb[8].mxu1 %vm1868_vm12, %v8324_v35  ;;  %5033 = vrot.lane.b32.xlu0 %v8369_v46, %s7265_s11 }
 0x384   :  { %2686 = vmatpush1.bf16.msra.mxu1 %v2671_v23  ;;  %2717 = vmatprep.mubr.bf16.mxu1 %v7266_v7  ;;  %v3012_v62 = vpop.permute.xlu1 %3011  ;;  %v3014_v33 = vpop.permute.xlu0 %3013 }
 0x385   :  { %2728 = vmatprep.subr.bf16.mxu1 %v2674_v20  ;;  %v3018_v42 = vsel %vm1345_vm8, %v3010_v41, %v3012_v62  ;;  %v3019_v55 = vsel %vm1345_vm8, %v3012_v62, %v3014_v33 }
 0x386   :  { %5312 = vrot.lane.b32.xlu1 %v8345_v16, %s7267_s12 }
 0x387   :  { %5308 = vrot.lane.b32.xlu0 %v8327_v3, %s7267_s12 }
 0x388   :  { %v3178_v49 = vpop.permute.xlu1 %3177 }
 0x38a   :  { %5470 = vrot.lane.b32.xlu1 %v8305_v38, %s7268_s13 }
 0x38b   :  { %6698 = vmatmul.mubr.msk.bf16.vlgmr.msra.gmra.mrb[0].mxu1 %vm1868_vm12, %v8391_v24  ;;  %5310 = vrot.lane.b32.xlu0 %v8342_v13, %s7267_s12 }
 0x38c   :  { %2729 = vmatpush1.bf16.msra.mxu1 %v2673_v25  ;;  %2760 = vmatprep.mubr.bf16.mxu1 %v7266_v7  ;;  %v3176_v57 = vpop.permute.xlu1 %3175 }
 0x38d   :  { %2771 = vmatprep.subr.bf16.mxu1 %v8279_v53  ;;  %v3180_v53 = vpop.permute.xlu0 %3179  ;;  %v3187_v54 = vsel %vm1530_vm9, %v3176_v57, %v3178_v49 }
 0x38e   :  { %5468 = vrot.lane.b32.xlu1 %v8317_v63, %s7268_s13  ;;  %v3188_v26 = vsel %vm1530_vm9, %v3178_v49, %v3180_v53 }
 0x38f   :  { %5314 = vrot.lane.b32.xlu0 %v8369_v46, %s7267_s12 }
 0x390   :  { %v3184_v15 = vpop.permute.xlu1 %3183 }
 0x391   :  { %v3182_v14 = vpop.permute.xlu0 %3181 }
 0x392   :  { %5476 = vrot.lane.b32.xlu1 %v8345_v16, %s7268_s13  ;;  %v3190_v58 = vsel %vm1530_vm9, %v3182_v14, %v3184_v15  ;;  %v3189_v17 = vsel %vm1530_vm9, %v3180_v53, %v3182_v14 }
 0x393   :  { %6699 = vmatmul.mubr.msk.bf16.vlgmr.msra.gmra.mrb[4].mxu1 %vm1868_vm12, %v8391_v24  ;;  %5472 = vrot.lane.b32.xlu0 %v8327_v3, %s7268_s13 }
 0x394   :  { %2772 = vmatpush1.bf16.msra.mxu1 %v2675_v52  ;;  %2803 = vmatprep.mubr.bf16.mxu1 %v7266_v7 }
 0x395   :  { %2857 = vmatprep.subr.bf16.mxu1 %v2844_v27  ;;  %v3186_v37 = vpop.permute.xlu0 %3185 }
 0x396   :  { %5634 = vrot.lane.b32.xlu1 %v8305_v38, %s7269_s14  ;;  %v3191_v2 = vsel %vm1530_vm9, %v3184_v15, %v3186_v37 }
 0x397   :  { %5474 = vrot.lane.b32.xlu0 %v8342_v13, %s7268_s13 }
 0x39a   :  { %5632 = vrot.lane.b32.xlu1 %v8317_v63, %s7269_s14 }
 0x39b   :  { %6700 = vmatmul.mubr.msk.bf16.vlgmr.msra.gmra.mrb[8].mxu1 %vm1868_vm12, %v8391_v24  ;;  %5478 = vrot.lane.b32.xlu0 %v8369_v46, %s7268_s13 }
 0x39c   :  { %2858 = vmatpush1.bf16.msra.mxu1 %v2843_v29  ;;  %2889 = vmatprep.mubr.bf16.mxu1 %v7266_v7 }
 0x39d   :  { %2900 = vmatprep.subr.bf16.mxu1 %v2846_v11 }
 0x39e   :  { %5640 = vrot.lane.b32.xlu1 %v8345_v16, %s7269_s14 }
 0x39f   :  { %5636 = vrot.lane.b32.xlu0 %v8327_v3, %s7269_s14 }
 0x3a2   :  { %5798 = vrot.lane.b32.xlu1 %v8305_v38, %s7270_s15 }
 0x3a3   :  { %6702 = vmatmul.mubr.msk.bf16.vlgmr.msra.gmra.mrb[0].mxu1 %vm1868_vm12, %v8445_v32  ;;  %5638 = vrot.lane.b32.xlu0 %v8342_v13, %s7269_s14 }
 0x3a4   :  { %2901 = vmatpush1.bf16.msra.mxu1 %v2845_v34  ;;  %2932 = vmatprep.mubr.bf16.mxu1 %v7266_v7 }
 0x3a5   :  { %2943 = vmatprep.subr.bf16.mxu1 %v8335_v5 }
 0x3a6   :  { %5796 = vrot.lane.b32.xlu1 %v8317_v63, %s7270_s15 }
 0x3a7   :  { %5642 = vrot.lane.b32.xlu0 %v8369_v46, %s7269_s14 }
 0x3aa   :  { %5804 = vrot.lane.b32.xlu1 %v8345_v16, %s7270_s15 }
 0x3ab   :  { %6703 = vmatmul.mubr.msk.bf16.vlgmr.msra.gmra.mrb[4].mxu1 %vm1868_vm12, %v8445_v32  ;;  %5800 = vrot.lane.b32.xlu0 %v8327_v3, %s7270_s15 }
 0x3ac   :  { %2944 = vmatpush1.bf16.msra.mxu1 %v2847_v36  ;;  %2975 = vmatprep.mubr.bf16.mxu1 %v7266_v7 }
 0x3ad   :  { %3029 = vmatprep.subr.bf16.mxu1 %v3016_v8 }
 0x3ae   :  { %5962 = vrot.lane.b32.xlu1 %v8305_v38, %s7271_s16 }
 0x3af   :  { %5802 = vrot.lane.b32.xlu0 %v8342_v13, %s7270_s15 }
 0x3b2   :  { %5960 = vrot.lane.b32.xlu1 %v8317_v63, %s7271_s16 }
 0x3b3   :  { %6704 = vmatmul.mubr.msk.bf16.vlgmr.msra.gmra.mrb[8].mxu1 %vm1868_vm12, %v8445_v32  ;;  %5806 = vrot.lane.b32.xlu0 %v8369_v46, %s7270_s15 }
 0x3b4   :  { %3030 = vmatpush1.bf16.msra.mxu1 %v3015_v40  ;;  %3061 = vmatprep.mubr.bf16.mxu1 %v7266_v7 }
 0x3b5   :  { %3072 = vmatprep.subr.bf16.mxu1 %v3018_v42 }
 0x3b6   :  { %5968 = vrot.lane.b32.xlu1 %v8345_v16, %s7271_s16 }
 0x3b7   :  { %5964 = vrot.lane.b32.xlu0 %v8327_v3, %s7271_s16 }
 0x3ba   :  { %6126 = vrot.lane.b32.xlu1 %v8305_v38, %s7272_s17 }
 0x3bb   :  { %6706 = vmatmul.mubr.msk.bf16.vlgmr.msra.gmra.mrb[0].mxu1 %vm1868_vm12, %v8496_v44  ;;  %5966 = vrot.lane.b32.xlu0 %v8342_v13, %s7271_s16 }
 0x3bc   :  { %3073 = vmatpush1.bf16.msra.mxu1 %v3017_v45  ;;  %3104 = vmatprep.mubr.bf16.mxu1 %v7266_v7 }
 0x3bd   :  { %3115 = vmatprep.subr.bf16.mxu1 %v3014_v33 }
 0x3be   :  { %6124 = vrot.lane.b32.xlu1 %v8317_v63, %s7272_s17 }
 0x3bf   :  { %5970 = vrot.lane.b32.xlu0 %v8369_v46, %s7271_s16 }
 0x3c2   :  { %6132 = vrot.lane.b32.xlu1 %v8345_v16, %s7272_s17 }
 0x3c3   :  { %6707 = vmatmul.mubr.msk.bf16.vlgmr.msra.gmra.mrb[4].mxu1 %vm1868_vm12, %v8496_v44  ;;  %6128 = vrot.lane.b32.xlu0 %v8327_v3, %s7272_s17 }
 0x3c4   :  { %3116 = vmatpush1.bf16.msra.mxu1 %v3019_v55  ;;  %3147 = vmatprep.mubr.bf16.mxu1 %v7266_v7 }
 0x3c5   :  { %3201 = vmatprep.subr.bf16.mxu1 %v3188_v26 }
 0x3c6   :  { %6290 = vrot.lane.b32.xlu1 %v8305_v38, %s7273_s18 }
 0x3c7   :  { %6130 = vrot.lane.b32.xlu0 %v8342_v13, %s7272_s17 }
 0x3ca   :  { %6288 = vrot.lane.b32.xlu1 %v8317_v63, %s7273_s18  ;;  %v1837_v63 = vld [vmem:[%s8834_s5 + $0x8] sm:$0xff] }
 0x3cb   :  { %6708 = vmatmul.mubr.msk.bf16.vlgmr.msra.gmra.mrb[8].mxu1 %vm1868_vm12, %v8496_v44  ;;  %6134 = vrot.lane.b32.xlu0 %v8369_v46, %s7272_s17 }
 0x3cc   :  { %3202 = vmatpush1.bf16.msra.mxu1 %v3187_v54  ;;  %3233 = vmatprep.mubr.bf16.mxu1 %v7266_v7 }
 0x3cd   :  { %3244 = vmatprep.subr.bf16.mxu1 %v3190_v58 }
 0x3ce   :  { %6296 = vrot.lane.b32.xlu1 %v8345_v16, %s7273_s18 }
 0x3cf   :  { %6292 = vrot.lane.b32.xlu0 %v8327_v3, %s7273_s18 }
 0x3d2   :  { %3344 = vperm.xlu1 %7203, %v1836_v18  }
 0x3d3   :  { %6710 = vmatmul.mubr.msk.bf16.vlgmr.msra.gmra.mrb[0].mxu1 %vm1868_vm12, %v8543_v60  ;;  %6294 = vrot.lane.b32.xlu0 %v8342_v13, %s7273_s18 }
 0x3d4   :  { %3245 = vmatpush1.bf16.msra.mxu1 %v3189_v17  ;;  %3276 = vmatprep.mubr.bf16.mxu1 %v7266_v7 }
 0x3d5   :  { %3287 = vmatprep.subr.bf16.mxu1 %v3186_v37 }
 0x3d7   :  { %6298 = vrot.lane.b32.xlu0 %v8369_v46, %s7273_s18 }
 0x3db   :  { %6711 = vmatmul.mubr.msk.bf16.vlgmr.msra.gmra.mrb[4].mxu1 %vm1868_vm12, %v8543_v60  ;;  %3349 = vperm.xlu0 %7204, %v1837_v63  }
 0x3dc   :  { %3288 = vmatpush1.bf16.msra.mxu1 %v3191_v2  ;;  %3319 = vmatprep.mubr.bf16.mxu1 %v7266_v7 }
 0x3dd   :  { %v5026_v4 = vpop.permute.xlu1 %5025 }
 0x3e1   :  { %v5024_v5 = vpop.permute.xlu1 %5023 }
 0x3e2   :  { %v5035_v10 = vsel %vm90_vm0, %v5024_v5, %v5026_v4 }
 0x3e3   :  { %6712 = vmatmul.mubr.msk.bf16.vlgmr.msra.gmra.mrb[8].mxu1 %vm1868_vm12, %v8543_v60 }
 0x3e4   :  { %v5028_v6 = vpop.permute.xlu0 %5027  ;;  %5078 = vmatprep.mubr.bf16.mxu1 %v7266_v7 }
 0x3e5   :  { %v5036_v9 = vsel %vm90_vm0, %v5026_v4, %v5028_v6 }
 0x3e6   :  { %5046 = vmatprep.subr.bf16.mxu1 %v5036_v9 }
 0x3e7   :  { %5047 = vmatpush1.bf16.msra.mxu1 %v5035_v10 }
 0x3eb   :  { %6773 = vmatmul.mubr.msk.bf16.vlgmr.msra.gmra.mrb[12].mxu1 %vm1868_vm12, %v8178_v0 }
 0x3ec   :  { %v5030_v19 = vpop.permute.xlu0 %5029  ;;  %v5032_v21 = vpop.permute.xlu1 %5031  ;;  %5121 = vmatprep.mubr.bf16.mxu1 %v7266_v7 }
 0x3ed   :  { %v5037_v31 = vsel %vm90_vm0, %v5028_v6, %v5030_v19  ;;  %v5038_v22 = vsel %vm90_vm0, %v5030_v19, %v5032_v21 }
 0x3ee   :  { %5089 = vmatprep.subr.bf16.mxu1 %v5038_v22 }
 0x3ef   :  { %5090 = vmatpush1.bf16.msra.mxu1 %v5037_v31 }
 0x3f3   :  { %6774 = vmatmul.mubr.msk.bf16.vlgmr.msra.gmra.mrb[16].mxu1 %vm1868_vm12, %v8178_v0 }
 0x3f4   :  { %5164 = vmatprep.mubr.bf16.mxu1 %v7266_v7 }
 0x3f5   :  { %v5034_v46 = vpop.permute.xlu0 %5033 }
 0x3f6   :  { %v5039_v23 = vsel %vm90_vm0, %v5032_v21, %v5034_v46  ;;  %5132 = vmatprep.subr.bf16.mxu1 %v5034_v46 }
 0x3f7   :  { %5133 = vmatpush1.bf16.msra.mxu1 %v5039_v23 }
 0x3f8   :  { %5175 = vmatprep.subr.bf16.mxu1 %v8305_v38  ;;  %v5307_v38 = vpop.permute.xlu1 %5306 }
 0x3fb   :  { %6775 = vmatmul.mubr.msk.bf16.vlgmr.msra.gmra.mrb[20].mxu1 %vm1868_vm12, %v8178_v0  ;;  %v5309_v0 = vpop.permute.xlu0 %5308 }
 0x3fc   :  { %6777 = vmatpush1.bf16.msk.msra.mxu1 %vm8207_vm13, %v8301_v59  ;;  %5207 = vmatprep.mubr.bf16.mxu1 %v7266_v7  ;;  %v5317_v50 = vsel %vm420_vm3, %v5307_v38, %v5309_v0  ;;  %v5305_v59 = vpop.permute.xlu1 %5304 }
 0x3fd   :  { %5218 = vmatprep.subr.bf16.mxu1 %v8342_v13 }
 0x3ff   :  { %v5311_v13 = vpop.permute.xlu0 %5310 }
 0x400   :  { %v5313_v20 = vpop.permute.xlu1 %5312 }
 0x403   :  { %6778 = vmatmul.mubr.msk.bf16.vlgmr.msra.gmra.mrb[12].mxu1 %vm1868_vm12, %v8221_v12  ;;  %v5315_v25 = vpop.permute.xlu0 %5314 }
 0x404   :  { %5219 = vmatpush1.bf16.msra.mxu1 %v8327_v3  ;;  %5250 = vmatprep.mubr.bf16.mxu1 %v7266_v7  ;;  %v5316_v3 = vsel %vm420_vm3, %v5305_v59, %v5307_v38  ;;  %v5471_v52 = vpop.permute.xlu1 %5470 }
 0x405   :  { %6780 = vmatprep.subr.msk.bf16.mxu1 %vm1814_vm11, %v8365_v47  ;;  %v5319_v47 = vsel %vm420_vm3, %v5311_v13, %v5313_v20 }
 0x407   :  { %v5473_v27 = vpop.permute.xlu0 %5472 }
 0x408   :  { %v5481_v29 = vsel %vm605_vm4, %v5471_v52, %v5473_v27  ;;  %v5469_v11 = vpop.permute.xlu1 %5468 }
 0x409   :  { %v5480_v36 = vsel %vm605_vm4, %v5469_v11, %v5471_v52 }
 0x40b   :  { %6779 = vmatmul.mubr.msk.bf16.vlgmr.msra.gmra.mrb[16].mxu1 %vm1868_vm12, %v8221_v12  ;;  %v5475_v34 = vpop.permute.xlu0 %5474 }
 0x40c   :  { %5262 = vmatpush1.bf16.msra.mxu1 %v8345_v16  ;;  %5293 = vmatprep.mubr.bf16.mxu1 %v7266_v7  ;;  %v5318_v16 = vsel %vm420_vm3, %v5309_v0, %v5311_v13  ;;  %v5477_v8 = vpop.permute.xlu1 %5476  ;;  %v5482_v62 = vsel %vm605_vm4, %v5473_v27, %v5475_v34 }
 0x40d   :  { %5327 = vmatprep.subr.bf16.mxu1 %v5317_v50  ;;  %v5483_v39 = vsel %vm605_vm4, %v5475_v34, %v5477_v8 }
 0x40f   :  { %v5479_v40 = vpop.permute.xlu0 %5478 }
 0x410   :  { %v5635_v41 = vpop.permute.xlu1 %5634 }
 0x413   :  { %6781 = vmatmul.mubr.msk.bf16.vlgmr.msra.gmra.mrb[20].mxu1 %vm1868_vm12, %v8221_v12  ;;  %v5320_v12 = vsel %vm420_vm3, %v5313_v20, %v5315_v25  ;;  %v5637_v42 = vpop.permute.xlu0 %5636 }
 0x414   :  { %5328 = vmatpush1.bf16.msra.mxu1 %v5316_v3  ;;  %5359 = vmatprep.mubr.bf16.mxu1 %v7266_v7  ;;  %v5645_v45 = vsel %vm790_vm5, %v5635_v41, %v5637_v42  ;;  %v5633_v33 = vpop.permute.xlu1 %5632 }
 0x415   :  { %5370 = vmatprep.subr.bf16.mxu1 %v5319_v47  ;;  %v5644_v53 = vsel %vm790_vm5, %v5633_v33, %v5635_v41 }
 0x417   :  { %v5639_v49 = vpop.permute.xlu0 %5638 }
 0x418   :  { %v5641_v55 = vpop.permute.xlu1 %5640  ;;  %v5646_v26 = vsel %vm790_vm5, %v5637_v42, %v5639_v49 }
 0x419   :  { %v5647_v57 = vsel %vm790_vm5, %v5639_v49, %v5641_v55 }
 0x41b   :  { %6782 = vmatmul.mubr.msk.bf16.vlgmr.msra.gmra.mrb[12].mxu1 %vm1868_vm12, %v8244_v56  ;;  %v5643_v15 = vpop.permute.xlu0 %5642 }
 0x41c   :  { %5371 = vmatpush1.bf16.msra.mxu1 %v5318_v16  ;;  %5402 = vmatprep.mubr.bf16.mxu1 %v7266_v7  ;;  %v5799_v14 = vpop.permute.xlu1 %5798 }
 0x41d   :  { %5413 = vmatprep.subr.bf16.mxu1 %v5315_v25 }
 0x41f   :  { %v5801_v54 = vpop.permute.xlu0 %5800 }
 0x420   :  { %v5809_v58 = vsel %vm975_vm6, %v5799_v14, %v5801_v54  ;;  %v5797_v18 = vpop.permute.xlu1 %5796 }
 0x421   :  { %v5808_v37 = vsel %vm975_vm6, %v5797_v18, %v5799_v14 }
 0x423   :  { %6783 = vmatmul.mubr.msk.bf16.vlgmr.msra.gmra.mrb[16].mxu1 %vm1868_vm12, %v8244_v56  ;;  %v5803_v17 = vpop.permute.xlu0 %5802 }
 0x424   :  { %5414 = vmatpush1.bf16.msra.mxu1 %v5320_v12  ;;  %5445 = vmatprep.mubr.bf16.mxu1 %v7266_v7  ;;  %v5805_v63 = vpop.permute.xlu1 %5804  ;;  %v5810_v4 = vsel %vm975_vm6, %v5801_v54, %v5803_v17  ;;  %v7235_v54 = vld [vmem:[%s8829_s0] sm:$0xff] }
 0x425   :  { %5491 = vmatprep.subr.bf16.mxu1 %v5481_v29  ;;  %v5811_v2 = vsel %vm975_vm6, %v5803_v17, %v5805_v63 }
 0x427   :  { %v5807_v5 = vpop.permute.xlu0 %5806 }
 0x428   :  { %v5963_v6 = vpop.permute.xlu1 %5962 }
 0x42b   :  { %6784 = vmatmul.mubr.msk.bf16.vlgmr.msra.gmra.mrb[20].mxu1 %vm1868_vm12, %v8244_v56  ;;  %v5484_v56 = vsel %vm605_vm4, %v5477_v8, %v5479_v40  ;;  %v5965_v9 = vpop.permute.xlu0 %5964 }
 0x42c   :  { %5492 = vmatpush1.bf16.msra.mxu1 %v5480_v36  ;;  %5523 = vmatprep.mubr.bf16.mxu1 %v7266_v7  ;;  %v5973_v10 = vsel %vm1160_vm7, %v5963_v6, %v5965_v9  ;;  %v5961_v19 = vpop.permute.xlu1 %5960 }
 0x42d   :  { %5534 = vmatprep.subr.bf16.mxu1 %v5483_v39  ;;  %v5972_v31 = vsel %vm1160_vm7, %v5961_v19, %v5963_v6 }
 0x42f   :  { %v5967_v21 = vpop.permute.xlu0 %5966 }
 0x430   :  { %v5969_v22 = vpop.permute.xlu1 %5968  ;;  %v5974_v23 = vsel %vm1160_vm7, %v5965_v9, %v5967_v21 }
 0x431   :  { %v5975_v46 = vsel %vm1160_vm7, %v5967_v21, %v5969_v22  ;;  %v7239_v21 = vld [vmem:[%s8829_s0 + $0x10] sm:$0xff] }
 0x433   :  { %6785 = vmatmul.mubr.msk.bf16.vlgmr.msra.gmra.mrb[12].mxu1 %vm1868_vm12, %v8277_v51  ;;  %v5971_v38 = vpop.permute.xlu0 %5970 }
 0x434   :  { %5535 = vmatpush1.bf16.msra.mxu1 %v5482_v62  ;;  %5566 = vmatprep.mubr.bf16.mxu1 %v7266_v7  ;;  %v6127_v0 = vpop.permute.xlu1 %6126 }
 0x435   :  { %5577 = vmatprep.subr.bf16.mxu1 %v5479_v40 }
 0x437   :  { %v6129_v50 = vpop.permute.xlu0 %6128 }
 0x438   :  { %v6137_v59 = vsel %vm1345_vm8, %v6127_v0, %v6129_v50  ;;  %v6125_v13 = vpop.permute.xlu1 %6124 }
 0x439   :  { %v6136_v20 = vsel %vm1345_vm8, %v6125_v13, %v6127_v0  ;;  %v6542_v0 = vunpack.c.h.bf16 %v7239_v21 }
 0x43b   :  { %6786 = vmatmul.mubr.msk.bf16.vlgmr.msra.gmra.mrb[16].mxu1 %vm1868_vm12, %v8277_v51  ;;  %v6131_v3 = vpop.permute.xlu0 %6130 }
 0x43c   :  { %5578 = vmatpush1.bf16.msra.mxu1 %v5484_v56  ;;  %5609 = vmatprep.mubr.bf16.mxu1 %v7266_v7  ;;  %v6133_v47 = vpop.permute.xlu1 %6132  ;;  %v6138_v25 = vsel %vm1345_vm8, %v6129_v50, %v6131_v3 }
 0x43d   :  { %5655 = vmatprep.subr.bf16.mxu1 %v5645_v45  ;;  %v6139_v16 = vsel %vm1345_vm8, %v6131_v3, %v6133_v47 }
 0x43f   :  { %v6135_v52 = vpop.permute.xlu0 %6134 }
 0x440   :  { %v6291_v27 = vpop.permute.xlu1 %6290 }
 0x443   :  { %6787 = vmatmul.mubr.msk.bf16.vlgmr.msra.gmra.mrb[20].mxu1 %vm1868_vm12, %v8277_v51  ;;  %v5648_v51 = vsel %vm790_vm5, %v5641_v55, %v5643_v15  ;;  %v6293_v12 = vpop.permute.xlu0 %6292 }
 0x444   :  { %5656 = vmatpush1.bf16.msra.mxu1 %v5644_v53  ;;  %5687 = vmatprep.mubr.bf16.mxu1 %v7266_v7  ;;  %v6301_v29 = vsel %vm1530_vm9, %v6291_v27, %v6293_v12  ;;  %v6289_v11 = vpop.permute.xlu1 %6288 }
 0x445   :  { %5698 = vmatprep.subr.bf16.mxu1 %v5647_v57  ;;  %v6300_v36 = vsel %vm1530_vm9, %v6289_v11, %v6291_v27 }
 0x447   :  { %v6295_v34 = vpop.permute.xlu0 %6294 }
 0x448   :  { %v6297_v8 = vpop.permute.xlu1 %6296  ;;  %v6302_v56 = vsel %vm1530_vm9, %v6293_v12, %v6295_v34 }
 0x449   :  { %v6303_v39 = vsel %vm1530_vm9, %v6295_v34, %v6297_v8 }
 0x44b   :  { %6788 = vmatmul.mubr.msk.bf16.vlgmr.msra.gmra.mrb[12].mxu1 %vm1868_vm12, %v8324_v35  ;;  %v6299_v45 = vpop.permute.xlu0 %6298 }
 0x44c   :  { %5699 = vmatpush1.bf16.msra.mxu1 %v5646_v26  ;;  %5730 = vmatprep.mubr.bf16.mxu1 %v7266_v7  ;;  %v6304_v55 = vsel %vm1530_vm9, %v6297_v8, %v6299_v45 }
 0x44d   :  { %5741 = vmatprep.subr.bf16.mxu1 %v5643_v15 }
 0x453   :  { %6789 = vmatmul.mubr.msk.bf16.vlgmr.msra.gmra.mrb[16].mxu1 %vm1868_vm12, %v8324_v35 }
 0x454   :  { %5742 = vmatpush1.bf16.msra.mxu1 %v5648_v51  ;;  %5773 = vmatprep.mubr.bf16.mxu1 %v7266_v7  ;;  %v6537_v51 = vunpack.c.l.bf16 %v7235_v54 }
 0x455   :  { %5819 = vmatprep.subr.bf16.mxu1 %v5809_v58  ;;  %v6538_v58 = vunpack.c.h.bf16 %v7235_v54 }
 0x45a   :  { %v8735_v11 = vpop.permute.xlu0 %3349 }
 0x45b   :  { %6790 = vmatmul.mubr.msk.bf16.vlgmr.msra.gmra.mrb[20].mxu1 %vm1868_vm12, %v8324_v35  ;;  %v5812_v35 = vsel %vm975_vm6, %v5805_v63, %v5807_v5 }
 0x45c   :  { %5820 = vmatpush1.bf16.msra.mxu1 %v5808_v37  ;;  %5851 = vmatprep.mubr.bf16.mxu1 %v7266_v7  ;;  %v7237_v37 = vld [vmem:[%s8829_s0 + $0x8] sm:$0xff] }
 0x45d   :  { %5862 = vmatprep.subr.bf16.mxu1 %v5811_v2  ;;  %v6539_v63 = vunpack.c.l.bf16 %v7237_v37  ;;  %v6540_v6 = vunpack.c.h.bf16 %v7237_v37 }
 0x463   :  { %6791 = vmatmul.mubr.msk.bf16.vlgmr.msra.gmra.mrb[12].mxu1 %vm1868_vm12, %v8391_v24 }
 0x464   :  { %5863 = vmatpush1.bf16.msra.mxu1 %v5810_v4  ;;  %5894 = vmatprep.mubr.bf16.mxu1 %v7266_v7 }
 0x465   :  { %5905 = vmatprep.subr.bf16.mxu1 %v5807_v5 }
 0x46b   :  { %6792 = vmatmul.mubr.msk.bf16.vlgmr.msra.gmra.mrb[16].mxu1 %vm1868_vm12, %v8391_v24 }
 0x46c   :  { %5906 = vmatpush1.bf16.msra.mxu1 %v5812_v35  ;;  %5937 = vmatprep.mubr.bf16.mxu1 %v7266_v7 }
 0x46d   :  { %5983 = vmatprep.subr.bf16.mxu1 %v5973_v10 }
 0x473   :  { %6793 = vmatmul.mubr.msk.bf16.vlgmr.msra.gmra.mrb[20].mxu1 %vm1868_vm12, %v8391_v24  ;;  %v5976_v24 = vsel %vm1160_vm7, %v5969_v22, %v5971_v38  ;;  %v7240_v22 = vld [vmem:[%s8830_s1 + $0x10] sm:$0xff] }
 0x474   :  { %5984 = vmatpush1.bf16.msra.mxu1 %v5972_v31  ;;  %6015 = vmatprep.mubr.bf16.mxu1 %v7266_v7  ;;  %v6541_v31 = vunpack.c.l.bf16 %v7239_v21  ;;  %v6548_v50 = vunpack.c.h.bf16 %v7240_v22 }
 0x475   :  { %6026 = vmatprep.subr.bf16.mxu1 %v5975_v46  ;;  %v6547_v46 = vunpack.c.l.bf16 %v7240_v22 }
 0x476   :  { %v6554_v3 = vsub.f32 %v6542_v0, %v6548_v50 }
 0x47b   :  { %6794 = vmatmul.mubr.msk.bf16.vlgmr.msra.gmra.mrb[12].mxu1 %vm1868_vm12, %v8445_v32 }
 0x47c   :  { %6027 = vmatpush1.bf16.msra.mxu1 %v5974_v23  ;;  %6058 = vmatprep.mubr.bf16.mxu1 %v7266_v7 }
 0x47d   :  { %6069 = vmatprep.subr.bf16.mxu1 %v5971_v38 }
 0x483   :  { %6795 = vmatmul.mubr.msk.bf16.vlgmr.msra.gmra.mrb[16].mxu1 %vm1868_vm12, %v8445_v32 }
 0x484   :  { %6070 = vmatpush1.bf16.msra.mxu1 %v5976_v24  ;;  %6101 = vmatprep.mubr.bf16.mxu1 %v7266_v7 }
 0x485   :  { %6147 = vmatprep.subr.bf16.mxu1 %v6137_v59  ;;  %v6553_v59 = vsub.f32 %v6541_v31, %v6547_v46 }
 0x48b   :  { %6796 = vmatmul.mubr.msk.bf16.vlgmr.msra.gmra.mrb[20].mxu1 %vm1868_vm12, %v8445_v32  ;;  %v6140_v32 = vsel %vm1345_vm8, %v6133_v47, %v6135_v52  ;;  %v6559_v47 = vmul.f32 %v6553_v59, %v6553_v59 }
 0x48c   :  { %6148 = vmatpush1.bf16.msra.mxu1 %v6136_v20  ;;  %6179 = vmatprep.mubr.bf16.mxu1 %v7266_v7 }
 0x48d   :  { %6190 = vmatprep.subr.bf16.mxu1 %v6139_v16  ;;  %v6560_v16 = vmul.f32 %v6554_v3, %v6554_v3 }
 0x48f   :  { %v6566_v27 = vsel %vm6565_vm14, %v6560_v16, 0.0 }
 0x493   :  { %6797 = vmatmul.mubr.msk.bf16.vlgmr.msra.gmra.mrb[12].mxu1 %vm1868_vm12, %v8496_v44 }
 0x494   :  { %6191 = vmatpush1.bf16.msra.mxu1 %v6138_v25  ;;  %6222 = vmatprep.mubr.bf16.mxu1 %v7266_v7 }
 0x495   :  { %6233 = vmatprep.subr.bf16.mxu1 %v6135_v52 }
 0x49b   :  { %6798 = vmatmul.mubr.msk.bf16.vlgmr.msra.gmra.mrb[16].mxu1 %vm1868_vm12, %v8496_v44 }
 0x49c   :  { %6234 = vmatpush1.bf16.msra.mxu1 %v6140_v32  ;;  %6265 = vmatprep.mubr.bf16.mxu1 %v7266_v7  ;;  %v8732_v32 = vpop.permute.xlu1 %3344 }
 0x49d   :  { %6311 = vmatprep.subr.bf16.mxu1 %v6301_v29 }
 0x4a3   :  { %6799 = vmatmul.mubr.msk.bf16.vlgmr.msra.gmra.mrb[20].mxu1 %vm1868_vm12, %v8496_v44 }
 0x4a4   :  { %6312 = vmatpush1.bf16.msra.mxu1 %v6300_v36  ;;  %6343 = vmatprep.mubr.bf16.mxu1 %v7266_v7 }
 0x4a5   :  { %6354 = vmatprep.subr.bf16.mxu1 %v6303_v39 }
 0x4a6   :  { %v3235_v62 = vpop.f32.mrb[0].mxu1 }
 0x4a7   :  { %v8682_v40 = vpop.f32.mrb[1].mxu1  ;;  %v3352_v29 = vadd.f32 %v8732_v32, %v3235_v62 }
 0x4a8   :  { %v8684_v41 = vpop.f32.mrb[2].mxu1  ;;  %v3353_v34 = vadd.f32 %v8732_v32, %v8682_v40 }
 0x4a9   :  { %v8686_v42 = vpop.f32.mrb[3].mxu1  ;;  %v3358_v36 = vadd.f32 %v8735_v11, %v8684_v41 }
 0x4aa   :  { %v3359_v8 = vadd.f32 %v8735_v11, %v8686_v42  ;;  %v3365_v54 = vmax.f32 %v3353_v34, 0.0 }
 0x4ab   :  { %6800 = vmatmul.mubr.msk.bf16.vlgmr.msra.gmra.mrb[12].mxu1 %vm1868_vm12, %v8543_v60 }
 0x4ac   :  { %6355 = vmatpush1.bf16.msra.mxu1 %v6302_v56  ;;  %6386 = vmatprep.mubr.bf16.mxu1 %v7266_v7  ;;  %v3364_v56 = vmax.f32 %v3352_v29, 0.0 }
 0x4ad   :  { %6397 = vmatprep.subr.bf16.mxu1 %v6299_v45 }
 0x4ae   :  { %v8692_v44 = vpop.f32.mrb[4].mxu1  ;;  %v3376_v42 = vmul.f32 %v3364_v56, %v7976_v43 }
 0x4af   :  { %v8694_v33 = vpop.f32.mrb[5].mxu1 }
 0x4b0   :  { %v8696_v49 = vpop.f32.mrb[6].mxu1 }
 0x4b1   :  { %v8698_v53 = vpop.f32.mrb[7].mxu1 }
 0x4b2   :  { %v3361_v31 = vadd.f32 %v8735_v11, %v8698_v53 }
 0x4b3   :  { %6801 = vmatmul.mubr.msk.bf16.vlgmr.msra.gmra.mrb[16].mxu1 %vm1868_vm12, %v8543_v60 }
 0x4b4   :  { %6398 = vmatpush1.bf16.msra.mxu1 %v6304_v55  ;;  %6429 = vmatprep.mubr.bf16.mxu1 %v7266_v7  ;;  %v7236_v7 = vld [vmem:[%s8830_s1] sm:$0xff]  ;;  %v3373_v16 = vmax.f32 %v3361_v31, 0.0 }
 0x4b5   :  { %v6543_v18 = vunpack.c.l.bf16 %v7236_v7  ;;  %v6544_v17 = vunpack.c.h.bf16 %v7236_v7 }
 0x4b6   :  { %v8704_v57 = vpop.f32.mrb[8].mxu1 }
 0x4b7   :  { %v8706_v26 = vpop.f32.mrb[9].mxu1  ;;  %v6549_v4 = vsub.f32 %v6537_v51, %v6543_v18  ;;  %v6550_v5 = vsub.f32 %v6538_v58, %v6544_v17  ;;  %v3370_v58 = vmax.f32 %v3358_v36, 0.0  ;;  %v3371_v17 = vmax.f32 %v3359_v8, 0.0 }
 0x4b8   :  { %v8708_v15 = vpop.f32.mrb[10].mxu1  ;;  %v3356_v29 = vadd.f32 %v8732_v32, %v8704_v57  ;;  %v3385_v57 = vmul.f32 %v3373_v16, %v8003_v1 }
 0x4b9   :  { %v8710_v14 = vpop.f32.mrb[11].mxu1  ;;  %v6555_v10 = vmul.f32 %v6549_v4, %v6549_v4  ;;  %v6556_v19 = vmul.f32 %v6550_v5, %v6550_v5  ;;  %v3377_v4 = vmul.f32 %v3365_v54, %v7980_v48  ;;  %v3355_v5 = vadd.f32 %v8732_v32, %v8694_v33 }
 0x4ba   :  { %v3362_v54 = vadd.f32 %v8735_v11, %v8708_v15 }
 0x4bb   :  { %6802 = vmatmul.mubr.msk.bf16.vlgmr.msra.gmra.mrb[20].mxu1 %vm1868_vm12, %v8543_v60  ;;  %v7238_v60 = vld [vmem:[%s8830_s1 + $0x8] sm:$0xff]  ;;  %v6561_v24 = vadd.f32 %v6556_v19, %v6555_v10  ;;  %v3360_v10 = vadd.f32 %v8735_v11, %v8696_v49  ;;  %v3367_v49 = vmax.f32 %v3355_v5, 0.0 }
 0x4bc   :  { %v6545_v2 = vunpack.c.l.bf16 %v7238_v60  ;;  %v6546_v9 = vunpack.c.h.bf16 %v7238_v60 }
 0x4bd   :  { %v3379_v8 = vmul.f32 %v3367_v49, %v8003_v1 }
 0x4be   :  { %v6551_v35 = vsub.f32 %v6539_v63, %v6545_v2  ;;  %v6552_v23 = vsub.f32 %v6540_v6, %v6546_v9  ;;  %v3354_v63 = vadd.f32 %v8732_v32, %v8692_v44  ;;  %v3383_v44 = vmul.f32 %v3371_v17, %v7980_v48 }
 0x4c0   :  { %v6557_v38 = vmul.f32 %v6551_v35, %v6551_v35  ;;  %v6558_v13 = vmul.f32 %v6552_v23, %v6552_v23  ;;  %v3382_v35 = vmul.f32 %v3370_v58, %v7976_v43  ;;  %v3366_v23 = vmax.f32 %v3354_v63, 0.0 }
 0x4c1   :  { %v3363_v58 = vadd.f32 %v8735_v11, %v8710_v14 }
 0x4c2   :  { %v6562_v20 = vadd.f32 %v6561_v24, %v6557_v38 }
 0x4c4   :  { %v6563_v25 = vadd.f32 %v6562_v20, %v6558_v13  ;;  %v3372_v20 = vmax.f32 %v3360_v10, 0.0 }
 0x4c6   :  { %v6564_v52 = vadd.f32 %v6563_v25, %v6559_v47 }
 0x4c8   :  { %v6567_v12 = vadd.f32 %v6566_v27, %v6564_v52 }
 0x4ca   :  { %6568 = vadd.xlane.f32.xlu0 %v6567_v12  ;;  %v3378_v12 = vmul.f32 %v3366_v23, %v7998_v61 }
 0x57e   :  { %v6345_v39 = vpop.f32.mrb[12].mxu1 }
 0x57f   :  { %v6452_v45 = vadd.f32 %v6345_v39, %v8732_v32  ;;  %v6347_v55 = vpop.f32.mrb[13].mxu1  ;;  %v3357_v39 = vadd.f32 %v8732_v32, %v8706_v26 }
 0x580   :  { %v6453_v51 = vadd.f32 %v6347_v55, %v8732_v32  ;;  %v6349_v62 = vpop.f32.mrb[14].mxu1  ;;  %v3384_v55 = vmul.f32 %v3372_v20, %v7998_v61 }
 0x581   :  { %v6464_v7 = vmax.f32 %v6452_v45, 0.0  ;;  %v6458_v18 = vadd.f32 %v6349_v62, %v8735_v11  ;;  %v6351_v40 = vpop.f32.mrb[15].mxu1  ;;  %v3369_v63 = vmax.f32 %v3357_v39, 0.0 }
 0x582   :  { %v6465_v37 = vmax.f32 %v6453_v51, 0.0  ;;  %v6459_v41 = vadd.f32 %v6351_v40, %v8735_v11  ;;  %v3368_v40 = vmax.f32 %v3356_v29, 0.0 }
 0x583   :  { %v6476_v60 = vmul.f32 %v6464_v7, %v7976_v43  ;;  %v6470_v2 = vmax.f32 %v6458_v18, 0.0 }
 0x584   :  { %v6477_v6 = vmul.f32 %v6465_v37, %v7980_v48  ;;  %v6471_v9 = vmax.f32 %v6459_v41, 0.0 }
 0x585   :  { %v6488_v19 = vsub.f32 %v3376_v42, %v6476_v60  ;;  %v6482_v21 = vmul.f32 %v6470_v2, %v7976_v43 }
 0x586   :  { %v6489_v22 = vsub.f32 %v3377_v4, %v6477_v6  ;;  %v6483_v46 = vmul.f32 %v6471_v9, %v7980_v48  ;;  %v6388_v33 = vpop.f32.mrb[16].mxu1  ;;  %v3374_v4 = vmax.f32 %v3362_v54, 0.0 }
 0x587   :  { %v6500_v38 = vmul.f32 %v6488_v19, %v6488_v19  ;;  %v8763_v0 = vsub.f32 %v3382_v35, %v6482_v21  ;;  %v6454_v50 = vadd.f32 %v6388_v33, %v8732_v32  ;;  %v6390_v24 = vpop.f32.mrb[17].mxu1  ;;  %v3380_v19 = vmul.f32 %v3368_v40, %v8020_v30 }
 0x588   :  { %v6501_v59 = vmul.f32 %v6489_v22, %v6489_v22  ;;  %v8766_v13 = vsub.f32 %v3383_v44, %v6483_v46  ;;  %v6455_v43 = vadd.f32 %v6390_v24, %v8732_v32  ;;  %v6392_v3 = vpop.f32.mrb[18].mxu1  ;;  %v3381_v22 = vmul.f32 %v3369_v63, %v8025_v28 }
 0x589   :  { %v6466_v53 = vmax.f32 %v6454_v50, 0.0  ;;  %v6460_v47 = vadd.f32 %v6392_v3, %v8735_v11  ;;  %v6394_v48 = vpop.f32.mrb[19].mxu1  ;;  %v3386_v33 = vmul.f32 %v3374_v4, %v8020_v30 }
 0x58a   :  { %v6512_v25 = vadd.f32 %v6501_v59, %v6500_v38  ;;  %v6467_v52 = vmax.f32 %v6455_v43, 0.0  ;;  %v6461_v27 = vadd.f32 %v6394_v48, %v8735_v11  ;;  %v6507_v16 = vmul.f32 %v8766_v13, %v8766_v13 }
 0x58b   :  { %v6478_v34 = vmul.f32 %v6466_v53, %v7998_v61  ;;  %v6472_v36 = vmax.f32 %v6460_v47, 0.0  ;;  %v6506_v47 = vmul.f32 %v8763_v0, %v8763_v0 }
 0x58c   :  { %v6479_v56 = vmul.f32 %v6467_v52, %v8003_v1  ;;  %v6473_v45 = vmax.f32 %v6461_v27, 0.0 }
 0x58d   :  { %v6490_v51 = vsub.f32 %v3378_v12, %v6478_v34  ;;  %v6484_v62 = vmul.f32 %v6472_v36, %v7998_v61 }
 0x58e   :  { %v6491_v7 = vsub.f32 %v3379_v8, %v6479_v56  ;;  %v6485_v18 = vmul.f32 %v6473_v45, %v8003_v1  ;;  %v6431_v26 = vpop.f32.mrb[20].mxu1  ;;  %v3375_v1 = vmax.f32 %v3363_v58, 0.0  ;;  %v6569_v56 = vpop.xlane.xlu0 %6568 }
 0x58f   :  { %v6502_v17 = vmul.f32 %v6490_v51, %v6490_v51  ;;  %v6496_v37 = vsub.f32 %v3384_v55, %v6484_v62  ;;  %v6456_v41 = vadd.f32 %v6431_v26, %v8732_v32  ;;  %v6433_v42 = vpop.f32.mrb[21].mxu1  ;;  %v6570_v45 = vrot.slane %v6569_v56, 4 }
 0x590   :  { %v6503_v15 = vmul.f32 %v6491_v7, %v6491_v7  ;;  %v6497_v60 = vsub.f32 %v3385_v57, %v6485_v18  ;;  %v6457_v61 = vadd.f32 %v6433_v42, %v8732_v32  ;;  %v6435_v2 = vpop.f32.mrb[22].mxu1  ;;  %v3387_v50 = vmul.f32 %v3375_v1, %v8025_v28 }
 0x591   :  { %v6513_v5 = vadd.f32 %v6512_v25, %v6502_v17  ;;  %v6468_v6 = vmax.f32 %v6456_v41, 0.0  ;;  %v6462_v14 = vadd.f32 %v6435_v2, %v8735_v11  ;;  %v6437_v9 = vpop.f32.mrb[23].mxu1  ;;  %v6508_v25 = vmul.f32 %v6496_v37, %v6496_v37 }
 0x592   :  { %v6469_v35 = vmax.f32 %v6457_v61, 0.0  ;;  %v6463_v10 = vadd.f32 %v6437_v9, %v8735_v11  ;;  %v6509_v27 = vmul.f32 %v6497_v60, %v6497_v60  ;;  %v6571_v0 = vadd.f32 %v6570_v45, %v6569_v56 }
 0x593   :  { %v6514_v21 = vadd.f32 %v6513_v5, %v6503_v15  ;;  %v6480_v44 = vmul.f32 %v6468_v6, %v8020_v30  ;;  %v6474_v31 = vmax.f32 %v6462_v14, 0.0 }
 0x594   :  { %v6481_v32 = vmul.f32 %v6469_v35, %v8025_v28  ;;  %v6475_v46 = vmax.f32 %v6463_v10, 0.0  ;;  %v6572_v55 = vrot.slane %v6571_v0, 2 }
 0x595   :  { %v6492_v23 = vsub.f32 %v3380_v19, %v6480_v44  ;;  %v6486_v38 = vmul.f32 %v6474_v31, %v8020_v30 }
 0x596   :  { %v6493_v24 = vsub.f32 %v3381_v22, %v6481_v32  ;;  %v6487_v11 = vmul.f32 %v6475_v46, %v8025_v28  ;;  %v6573_v62 = vadd.f32 %v6572_v55, %v6571_v0 }
 0x597   :  { %v6504_v49 = vmul.f32 %v6492_v23, %v6492_v23  ;;  %v6498_v59 = vsub.f32 %v3386_v33, %v6486_v38 }
 0x598   :  { %v6505_v43 = vmul.f32 %v6493_v24, %v6493_v24  ;;  %v6499_v3 = vsub.f32 %v3387_v50, %v6487_v11  ;;  %v6574_v7 = vrot.slane %v6573_v62, 1 }
 0x599   :  { %v6515_v20 = vadd.f32 %v6514_v21, %v6504_v49  ;;  %v6510_v29 = vmul.f32 %v6498_v59, %v6498_v59 }
 0x59a   :  { %v6516_v53 = vsel %vm96_vm2, %v6505_v43, 0.0  ;;  %v6511_v28 = vmul.f32 %v6499_v3, %v6499_v3  ;;  %v6575_v40 = vadd.f32 %v6574_v7, %v6573_v62 }
 0x59b   :  { %v6517_v48 = vadd.f32 %v6516_v53, %v6515_v20 }
 0x59c   :  { %v6523_v8 = vsel %vm96_vm2, %v6511_v28, 0.0 }
 0x59d   :  { %v6518_v30 = vadd.f32 %v6517_v48, %v6506_v47 }
 0x59f   :  { %v6519_v52 = vadd.f32 %v6518_v30, %v6507_v16 }
 0x5a1   :  { %v6520_v12 = vadd.f32 %v6519_v52, %v6508_v25 }
 0x5a3   :  { %v6521_v34 = vadd.f32 %v6520_v12, %v6509_v27 }
 0x5a5   :  { %v6522_v36 = vadd.f32 %v6521_v34, %v6510_v29 }
 0x5a7   :  { %v6524_v39 = vadd.f32 %v6523_v8, %v6522_v36 }
 0x5a9   :  { %6525 = vadd.xlane.f32.xlu1 %v6524_v39 }
 0x636   :  { %v6526_v54 = vpop.xlane.xlu1 %6525 }
 0x637   :  { %v6527_v51 = vrot.slane %v6526_v54, 4 }
 0x639   :  { %v6528_v13 = vadd.f32 %v6527_v51, %v6526_v54 }
 0x63b   :  { %v6529_v57 = vrot.slane %v6528_v13, 2 }
 0x63d   :  { %v6530_v58 = vadd.f32 %v6529_v57, %v6528_v13 }
 0x63f   :  { %v6531_v18 = vrot.slane %v6530_v58, 1 }
 0x641   :  { %v6532_v26 = vadd.f32 %v6531_v18, %v6530_v58 }
 0x643   :  { %7187 = vpush %v6532_v26 }
 0x644   :  { %7189 = vpush %v6575_v40 }
 0x674   :  { %s7188_s0 = spop %7187 }
 0x675   :  { %s6534_s1 = smul.f32 0.00012207031, %s7188_s0  ;;  %s7190_s26 = spop %7189 }
 0x676   :  { %s6577_s27 = smul.f32 0.0006510417, %s7190_s26 }
 0x677   :  { %6536 = sst [smem:[#allocation2]] %s6534_s1 }
 0x678   :  { %6579 = sst [smem:[#allocation4]] %s6577_s27 }
 0x679   :  { %7250 = shalt.err (!%p7247_p2)
}
 0x67a   :  { %s7275_s15 = smov [#allocation2]   ;;  %s7251_s4 = scalar_lea.hbm %s8837_s8, 16 }
 0x67b   :  { %6587 = dma.smem_to_hbm %s7275_s15, 16, %s8836_s7, [#allocation3]  }
 0x67c   :  { %p7252_p3 = scmp.ne.s32.totalorder %s8837_s8, %s7251_s4  ;;  %p7255_p4 = scmp.lt.u32.totalorder %s7251_s4, %s8837_s8 }
 0x67e   :  { %p7257_p5 = pnand %p7255_p4, %p7252_p3 }
 0x680   :  { %7260 = shalt.err (!%p7257_p5)
}
 0x681   :  { %s7276_s6 = smov [#allocation4]  }
 0x682   :  { %6595 = dma.smem_to_hbm %s7276_s6, 16, %s8837_s8, [#allocation5]  }
 0x683   :  { %7261 = dma.done.wait [#allocation3], 16  }
 0x684   :  { %7262 = vsyncadd [#allocation3], 4294967280 }
 0x685   :  { %7263 = dma.done.wait [#allocation5], 16  }
 0x686   :  { %7264 = vsyncadd [#allocation5], 4294967280 }
 0x687   :  { %6602 = sfence }
 0x688   :  { %6603 = vsyncpa [#allocation3], 1 }
 0x689   :  { %6604 = vsyncpa [#allocation5], 1 }

</bundles_post_ra>
